<compile_context>
chip_gen: v7x
topology: tpu7x:2x2x1
jax: 0.10.0
libtpu: 0.0.40
codegen_flags: <defaults>
</compile_context>

<pallas_src>
import numpy as np
import jax
import jax.numpy as jnp
from jax.experimental import pallas as pl
from jax.experimental.pallas import tpu as pltpu

# ----------------------------- hyperparameters -------------------------------
d_model = 32          # embedding size
d_ff = 64             # feed-forward hidden size
d_k = d_v = 8         # per-head dims
n_heads = 4
n_layers = 2
src_vocab_size = 10
tgt_vocab_size = 9
src_len = 5           # fixed (decoder/encoder hard-code 5 positional indices)
tgt_len = 5
batch = 2

LANE = 128            # lane width used to keep the HBM-facing logits lane-dense
HDK = n_heads * d_k   # 32
HDV = n_heads * d_v   # 32

# --------------------------- in-kernel building blocks ------------------------


def _layernorm(y, g, b):
    """LayerNorm over the last dim (eps=1e-5, like nn.LayerNorm). g/b: (1, D)."""
    mu = jnp.mean(y, axis=-1, keepdims=True)
    var = jnp.mean((y - mu) ** 2, axis=-1, keepdims=True)
    return (y - mu) * jax.lax.rsqrt(var + 1e-5) * g + b


def _mha(q_in, kv_in, mask, wqkv, bqkv, wo, bo, g, b, attn_ref, attn_base):
    """Fused multi-head attention for one batch element, fully in VMEM.

    q_in: (Lq, D), kv_in: (Lk, D), mask: (Lq, Lk) float (1.0 => masked).
    Writes per-head attention maps to attn_ref[0, attn_base + h]; returns
    LayerNorm(out_proj(context) + q_in)  with shape (Lq, D).
    """
    q = jnp.dot(q_in, wqkv[:, :HDK],
                preferred_element_type=jnp.float32) + bqkv[:, :HDK]
    k = jnp.dot(kv_in, wqkv[:, HDK:2 * HDK],
                preferred_element_type=jnp.float32) + bqkv[:, HDK:2 * HDK]
    v = jnp.dot(kv_in, wqkv[:, 2 * HDK:],
                preferred_element_type=jnp.float32) + bqkv[:, 2 * HDK:]

    scale = jnp.float32(1.0 / np.sqrt(d_k))
    ctx_proj = None
    # Heads are unrolled static slices; concat_h(ctx_h) @ Wo == sum_h ctx_h @ Wo_h
    for h in range(n_heads):
        qh = q[:, h * d_k:(h + 1) * d_k]
        kh = k[:, h * d_k:(h + 1) * d_k]
        vh = v[:, h * d_v:(h + 1) * d_v]
        s = jnp.dot(qh, kh.T, preferred_element_type=jnp.float32) * scale
        s = jnp.where(mask > 0.5, jnp.float32(-1e9), s)
        m = jnp.max(s, axis=-1, keepdims=True)
        e = jnp.exp(s - m)
        a = e / jnp.sum(e, axis=-1, keepdims=True)
        attn_ref[0, attn_base + h] = a
        ctx_h = jnp.dot(a, vh, preferred_element_type=jnp.float32)
        term = jnp.dot(ctx_h, wo[h * d_v:(h + 1) * d_v, :],
                       preferred_element_type=jnp.float32)
        ctx_proj = term if ctx_proj is None else ctx_proj + term

    out = ctx_proj + bo                       # (Lq, D) + (1, D)
    return _layernorm(out + q_in, g, b)


def _ffn(x, w1, b1, w2, b2, g, b):
    """Conv1d(k=1) -> ReLU -> Conv1d(k=1) -> add & LayerNorm, on (L, D)."""
    h = jnp.maximum(
        jnp.dot(x, w1, preferred_element_type=jnp.float32) + b1, 0.0)
    o = jnp.dot(h, w2, preferred_element_type=jnp.float32) + b2
    return _layernorm(o + x, g, b)


# --------------------------- one fused whole-model kernel ---------------------


def _transformer_kernel(
        enc_x_ref, dec_x_ref, enc_mask_ref, dec_smask_ref, dec_emask_ref,
        # encoder self-attn + ffn (stacked over layers)
        e_wqkv, e_bqkv, e_wo, e_bo, e_ag, e_ab,
        e_w1, e_b1, e_w2, e_b2, e_fg, e_fb,
        # decoder self-attn (stacked)
        s_wqkv, s_bqkv, s_wo, s_bo, s_g, s_b,
        # decoder cross-attn (stacked)
        c_wqkv, c_bqkv, c_wo, c_bo, c_g, c_b,
        # decoder ffn (stacked)
        f_w1, f_b1, f_w2, f_b2, f_fg, f_fb,
        # final projection (zero-padded to 128 lanes)
        w_proj,
        # outputs
        logits_ref, enc_attn_ref, dec_sattn_ref, dec_cattn_ref):
    # ---------------- encoder ----------------
    enc = enc_x_ref[0]                     # (Ls, D)
    emask = enc_mask_ref[0]                # (Ls, Ls)
    for l in range(n_layers):
        y = _mha(enc, enc, emask,
                 e_wqkv[l], e_bqkv[l], e_wo[l], e_bo[l], e_ag[l], e_ab[l],
                 enc_attn_ref, l * n_heads)
        enc = _ffn(y, e_w1[l], e_b1[l], e_w2[l], e_b2[l], e_fg[l], e_fb[l])

    # ---------------- decoder ----------------
    dec = dec_x_ref[0]                     # (Lt, D)
    smask = dec_smask_ref[0]               # (Lt, Lt)
    cmask = dec_emask_ref[0]               # (Lt, Ls)
    for l in range(n_layers):
        y = _mha(dec, dec, smask,
                 s_wqkv[l], s_bqkv[l], s_wo[l], s_bo[l], s_g[l], s_b[l],
                 dec_sattn_ref, l * n_heads)
        y = _mha(y, enc, cmask,
                 c_wqkv[l], c_bqkv[l], c_wo[l], c_bo[l], c_g[l], c_b[l],
                 dec_cattn_ref, l * n_heads)
        dec = _ffn(y, f_w1[l], f_b1[l], f_w2[l], f_b2[l], f_fg[l], f_fb[l])

    # ---------------- projection (lane-dense, padded to 128) -----------------
    logits_ref[0] = jnp.dot(dec, w_proj[...],
                            preferred_element_type=jnp.float32)


# ------------------------------ pallas_call wrapper ---------------------------


def _w_spec(w):
    """Full-array BlockSpec (same weight block for every grid step)."""
    nd = w.ndim
    return pl.BlockSpec(w.shape, lambda b: (0,) * nd)


def transformer_pallas(params, enc_x, dec_x, enc_mask, dec_smask, dec_emask):
    """enc_x: (B, Ls, D), dec_x: (B, Lt, D), masks float32 (1.0 => masked)."""
    B = enc_x.shape[0]
    Ls, Lt, D = src_len, tgt_len, d_model

    esa, eff = params['enc_sa'], params['enc_ff']
    dsa, dca, dff = params['dec_sa'], params['dec_ca'], params['dec_ff']
    weights = [
        esa['wqkv'], esa['bqkv'], esa['wo'], esa['bo'], esa['ln_g'], esa['ln_b'],
        eff['w1'], eff['b1'], eff['w2'], eff['b2'], eff['ln_g'], eff['ln_b'],
        dsa['wqkv'], dsa['bqkv'], dsa['wo'], dsa['bo'], dsa['ln_g'], dsa['ln_b'],
        dca['wqkv'], dca['bqkv'], dca['wo'], dca['bo'], dca['ln_g'], dca['ln_b'],
        dff['w1'], dff['b1'], dff['w2'], dff['b2'], dff['ln_g'], dff['ln_b'],
        params['proj'],
    ]

    in_specs = ([pl.BlockSpec((1, Ls, D), lambda b: (b, 0, 0)),
                 pl.BlockSpec((1, Lt, D), lambda b: (b, 0, 0)),
                 pl.BlockSpec((1, Ls, Ls), lambda b: (b, 0, 0)),
                 pl.BlockSpec((1, Lt, Lt), lambda b: (b, 0, 0)),
                 pl.BlockSpec((1, Lt, Ls), lambda b: (b, 0, 0))] +
                [_w_spec(w) for w in weights])
    out_specs = [
        pl.BlockSpec((1, Lt, LANE), lambda b: (b, 0, 0)),
        pl.BlockSpec((1, n_layers * n_heads, Ls, Ls), lambda b: (b, 0, 0, 0)),
        pl.BlockSpec((1, n_layers * n_heads, Lt, Lt), lambda b: (b, 0, 0, 0)),
        pl.BlockSpec((1, n_layers * n_heads, Lt, Ls), lambda b: (b, 0, 0, 0)),
    ]
    out_shape = [
        jax.ShapeDtypeStruct((B, Lt, LANE), jnp.float32),
        jax.ShapeDtypeStruct((B, n_layers * n_heads, Ls, Ls), jnp.float32),
        jax.ShapeDtypeStruct((B, n_layers * n_heads, Lt, Lt), jnp.float32),
        jax.ShapeDtypeStruct((B, n_layers * n_heads, Lt, Ls), jnp.float32),
    ]
    return pl.pallas_call(
        _transformer_kernel,
        grid=(B,),
        in_specs=in_specs,
        out_specs=out_specs,
        out_shape=out_shape,
        compiler_params=pltpu.CompilerParams(
            dimension_semantics=("parallel",)),
    )(enc_x, dec_x, enc_mask, dec_smask, dec_emask, *weights)


# ------------------------------ model pieces ---------------------------------


def get_sinusoid_encoding_table(n_position, dm):
    pos = np.arange(n_position)[:, None].astype(np.float64)
    hid = np.arange(dm)[None, :]
    table = pos / np.power(10000, 2 * (hid // 2) / dm)
    table[:, 0::2] = np.sin(table[:, 0::2])
    table[:, 1::2] = np.cos(table[:, 1::2])
    return jnp.asarray(table, dtype=jnp.float32)


def get_attn_pad_mask(seq_q, seq_k):
    B, Lq = seq_q.shape
    Lk = seq_k.shape[1]
    pad = (seq_k == 0)[:, None, :]
    return jnp.broadcast_to(pad, (B, Lq, Lk))


def get_attn_subsequent_mask(seq):
    B, L = seq.shape
    sub = jnp.triu(jnp.ones((L, L), dtype=jnp.bool_), k=1)
    return jnp.broadcast_to(sub[None], (B, L, L))


def transformer_forward(params, enc_inputs, dec_inputs):
    # TODO(synk): embedding gather + positional add left to XLA under jit
    # (tables are tiny; folding them in-kernel adds scalar-prefetch complexity).
    enc_pos = jnp.array([[1, 2, 3, 4, 0]], dtype=jnp.int32)
    enc_x = params['src_emb'][enc_inputs] + params['enc_pos_table'][enc_pos]
    dec_pos = jnp.array([[5, 1, 2, 3, 4]], dtype=jnp.int32)
    dec_x = params['tgt_emb'][dec_inputs] + params['dec_pos_table'][dec_pos]

    enc_self_mask = get_attn_pad_mask(enc_inputs, enc_inputs).astype(jnp.float32)
    pad_mask = get_attn_pad_mask(dec_inputs, dec_inputs)
    sub_mask = get_attn_subsequent_mask(dec_inputs)
    dec_self_mask = jnp.logical_or(pad_mask, sub_mask).astype(jnp.float32)
    dec_enc_mask = get_attn_pad_mask(dec_inputs, enc_inputs).astype(jnp.float32)

    logits_pad, enc_attn, dec_sattn, dec_cattn = transformer_pallas(
        params, enc_x, dec_x, enc_self_mask, dec_self_mask, dec_enc_mask)

    B = logits_pad.shape[0]
    dec_logits = logits_pad.reshape(B * tgt_len, LANE)[:, :tgt_vocab_size]
    enc_attn = enc_attn.reshape(B, n_layers, n_heads, src_len, src_len)
    dec_sattn = dec_sattn.reshape(B, n_layers, n_heads, tgt_len, tgt_len)
    dec_cattn = dec_cattn.reshape(B, n_layers, n_heads, tgt_len, src_len)
    enc_self_attns = [enc_attn[:, l] for l in range(n_layers)]
    dec_self_attns = [dec_sattn[:, l] for l in range(n_layers)]
    dec_enc_attns = [dec_cattn[:, l] for l in range(n_layers)]
    return dec_logits, enc_self_attns, dec_self_attns, dec_enc_attns


# ---------------------------- parameter init ---------------------------------


def _uniform(key, shape, bound):
    return jax.random.uniform(key, shape, jnp.float32, -bound, bound)


def init_mha_params(key):
    ks = jax.random.split(key, 8)
    bi = 1.0 / np.sqrt(d_model)
    bo = 1.0 / np.sqrt(n_heads * d_v)
    wq = _uniform(ks[0], (d_model, d_k * n_heads), bi)
    bq = _uniform(ks[1], (d_k * n_heads,), bi)
    wk = _uniform(ks[2], (d_model, d_k * n_heads), bi)
    bk = _uniform(ks[3], (d_k * n_heads,), bi)
    wv = _uniform(ks[4], (d_model, d_v * n_heads), bi)
    bv = _uniform(ks[5], (d_v * n_heads,), bi)
    return {
        'wqkv': jnp.concatenate([wq, wk, wv], axis=1),          # (D, 3*H*dk)
        'bqkv': jnp.concatenate([bq, bk, bv]).reshape(1, -1),    # (1, 3*H*dk)
        'wo': _uniform(ks[6], (n_heads * d_v, d_model), bo),
        'bo': _uniform(ks[7], (d_model,), bo).reshape(1, -1),
        'ln_g': jnp.ones((1, d_model), jnp.float32),
        'ln_b': jnp.zeros((1, d_model), jnp.float32),
    }


def init_ffn_params(key):
    ks = jax.random.split(key, 4)
    b1 = 1.0 / np.sqrt(d_model)
    b2 = 1.0 / np.sqrt(d_ff)
    return {
        'w1': _uniform(ks[0], (d_model, d_ff), b1),
        'b1': _uniform(ks[1], (d_ff,), b1).reshape(1, -1),
        'w2': _uniform(ks[2], (d_ff, d_model), b2),
        'b2': _uniform(ks[3], (d_model,), b2).reshape(1, -1),
        'ln_g': jnp.ones((1, d_model), jnp.float32),
        'ln_b': jnp.zeros((1, d_model), jnp.float32),
    }


def _stack(dicts):
    keys = dicts[0].keys()
    return {k: jnp.stack([d[k] for d in dicts]) for k in keys}


def init_params(key):
    keys = jax.random.split(key, 2 + 2 * n_layers + 3 * n_layers)
    it = iter(keys)
    proj = _uniform(jax.random.fold_in(key, 123),
                    (d_model, tgt_vocab_size), 1.0 / np.sqrt(d_model))
    params = {
        'src_emb': jax.random.normal(next(it), (src_vocab_size, d_model),
                                     jnp.float32),
        'tgt_emb': jax.random.normal(next(it), (tgt_vocab_size, d_model),
                                     jnp.float32),
        'enc_pos_table': get_sinusoid_encoding_table(src_len + 1, d_model),
        'dec_pos_table': get_sinusoid_encoding_table(tgt_len + 1, d_model),
        # zero-pad projection weight to 128 lanes -> lane-dense output store
        'proj': jnp.pad(proj, ((0, 0), (0, LANE - tgt_vocab_size))),
    }
    enc_sa = [init_mha_params(next(it)) for _ in range(n_layers)]
    enc_ff = [init_ffn_params(next(it)) for _ in range(n_layers)]
    dec_sa = [init_mha_params(next(it)) for _ in range(n_layers)]
    dec_ca = [init_mha_params(next(it)) for _ in range(n_layers)]
    dec_ff = [init_ffn_params(next(it)) for _ in range(n_layers)]
    params['enc_sa'] = _stack(enc_sa)
    params['enc_ff'] = _stack(enc_ff)
    params['dec_sa'] = _stack(dec_sa)
    params['dec_ca'] = _stack(dec_ca)
    params['dec_ff'] = _stack(dec_ff)
    return params


# ---------------------------------- main --------------------------------------

if __name__ == "__main__":
    key = jax.random.PRNGKey(0)
    kp, ke, kd = jax.random.split(key, 3)
    params = init_params(kp)

    enc_inputs = jax.random.randint(ke, (batch, src_len), 1, src_vocab_size,
                                    dtype=jnp.int32)
    enc_inputs = enc_inputs.at[:, -1].set(0)   # pad token to exercise pad mask
    dec_inputs = jax.random.randint(kd, (batch, tgt_len), 1, tgt_vocab_size,
                                    dtype=jnp.int32)

    fwd = jax.jit(transformer_forward)
    outputs = fwd(params, enc_inputs, dec_inputs)
    outputs = jax.block_until_ready(outputs)
    dec_logits, enc_self_attns, dec_self_attns, dec_enc_attns = outputs

    assert dec_logits.shape == (batch * tgt_len, tgt_vocab_size)
    assert len(enc_self_attns) == n_layers
    assert enc_self_attns[0].shape == (batch, n_heads, src_len, src_len)
    assert dec_self_attns[0].shape == (batch, n_heads, tgt_len, tgt_len)
    assert dec_enc_attns[0].shape == (batch, n_heads, tgt_len, src_len)
    assert bool(jnp.all(jnp.isfinite(dec_logits)))
    for a in enc_self_attns + dec_self_attns + dec_enc_attns:
        assert bool(jnp.all(jnp.isfinite(a)))
    print("KERNEL_OK")
</pallas_src>

<mosaic_0001>
module attributes {stable_mosaic.version = 11 : i64} {
  func.func @_transformer_kernel(%arg0: i32, %arg1: memref<1x5x32xf32, #tpu.memory_space<vmem>>, %arg2: memref<1x5x32xf32, #tpu.memory_space<vmem>>, %arg3: memref<1x5x5xf32, #tpu.memory_space<vmem>>, %arg4: memref<1x5x5xf32, #tpu.memory_space<vmem>>, %arg5: memref<1x5x5xf32, #tpu.memory_space<vmem>>, %arg6: memref<2x32x96xf32, #tpu.memory_space<vmem>>, %arg7: memref<2x1x96xf32, #tpu.memory_space<vmem>>, %arg8: memref<2x32x32xf32, #tpu.memory_space<vmem>>, %arg9: memref<2x1x32xf32, #tpu.memory_space<vmem>>, %arg10: memref<2x1x32xf32, #tpu.memory_space<vmem>>, %arg11: memref<2x1x32xf32, #tpu.memory_space<vmem>>, %arg12: memref<2x32x64xf32, #tpu.memory_space<vmem>>, %arg13: memref<2x1x64xf32, #tpu.memory_space<vmem>>, %arg14: memref<2x64x32xf32, #tpu.memory_space<vmem>>, %arg15: memref<2x1x32xf32, #tpu.memory_space<vmem>>, %arg16: memref<2x1x32xf32, #tpu.memory_space<vmem>>, %arg17: memref<2x1x32xf32, #tpu.memory_space<vmem>>, %arg18: memref<2x32x96xf32, #tpu.memory_space<vmem>>, %arg19: memref<2x1x96xf32, #tpu.memory_space<vmem>>, %arg20: memref<2x32x32xf32, #tpu.memory_space<vmem>>, %arg21: memref<2x1x32xf32, #tpu.memory_space<vmem>>, %arg22: memref<2x1x32xf32, #tpu.memory_space<vmem>>, %arg23: memref<2x1x32xf32, #tpu.memory_space<vmem>>, %arg24: memref<2x32x96xf32, #tpu.memory_space<vmem>>, %arg25: memref<2x1x96xf32, #tpu.memory_space<vmem>>, %arg26: memref<2x32x32xf32, #tpu.memory_space<vmem>>, %arg27: memref<2x1x32xf32, #tpu.memory_space<vmem>>, %arg28: memref<2x1x32xf32, #tpu.memory_space<vmem>>, %arg29: memref<2x1x32xf32, #tpu.memory_space<vmem>>, %arg30: memref<2x32x64xf32, #tpu.memory_space<vmem>>, %arg31: memref<2x1x64xf32, #tpu.memory_space<vmem>>, %arg32: memref<2x64x32xf32, #tpu.memory_space<vmem>>, %arg33: memref<2x1x32xf32, #tpu.memory_space<vmem>>, %arg34: memref<2x1x32xf32, #tpu.memory_space<vmem>>, %arg35: memref<2x1x32xf32, #tpu.memory_space<vmem>>, %arg36: memref<32x128xf32, #tpu.memory_space<vmem>>, %arg37: memref<1x5x128xf32, #tpu.memory_space<vmem>>, %arg38: memref<1x8x5x5xf32, #tpu.memory_space<vmem>>, %arg39: memref<1x8x5x5xf32, #tpu.memory_space<vmem>>, %arg40: memref<1x8x5x5xf32, #tpu.memory_space<vmem>>) attributes {dimension_semantics = [#tpu.dimension_semantics<parallel>], iteration_bounds = array<i64: 2>, scalar_prefetch = 0 : i64, scratch_operands = 0 : i64, tpu.core_type = #tpu.core_type<tc>, window_params = [{transform_indices = @transform_0, window_bounds = array<i64: 1, 5, 32>}, {transform_indices = @transform_1, window_bounds = array<i64: 1, 5, 32>}, {transform_indices = @transform_2, window_bounds = array<i64: 1, 5, 5>}, {transform_indices = @transform_3, window_bounds = array<i64: 1, 5, 5>}, {transform_indices = @transform_4, window_bounds = array<i64: 1, 5, 5>}, {pipeline_mode = #tpu.pipeline_mode<synchronous>, transform_indices = @transform_5, window_bounds = array<i64: 2, 32, 96>}, {pipeline_mode = #tpu.pipeline_mode<synchronous>, transform_indices = @transform_6, window_bounds = array<i64: 2, 1, 96>}, {pipeline_mode = #tpu.pipeline_mode<synchronous>, transform_indices = @transform_7, window_bounds = array<i64: 2, 32, 32>}, {pipeline_mode = #tpu.pipeline_mode<synchronous>, transform_indices = @transform_8, window_bounds = array<i64: 2, 1, 32>}, {pipeline_mode = #tpu.pipeline_mode<synchronous>, transform_indices = @transform_9, window_bounds = array<i64: 2, 1, 32>}, {pipeline_mode = #tpu.pipeline_mode<synchronous>, transform_indices = @transform_10, window_bounds = array<i64: 2, 1, 32>}, {pipeline_mode = #tpu.pipeline_mode<synchronous>, transform_indices = @transform_11, window_bounds = array<i64: 2, 32, 64>}, {pipeline_mode = #tpu.pipeline_mode<synchronous>, transform_indices = @transform_12, window_bounds = array<i64: 2, 1, 64>}, {pipeline_mode = #tpu.pipeline_mode<synchronous>, transform_indices = @transform_13, window_bounds = array<i64: 2, 64, 32>}, {pipeline_mode = #tpu.pipeline_mode<synchronous>, transform_indices = @transform_14, window_bounds = array<i64: 2, 1, 32>}, {pipeline_mode = #tpu.pipeline_mode<synchronous>, transform_indices = @transform_15, window_bounds = array<i64: 2, 1, 32>}, {pipeline_mode = #tpu.pipeline_mode<synchronous>, transform_indices = @transform_16, window_bounds = array<i64: 2, 1, 32>}, {pipeline_mode = #tpu.pipeline_mode<synchronous>, transform_indices = @transform_17, window_bounds = array<i64: 2, 32, 96>}, {pipeline_mode = #tpu.pipeline_mode<synchronous>, transform_indices = @transform_18, window_bounds = array<i64: 2, 1, 96>}, {pipeline_mode = #tpu.pipeline_mode<synchronous>, transform_indices = @transform_19, window_bounds = array<i64: 2, 32, 32>}, {pipeline_mode = #tpu.pipeline_mode<synchronous>, transform_indices = @transform_20, window_bounds = array<i64: 2, 1, 32>}, {pipeline_mode = #tpu.pipeline_mode<synchronous>, transform_indices = @transform_21, window_bounds = array<i64: 2, 1, 32>}, {pipeline_mode = #tpu.pipeline_mode<synchronous>, transform_indices = @transform_22, window_bounds = array<i64: 2, 1, 32>}, {pipeline_mode = #tpu.pipeline_mode<synchronous>, transform_indices = @transform_23, window_bounds = array<i64: 2, 32, 96>}, {pipeline_mode = #tpu.pipeline_mode<synchronous>, transform_indices = @transform_24, window_bounds = array<i64: 2, 1, 96>}, {pipeline_mode = #tpu.pipeline_mode<synchronous>, transform_indices = @transform_25, window_bounds = array<i64: 2, 32, 32>}, {pipeline_mode = #tpu.pipeline_mode<synchronous>, transform_indices = @transform_26, window_bounds = array<i64: 2, 1, 32>}, {pipeline_mode = #tpu.pipeline_mode<synchronous>, transform_indices = @transform_27, window_bounds = array<i64: 2, 1, 32>}, {pipeline_mode = #tpu.pipeline_mode<synchronous>, transform_indices = @transform_28, window_bounds = array<i64: 2, 1, 32>}, {pipeline_mode = #tpu.pipeline_mode<synchronous>, transform_indices = @transform_29, window_bounds = array<i64: 2, 32, 64>}, {pipeline_mode = #tpu.pipeline_mode<synchronous>, transform_indices = @transform_30, window_bounds = array<i64: 2, 1, 64>}, {pipeline_mode = #tpu.pipeline_mode<synchronous>, transform_indices = @transform_31, window_bounds = array<i64: 2, 64, 32>}, {pipeline_mode = #tpu.pipeline_mode<synchronous>, transform_indices = @transform_32, window_bounds = array<i64: 2, 1, 32>}, {pipeline_mode = #tpu.pipeline_mode<synchronous>, transform_indices = @transform_33, window_bounds = array<i64: 2, 1, 32>}, {pipeline_mode = #tpu.pipeline_mode<synchronous>, transform_indices = @transform_34, window_bounds = array<i64: 2, 1, 32>}, {pipeline_mode = #tpu.pipeline_mode<synchronous>, transform_indices = @transform_35, window_bounds = array<i64: 32, 128>}, {transform_indices = @transform_36, window_bounds = array<i64: 1, 5, 128>}, {transform_indices = @transform_37, window_bounds = array<i64: 1, 8, 5, 5>}, {transform_indices = @transform_38, window_bounds = array<i64: 1, 8, 5, 5>}, {transform_indices = @transform_39, window_bounds = array<i64: 1, 8, 5, 5>}]} {
    %c0 = arith.constant 0 : index
    %c0_0 = arith.constant 0 : index
    %c0_1 = arith.constant 0 : index
    %0 = vector.load %arg1[%c0, %c0_0, %c0_1] : memref<1x5x32xf32, #tpu.memory_space<vmem>>, vector<1x5x32xf32>
    %1 = vector.shape_cast %0 : vector<1x5x32xf32> to vector<5x32xf32>
    %c0_2 = arith.constant 0 : index
    %c0_3 = arith.constant 0 : index
    %c0_4 = arith.constant 0 : index
    %2 = vector.load %arg3[%c0_2, %c0_3, %c0_4] : memref<1x5x5xf32, #tpu.memory_space<vmem>>, vector<1x5x5xf32>
    %3 = vector.shape_cast %2 : vector<1x5x5xf32> to vector<5x5xf32>
    %c0_5 = arith.constant 0 : index
    %c0_6 = arith.constant 0 : index
    %c0_7 = arith.constant 0 : index
    %4 = vector.load %arg6[%c0_5, %c0_6, %c0_7] : memref<2x32x96xf32, #tpu.memory_space<vmem>>, vector<1x32x96xf32>
    %5 = vector.shape_cast %4 : vector<1x32x96xf32> to vector<32x96xf32>
    %c0_8 = arith.constant 0 : index
    %c0_9 = arith.constant 0 : index
    %c0_10 = arith.constant 0 : index
    %6 = vector.load %arg7[%c0_8, %c0_9, %c0_10] : memref<2x1x96xf32, #tpu.memory_space<vmem>>, vector<1x1x96xf32>
    %7 = vector.shape_cast %6 : vector<1x1x96xf32> to vector<1x96xf32>
    %c0_11 = arith.constant 0 : index
    %c0_12 = arith.constant 0 : index
    %c0_13 = arith.constant 0 : index
    %8 = vector.load %arg8[%c0_11, %c0_12, %c0_13] : memref<2x32x32xf32, #tpu.memory_space<vmem>>, vector<1x32x32xf32>
    %9 = vector.shape_cast %8 : vector<1x32x32xf32> to vector<32x32xf32>
    %c0_14 = arith.constant 0 : index
    %c0_15 = arith.constant 0 : index
    %c0_16 = arith.constant 0 : index
    %10 = vector.load %arg9[%c0_14, %c0_15, %c0_16] : memref<2x1x32xf32, #tpu.memory_space<vmem>>, vector<1x1x32xf32>
    %11 = vector.shape_cast %10 : vector<1x1x32xf32> to vector<1x32xf32>
    %c0_17 = arith.constant 0 : index
    %c0_18 = arith.constant 0 : index
    %c0_19 = arith.constant 0 : index
    %12 = vector.load %arg10[%c0_17, %c0_18, %c0_19] : memref<2x1x32xf32, #tpu.memory_space<vmem>>, vector<1x1x32xf32>
    %13 = vector.shape_cast %12 : vector<1x1x32xf32> to vector<1x32xf32>
    %c0_20 = arith.constant 0 : index
    %c0_21 = arith.constant 0 : index
    %c0_22 = arith.constant 0 : index
    %14 = vector.load %arg11[%c0_20, %c0_21, %c0_22] : memref<2x1x32xf32, #tpu.memory_space<vmem>>, vector<1x1x32xf32>
    %15 = vector.shape_cast %14 : vector<1x1x32xf32> to vector<1x32xf32>
    %16 = vector.extract_strided_slice %5 {offsets = [0, 0], sizes = [32, 32], strides = [1, 1]} : vector<32x96xf32> to vector<32x32xf32>
    %cst = arith.constant dense<0.000000e+00> : vector<5x32xf32>
    %17 = tpu.matmul %1, %16, %cst {dimension_numbers = #tpu.dot_dimension_numbers<[1], [0], [0], [1], [0, 0, 1, 1], [], []>} : vector<5x32xf32>, vector<32x32xf32>, vector<5x32xf32> -> vector<5x32xf32>
    %18 = vector.extract_strided_slice %7 {offsets = [0, 0], sizes = [1, 32], strides = [1, 1]} : vector<1x96xf32> to vector<1x32xf32>
    %19 = vector.broadcast %18 : vector<1x32xf32> to vector<5x32xf32>
    %20 = arith.addf %17, %19 : vector<5x32xf32>
    %21 = vector.extract_strided_slice %5 {offsets = [0, 32], sizes = [32, 32], strides = [1, 1]} : vector<32x96xf32> to vector<32x32xf32>
    %cst_23 = arith.constant dense<0.000000e+00> : vector<5x32xf32>
    %22 = tpu.matmul %1, %21, %cst_23 {dimension_numbers = #tpu.dot_dimension_numbers<[1], [0], [0], [1], [0, 0, 1, 1], [], []>} : vector<5x32xf32>, vector<32x32xf32>, vector<5x32xf32> -> vector<5x32xf32>
    %23 = vector.extract_strided_slice %7 {offsets = [0, 32], sizes = [1, 32], strides = [1, 1]} : vector<1x96xf32> to vector<1x32xf32>
    %24 = vector.broadcast %23 : vector<1x32xf32> to vector<5x32xf32>
    %25 = arith.addf %22, %24 : vector<5x32xf32>
    %26 = vector.extract_strided_slice %5 {offsets = [0, 64], sizes = [32, 32], strides = [1, 1]} : vector<32x96xf32> to vector<32x32xf32>
    %cst_24 = arith.constant dense<0.000000e+00> : vector<5x32xf32>
    %27 = tpu.matmul %1, %26, %cst_24 {dimension_numbers = #tpu.dot_dimension_numbers<[1], [0], [0], [1], [0, 0, 1, 1], [], []>} : vector<5x32xf32>, vector<32x32xf32>, vector<5x32xf32> -> vector<5x32xf32>
    %28 = vector.extract_strided_slice %7 {offsets = [0, 64], sizes = [1, 32], strides = [1, 1]} : vector<1x96xf32> to vector<1x32xf32>
    %29 = vector.broadcast %28 : vector<1x32xf32> to vector<5x32xf32>
    %30 = arith.addf %27, %29 : vector<5x32xf32>
    %31 = vector.extract_strided_slice %20 {offsets = [0, 0], sizes = [5, 8], strides = [1, 1]} : vector<5x32xf32> to vector<5x8xf32>
    %32 = vector.extract_strided_slice %25 {offsets = [0, 0], sizes = [5, 8], strides = [1, 1]} : vector<5x32xf32> to vector<5x8xf32>
    %33 = vector.extract_strided_slice %30 {offsets = [0, 0], sizes = [5, 8], strides = [1, 1]} : vector<5x32xf32> to vector<5x8xf32>
    %34 = tpu.transpose %32, [1, 0] : vector<5x8xf32> -> vector<8x5xf32>
    %cst_25 = arith.constant dense<0.000000e+00> : vector<5x5xf32>
    %35 = tpu.matmul %31, %34, %cst_25 {dimension_numbers = #tpu.dot_dimension_numbers<[1], [0], [0], [1], [0, 0, 1, 1], [], []>} : vector<5x8xf32>, vector<8x5xf32>, vector<5x5xf32> -> vector<5x5xf32>
    %cst_26 = arith.constant 0.353553385 : f32
    %36 = vector.broadcast %cst_26 : f32 to vector<5x5xf32>
    %37 = arith.mulf %35, %36 : vector<5x5xf32>
    %cst_27 = arith.constant 5.000000e-01 : f32
    %38 = vector.broadcast %cst_27 : f32 to vector<5x5xf32>
    %39 = arith.cmpf ogt, %3, %38 : vector<5x5xf32>
    %cst_28 = arith.constant -1.000000e+09 : f32
    %40 = vector.broadcast %cst_28 : f32 to vector<5x5xf32>
    %41 = arith.select %39, %40, %37 : vector<5x5xi1>, vector<5x5xf32>
    %cst_29 = arith.constant dense<0xFF800000> : vector<5xf32>
    %42 = vector.multi_reduction <maximumf>, %41, %cst_29 [1] : vector<5x5xf32> to vector<5xf32>
    %43 = vector.shape_cast %42 : vector<5xf32> to vector<5x1xf32>
    %44 = vector.broadcast %43 : vector<5x1xf32> to vector<5x5xf32>
    %45 = arith.subf %41, %44 : vector<5x5xf32>
    %46 = math.exp %45 : vector<5x5xf32>
    %cst_30 = arith.constant dense<0.000000e+00> : vector<5xf32>
    %47 = vector.multi_reduction <add>, %46, %cst_30 [1] : vector<5x5xf32> to vector<5xf32>
    %48 = vector.shape_cast %47 : vector<5xf32> to vector<5x1xf32>
    %49 = vector.broadcast %48 : vector<5x1xf32> to vector<5x5xf32>
    %50 = arith.divf %46, %49 : vector<5x5xf32>
    %c0_31 = arith.constant 0 : index
    %c0_32 = arith.constant 0 : index
    %c0_33 = arith.constant 0 : index
    %c0_34 = arith.constant 0 : index
    %51 = vector.load %arg38[%c0_31, %c0_32, %c0_33, %c0_34] : memref<1x8x5x5xf32, #tpu.memory_space<vmem>>, vector<1x1x5x5xf32>
    %52 = vector.shape_cast %51 : vector<1x1x5x5xf32> to vector<5x5xf32>
    %53 = vector.shape_cast %50 : vector<5x5xf32> to vector<1x1x5x5xf32>
    tpu.vector_store %arg38[%c0_31, %c0_32, %c0_33, %c0_34], %53 {strides = array<i32>} : memref<1x8x5x5xf32, #tpu.memory_space<vmem>>, vector<1x1x5x5xf32>,
    %cst_35 = arith.constant dense<0.000000e+00> : vector<5x8xf32>
    %54 = tpu.matmul %50, %33, %cst_35 {dimension_numbers = #tpu.dot_dimension_numbers<[1], [0], [0], [1], [0, 0, 1, 1], [], []>} : vector<5x5xf32>, vector<5x8xf32>, vector<5x8xf32> -> vector<5x8xf32>
    %55 = vector.extract_strided_slice %9 {offsets = [0, 0], sizes = [8, 32], strides = [1, 1]} : vector<32x32xf32> to vector<8x32xf32>
    %cst_36 = arith.constant dense<0.000000e+00> : vector<5x32xf32>
    %56 = tpu.matmul %54, %55, %cst_36 {dimension_numbers = #tpu.dot_dimension_numbers<[1], [0], [0], [1], [0, 0, 1, 1], [], []>} : vector<5x8xf32>, vector<8x32xf32>, vector<5x32xf32> -> vector<5x32xf32>
    %57 = vector.extract_strided_slice %20 {offsets = [0, 8], sizes = [5, 8], strides = [1, 1]} : vector<5x32xf32> to vector<5x8xf32>
    %58 = vector.extract_strided_slice %25 {offsets = [0, 8], sizes = [5, 8], strides = [1, 1]} : vector<5x32xf32> to vector<5x8xf32>
    %59 = vector.extract_strided_slice %30 {offsets = [0, 8], sizes = [5, 8], strides = [1, 1]} : vector<5x32xf32> to vector<5x8xf32>
    %60 = tpu.transpose %58, [1, 0] : vector<5x8xf32> -> vector<8x5xf32>
    %cst_37 = arith.constant dense<0.000000e+00> : vector<5x5xf32>
    %61 = tpu.matmul %57, %60, %cst_37 {dimension_numbers = #tpu.dot_dimension_numbers<[1], [0], [0], [1], [0, 0, 1, 1], [], []>} : vector<5x8xf32>, vector<8x5xf32>, vector<5x5xf32> -> vector<5x5xf32>
    %cst_38 = arith.constant 0.353553385 : f32
    %62 = vector.broadcast %cst_38 : f32 to vector<5x5xf32>
    %63 = arith.mulf %61, %62 : vector<5x5xf32>
    %cst_39 = arith.constant 5.000000e-01 : f32
    %64 = vector.broadcast %cst_39 : f32 to vector<5x5xf32>
    %65 = arith.cmpf ogt, %3, %64 : vector<5x5xf32>
    %cst_40 = arith.constant -1.000000e+09 : f32
    %66 = vector.broadcast %cst_40 : f32 to vector<5x5xf32>
    %67 = arith.select %65, %66, %63 : vector<5x5xi1>, vector<5x5xf32>
    %cst_41 = arith.constant dense<0xFF800000> : vector<5xf32>
    %68 = vector.multi_reduction <maximumf>, %67, %cst_41 [1] : vector<5x5xf32> to vector<5xf32>
    %69 = vector.shape_cast %68 : vector<5xf32> to vector<5x1xf32>
    %70 = vector.broadcast %69 : vector<5x1xf32> to vector<5x5xf32>
    %71 = arith.subf %67, %70 : vector<5x5xf32>
    %72 = math.exp %71 : vector<5x5xf32>
    %cst_42 = arith.constant dense<0.000000e+00> : vector<5xf32>
    %73 = vector.multi_reduction <add>, %72, %cst_42 [1] : vector<5x5xf32> to vector<5xf32>
    %74 = vector.shape_cast %73 : vector<5xf32> to vector<5x1xf32>
    %75 = vector.broadcast %74 : vector<5x1xf32> to vector<5x5xf32>
    %76 = arith.divf %72, %75 : vector<5x5xf32>
    %c0_43 = arith.constant 0 : index
    %c1 = arith.constant 1 : index
    %c0_44 = arith.constant 0 : index
    %c0_45 = arith.constant 0 : index
    %77 = vector.load %arg38[%c0_43, %c1, %c0_44, %c0_45] : memref<1x8x5x5xf32, #tpu.memory_space<vmem>>, vector<1x1x5x5xf32>
    %78 = vector.shape_cast %77 : vector<1x1x5x5xf32> to vector<5x5xf32>
    %79 = vector.shape_cast %76 : vector<5x5xf32> to vector<1x1x5x5xf32>
    tpu.vector_store %arg38[%c0_43, %c1, %c0_44, %c0_45], %79 {strides = array<i32>} : memref<1x8x5x5xf32, #tpu.memory_space<vmem>>, vector<1x1x5x5xf32>,
    %cst_46 = arith.constant dense<0.000000e+00> : vector<5x8xf32>
    %80 = tpu.matmul %76, %59, %cst_46 {dimension_numbers = #tpu.dot_dimension_numbers<[1], [0], [0], [1], [0, 0, 1, 1], [], []>} : vector<5x5xf32>, vector<5x8xf32>, vector<5x8xf32> -> vector<5x8xf32>
    %81 = vector.extract_strided_slice %9 {offsets = [8, 0], sizes = [8, 32], strides = [1, 1]} : vector<32x32xf32> to vector<8x32xf32>
    %cst_47 = arith.constant dense<0.000000e+00> : vector<5x32xf32>
    %82 = tpu.matmul %80, %81, %cst_47 {dimension_numbers = #tpu.dot_dimension_numbers<[1], [0], [0], [1], [0, 0, 1, 1], [], []>} : vector<5x8xf32>, vector<8x32xf32>, vector<5x32xf32> -> vector<5x32xf32>
    %83 = arith.addf %56, %82 : vector<5x32xf32>
    %84 = vector.extract_strided_slice %20 {offsets = [0, 16], sizes = [5, 8], strides = [1, 1]} : vector<5x32xf32> to vector<5x8xf32>
    %85 = vector.extract_strided_slice %25 {offsets = [0, 16], sizes = [5, 8], strides = [1, 1]} : vector<5x32xf32> to vector<5x8xf32>
    %86 = vector.extract_strided_slice %30 {offsets = [0, 16], sizes = [5, 8], strides = [1, 1]} : vector<5x32xf32> to vector<5x8xf32>
    %87 = tpu.transpose %85, [1, 0] : vector<5x8xf32> -> vector<8x5xf32>
    %cst_48 = arith.constant dense<0.000000e+00> : vector<5x5xf32>
    %88 = tpu.matmul %84, %87, %cst_48 {dimension_numbers = #tpu.dot_dimension_numbers<[1], [0], [0], [1], [0, 0, 1, 1], [], []>} : vector<5x8xf32>, vector<8x5xf32>, vector<5x5xf32> -> vector<5x5xf32>
    %cst_49 = arith.constant 0.353553385 : f32
    %89 = vector.broadcast %cst_49 : f32 to vector<5x5xf32>
    %90 = arith.mulf %88, %89 : vector<5x5xf32>
    %cst_50 = arith.constant 5.000000e-01 : f32
    %91 = vector.broadcast %cst_50 : f32 to vector<5x5xf32>
    %92 = arith.cmpf ogt, %3, %91 : vector<5x5xf32>
    %cst_51 = arith.constant -1.000000e+09 : f32
    %93 = vector.broadcast %cst_51 : f32 to vector<5x5xf32>
    %94 = arith.select %92, %93, %90 : vector<5x5xi1>, vector<5x5xf32>
    %cst_52 = arith.constant dense<0xFF800000> : vector<5xf32>
    %95 = vector.multi_reduction <maximumf>, %94, %cst_52 [1] : vector<5x5xf32> to vector<5xf32>
    %96 = vector.shape_cast %95 : vector<5xf32> to vector<5x1xf32>
    %97 = vector.broadcast %96 : vector<5x1xf32> to vector<5x5xf32>
    %98 = arith.subf %94, %97 : vector<5x5xf32>
    %99 = math.exp %98 : vector<5x5xf32>
    %cst_53 = arith.constant dense<0.000000e+00> : vector<5xf32>
    %100 = vector.multi_reduction <add>, %99, %cst_53 [1] : vector<5x5xf32> to vector<5xf32>
    %101 = vector.shape_cast %100 : vector<5xf32> to vector<5x1xf32>
    %102 = vector.broadcast %101 : vector<5x1xf32> to vector<5x5xf32>
    %103 = arith.divf %99, %102 : vector<5x5xf32>
    %c0_54 = arith.constant 0 : index
    %c2 = arith.constant 2 : index
    %c0_55 = arith.constant 0 : index
    %c0_56 = arith.constant 0 : index
    %104 = vector.load %arg38[%c0_54, %c2, %c0_55, %c0_56] : memref<1x8x5x5xf32, #tpu.memory_space<vmem>>, vector<1x1x5x5xf32>
    %105 = vector.shape_cast %104 : vector<1x1x5x5xf32> to vector<5x5xf32>
    %106 = vector.shape_cast %103 : vector<5x5xf32> to vector<1x1x5x5xf32>
    tpu.vector_store %arg38[%c0_54, %c2, %c0_55, %c0_56], %106 {strides = array<i32>} : memref<1x8x5x5xf32, #tpu.memory_space<vmem>>, vector<1x1x5x5xf32>,
    %cst_57 = arith.constant dense<0.000000e+00> : vector<5x8xf32>
    %107 = tpu.matmul %103, %86, %cst_57 {dimension_numbers = #tpu.dot_dimension_numbers<[1], [0], [0], [1], [0, 0, 1, 1], [], []>} : vector<5x5xf32>, vector<5x8xf32>, vector<5x8xf32> -> vector<5x8xf32>
    %108 = vector.extract_strided_slice %9 {offsets = [16, 0], sizes = [8, 32], strides = [1, 1]} : vector<32x32xf32> to vector<8x32xf32>
    %cst_58 = arith.constant dense<0.000000e+00> : vector<5x32xf32>
    %109 = tpu.matmul %107, %108, %cst_58 {dimension_numbers = #tpu.dot_dimension_numbers<[1], [0], [0], [1], [0, 0, 1, 1], [], []>} : vector<5x8xf32>, vector<8x32xf32>, vector<5x32xf32> -> vector<5x32xf32>
    %110 = arith.addf %83, %109 : vector<5x32xf32>
    %111 = vector.extract_strided_slice %20 {offsets = [0, 24], sizes = [5, 8], strides = [1, 1]} : vector<5x32xf32> to vector<5x8xf32>
    %112 = vector.extract_strided_slice %25 {offsets = [0, 24], sizes = [5, 8], strides = [1, 1]} : vector<5x32xf32> to vector<5x8xf32>
    %113 = vector.extract_strided_slice %30 {offsets = [0, 24], sizes = [5, 8], strides = [1, 1]} : vector<5x32xf32> to vector<5x8xf32>
    %114 = tpu.transpose %112, [1, 0] : vector<5x8xf32> -> vector<8x5xf32>
    %cst_59 = arith.constant dense<0.000000e+00> : vector<5x5xf32>
    %115 = tpu.matmul %111, %114, %cst_59 {dimension_numbers = #tpu.dot_dimension_numbers<[1], [0], [0], [1], [0, 0, 1, 1], [], []>} : vector<5x8xf32>, vector<8x5xf32>, vector<5x5xf32> -> vector<5x5xf32>
    %cst_60 = arith.constant 0.353553385 : f32
    %116 = vector.broadcast %cst_60 : f32 to vector<5x5xf32>
    %117 = arith.mulf %115, %116 : vector<5x5xf32>
    %cst_61 = arith.constant 5.000000e-01 : f32
    %118 = vector.broadcast %cst_61 : f32 to vector<5x5xf32>
    %119 = arith.cmpf ogt, %3, %118 : vector<5x5xf32>
    %cst_62 = arith.constant -1.000000e+09 : f32
    %120 = vector.broadcast %cst_62 : f32 to vector<5x5xf32>
    %121 = arith.select %119, %120, %117 : vector<5x5xi1>, vector<5x5xf32>
    %cst_63 = arith.constant dense<0xFF800000> : vector<5xf32>
    %122 = vector.multi_reduction <maximumf>, %121, %cst_63 [1] : vector<5x5xf32> to vector<5xf32>
    %123 = vector.shape_cast %122 : vector<5xf32> to vector<5x1xf32>
    %124 = vector.broadcast %123 : vector<5x1xf32> to vector<5x5xf32>
    %125 = arith.subf %121, %124 : vector<5x5xf32>
    %126 = math.exp %125 : vector<5x5xf32>
    %cst_64 = arith.constant dense<0.000000e+00> : vector<5xf32>
    %127 = vector.multi_reduction <add>, %126, %cst_64 [1] : vector<5x5xf32> to vector<5xf32>
    %128 = vector.shape_cast %127 : vector<5xf32> to vector<5x1xf32>
    %129 = vector.broadcast %128 : vector<5x1xf32> to vector<5x5xf32>
    %130 = arith.divf %126, %129 : vector<5x5xf32>
    %c0_65 = arith.constant 0 : index
    %c3 = arith.constant 3 : index
    %c0_66 = arith.constant 0 : index
    %c0_67 = arith.constant 0 : index
    %131 = vector.load %arg38[%c0_65, %c3, %c0_66, %c0_67] : memref<1x8x5x5xf32, #tpu.memory_space<vmem>>, vector<1x1x5x5xf32>
    %132 = vector.shape_cast %131 : vector<1x1x5x5xf32> to vector<5x5xf32>
    %133 = vector.shape_cast %130 : vector<5x5xf32> to vector<1x1x5x5xf32>
    tpu.vector_store %arg38[%c0_65, %c3, %c0_66, %c0_67], %133 {strides = array<i32>} : memref<1x8x5x5xf32, #tpu.memory_space<vmem>>, vector<1x1x5x5xf32>,
    %cst_68 = arith.constant dense<0.000000e+00> : vector<5x8xf32>
    %134 = tpu.matmul %130, %113, %cst_68 {dimension_numbers = #tpu.dot_dimension_numbers<[1], [0], [0], [1], [0, 0, 1, 1], [], []>} : vector<5x5xf32>, vector<5x8xf32>, vector<5x8xf32> -> vector<5x8xf32>
    %135 = vector.extract_strided_slice %9 {offsets = [24, 0], sizes = [8, 32], strides = [1, 1]} : vector<32x32xf32> to vector<8x32xf32>
    %cst_69 = arith.constant dense<0.000000e+00> : vector<5x32xf32>
    %136 = tpu.matmul %134, %135, %cst_69 {dimension_numbers = #tpu.dot_dimension_numbers<[1], [0], [0], [1], [0, 0, 1, 1], [], []>} : vector<5x8xf32>, vector<8x32xf32>, vector<5x32xf32> -> vector<5x32xf32>
    %137 = arith.addf %110, %136 : vector<5x32xf32>
    %138 = vector.broadcast %11 : vector<1x32xf32> to vector<5x32xf32>
    %139 = arith.addf %137, %138 : vector<5x32xf32>
    %140 = arith.addf %139, %1 : vector<5x32xf32>
    %cst_70 = arith.constant dense<0.000000e+00> : vector<5xf32>
    %141 = vector.multi_reduction <add>, %140, %cst_70 [1] : vector<5x32xf32> to vector<5xf32>
    %142 = vector.shape_cast %141 : vector<5xf32> to vector<5x1xf32>
    %cst_71 = arith.constant 3.200000e+01 : f32
    %143 = vector.broadcast %cst_71 : f32 to vector<5x1xf32>
    %144 = arith.divf %142, %143 : vector<5x1xf32>
    %145 = vector.broadcast %144 : vector<5x1xf32> to vector<5x32xf32>
    %146 = arith.subf %140, %145 : vector<5x32xf32>
    %147 = arith.mulf %146, %146 : vector<5x32xf32>
    %cst_72 = arith.constant dense<0.000000e+00> : vector<5xf32>
    %148 = vector.multi_reduction <add>, %147, %cst_72 [1] : vector<5x32xf32> to vector<5xf32>
    %149 = vector.shape_cast %148 : vector<5xf32> to vector<5x1xf32>
    %cst_73 = arith.constant 3.200000e+01 : f32
    %150 = vector.broadcast %cst_73 : f32 to vector<5x1xf32>
    %151 = arith.divf %149, %150 : vector<5x1xf32>
    %152 = vector.broadcast %144 : vector<5x1xf32> to vector<5x32xf32>
    %153 = arith.subf %140, %152 : vector<5x32xf32>
    %cst_74 = arith.constant 9.99999974E-6 : f32
    %154 = vector.broadcast %cst_74 : f32 to vector<5x1xf32>
    %155 = arith.addf %151, %154 : vector<5x1xf32>
    %156 = math.rsqrt %155 : vector<5x1xf32>
    %157 = vector.broadcast %156 : vector<5x1xf32> to vector<5x32xf32>
    %158 = arith.mulf %153, %157 : vector<5x32xf32>
    %159 = vector.broadcast %13 : vector<1x32xf32> to vector<5x32xf32>
    %160 = arith.mulf %158, %159 : vector<5x32xf32>
    %161 = vector.broadcast %15 : vector<1x32xf32> to vector<5x32xf32>
    %162 = arith.addf %160, %161 : vector<5x32xf32>
    %c0_75 = arith.constant 0 : index
    %c0_76 = arith.constant 0 : index
    %c0_77 = arith.constant 0 : index
    %163 = vector.load %arg12[%c0_75, %c0_76, %c0_77] : memref<2x32x64xf32, #tpu.memory_space<vmem>>, vector<1x32x64xf32>
    %164 = vector.shape_cast %163 : vector<1x32x64xf32> to vector<32x64xf32>
    %c0_78 = arith.constant 0 : index
    %c0_79 = arith.constant 0 : index
    %c0_80 = arith.constant 0 : index
    %165 = vector.load %arg13[%c0_78, %c0_79, %c0_80] : memref<2x1x64xf32, #tpu.memory_space<vmem>>, vector<1x1x64xf32>
    %166 = vector.shape_cast %165 : vector<1x1x64xf32> to vector<1x64xf32>
    %c0_81 = arith.constant 0 : index
    %c0_82 = arith.constant 0 : index
    %c0_83 = arith.constant 0 : index
    %167 = vector.load %arg14[%c0_81, %c0_82, %c0_83] : memref<2x64x32xf32, #tpu.memory_space<vmem>>, vector<1x64x32xf32>
    %168 = vector.shape_cast %167 : vector<1x64x32xf32> to vector<64x32xf32>
    %c0_84 = arith.constant 0 : index
    %c0_85 = arith.constant 0 : index
    %c0_86 = arith.constant 0 : index
    %169 = vector.load %arg15[%c0_84, %c0_85, %c0_86] : memref<2x1x32xf32, #tpu.memory_space<vmem>>, vector<1x1x32xf32>
    %170 = vector.shape_cast %169 : vector<1x1x32xf32> to vector<1x32xf32>
    %c0_87 = arith.constant 0 : index
    %c0_88 = arith.constant 0 : index
    %c0_89 = arith.constant 0 : index
    %171 = vector.load %arg16[%c0_87, %c0_88, %c0_89] : memref<2x1x32xf32, #tpu.memory_space<vmem>>, vector<1x1x32xf32>
    %172 = vector.shape_cast %171 : vector<1x1x32xf32> to vector<1x32xf32>
    %c0_90 = arith.constant 0 : index
    %c0_91 = arith.constant 0 : index
    %c0_92 = arith.constant 0 : index
    %173 = vector.load %arg17[%c0_90, %c0_91, %c0_92] : memref<2x1x32xf32, #tpu.memory_space<vmem>>, vector<1x1x32xf32>
    %174 = vector.shape_cast %173 : vector<1x1x32xf32> to vector<1x32xf32>
    %cst_93 = arith.constant dense<0.000000e+00> : vector<5x64xf32>
    %175 = tpu.matmul %162, %164, %cst_93 {dimension_numbers = #tpu.dot_dimension_numbers<[1], [0], [0], [1], [0, 0, 1, 1], [], []>} : vector<5x32xf32>, vector<32x64xf32>, vector<5x64xf32> -> vector<5x64xf32>
    %176 = vector.broadcast %166 : vector<1x64xf32> to vector<5x64xf32>
    %177 = arith.addf %175, %176 : vector<5x64xf32>
    %cst_94 = arith.constant 0.000000e+00 : f32
    %178 = vector.broadcast %cst_94 : f32 to vector<5x64xf32>
    %179 = arith.maximumf %177, %178 : vector<5x64xf32>
    %cst_95 = arith.constant dense<0.000000e+00> : vector<5x32xf32>
    %180 = tpu.matmul %179, %168, %cst_95 {dimension_numbers = #tpu.dot_dimension_numbers<[1], [0], [0], [1], [0, 0, 1, 1], [], []>} : vector<5x64xf32>, vector<64x32xf32>, vector<5x32xf32> -> vector<5x32xf32>
    %181 = vector.broadcast %170 : vector<1x32xf32> to vector<5x32xf32>
    %182 = arith.addf %180, %181 : vector<5x32xf32>
    %183 = arith.addf %182, %162 : vector<5x32xf32>
    %cst_96 = arith.constant dense<0.000000e+00> : vector<5xf32>
    %184 = vector.multi_reduction <add>, %183, %cst_96 [1] : vector<5x32xf32> to vector<5xf32>
    %185 = vector.shape_cast %184 : vector<5xf32> to vector<5x1xf32>
    %cst_97 = arith.constant 3.200000e+01 : f32
    %186 = vector.broadcast %cst_97 : f32 to vector<5x1xf32>
    %187 = arith.divf %185, %186 : vector<5x1xf32>
    %188 = vector.broadcast %187 : vector<5x1xf32> to vector<5x32xf32>
    %189 = arith.subf %183, %188 : vector<5x32xf32>
    %190 = arith.mulf %189, %189 : vector<5x32xf32>
    %cst_98 = arith.constant dense<0.000000e+00> : vector<5xf32>
    %191 = vector.multi_reduction <add>, %190, %cst_98 [1] : vector<5x32xf32> to vector<5xf32>
    %192 = vector.shape_cast %191 : vector<5xf32> to vector<5x1xf32>
    %cst_99 = arith.constant 3.200000e+01 : f32
    %193 = vector.broadcast %cst_99 : f32 to vector<5x1xf32>
    %194 = arith.divf %192, %193 : vector<5x1xf32>
    %195 = vector.broadcast %187 : vector<5x1xf32> to vector<5x32xf32>
    %196 = arith.subf %183, %195 : vector<5x32xf32>
    %cst_100 = arith.constant 9.99999974E-6 : f32
    %197 = vector.broadcast %cst_100 : f32 to vector<5x1xf32>
    %198 = arith.addf %194, %197 : vector<5x1xf32>
    %199 = math.rsqrt %198 : vector<5x1xf32>
    %200 = vector.broadcast %199 : vector<5x1xf32> to vector<5x32xf32>
    %201 = arith.mulf %196, %200 : vector<5x32xf32>
    %202 = vector.broadcast %172 : vector<1x32xf32> to vector<5x32xf32>
    %203 = arith.mulf %201, %202 : vector<5x32xf32>
    %204 = vector.broadcast %174 : vector<1x32xf32> to vector<5x32xf32>
    %205 = arith.addf %203, %204 : vector<5x32xf32>
    %c1_101 = arith.constant 1 : index
    %c0_102 = arith.constant 0 : index
    %c0_103 = arith.constant 0 : index
    %206 = vector.load %arg6[%c1_101, %c0_102, %c0_103] : memref<2x32x96xf32, #tpu.memory_space<vmem>>, vector<1x32x96xf32>
    %207 = vector.shape_cast %206 : vector<1x32x96xf32> to vector<32x96xf32>
    %c1_104 = arith.constant 1 : index
    %c0_105 = arith.constant 0 : index
    %c0_106 = arith.constant 0 : index
    %208 = vector.load %arg7[%c1_104, %c0_105, %c0_106] : memref<2x1x96xf32, #tpu.memory_space<vmem>>, vector<1x1x96xf32>
    %209 = vector.shape_cast %208 : vector<1x1x96xf32> to vector<1x96xf32>
    %c1_107 = arith.constant 1 : index
    %c0_108 = arith.constant 0 : index
    %c0_109 = arith.constant 0 : index
    %210 = vector.load %arg8[%c1_107, %c0_108, %c0_109] : memref<2x32x32xf32, #tpu.memory_space<vmem>>, vector<1x32x32xf32>
    %211 = vector.shape_cast %210 : vector<1x32x32xf32> to vector<32x32xf32>
    %c1_110 = arith.constant 1 : index
    %c0_111 = arith.constant 0 : index
    %c0_112 = arith.constant 0 : index
    %212 = vector.load %arg9[%c1_110, %c0_111, %c0_112] : memref<2x1x32xf32, #tpu.memory_space<vmem>>, vector<1x1x32xf32>
    %213 = vector.shape_cast %212 : vector<1x1x32xf32> to vector<1x32xf32>
    %c1_113 = arith.constant 1 : index
    %c0_114 = arith.constant 0 : index
    %c0_115 = arith.constant 0 : index
    %214 = vector.load %arg10[%c1_113, %c0_114, %c0_115] : memref<2x1x32xf32, #tpu.memory_space<vmem>>, vector<1x1x32xf32>
    %215 = vector.shape_cast %214 : vector<1x1x32xf32> to vector<1x32xf32>
    %c1_116 = arith.constant 1 : index
    %c0_117 = arith.constant 0 : index
    %c0_118 = arith.constant 0 : index
    %216 = vector.load %arg11[%c1_116, %c0_117, %c0_118] : memref<2x1x32xf32, #tpu.memory_space<vmem>>, vector<1x1x32xf32>
    %217 = vector.shape_cast %216 : vector<1x1x32xf32> to vector<1x32xf32>
    %218 = vector.extract_strided_slice %207 {offsets = [0, 0], sizes = [32, 32], strides = [1, 1]} : vector<32x96xf32> to vector<32x32xf32>
    %cst_119 = arith.constant dense<0.000000e+00> : vector<5x32xf32>
    %219 = tpu.matmul %205, %218, %cst_119 {dimension_numbers = #tpu.dot_dimension_numbers<[1], [0], [0], [1], [0, 0, 1, 1], [], []>} : vector<5x32xf32>, vector<32x32xf32>, vector<5x32xf32> -> vector<5x32xf32>
    %220 = vector.extract_strided_slice %209 {offsets = [0, 0], sizes = [1, 32], strides = [1, 1]} : vector<1x96xf32> to vector<1x32xf32>
    %221 = vector.broadcast %220 : vector<1x32xf32> to vector<5x32xf32>
    %222 = arith.addf %219, %221 : vector<5x32xf32>
    %223 = vector.extract_strided_slice %207 {offsets = [0, 32], sizes = [32, 32], strides = [1, 1]} : vector<32x96xf32> to vector<32x32xf32>
    %cst_120 = arith.constant dense<0.000000e+00> : vector<5x32xf32>
    %224 = tpu.matmul %205, %223, %cst_120 {dimension_numbers = #tpu.dot_dimension_numbers<[1], [0], [0], [1], [0, 0, 1, 1], [], []>} : vector<5x32xf32>, vector<32x32xf32>, vector<5x32xf32> -> vector<5x32xf32>
    %225 = vector.extract_strided_slice %209 {offsets = [0, 32], sizes = [1, 32], strides = [1, 1]} : vector<1x96xf32> to vector<1x32xf32>
    %226 = vector.broadcast %225 : vector<1x32xf32> to vector<5x32xf32>
    %227 = arith.addf %224, %226 : vector<5x32xf32>
    %228 = vector.extract_strided_slice %207 {offsets = [0, 64], sizes = [32, 32], strides = [1, 1]} : vector<32x96xf32> to vector<32x32xf32>
    %cst_121 = arith.constant dense<0.000000e+00> : vector<5x32xf32>
    %229 = tpu.matmul %205, %228, %cst_121 {dimension_numbers = #tpu.dot_dimension_numbers<[1], [0], [0], [1], [0, 0, 1, 1], [], []>} : vector<5x32xf32>, vector<32x32xf32>, vector<5x32xf32> -> vector<5x32xf32>
    %230 = vector.extract_strided_slice %209 {offsets = [0, 64], sizes = [1, 32], strides = [1, 1]} : vector<1x96xf32> to vector<1x32xf32>
    %231 = vector.broadcast %230 : vector<1x32xf32> to vector<5x32xf32>
    %232 = arith.addf %229, %231 : vector<5x32xf32>
    %233 = vector.extract_strided_slice %222 {offsets = [0, 0], sizes = [5, 8], strides = [1, 1]} : vector<5x32xf32> to vector<5x8xf32>
    %234 = vector.extract_strided_slice %227 {offsets = [0, 0], sizes = [5, 8], strides = [1, 1]} : vector<5x32xf32> to vector<5x8xf32>
    %235 = vector.extract_strided_slice %232 {offsets = [0, 0], sizes = [5, 8], strides = [1, 1]} : vector<5x32xf32> to vector<5x8xf32>
    %236 = tpu.transpose %234, [1, 0] : vector<5x8xf32> -> vector<8x5xf32>
    %cst_122 = arith.constant dense<0.000000e+00> : vector<5x5xf32>
    %237 = tpu.matmul %233, %236, %cst_122 {dimension_numbers = #tpu.dot_dimension_numbers<[1], [0], [0], [1], [0, 0, 1, 1], [], []>} : vector<5x8xf32>, vector<8x5xf32>, vector<5x5xf32> -> vector<5x5xf32>
    %cst_123 = arith.constant 0.353553385 : f32
    %238 = vector.broadcast %cst_123 : f32 to vector<5x5xf32>
    %239 = arith.mulf %237, %238 : vector<5x5xf32>
    %cst_124 = arith.constant 5.000000e-01 : f32
    %240 = vector.broadcast %cst_124 : f32 to vector<5x5xf32>
    %241 = arith.cmpf ogt, %3, %240 : vector<5x5xf32>
    %cst_125 = arith.constant -1.000000e+09 : f32
    %242 = vector.broadcast %cst_125 : f32 to vector<5x5xf32>
    %243 = arith.select %241, %242, %239 : vector<5x5xi1>, vector<5x5xf32>
    %cst_126 = arith.constant dense<0xFF800000> : vector<5xf32>
    %244 = vector.multi_reduction <maximumf>, %243, %cst_126 [1] : vector<5x5xf32> to vector<5xf32>
    %245 = vector.shape_cast %244 : vector<5xf32> to vector<5x1xf32>
    %246 = vector.broadcast %245 : vector<5x1xf32> to vector<5x5xf32>
    %247 = arith.subf %243, %246 : vector<5x5xf32>
    %248 = math.exp %247 : vector<5x5xf32>
    %cst_127 = arith.constant dense<0.000000e+00> : vector<5xf32>
    %249 = vector.multi_reduction <add>, %248, %cst_127 [1] : vector<5x5xf32> to vector<5xf32>
    %250 = vector.shape_cast %249 : vector<5xf32> to vector<5x1xf32>
    %251 = vector.broadcast %250 : vector<5x1xf32> to vector<5x5xf32>
    %252 = arith.divf %248, %251 : vector<5x5xf32>
    %c0_128 = arith.constant 0 : index
    %c4 = arith.constant 4 : index
    %c0_129 = arith.constant 0 : index
    %c0_130 = arith.constant 0 : index
    %253 = vector.load %arg38[%c0_128, %c4, %c0_129, %c0_130] : memref<1x8x5x5xf32, #tpu.memory_space<vmem>>, vector<1x1x5x5xf32>
    %254 = vector.shape_cast %253 : vector<1x1x5x5xf32> to vector<5x5xf32>
    %255 = vector.shape_cast %252 : vector<5x5xf32> to vector<1x1x5x5xf32>
    tpu.vector_store %arg38[%c0_128, %c4, %c0_129, %c0_130], %255 {strides = array<i32>} : memref<1x8x5x5xf32, #tpu.memory_space<vmem>>, vector<1x1x5x5xf32>,
    %cst_131 = arith.constant dense<0.000000e+00> : vector<5x8xf32>
    %256 = tpu.matmul %252, %235, %cst_131 {dimension_numbers = #tpu.dot_dimension_numbers<[1], [0], [0], [1], [0, 0, 1, 1], [], []>} : vector<5x5xf32>, vector<5x8xf32>, vector<5x8xf32> -> vector<5x8xf32>
    %257 = vector.extract_strided_slice %211 {offsets = [0, 0], sizes = [8, 32], strides = [1, 1]} : vector<32x32xf32> to vector<8x32xf32>
    %cst_132 = arith.constant dense<0.000000e+00> : vector<5x32xf32>
    %258 = tpu.matmul %256, %257, %cst_132 {dimension_numbers = #tpu.dot_dimension_numbers<[1], [0], [0], [1], [0, 0, 1, 1], [], []>} : vector<5x8xf32>, vector<8x32xf32>, vector<5x32xf32> -> vector<5x32xf32>
    %259 = vector.extract_strided_slice %222 {offsets = [0, 8], sizes = [5, 8], strides = [1, 1]} : vector<5x32xf32> to vector<5x8xf32>
    %260 = vector.extract_strided_slice %227 {offsets = [0, 8], sizes = [5, 8], strides = [1, 1]} : vector<5x32xf32> to vector<5x8xf32>
    %261 = vector.extract_strided_slice %232 {offsets = [0, 8], sizes = [5, 8], strides = [1, 1]} : vector<5x32xf32> to vector<5x8xf32>
    %262 = tpu.transpose %260, [1, 0] : vector<5x8xf32> -> vector<8x5xf32>
    %cst_133 = arith.constant dense<0.000000e+00> : vector<5x5xf32>
    %263 = tpu.matmul %259, %262, %cst_133 {dimension_numbers = #tpu.dot_dimension_numbers<[1], [0], [0], [1], [0, 0, 1, 1], [], []>} : vector<5x8xf32>, vector<8x5xf32>, vector<5x5xf32> -> vector<5x5xf32>
    %cst_134 = arith.constant 0.353553385 : f32
    %264 = vector.broadcast %cst_134 : f32 to vector<5x5xf32>
    %265 = arith.mulf %263, %264 : vector<5x5xf32>
    %cst_135 = arith.constant 5.000000e-01 : f32
    %266 = vector.broadcast %cst_135 : f32 to vector<5x5xf32>
    %267 = arith.cmpf ogt, %3, %266 : vector<5x5xf32>
    %cst_136 = arith.constant -1.000000e+09 : f32
    %268 = vector.broadcast %cst_136 : f32 to vector<5x5xf32>
    %269 = arith.select %267, %268, %265 : vector<5x5xi1>, vector<5x5xf32>
    %cst_137 = arith.constant dense<0xFF800000> : vector<5xf32>
    %270 = vector.multi_reduction <maximumf>, %269, %cst_137 [1] : vector<5x5xf32> to vector<5xf32>
    %271 = vector.shape_cast %270 : vector<5xf32> to vector<5x1xf32>
    %272 = vector.broadcast %271 : vector<5x1xf32> to vector<5x5xf32>
    %273 = arith.subf %269, %272 : vector<5x5xf32>
    %274 = math.exp %273 : vector<5x5xf32>
    %cst_138 = arith.constant dense<0.000000e+00> : vector<5xf32>
    %275 = vector.multi_reduction <add>, %274, %cst_138 [1] : vector<5x5xf32> to vector<5xf32>
    %276 = vector.shape_cast %275 : vector<5xf32> to vector<5x1xf32>
    %277 = vector.broadcast %276 : vector<5x1xf32> to vector<5x5xf32>
    %278 = arith.divf %274, %277 : vector<5x5xf32>
    %c0_139 = arith.constant 0 : index
    %c5 = arith.constant 5 : index
    %c0_140 = arith.constant 0 : index
    %c0_141 = arith.constant 0 : index
    %279 = vector.load %arg38[%c0_139, %c5, %c0_140, %c0_141] : memref<1x8x5x5xf32, #tpu.memory_space<vmem>>, vector<1x1x5x5xf32>
    %280 = vector.shape_cast %279 : vector<1x1x5x5xf32> to vector<5x5xf32>
    %281 = vector.shape_cast %278 : vector<5x5xf32> to vector<1x1x5x5xf32>
    tpu.vector_store %arg38[%c0_139, %c5, %c0_140, %c0_141], %281 {strides = array<i32>} : memref<1x8x5x5xf32, #tpu.memory_space<vmem>>, vector<1x1x5x5xf32>,
    %cst_142 = arith.constant dense<0.000000e+00> : vector<5x8xf32>
    %282 = tpu.matmul %278, %261, %cst_142 {dimension_numbers = #tpu.dot_dimension_numbers<[1], [0], [0], [1], [0, 0, 1, 1], [], []>} : vector<5x5xf32>, vector<5x8xf32>, vector<5x8xf32> -> vector<5x8xf32>
    %283 = vector.extract_strided_slice %211 {offsets = [8, 0], sizes = [8, 32], strides = [1, 1]} : vector<32x32xf32> to vector<8x32xf32>
    %cst_143 = arith.constant dense<0.000000e+00> : vector<5x32xf32>
    %284 = tpu.matmul %282, %283, %cst_143 {dimension_numbers = #tpu.dot_dimension_numbers<[1], [0], [0], [1], [0, 0, 1, 1], [], []>} : vector<5x8xf32>, vector<8x32xf32>, vector<5x32xf32> -> vector<5x32xf32>
    %285 = arith.addf %258, %284 : vector<5x32xf32>
    %286 = vector.extract_strided_slice %222 {offsets = [0, 16], sizes = [5, 8], strides = [1, 1]} : vector<5x32xf32> to vector<5x8xf32>
    %287 = vector.extract_strided_slice %227 {offsets = [0, 16], sizes = [5, 8], strides = [1, 1]} : vector<5x32xf32> to vector<5x8xf32>
    %288 = vector.extract_strided_slice %232 {offsets = [0, 16], sizes = [5, 8], strides = [1, 1]} : vector<5x32xf32> to vector<5x8xf32>
    %289 = tpu.transpose %287, [1, 0] : vector<5x8xf32> -> vector<8x5xf32>
    %cst_144 = arith.constant dense<0.000000e+00> : vector<5x5xf32>
    %290 = tpu.matmul %286, %289, %cst_144 {dimension_numbers = #tpu.dot_dimension_numbers<[1], [0], [0], [1], [0, 0, 1, 1], [], []>} : vector<5x8xf32>, vector<8x5xf32>, vector<5x5xf32> -> vector<5x5xf32>
    %cst_145 = arith.constant 0.353553385 : f32
    %291 = vector.broadcast %cst_145 : f32 to vector<5x5xf32>
    %292 = arith.mulf %290, %291 : vector<5x5xf32>
    %cst_146 = arith.constant 5.000000e-01 : f32
    %293 = vector.broadcast %cst_146 : f32 to vector<5x5xf32>
    %294 = arith.cmpf ogt, %3, %293 : vector<5x5xf32>
    %cst_147 = arith.constant -1.000000e+09 : f32
    %295 = vector.broadcast %cst_147 : f32 to vector<5x5xf32>
    %296 = arith.select %294, %295, %292 : vector<5x5xi1>, vector<5x5xf32>
    %cst_148 = arith.constant dense<0xFF800000> : vector<5xf32>
    %297 = vector.multi_reduction <maximumf>, %296, %cst_148 [1] : vector<5x5xf32> to vector<5xf32>
    %298 = vector.shape_cast %297 : vector<5xf32> to vector<5x1xf32>
    %299 = vector.broadcast %298 : vector<5x1xf32> to vector<5x5xf32>
    %300 = arith.subf %296, %299 : vector<5x5xf32>
    %301 = math.exp %300 : vector<5x5xf32>
    %cst_149 = arith.constant dense<0.000000e+00> : vector<5xf32>
    %302 = vector.multi_reduction <add>, %301, %cst_149 [1] : vector<5x5xf32> to vector<5xf32>
    %303 = vector.shape_cast %302 : vector<5xf32> to vector<5x1xf32>
    %304 = vector.broadcast %303 : vector<5x1xf32> to vector<5x5xf32>
    %305 = arith.divf %301, %304 : vector<5x5xf32>
    %c0_150 = arith.constant 0 : index
    %c6 = arith.constant 6 : index
    %c0_151 = arith.constant 0 : index
    %c0_152 = arith.constant 0 : index
    %306 = vector.load %arg38[%c0_150, %c6, %c0_151, %c0_152] : memref<1x8x5x5xf32, #tpu.memory_space<vmem>>, vector<1x1x5x5xf32>
    %307 = vector.shape_cast %306 : vector<1x1x5x5xf32> to vector<5x5xf32>
    %308 = vector.shape_cast %305 : vector<5x5xf32> to vector<1x1x5x5xf32>
    tpu.vector_store %arg38[%c0_150, %c6, %c0_151, %c0_152], %308 {strides = array<i32>} : memref<1x8x5x5xf32, #tpu.memory_space<vmem>>, vector<1x1x5x5xf32>,
    %cst_153 = arith.constant dense<0.000000e+00> : vector<5x8xf32>
    %309 = tpu.matmul %305, %288, %cst_153 {dimension_numbers = #tpu.dot_dimension_numbers<[1], [0], [0], [1], [0, 0, 1, 1], [], []>} : vector<5x5xf32>, vector<5x8xf32>, vector<5x8xf32> -> vector<5x8xf32>
    %310 = vector.extract_strided_slice %211 {offsets = [16, 0], sizes = [8, 32], strides = [1, 1]} : vector<32x32xf32> to vector<8x32xf32>
    %cst_154 = arith.constant dense<0.000000e+00> : vector<5x32xf32>
    %311 = tpu.matmul %309, %310, %cst_154 {dimension_numbers = #tpu.dot_dimension_numbers<[1], [0], [0], [1], [0, 0, 1, 1], [], []>} : vector<5x8xf32>, vector<8x32xf32>, vector<5x32xf32> -> vector<5x32xf32>
    %312 = arith.addf %285, %311 : vector<5x32xf32>
    %313 = vector.extract_strided_slice %222 {offsets = [0, 24], sizes = [5, 8], strides = [1, 1]} : vector<5x32xf32> to vector<5x8xf32>
    %314 = vector.extract_strided_slice %227 {offsets = [0, 24], sizes = [5, 8], strides = [1, 1]} : vector<5x32xf32> to vector<5x8xf32>
    %315 = vector.extract_strided_slice %232 {offsets = [0, 24], sizes = [5, 8], strides = [1, 1]} : vector<5x32xf32> to vector<5x8xf32>
    %316 = tpu.transpose %314, [1, 0] : vector<5x8xf32> -> vector<8x5xf32>
    %cst_155 = arith.constant dense<0.000000e+00> : vector<5x5xf32>
    %317 = tpu.matmul %313, %316, %cst_155 {dimension_numbers = #tpu.dot_dimension_numbers<[1], [0], [0], [1], [0, 0, 1, 1], [], []>} : vector<5x8xf32>, vector<8x5xf32>, vector<5x5xf32> -> vector<5x5xf32>
    %cst_156 = arith.constant 0.353553385 : f32
    %318 = vector.broadcast %cst_156 : f32 to vector<5x5xf32>
    %319 = arith.mulf %317, %318 : vector<5x5xf32>
    %cst_157 = arith.constant 5.000000e-01 : f32
    %320 = vector.broadcast %cst_157 : f32 to vector<5x5xf32>
    %321 = arith.cmpf ogt, %3, %320 : vector<5x5xf32>
    %cst_158 = arith.constant -1.000000e+09 : f32
    %322 = vector.broadcast %cst_158 : f32 to vector<5x5xf32>
    %323 = arith.select %321, %322, %319 : vector<5x5xi1>, vector<5x5xf32>
    %cst_159 = arith.constant dense<0xFF800000> : vector<5xf32>
    %324 = vector.multi_reduction <maximumf>, %323, %cst_159 [1] : vector<5x5xf32> to vector<5xf32>
    %325 = vector.shape_cast %324 : vector<5xf32> to vector<5x1xf32>
    %326 = vector.broadcast %325 : vector<5x1xf32> to vector<5x5xf32>
    %327 = arith.subf %323, %326 : vector<5x5xf32>
    %328 = math.exp %327 : vector<5x5xf32>
    %cst_160 = arith.constant dense<0.000000e+00> : vector<5xf32>
    %329 = vector.multi_reduction <add>, %328, %cst_160 [1] : vector<5x5xf32> to vector<5xf32>
    %330 = vector.shape_cast %329 : vector<5xf32> to vector<5x1xf32>
    %331 = vector.broadcast %330 : vector<5x1xf32> to vector<5x5xf32>
    %332 = arith.divf %328, %331 : vector<5x5xf32>
    %c0_161 = arith.constant 0 : index
    %c7 = arith.constant 7 : index
    %c0_162 = arith.constant 0 : index
    %c0_163 = arith.constant 0 : index
    %333 = vector.load %arg38[%c0_161, %c7, %c0_162, %c0_163] : memref<1x8x5x5xf32, #tpu.memory_space<vmem>>, vector<1x1x5x5xf32>
    %334 = vector.shape_cast %333 : vector<1x1x5x5xf32> to vector<5x5xf32>
    %335 = vector.shape_cast %332 : vector<5x5xf32> to vector<1x1x5x5xf32>
    tpu.vector_store %arg38[%c0_161, %c7, %c0_162, %c0_163], %335 {strides = array<i32>} : memref<1x8x5x5xf32, #tpu.memory_space<vmem>>, vector<1x1x5x5xf32>,
    %cst_164 = arith.constant dense<0.000000e+00> : vector<5x8xf32>
    %336 = tpu.matmul %332, %315, %cst_164 {dimension_numbers = #tpu.dot_dimension_numbers<[1], [0], [0], [1], [0, 0, 1, 1], [], []>} : vector<5x5xf32>, vector<5x8xf32>, vector<5x8xf32> -> vector<5x8xf32>
    %337 = vector.extract_strided_slice %211 {offsets = [24, 0], sizes = [8, 32], strides = [1, 1]} : vector<32x32xf32> to vector<8x32xf32>
    %cst_165 = arith.constant dense<0.000000e+00> : vector<5x32xf32>
    %338 = tpu.matmul %336, %337, %cst_165 {dimension_numbers = #tpu.dot_dimension_numbers<[1], [0], [0], [1], [0, 0, 1, 1], [], []>} : vector<5x8xf32>, vector<8x32xf32>, vector<5x32xf32> -> vector<5x32xf32>
    %339 = arith.addf %312, %338 : vector<5x32xf32>
    %340 = vector.broadcast %213 : vector<1x32xf32> to vector<5x32xf32>
    %341 = arith.addf %339, %340 : vector<5x32xf32>
    %342 = arith.addf %341, %205 : vector<5x32xf32>
    %cst_166 = arith.constant dense<0.000000e+00> : vector<5xf32>
    %343 = vector.multi_reduction <add>, %342, %cst_166 [1] : vector<5x32xf32> to vector<5xf32>
    %344 = vector.shape_cast %343 : vector<5xf32> to vector<5x1xf32>
    %cst_167 = arith.constant 3.200000e+01 : f32
    %345 = vector.broadcast %cst_167 : f32 to vector<5x1xf32>
    %346 = arith.divf %344, %345 : vector<5x1xf32>
    %347 = vector.broadcast %346 : vector<5x1xf32> to vector<5x32xf32>
    %348 = arith.subf %342, %347 : vector<5x32xf32>
    %349 = arith.mulf %348, %348 : vector<5x32xf32>
    %cst_168 = arith.constant dense<0.000000e+00> : vector<5xf32>
    %350 = vector.multi_reduction <add>, %349, %cst_168 [1] : vector<5x32xf32> to vector<5xf32>
    %351 = vector.shape_cast %350 : vector<5xf32> to vector<5x1xf32>
    %cst_169 = arith.constant 3.200000e+01 : f32
    %352 = vector.broadcast %cst_169 : f32 to vector<5x1xf32>
    %353 = arith.divf %351, %352 : vector<5x1xf32>
    %354 = vector.broadcast %346 : vector<5x1xf32> to vector<5x32xf32>
    %355 = arith.subf %342, %354 : vector<5x32xf32>
    %cst_170 = arith.constant 9.99999974E-6 : f32
    %356 = vector.broadcast %cst_170 : f32 to vector<5x1xf32>
    %357 = arith.addf %353, %356 : vector<5x1xf32>
    %358 = math.rsqrt %357 : vector<5x1xf32>
    %359 = vector.broadcast %358 : vector<5x1xf32> to vector<5x32xf32>
    %360 = arith.mulf %355, %359 : vector<5x32xf32>
    %361 = vector.broadcast %215 : vector<1x32xf32> to vector<5x32xf32>
    %362 = arith.mulf %360, %361 : vector<5x32xf32>
    %363 = vector.broadcast %217 : vector<1x32xf32> to vector<5x32xf32>
    %364 = arith.addf %362, %363 : vector<5x32xf32>
    %c1_171 = arith.constant 1 : index
    %c0_172 = arith.constant 0 : index
    %c0_173 = arith.constant 0 : index
    %365 = vector.load %arg12[%c1_171, %c0_172, %c0_173] : memref<2x32x64xf32, #tpu.memory_space<vmem>>, vector<1x32x64xf32>
    %366 = vector.shape_cast %365 : vector<1x32x64xf32> to vector<32x64xf32>
    %c1_174 = arith.constant 1 : index
    %c0_175 = arith.constant 0 : index
    %c0_176 = arith.constant 0 : index
    %367 = vector.load %arg13[%c1_174, %c0_175, %c0_176] : memref<2x1x64xf32, #tpu.memory_space<vmem>>, vector<1x1x64xf32>
    %368 = vector.shape_cast %367 : vector<1x1x64xf32> to vector<1x64xf32>
    %c1_177 = arith.constant 1 : index
    %c0_178 = arith.constant 0 : index
    %c0_179 = arith.constant 0 : index
    %369 = vector.load %arg14[%c1_177, %c0_178, %c0_179] : memref<2x64x32xf32, #tpu.memory_space<vmem>>, vector<1x64x32xf32>
    %370 = vector.shape_cast %369 : vector<1x64x32xf32> to vector<64x32xf32>
    %c1_180 = arith.constant 1 : index
    %c0_181 = arith.constant 0 : index
    %c0_182 = arith.constant 0 : index
    %371 = vector.load %arg15[%c1_180, %c0_181, %c0_182] : memref<2x1x32xf32, #tpu.memory_space<vmem>>, vector<1x1x32xf32>
    %372 = vector.shape_cast %371 : vector<1x1x32xf32> to vector<1x32xf32>
    %c1_183 = arith.constant 1 : index
    %c0_184 = arith.constant 0 : index
    %c0_185 = arith.constant 0 : index
    %373 = vector.load %arg16[%c1_183, %c0_184, %c0_185] : memref<2x1x32xf32, #tpu.memory_space<vmem>>, vector<1x1x32xf32>
    %374 = vector.shape_cast %373 : vector<1x1x32xf32> to vector<1x32xf32>
    %c1_186 = arith.constant 1 : index
    %c0_187 = arith.constant 0 : index
    %c0_188 = arith.constant 0 : index
    %375 = vector.load %arg17[%c1_186, %c0_187, %c0_188] : memref<2x1x32xf32, #tpu.memory_space<vmem>>, vector<1x1x32xf32>
    %376 = vector.shape_cast %375 : vector<1x1x32xf32> to vector<1x32xf32>
    %cst_189 = arith.constant dense<0.000000e+00> : vector<5x64xf32>
    %377 = tpu.matmul %364, %366, %cst_189 {dimension_numbers = #tpu.dot_dimension_numbers<[1], [0], [0], [1], [0, 0, 1, 1], [], []>} : vector<5x32xf32>, vector<32x64xf32>, vector<5x64xf32> -> vector<5x64xf32>
    %378 = vector.broadcast %368 : vector<1x64xf32> to vector<5x64xf32>
    %379 = arith.addf %377, %378 : vector<5x64xf32>
    %cst_190 = arith.constant 0.000000e+00 : f32
    %380 = vector.broadcast %cst_190 : f32 to vector<5x64xf32>
    %381 = arith.maximumf %379, %380 : vector<5x64xf32>
    %cst_191 = arith.constant dense<0.000000e+00> : vector<5x32xf32>
    %382 = tpu.matmul %381, %370, %cst_191 {dimension_numbers = #tpu.dot_dimension_numbers<[1], [0], [0], [1], [0, 0, 1, 1], [], []>} : vector<5x64xf32>, vector<64x32xf32>, vector<5x32xf32> -> vector<5x32xf32>
    %383 = vector.broadcast %372 : vector<1x32xf32> to vector<5x32xf32>
    %384 = arith.addf %382, %383 : vector<5x32xf32>
    %385 = arith.addf %384, %364 : vector<5x32xf32>
    %cst_192 = arith.constant dense<0.000000e+00> : vector<5xf32>
    %386 = vector.multi_reduction <add>, %385, %cst_192 [1] : vector<5x32xf32> to vector<5xf32>
    %387 = vector.shape_cast %386 : vector<5xf32> to vector<5x1xf32>
    %cst_193 = arith.constant 3.200000e+01 : f32
    %388 = vector.broadcast %cst_193 : f32 to vector<5x1xf32>
    %389 = arith.divf %387, %388 : vector<5x1xf32>
    %390 = vector.broadcast %389 : vector<5x1xf32> to vector<5x32xf32>
    %391 = arith.subf %385, %390 : vector<5x32xf32>
    %392 = arith.mulf %391, %391 : vector<5x32xf32>
    %cst_194 = arith.constant dense<0.000000e+00> : vector<5xf32>
    %393 = vector.multi_reduction <add>, %392, %cst_194 [1] : vector<5x32xf32> to vector<5xf32>
    %394 = vector.shape_cast %393 : vector<5xf32> to vector<5x1xf32>
    %cst_195 = arith.constant 3.200000e+01 : f32
    %395 = vector.broadcast %cst_195 : f32 to vector<5x1xf32>
    %396 = arith.divf %394, %395 : vector<5x1xf32>
    %397 = vector.broadcast %389 : vector<5x1xf32> to vector<5x32xf32>
    %398 = arith.subf %385, %397 : vector<5x32xf32>
    %cst_196 = arith.constant 9.99999974E-6 : f32
    %399 = vector.broadcast %cst_196 : f32 to vector<5x1xf32>
    %400 = arith.addf %396, %399 : vector<5x1xf32>
    %401 = math.rsqrt %400 : vector<5x1xf32>
    %402 = vector.broadcast %401 : vector<5x1xf32> to vector<5x32xf32>
    %403 = arith.mulf %398, %402 : vector<5x32xf32>
    %404 = vector.broadcast %374 : vector<1x32xf32> to vector<5x32xf32>
    %405 = arith.mulf %403, %404 : vector<5x32xf32>
    %406 = vector.broadcast %376 : vector<1x32xf32> to vector<5x32xf32>
    %407 = arith.addf %405, %406 : vector<5x32xf32>
    %c0_197 = arith.constant 0 : index
    %c0_198 = arith.constant 0 : index
    %c0_199 = arith.constant 0 : index
    %408 = vector.load %arg2[%c0_197, %c0_198, %c0_199] : memref<1x5x32xf32, #tpu.memory_space<vmem>>, vector<1x5x32xf32>
    %409 = vector.shape_cast %408 : vector<1x5x32xf32> to vector<5x32xf32>
    %c0_200 = arith.constant 0 : index
    %c0_201 = arith.constant 0 : index
    %c0_202 = arith.constant 0 : index
    %410 = vector.load %arg4[%c0_200, %c0_201, %c0_202] : memref<1x5x5xf32, #tpu.memory_space<vmem>>, vector<1x5x5xf32>
    %411 = vector.shape_cast %410 : vector<1x5x5xf32> to vector<5x5xf32>
    %c0_203 = arith.constant 0 : index
    %c0_204 = arith.constant 0 : index
    %c0_205 = arith.constant 0 : index
    %412 = vector.load %arg5[%c0_203, %c0_204, %c0_205] : memref<1x5x5xf32, #tpu.memory_space<vmem>>, vector<1x5x5xf32>
    %413 = vector.shape_cast %412 : vector<1x5x5xf32> to vector<5x5xf32>
    %c0_206 = arith.constant 0 : index
    %c0_207 = arith.constant 0 : index
    %c0_208 = arith.constant 0 : index
    %414 = vector.load %arg18[%c0_206, %c0_207, %c0_208] : memref<2x32x96xf32, #tpu.memory_space<vmem>>, vector<1x32x96xf32>
    %415 = vector.shape_cast %414 : vector<1x32x96xf32> to vector<32x96xf32>
    %c0_209 = arith.constant 0 : index
    %c0_210 = arith.constant 0 : index
    %c0_211 = arith.constant 0 : index
    %416 = vector.load %arg19[%c0_209, %c0_210, %c0_211] : memref<2x1x96xf32, #tpu.memory_space<vmem>>, vector<1x1x96xf32>
    %417 = vector.shape_cast %416 : vector<1x1x96xf32> to vector<1x96xf32>
    %c0_212 = arith.constant 0 : index
    %c0_213 = arith.constant 0 : index
    %c0_214 = arith.constant 0 : index
    %418 = vector.load %arg20[%c0_212, %c0_213, %c0_214] : memref<2x32x32xf32, #tpu.memory_space<vmem>>, vector<1x32x32xf32>
    %419 = vector.shape_cast %418 : vector<1x32x32xf32> to vector<32x32xf32>
    %c0_215 = arith.constant 0 : index
    %c0_216 = arith.constant 0 : index
    %c0_217 = arith.constant 0 : index
    %420 = vector.load %arg21[%c0_215, %c0_216, %c0_217] : memref<2x1x32xf32, #tpu.memory_space<vmem>>, vector<1x1x32xf32>
    %421 = vector.shape_cast %420 : vector<1x1x32xf32> to vector<1x32xf32>
    %c0_218 = arith.constant 0 : index
    %c0_219 = arith.constant 0 : index
    %c0_220 = arith.constant 0 : index
    %422 = vector.load %arg22[%c0_218, %c0_219, %c0_220] : memref<2x1x32xf32, #tpu.memory_space<vmem>>, vector<1x1x32xf32>
    %423 = vector.shape_cast %422 : vector<1x1x32xf32> to vector<1x32xf32>
    %c0_221 = arith.constant 0 : index
    %c0_222 = arith.constant 0 : index
    %c0_223 = arith.constant 0 : index
    %424 = vector.load %arg23[%c0_221, %c0_222, %c0_223] : memref<2x1x32xf32, #tpu.memory_space<vmem>>, vector<1x1x32xf32>
    %425 = vector.shape_cast %424 : vector<1x1x32xf32> to vector<1x32xf32>
    %426 = vector.extract_strided_slice %415 {offsets = [0, 0], sizes = [32, 32], strides = [1, 1]} : vector<32x96xf32> to vector<32x32xf32>
    %cst_224 = arith.constant dense<0.000000e+00> : vector<5x32xf32>
    %427 = tpu.matmul %409, %426, %cst_224 {dimension_numbers = #tpu.dot_dimension_numbers<[1], [0], [0], [1], [0, 0, 1, 1], [], []>} : vector<5x32xf32>, vector<32x32xf32>, vector<5x32xf32> -> vector<5x32xf32>
    %428 = vector.extract_strided_slice %417 {offsets = [0, 0], sizes = [1, 32], strides = [1, 1]} : vector<1x96xf32> to vector<1x32xf32>
    %429 = vector.broadcast %428 : vector<1x32xf32> to vector<5x32xf32>
    %430 = arith.addf %427, %429 : vector<5x32xf32>
    %431 = vector.extract_strided_slice %415 {offsets = [0, 32], sizes = [32, 32], strides = [1, 1]} : vector<32x96xf32> to vector<32x32xf32>
    %cst_225 = arith.constant dense<0.000000e+00> : vector<5x32xf32>
    %432 = tpu.matmul %409, %431, %cst_225 {dimension_numbers = #tpu.dot_dimension_numbers<[1], [0], [0], [1], [0, 0, 1, 1], [], []>} : vector<5x32xf32>, vector<32x32xf32>, vector<5x32xf32> -> vector<5x32xf32>
    %433 = vector.extract_strided_slice %417 {offsets = [0, 32], sizes = [1, 32], strides = [1, 1]} : vector<1x96xf32> to vector<1x32xf32>
    %434 = vector.broadcast %433 : vector<1x32xf32> to vector<5x32xf32>
    %435 = arith.addf %432, %434 : vector<5x32xf32>
    %436 = vector.extract_strided_slice %415 {offsets = [0, 64], sizes = [32, 32], strides = [1, 1]} : vector<32x96xf32> to vector<32x32xf32>
    %cst_226 = arith.constant dense<0.000000e+00> : vector<5x32xf32>
    %437 = tpu.matmul %409, %436, %cst_226 {dimension_numbers = #tpu.dot_dimension_numbers<[1], [0], [0], [1], [0, 0, 1, 1], [], []>} : vector<5x32xf32>, vector<32x32xf32>, vector<5x32xf32> -> vector<5x32xf32>
    %438 = vector.extract_strided_slice %417 {offsets = [0, 64], sizes = [1, 32], strides = [1, 1]} : vector<1x96xf32> to vector<1x32xf32>
    %439 = vector.broadcast %438 : vector<1x32xf32> to vector<5x32xf32>
    %440 = arith.addf %437, %439 : vector<5x32xf32>
    %441 = vector.extract_strided_slice %430 {offsets = [0, 0], sizes = [5, 8], strides = [1, 1]} : vector<5x32xf32> to vector<5x8xf32>
    %442 = vector.extract_strided_slice %435 {offsets = [0, 0], sizes = [5, 8], strides = [1, 1]} : vector<5x32xf32> to vector<5x8xf32>
    %443 = vector.extract_strided_slice %440 {offsets = [0, 0], sizes = [5, 8], strides = [1, 1]} : vector<5x32xf32> to vector<5x8xf32>
    %444 = tpu.transpose %442, [1, 0] : vector<5x8xf32> -> vector<8x5xf32>
    %cst_227 = arith.constant dense<0.000000e+00> : vector<5x5xf32>
    %445 = tpu.matmul %441, %444, %cst_227 {dimension_numbers = #tpu.dot_dimension_numbers<[1], [0], [0], [1], [0, 0, 1, 1], [], []>} : vector<5x8xf32>, vector<8x5xf32>, vector<5x5xf32> -> vector<5x5xf32>
    %cst_228 = arith.constant 0.353553385 : f32
    %446 = vector.broadcast %cst_228 : f32 to vector<5x5xf32>
    %447 = arith.mulf %445, %446 : vector<5x5xf32>
    %cst_229 = arith.constant 5.000000e-01 : f32
    %448 = vector.broadcast %cst_229 : f32 to vector<5x5xf32>
    %449 = arith.cmpf ogt, %411, %448 : vector<5x5xf32>
    %cst_230 = arith.constant -1.000000e+09 : f32
    %450 = vector.broadcast %cst_230 : f32 to vector<5x5xf32>
    %451 = arith.select %449, %450, %447 : vector<5x5xi1>, vector<5x5xf32>
    %cst_231 = arith.constant dense<0xFF800000> : vector<5xf32>
    %452 = vector.multi_reduction <maximumf>, %451, %cst_231 [1] : vector<5x5xf32> to vector<5xf32>
    %453 = vector.shape_cast %452 : vector<5xf32> to vector<5x1xf32>
    %454 = vector.broadcast %453 : vector<5x1xf32> to vector<5x5xf32>
    %455 = arith.subf %451, %454 : vector<5x5xf32>
    %456 = math.exp %455 : vector<5x5xf32>
    %cst_232 = arith.constant dense<0.000000e+00> : vector<5xf32>
    %457 = vector.multi_reduction <add>, %456, %cst_232 [1] : vector<5x5xf32> to vector<5xf32>
    %458 = vector.shape_cast %457 : vector<5xf32> to vector<5x1xf32>
    %459 = vector.broadcast %458 : vector<5x1xf32> to vector<5x5xf32>
    %460 = arith.divf %456, %459 : vector<5x5xf32>
    %c0_233 = arith.constant 0 : index
    %c0_234 = arith.constant 0 : index
    %c0_235 = arith.constant 0 : index
    %c0_236 = arith.constant 0 : index
    %461 = vector.load %arg39[%c0_233, %c0_234, %c0_235, %c0_236] : memref<1x8x5x5xf32, #tpu.memory_space<vmem>>, vector<1x1x5x5xf32>
    %462 = vector.shape_cast %461 : vector<1x1x5x5xf32> to vector<5x5xf32>
    %463 = vector.shape_cast %460 : vector<5x5xf32> to vector<1x1x5x5xf32>
    tpu.vector_store %arg39[%c0_233, %c0_234, %c0_235, %c0_236], %463 {strides = array<i32>} : memref<1x8x5x5xf32, #tpu.memory_space<vmem>>, vector<1x1x5x5xf32>,
    %cst_237 = arith.constant dense<0.000000e+00> : vector<5x8xf32>
    %464 = tpu.matmul %460, %443, %cst_237 {dimension_numbers = #tpu.dot_dimension_numbers<[1], [0], [0], [1], [0, 0, 1, 1], [], []>} : vector<5x5xf32>, vector<5x8xf32>, vector<5x8xf32> -> vector<5x8xf32>
    %465 = vector.extract_strided_slice %419 {offsets = [0, 0], sizes = [8, 32], strides = [1, 1]} : vector<32x32xf32> to vector<8x32xf32>
    %cst_238 = arith.constant dense<0.000000e+00> : vector<5x32xf32>
    %466 = tpu.matmul %464, %465, %cst_238 {dimension_numbers = #tpu.dot_dimension_numbers<[1], [0], [0], [1], [0, 0, 1, 1], [], []>} : vector<5x8xf32>, vector<8x32xf32>, vector<5x32xf32> -> vector<5x32xf32>
    %467 = vector.extract_strided_slice %430 {offsets = [0, 8], sizes = [5, 8], strides = [1, 1]} : vector<5x32xf32> to vector<5x8xf32>
    %468 = vector.extract_strided_slice %435 {offsets = [0, 8], sizes = [5, 8], strides = [1, 1]} : vector<5x32xf32> to vector<5x8xf32>
    %469 = vector.extract_strided_slice %440 {offsets = [0, 8], sizes = [5, 8], strides = [1, 1]} : vector<5x32xf32> to vector<5x8xf32>
    %470 = tpu.transpose %468, [1, 0] : vector<5x8xf32> -> vector<8x5xf32>
    %cst_239 = arith.constant dense<0.000000e+00> : vector<5x5xf32>
    %471 = tpu.matmul %467, %470, %cst_239 {dimension_numbers = #tpu.dot_dimension_numbers<[1], [0], [0], [1], [0, 0, 1, 1], [], []>} : vector<5x8xf32>, vector<8x5xf32>, vector<5x5xf32> -> vector<5x5xf32>
    %cst_240 = arith.constant 0.353553385 : f32
    %472 = vector.broadcast %cst_240 : f32 to vector<5x5xf32>
    %473 = arith.mulf %471, %472 : vector<5x5xf32>
    %cst_241 = arith.constant 5.000000e-01 : f32
    %474 = vector.broadcast %cst_241 : f32 to vector<5x5xf32>
    %475 = arith.cmpf ogt, %411, %474 : vector<5x5xf32>
    %cst_242 = arith.constant -1.000000e+09 : f32
    %476 = vector.broadcast %cst_242 : f32 to vector<5x5xf32>
    %477 = arith.select %475, %476, %473 : vector<5x5xi1>, vector<5x5xf32>
    %cst_243 = arith.constant dense<0xFF800000> : vector<5xf32>
    %478 = vector.multi_reduction <maximumf>, %477, %cst_243 [1] : vector<5x5xf32> to vector<5xf32>
    %479 = vector.shape_cast %478 : vector<5xf32> to vector<5x1xf32>
    %480 = vector.broadcast %479 : vector<5x1xf32> to vector<5x5xf32>
    %481 = arith.subf %477, %480 : vector<5x5xf32>
    %482 = math.exp %481 : vector<5x5xf32>
    %cst_244 = arith.constant dense<0.000000e+00> : vector<5xf32>
    %483 = vector.multi_reduction <add>, %482, %cst_244 [1] : vector<5x5xf32> to vector<5xf32>
    %484 = vector.shape_cast %483 : vector<5xf32> to vector<5x1xf32>
    %485 = vector.broadcast %484 : vector<5x1xf32> to vector<5x5xf32>
    %486 = arith.divf %482, %485 : vector<5x5xf32>
    %c0_245 = arith.constant 0 : index
    %c1_246 = arith.constant 1 : index
    %c0_247 = arith.constant 0 : index
    %c0_248 = arith.constant 0 : index
    %487 = vector.load %arg39[%c0_245, %c1_246, %c0_247, %c0_248] : memref<1x8x5x5xf32, #tpu.memory_space<vmem>>, vector<1x1x5x5xf32>
    %488 = vector.shape_cast %487 : vector<1x1x5x5xf32> to vector<5x5xf32>
    %489 = vector.shape_cast %486 : vector<5x5xf32> to vector<1x1x5x5xf32>
    tpu.vector_store %arg39[%c0_245, %c1_246, %c0_247, %c0_248], %489 {strides = array<i32>} : memref<1x8x5x5xf32, #tpu.memory_space<vmem>>, vector<1x1x5x5xf32>,
    %cst_249 = arith.constant dense<0.000000e+00> : vector<5x8xf32>
    %490 = tpu.matmul %486, %469, %cst_249 {dimension_numbers = #tpu.dot_dimension_numbers<[1], [0], [0], [1], [0, 0, 1, 1], [], []>} : vector<5x5xf32>, vector<5x8xf32>, vector<5x8xf32> -> vector<5x8xf32>
    %491 = vector.extract_strided_slice %419 {offsets = [8, 0], sizes = [8, 32], strides = [1, 1]} : vector<32x32xf32> to vector<8x32xf32>
    %cst_250 = arith.constant dense<0.000000e+00> : vector<5x32xf32>
    %492 = tpu.matmul %490, %491, %cst_250 {dimension_numbers = #tpu.dot_dimension_numbers<[1], [0], [0], [1], [0, 0, 1, 1], [], []>} : vector<5x8xf32>, vector<8x32xf32>, vector<5x32xf32> -> vector<5x32xf32>
    %493 = arith.addf %466, %492 : vector<5x32xf32>
    %494 = vector.extract_strided_slice %430 {offsets = [0, 16], sizes = [5, 8], strides = [1, 1]} : vector<5x32xf32> to vector<5x8xf32>
    %495 = vector.extract_strided_slice %435 {offsets = [0, 16], sizes = [5, 8], strides = [1, 1]} : vector<5x32xf32> to vector<5x8xf32>
    %496 = vector.extract_strided_slice %440 {offsets = [0, 16], sizes = [5, 8], strides = [1, 1]} : vector<5x32xf32> to vector<5x8xf32>
    %497 = tpu.transpose %495, [1, 0] : vector<5x8xf32> -> vector<8x5xf32>
    %cst_251 = arith.constant dense<0.000000e+00> : vector<5x5xf32>
    %498 = tpu.matmul %494, %497, %cst_251 {dimension_numbers = #tpu.dot_dimension_numbers<[1], [0], [0], [1], [0, 0, 1, 1], [], []>} : vector<5x8xf32>, vector<8x5xf32>, vector<5x5xf32> -> vector<5x5xf32>
    %cst_252 = arith.constant 0.353553385 : f32
    %499 = vector.broadcast %cst_252 : f32 to vector<5x5xf32>
    %500 = arith.mulf %498, %499 : vector<5x5xf32>
    %cst_253 = arith.constant 5.000000e-01 : f32
    %501 = vector.broadcast %cst_253 : f32 to vector<5x5xf32>
    %502 = arith.cmpf ogt, %411, %501 : vector<5x5xf32>
    %cst_254 = arith.constant -1.000000e+09 : f32
    %503 = vector.broadcast %cst_254 : f32 to vector<5x5xf32>
    %504 = arith.select %502, %503, %500 : vector<5x5xi1>, vector<5x5xf32>
    %cst_255 = arith.constant dense<0xFF800000> : vector<5xf32>
    %505 = vector.multi_reduction <maximumf>, %504, %cst_255 [1] : vector<5x5xf32> to vector<5xf32>
    %506 = vector.shape_cast %505 : vector<5xf32> to vector<5x1xf32>
    %507 = vector.broadcast %506 : vector<5x1xf32> to vector<5x5xf32>
    %508 = arith.subf %504, %507 : vector<5x5xf32>
    %509 = math.exp %508 : vector<5x5xf32>
    %cst_256 = arith.constant dense<0.000000e+00> : vector<5xf32>
    %510 = vector.multi_reduction <add>, %509, %cst_256 [1] : vector<5x5xf32> to vector<5xf32>
    %511 = vector.shape_cast %510 : vector<5xf32> to vector<5x1xf32>
    %512 = vector.broadcast %511 : vector<5x1xf32> to vector<5x5xf32>
    %513 = arith.divf %509, %512 : vector<5x5xf32>
    %c0_257 = arith.constant 0 : index
    %c2_258 = arith.constant 2 : index
    %c0_259 = arith.constant 0 : index
    %c0_260 = arith.constant 0 : index
    %514 = vector.load %arg39[%c0_257, %c2_258, %c0_259, %c0_260] : memref<1x8x5x5xf32, #tpu.memory_space<vmem>>, vector<1x1x5x5xf32>
    %515 = vector.shape_cast %514 : vector<1x1x5x5xf32> to vector<5x5xf32>
    %516 = vector.shape_cast %513 : vector<5x5xf32> to vector<1x1x5x5xf32>
    tpu.vector_store %arg39[%c0_257, %c2_258, %c0_259, %c0_260], %516 {strides = array<i32>} : memref<1x8x5x5xf32, #tpu.memory_space<vmem>>, vector<1x1x5x5xf32>,
    %cst_261 = arith.constant dense<0.000000e+00> : vector<5x8xf32>
    %517 = tpu.matmul %513, %496, %cst_261 {dimension_numbers = #tpu.dot_dimension_numbers<[1], [0], [0], [1], [0, 0, 1, 1], [], []>} : vector<5x5xf32>, vector<5x8xf32>, vector<5x8xf32> -> vector<5x8xf32>
    %518 = vector.extract_strided_slice %419 {offsets = [16, 0], sizes = [8, 32], strides = [1, 1]} : vector<32x32xf32> to vector<8x32xf32>
    %cst_262 = arith.constant dense<0.000000e+00> : vector<5x32xf32>
    %519 = tpu.matmul %517, %518, %cst_262 {dimension_numbers = #tpu.dot_dimension_numbers<[1], [0], [0], [1], [0, 0, 1, 1], [], []>} : vector<5x8xf32>, vector<8x32xf32>, vector<5x32xf32> -> vector<5x32xf32>
    %520 = arith.addf %493, %519 : vector<5x32xf32>
    %521 = vector.extract_strided_slice %430 {offsets = [0, 24], sizes = [5, 8], strides = [1, 1]} : vector<5x32xf32> to vector<5x8xf32>
    %522 = vector.extract_strided_slice %435 {offsets = [0, 24], sizes = [5, 8], strides = [1, 1]} : vector<5x32xf32> to vector<5x8xf32>
    %523 = vector.extract_strided_slice %440 {offsets = [0, 24], sizes = [5, 8], strides = [1, 1]} : vector<5x32xf32> to vector<5x8xf32>
    %524 = tpu.transpose %522, [1, 0] : vector<5x8xf32> -> vector<8x5xf32>
    %cst_263 = arith.constant dense<0.000000e+00> : vector<5x5xf32>
    %525 = tpu.matmul %521, %524, %cst_263 {dimension_numbers = #tpu.dot_dimension_numbers<[1], [0], [0], [1], [0, 0, 1, 1], [], []>} : vector<5x8xf32>, vector<8x5xf32>, vector<5x5xf32> -> vector<5x5xf32>
    %cst_264 = arith.constant 0.353553385 : f32
    %526 = vector.broadcast %cst_264 : f32 to vector<5x5xf32>
    %527 = arith.mulf %525, %526 : vector<5x5xf32>
    %cst_265 = arith.constant 5.000000e-01 : f32
    %528 = vector.broadcast %cst_265 : f32 to vector<5x5xf32>
    %529 = arith.cmpf ogt, %411, %528 : vector<5x5xf32>
    %cst_266 = arith.constant -1.000000e+09 : f32
    %530 = vector.broadcast %cst_266 : f32 to vector<5x5xf32>
    %531 = arith.select %529, %530, %527 : vector<5x5xi1>, vector<5x5xf32>
    %cst_267 = arith.constant dense<0xFF800000> : vector<5xf32>
    %532 = vector.multi_reduction <maximumf>, %531, %cst_267 [1] : vector<5x5xf32> to vector<5xf32>
    %533 = vector.shape_cast %532 : vector<5xf32> to vector<5x1xf32>
    %534 = vector.broadcast %533 : vector<5x1xf32> to vector<5x5xf32>
    %535 = arith.subf %531, %534 : vector<5x5xf32>
    %536 = math.exp %535 : vector<5x5xf32>
    %cst_268 = arith.constant dense<0.000000e+00> : vector<5xf32>
    %537 = vector.multi_reduction <add>, %536, %cst_268 [1] : vector<5x5xf32> to vector<5xf32>
    %538 = vector.shape_cast %537 : vector<5xf32> to vector<5x1xf32>
    %539 = vector.broadcast %538 : vector<5x1xf32> to vector<5x5xf32>
    %540 = arith.divf %536, %539 : vector<5x5xf32>
    %c0_269 = arith.constant 0 : index
    %c3_270 = arith.constant 3 : index
    %c0_271 = arith.constant 0 : index
    %c0_272 = arith.constant 0 : index
    %541 = vector.load %arg39[%c0_269, %c3_270, %c0_271, %c0_272] : memref<1x8x5x5xf32, #tpu.memory_space<vmem>>, vector<1x1x5x5xf32>
    %542 = vector.shape_cast %541 : vector<1x1x5x5xf32> to vector<5x5xf32>
    %543 = vector.shape_cast %540 : vector<5x5xf32> to vector<1x1x5x5xf32>
    tpu.vector_store %arg39[%c0_269, %c3_270, %c0_271, %c0_272], %543 {strides = array<i32>} : memref<1x8x5x5xf32, #tpu.memory_space<vmem>>, vector<1x1x5x5xf32>,
    %cst_273 = arith.constant dense<0.000000e+00> : vector<5x8xf32>
    %544 = tpu.matmul %540, %523, %cst_273 {dimension_numbers = #tpu.dot_dimension_numbers<[1], [0], [0], [1], [0, 0, 1, 1], [], []>} : vector<5x5xf32>, vector<5x8xf32>, vector<5x8xf32> -> vector<5x8xf32>
    %545 = vector.extract_strided_slice %419 {offsets = [24, 0], sizes = [8, 32], strides = [1, 1]} : vector<32x32xf32> to vector<8x32xf32>
    %cst_274 = arith.constant dense<0.000000e+00> : vector<5x32xf32>
    %546 = tpu.matmul %544, %545, %cst_274 {dimension_numbers = #tpu.dot_dimension_numbers<[1], [0], [0], [1], [0, 0, 1, 1], [], []>} : vector<5x8xf32>, vector<8x32xf32>, vector<5x32xf32> -> vector<5x32xf32>
    %547 = arith.addf %520, %546 : vector<5x32xf32>
    %548 = vector.broadcast %421 : vector<1x32xf32> to vector<5x32xf32>
    %549 = arith.addf %547, %548 : vector<5x32xf32>
    %550 = arith.addf %549, %409 : vector<5x32xf32>
    %cst_275 = arith.constant dense<0.000000e+00> : vector<5xf32>
    %551 = vector.multi_reduction <add>, %550, %cst_275 [1] : vector<5x32xf32> to vector<5xf32>
    %552 = vector.shape_cast %551 : vector<5xf32> to vector<5x1xf32>
    %cst_276 = arith.constant 3.200000e+01 : f32
    %553 = vector.broadcast %cst_276 : f32 to vector<5x1xf32>
    %554 = arith.divf %552, %553 : vector<5x1xf32>
    %555 = vector.broadcast %554 : vector<5x1xf32> to vector<5x32xf32>
    %556 = arith.subf %550, %555 : vector<5x32xf32>
    %557 = arith.mulf %556, %556 : vector<5x32xf32>
    %cst_277 = arith.constant dense<0.000000e+00> : vector<5xf32>
    %558 = vector.multi_reduction <add>, %557, %cst_277 [1] : vector<5x32xf32> to vector<5xf32>
    %559 = vector.shape_cast %558 : vector<5xf32> to vector<5x1xf32>
    %cst_278 = arith.constant 3.200000e+01 : f32
    %560 = vector.broadcast %cst_278 : f32 to vector<5x1xf32>
    %561 = arith.divf %559, %560 : vector<5x1xf32>
    %562 = vector.broadcast %554 : vector<5x1xf32> to vector<5x32xf32>
    %563 = arith.subf %550, %562 : vector<5x32xf32>
    %cst_279 = arith.constant 9.99999974E-6 : f32
    %564 = vector.broadcast %cst_279 : f32 to vector<5x1xf32>
    %565 = arith.addf %561, %564 : vector<5x1xf32>
    %566 = math.rsqrt %565 : vector<5x1xf32>
    %567 = vector.broadcast %566 : vector<5x1xf32> to vector<5x32xf32>
    %568 = arith.mulf %563, %567 : vector<5x32xf32>
    %569 = vector.broadcast %423 : vector<1x32xf32> to vector<5x32xf32>
    %570 = arith.mulf %568, %569 : vector<5x32xf32>
    %571 = vector.broadcast %425 : vector<1x32xf32> to vector<5x32xf32>
    %572 = arith.addf %570, %571 : vector<5x32xf32>
    %c0_280 = arith.constant 0 : index
    %c0_281 = arith.constant 0 : index
    %c0_282 = arith.constant 0 : index
    %573 = vector.load %arg24[%c0_280, %c0_281, %c0_282] : memref<2x32x96xf32, #tpu.memory_space<vmem>>, vector<1x32x96xf32>
    %574 = vector.shape_cast %573 : vector<1x32x96xf32> to vector<32x96xf32>
    %c0_283 = arith.constant 0 : index
    %c0_284 = arith.constant 0 : index
    %c0_285 = arith.constant 0 : index
    %575 = vector.load %arg25[%c0_283, %c0_284, %c0_285] : memref<2x1x96xf32, #tpu.memory_space<vmem>>, vector<1x1x96xf32>
    %576 = vector.shape_cast %575 : vector<1x1x96xf32> to vector<1x96xf32>
    %c0_286 = arith.constant 0 : index
    %c0_287 = arith.constant 0 : index
    %c0_288 = arith.constant 0 : index
    %577 = vector.load %arg26[%c0_286, %c0_287, %c0_288] : memref<2x32x32xf32, #tpu.memory_space<vmem>>, vector<1x32x32xf32>
    %578 = vector.shape_cast %577 : vector<1x32x32xf32> to vector<32x32xf32>
    %c0_289 = arith.constant 0 : index
    %c0_290 = arith.constant 0 : index
    %c0_291 = arith.constant 0 : index
    %579 = vector.load %arg27[%c0_289, %c0_290, %c0_291] : memref<2x1x32xf32, #tpu.memory_space<vmem>>, vector<1x1x32xf32>
    %580 = vector.shape_cast %579 : vector<1x1x32xf32> to vector<1x32xf32>
    %c0_292 = arith.constant 0 : index
    %c0_293 = arith.constant 0 : index
    %c0_294 = arith.constant 0 : index
    %581 = vector.load %arg28[%c0_292, %c0_293, %c0_294] : memref<2x1x32xf32, #tpu.memory_space<vmem>>, vector<1x1x32xf32>
    %582 = vector.shape_cast %581 : vector<1x1x32xf32> to vector<1x32xf32>
    %c0_295 = arith.constant 0 : index
    %c0_296 = arith.constant 0 : index
    %c0_297 = arith.constant 0 : index
    %583 = vector.load %arg29[%c0_295, %c0_296, %c0_297] : memref<2x1x32xf32, #tpu.memory_space<vmem>>, vector<1x1x32xf32>
    %584 = vector.shape_cast %583 : vector<1x1x32xf32> to vector<1x32xf32>
    %585 = vector.extract_strided_slice %574 {offsets = [0, 0], sizes = [32, 32], strides = [1, 1]} : vector<32x96xf32> to vector<32x32xf32>
    %cst_298 = arith.constant dense<0.000000e+00> : vector<5x32xf32>
    %586 = tpu.matmul %572, %585, %cst_298 {dimension_numbers = #tpu.dot_dimension_numbers<[1], [0], [0], [1], [0, 0, 1, 1], [], []>} : vector<5x32xf32>, vector<32x32xf32>, vector<5x32xf32> -> vector<5x32xf32>
    %587 = vector.extract_strided_slice %576 {offsets = [0, 0], sizes = [1, 32], strides = [1, 1]} : vector<1x96xf32> to vector<1x32xf32>
    %588 = vector.broadcast %587 : vector<1x32xf32> to vector<5x32xf32>
    %589 = arith.addf %586, %588 : vector<5x32xf32>
    %590 = vector.extract_strided_slice %574 {offsets = [0, 32], sizes = [32, 32], strides = [1, 1]} : vector<32x96xf32> to vector<32x32xf32>
    %cst_299 = arith.constant dense<0.000000e+00> : vector<5x32xf32>
    %591 = tpu.matmul %407, %590, %cst_299 {dimension_numbers = #tpu.dot_dimension_numbers<[1], [0], [0], [1], [0, 0, 1, 1], [], []>} : vector<5x32xf32>, vector<32x32xf32>, vector<5x32xf32> -> vector<5x32xf32>
    %592 = vector.extract_strided_slice %576 {offsets = [0, 32], sizes = [1, 32], strides = [1, 1]} : vector<1x96xf32> to vector<1x32xf32>
    %593 = vector.broadcast %592 : vector<1x32xf32> to vector<5x32xf32>
    %594 = arith.addf %591, %593 : vector<5x32xf32>
    %595 = vector.extract_strided_slice %574 {offsets = [0, 64], sizes = [32, 32], strides = [1, 1]} : vector<32x96xf32> to vector<32x32xf32>
    %cst_300 = arith.constant dense<0.000000e+00> : vector<5x32xf32>
    %596 = tpu.matmul %407, %595, %cst_300 {dimension_numbers = #tpu.dot_dimension_numbers<[1], [0], [0], [1], [0, 0, 1, 1], [], []>} : vector<5x32xf32>, vector<32x32xf32>, vector<5x32xf32> -> vector<5x32xf32>
    %597 = vector.extract_strided_slice %576 {offsets = [0, 64], sizes = [1, 32], strides = [1, 1]} : vector<1x96xf32> to vector<1x32xf32>
    %598 = vector.broadcast %597 : vector<1x32xf32> to vector<5x32xf32>
    %599 = arith.addf %596, %598 : vector<5x32xf32>
    %600 = vector.extract_strided_slice %589 {offsets = [0, 0], sizes = [5, 8], strides = [1, 1]} : vector<5x32xf32> to vector<5x8xf32>
    %601 = vector.extract_strided_slice %594 {offsets = [0, 0], sizes = [5, 8], strides = [1, 1]} : vector<5x32xf32> to vector<5x8xf32>
    %602 = vector.extract_strided_slice %599 {offsets = [0, 0], sizes = [5, 8], strides = [1, 1]} : vector<5x32xf32> to vector<5x8xf32>
    %603 = tpu.transpose %601, [1, 0] : vector<5x8xf32> -> vector<8x5xf32>
    %cst_301 = arith.constant dense<0.000000e+00> : vector<5x5xf32>
    %604 = tpu.matmul %600, %603, %cst_301 {dimension_numbers = #tpu.dot_dimension_numbers<[1], [0], [0], [1], [0, 0, 1, 1], [], []>} : vector<5x8xf32>, vector<8x5xf32>, vector<5x5xf32> -> vector<5x5xf32>
    %cst_302 = arith.constant 0.353553385 : f32
    %605 = vector.broadcast %cst_302 : f32 to vector<5x5xf32>
    %606 = arith.mulf %604, %605 : vector<5x5xf32>
    %cst_303 = arith.constant 5.000000e-01 : f32
    %607 = vector.broadcast %cst_303 : f32 to vector<5x5xf32>
    %608 = arith.cmpf ogt, %413, %607 : vector<5x5xf32>
    %cst_304 = arith.constant -1.000000e+09 : f32
    %609 = vector.broadcast %cst_304 : f32 to vector<5x5xf32>
    %610 = arith.select %608, %609, %606 : vector<5x5xi1>, vector<5x5xf32>
    %cst_305 = arith.constant dense<0xFF800000> : vector<5xf32>
    %611 = vector.multi_reduction <maximumf>, %610, %cst_305 [1] : vector<5x5xf32> to vector<5xf32>
    %612 = vector.shape_cast %611 : vector<5xf32> to vector<5x1xf32>
    %613 = vector.broadcast %612 : vector<5x1xf32> to vector<5x5xf32>
    %614 = arith.subf %610, %613 : vector<5x5xf32>
    %615 = math.exp %614 : vector<5x5xf32>
    %cst_306 = arith.constant dense<0.000000e+00> : vector<5xf32>
    %616 = vector.multi_reduction <add>, %615, %cst_306 [1] : vector<5x5xf32> to vector<5xf32>
    %617 = vector.shape_cast %616 : vector<5xf32> to vector<5x1xf32>
    %618 = vector.broadcast %617 : vector<5x1xf32> to vector<5x5xf32>
    %619 = arith.divf %615, %618 : vector<5x5xf32>
    %c0_307 = arith.constant 0 : index
    %c0_308 = arith.constant 0 : index
    %c0_309 = arith.constant 0 : index
    %c0_310 = arith.constant 0 : index
    %620 = vector.load %arg40[%c0_307, %c0_308, %c0_309, %c0_310] : memref<1x8x5x5xf32, #tpu.memory_space<vmem>>, vector<1x1x5x5xf32>
    %621 = vector.shape_cast %620 : vector<1x1x5x5xf32> to vector<5x5xf32>
    %622 = vector.shape_cast %619 : vector<5x5xf32> to vector<1x1x5x5xf32>
    tpu.vector_store %arg40[%c0_307, %c0_308, %c0_309, %c0_310], %622 {strides = array<i32>} : memref<1x8x5x5xf32, #tpu.memory_space<vmem>>, vector<1x1x5x5xf32>,
    %cst_311 = arith.constant dense<0.000000e+00> : vector<5x8xf32>
    %623 = tpu.matmul %619, %602, %cst_311 {dimension_numbers = #tpu.dot_dimension_numbers<[1], [0], [0], [1], [0, 0, 1, 1], [], []>} : vector<5x5xf32>, vector<5x8xf32>, vector<5x8xf32> -> vector<5x8xf32>
    %624 = vector.extract_strided_slice %578 {offsets = [0, 0], sizes = [8, 32], strides = [1, 1]} : vector<32x32xf32> to vector<8x32xf32>
    %cst_312 = arith.constant dense<0.000000e+00> : vector<5x32xf32>
    %625 = tpu.matmul %623, %624, %cst_312 {dimension_numbers = #tpu.dot_dimension_numbers<[1], [0], [0], [1], [0, 0, 1, 1], [], []>} : vector<5x8xf32>, vector<8x32xf32>, vector<5x32xf32> -> vector<5x32xf32>
    %626 = vector.extract_strided_slice %589 {offsets = [0, 8], sizes = [5, 8], strides = [1, 1]} : vector<5x32xf32> to vector<5x8xf32>
    %627 = vector.extract_strided_slice %594 {offsets = [0, 8], sizes = [5, 8], strides = [1, 1]} : vector<5x32xf32> to vector<5x8xf32>
    %628 = vector.extract_strided_slice %599 {offsets = [0, 8], sizes = [5, 8], strides = [1, 1]} : vector<5x32xf32> to vector<5x8xf32>
    %629 = tpu.transpose %627, [1, 0] : vector<5x8xf32> -> vector<8x5xf32>
    %cst_313 = arith.constant dense<0.000000e+00> : vector<5x5xf32>
    %630 = tpu.matmul %626, %629, %cst_313 {dimension_numbers = #tpu.dot_dimension_numbers<[1], [0], [0], [1], [0, 0, 1, 1], [], []>} : vector<5x8xf32>, vector<8x5xf32>, vector<5x5xf32> -> vector<5x5xf32>
    %cst_314 = arith.constant 0.353553385 : f32
    %631 = vector.broadcast %cst_314 : f32 to vector<5x5xf32>
    %632 = arith.mulf %630, %631 : vector<5x5xf32>
    %cst_315 = arith.constant 5.000000e-01 : f32
    %633 = vector.broadcast %cst_315 : f32 to vector<5x5xf32>
    %634 = arith.cmpf ogt, %413, %633 : vector<5x5xf32>
    %cst_316 = arith.constant -1.000000e+09 : f32
    %635 = vector.broadcast %cst_316 : f32 to vector<5x5xf32>
    %636 = arith.select %634, %635, %632 : vector<5x5xi1>, vector<5x5xf32>
    %cst_317 = arith.constant dense<0xFF800000> : vector<5xf32>
    %637 = vector.multi_reduction <maximumf>, %636, %cst_317 [1] : vector<5x5xf32> to vector<5xf32>
    %638 = vector.shape_cast %637 : vector<5xf32> to vector<5x1xf32>
    %639 = vector.broadcast %638 : vector<5x1xf32> to vector<5x5xf32>
    %640 = arith.subf %636, %639 : vector<5x5xf32>
    %641 = math.exp %640 : vector<5x5xf32>
    %cst_318 = arith.constant dense<0.000000e+00> : vector<5xf32>
    %642 = vector.multi_reduction <add>, %641, %cst_318 [1] : vector<5x5xf32> to vector<5xf32>
    %643 = vector.shape_cast %642 : vector<5xf32> to vector<5x1xf32>
    %644 = vector.broadcast %643 : vector<5x1xf32> to vector<5x5xf32>
    %645 = arith.divf %641, %644 : vector<5x5xf32>
    %c0_319 = arith.constant 0 : index
    %c1_320 = arith.constant 1 : index
    %c0_321 = arith.constant 0 : index
    %c0_322 = arith.constant 0 : index
    %646 = vector.load %arg40[%c0_319, %c1_320, %c0_321, %c0_322] : memref<1x8x5x5xf32, #tpu.memory_space<vmem>>, vector<1x1x5x5xf32>
    %647 = vector.shape_cast %646 : vector<1x1x5x5xf32> to vector<5x5xf32>
    %648 = vector.shape_cast %645 : vector<5x5xf32> to vector<1x1x5x5xf32>
    tpu.vector_store %arg40[%c0_319, %c1_320, %c0_321, %c0_322], %648 {strides = array<i32>} : memref<1x8x5x5xf32, #tpu.memory_space<vmem>>, vector<1x1x5x5xf32>,
    %cst_323 = arith.constant dense<0.000000e+00> : vector<5x8xf32>
    %649 = tpu.matmul %645, %628, %cst_323 {dimension_numbers = #tpu.dot_dimension_numbers<[1], [0], [0], [1], [0, 0, 1, 1], [], []>} : vector<5x5xf32>, vector<5x8xf32>, vector<5x8xf32> -> vector<5x8xf32>
    %650 = vector.extract_strided_slice %578 {offsets = [8, 0], sizes = [8, 32], strides = [1, 1]} : vector<32x32xf32> to vector<8x32xf32>
    %cst_324 = arith.constant dense<0.000000e+00> : vector<5x32xf32>
    %651 = tpu.matmul %649, %650, %cst_324 {dimension_numbers = #tpu.dot_dimension_numbers<[1], [0], [0], [1], [0, 0, 1, 1], [], []>} : vector<5x8xf32>, vector<8x32xf32>, vector<5x32xf32> -> vector<5x32xf32>
    %652 = arith.addf %625, %651 : vector<5x32xf32>
    %653 = vector.extract_strided_slice %589 {offsets = [0, 16], sizes = [5, 8], strides = [1, 1]} : vector<5x32xf32> to vector<5x8xf32>
    %654 = vector.extract_strided_slice %594 {offsets = [0, 16], sizes = [5, 8], strides = [1, 1]} : vector<5x32xf32> to vector<5x8xf32>
    %655 = vector.extract_strided_slice %599 {offsets = [0, 16], sizes = [5, 8], strides = [1, 1]} : vector<5x32xf32> to vector<5x8xf32>
    %656 = tpu.transpose %654, [1, 0] : vector<5x8xf32> -> vector<8x5xf32>
    %cst_325 = arith.constant dense<0.000000e+00> : vector<5x5xf32>
    %657 = tpu.matmul %653, %656, %cst_325 {dimension_numbers = #tpu.dot_dimension_numbers<[1], [0], [0], [1], [0, 0, 1, 1], [], []>} : vector<5x8xf32>, vector<8x5xf32>, vector<5x5xf32> -> vector<5x5xf32>
    %cst_326 = arith.constant 0.353553385 : f32
    %658 = vector.broadcast %cst_326 : f32 to vector<5x5xf32>
    %659 = arith.mulf %657, %658 : vector<5x5xf32>
    %cst_327 = arith.constant 5.000000e-01 : f32
    %660 = vector.broadcast %cst_327 : f32 to vector<5x5xf32>
    %661 = arith.cmpf ogt, %413, %660 : vector<5x5xf32>
    %cst_328 = arith.constant -1.000000e+09 : f32
    %662 = vector.broadcast %cst_328 : f32 to vector<5x5xf32>
    %663 = arith.select %661, %662, %659 : vector<5x5xi1>, vector<5x5xf32>
    %cst_329 = arith.constant dense<0xFF800000> : vector<5xf32>
    %664 = vector.multi_reduction <maximumf>, %663, %cst_329 [1] : vector<5x5xf32> to vector<5xf32>
    %665 = vector.shape_cast %664 : vector<5xf32> to vector<5x1xf32>
    %666 = vector.broadcast %665 : vector<5x1xf32> to vector<5x5xf32>
    %667 = arith.subf %663, %666 : vector<5x5xf32>
    %668 = math.exp %667 : vector<5x5xf32>
    %cst_330 = arith.constant dense<0.000000e+00> : vector<5xf32>
    %669 = vector.multi_reduction <add>, %668, %cst_330 [1] : vector<5x5xf32> to vector<5xf32>
    %670 = vector.shape_cast %669 : vector<5xf32> to vector<5x1xf32>
    %671 = vector.broadcast %670 : vector<5x1xf32> to vector<5x5xf32>
    %672 = arith.divf %668, %671 : vector<5x5xf32>
    %c0_331 = arith.constant 0 : index
    %c2_332 = arith.constant 2 : index
    %c0_333 = arith.constant 0 : index
    %c0_334 = arith.constant 0 : index
    %673 = vector.load %arg40[%c0_331, %c2_332, %c0_333, %c0_334] : memref<1x8x5x5xf32, #tpu.memory_space<vmem>>, vector<1x1x5x5xf32>
    %674 = vector.shape_cast %673 : vector<1x1x5x5xf32> to vector<5x5xf32>
    %675 = vector.shape_cast %672 : vector<5x5xf32> to vector<1x1x5x5xf32>
    tpu.vector_store %arg40[%c0_331, %c2_332, %c0_333, %c0_334], %675 {strides = array<i32>} : memref<1x8x5x5xf32, #tpu.memory_space<vmem>>, vector<1x1x5x5xf32>,
    %cst_335 = arith.constant dense<0.000000e+00> : vector<5x8xf32>
    %676 = tpu.matmul %672, %655, %cst_335 {dimension_numbers = #tpu.dot_dimension_numbers<[1], [0], [0], [1], [0, 0, 1, 1], [], []>} : vector<5x5xf32>, vector<5x8xf32>, vector<5x8xf32> -> vector<5x8xf32>
    %677 = vector.extract_strided_slice %578 {offsets = [16, 0], sizes = [8, 32], strides = [1, 1]} : vector<32x32xf32> to vector<8x32xf32>
    %cst_336 = arith.constant dense<0.000000e+00> : vector<5x32xf32>
    %678 = tpu.matmul %676, %677, %cst_336 {dimension_numbers = #tpu.dot_dimension_numbers<[1], [0], [0], [1], [0, 0, 1, 1], [], []>} : vector<5x8xf32>, vector<8x32xf32>, vector<5x32xf32> -> vector<5x32xf32>
    %679 = arith.addf %652, %678 : vector<5x32xf32>
    %680 = vector.extract_strided_slice %589 {offsets = [0, 24], sizes = [5, 8], strides = [1, 1]} : vector<5x32xf32> to vector<5x8xf32>
    %681 = vector.extract_strided_slice %594 {offsets = [0, 24], sizes = [5, 8], strides = [1, 1]} : vector<5x32xf32> to vector<5x8xf32>
    %682 = vector.extract_strided_slice %599 {offsets = [0, 24], sizes = [5, 8], strides = [1, 1]} : vector<5x32xf32> to vector<5x8xf32>
    %683 = tpu.transpose %681, [1, 0] : vector<5x8xf32> -> vector<8x5xf32>
    %cst_337 = arith.constant dense<0.000000e+00> : vector<5x5xf32>
    %684 = tpu.matmul %680, %683, %cst_337 {dimension_numbers = #tpu.dot_dimension_numbers<[1], [0], [0], [1], [0, 0, 1, 1], [], []>} : vector<5x8xf32>, vector<8x5xf32>, vector<5x5xf32> -> vector<5x5xf32>
    %cst_338 = arith.constant 0.353553385 : f32
    %685 = vector.broadcast %cst_338 : f32 to vector<5x5xf32>
    %686 = arith.mulf %684, %685 : vector<5x5xf32>
    %cst_339 = arith.constant 5.000000e-01 : f32
    %687 = vector.broadcast %cst_339 : f32 to vector<5x5xf32>
    %688 = arith.cmpf ogt, %413, %687 : vector<5x5xf32>
    %cst_340 = arith.constant -1.000000e+09 : f32
    %689 = vector.broadcast %cst_340 : f32 to vector<5x5xf32>
    %690 = arith.select %688, %689, %686 : vector<5x5xi1>, vector<5x5xf32>
    %cst_341 = arith.constant dense<0xFF800000> : vector<5xf32>
    %691 = vector.multi_reduction <maximumf>, %690, %cst_341 [1] : vector<5x5xf32> to vector<5xf32>
    %692 = vector.shape_cast %691 : vector<5xf32> to vector<5x1xf32>
    %693 = vector.broadcast %692 : vector<5x1xf32> to vector<5x5xf32>
    %694 = arith.subf %690, %693 : vector<5x5xf32>
    %695 = math.exp %694 : vector<5x5xf32>
    %cst_342 = arith.constant dense<0.000000e+00> : vector<5xf32>
    %696 = vector.multi_reduction <add>, %695, %cst_342 [1] : vector<5x5xf32> to vector<5xf32>
    %697 = vector.shape_cast %696 : vector<5xf32> to vector<5x1xf32>
    %698 = vector.broadcast %697 : vector<5x1xf32> to vector<5x5xf32>
    %699 = arith.divf %695, %698 : vector<5x5xf32>
    %c0_343 = arith.constant 0 : index
    %c3_344 = arith.constant 3 : index
    %c0_345 = arith.constant 0 : index
    %c0_346 = arith.constant 0 : index
    %700 = vector.load %arg40[%c0_343, %c3_344, %c0_345, %c0_346] : memref<1x8x5x5xf32, #tpu.memory_space<vmem>>, vector<1x1x5x5xf32>
    %701 = vector.shape_cast %700 : vector<1x1x5x5xf32> to vector<5x5xf32>
    %702 = vector.shape_cast %699 : vector<5x5xf32> to vector<1x1x5x5xf32>
    tpu.vector_store %arg40[%c0_343, %c3_344, %c0_345, %c0_346], %702 {strides = array<i32>} : memref<1x8x5x5xf32, #tpu.memory_space<vmem>>, vector<1x1x5x5xf32>,
    %cst_347 = arith.constant dense<0.000000e+00> : vector<5x8xf32>
    %703 = tpu.matmul %699, %682, %cst_347 {dimension_numbers = #tpu.dot_dimension_numbers<[1], [0], [0], [1], [0, 0, 1, 1], [], []>} : vector<5x5xf32>, vector<5x8xf32>, vector<5x8xf32> -> vector<5x8xf32>
    %704 = vector.extract_strided_slice %578 {offsets = [24, 0], sizes = [8, 32], strides = [1, 1]} : vector<32x32xf32> to vector<8x32xf32>
    %cst_348 = arith.constant dense<0.000000e+00> : vector<5x32xf32>
    %705 = tpu.matmul %703, %704, %cst_348 {dimension_numbers = #tpu.dot_dimension_numbers<[1], [0], [0], [1], [0, 0, 1, 1], [], []>} : vector<5x8xf32>, vector<8x32xf32>, vector<5x32xf32> -> vector<5x32xf32>
    %706 = arith.addf %679, %705 : vector<5x32xf32>
    %707 = vector.broadcast %580 : vector<1x32xf32> to vector<5x32xf32>
    %708 = arith.addf %706, %707 : vector<5x32xf32>
    %709 = arith.addf %708, %572 : vector<5x32xf32>
    %cst_349 = arith.constant dense<0.000000e+00> : vector<5xf32>
    %710 = vector.multi_reduction <add>, %709, %cst_349 [1] : vector<5x32xf32> to vector<5xf32>
    %711 = vector.shape_cast %710 : vector<5xf32> to vector<5x1xf32>
    %cst_350 = arith.constant 3.200000e+01 : f32
    %712 = vector.broadcast %cst_350 : f32 to vector<5x1xf32>
    %713 = arith.divf %711, %712 : vector<5x1xf32>
    %714 = vector.broadcast %713 : vector<5x1xf32> to vector<5x32xf32>
    %715 = arith.subf %709, %714 : vector<5x32xf32>
    %716 = arith.mulf %715, %715 : vector<5x32xf32>
    %cst_351 = arith.constant dense<0.000000e+00> : vector<5xf32>
    %717 = vector.multi_reduction <add>, %716, %cst_351 [1] : vector<5x32xf32> to vector<5xf32>
    %718 = vector.shape_cast %717 : vector<5xf32> to vector<5x1xf32>
    %cst_352 = arith.constant 3.200000e+01 : f32
    %719 = vector.broadcast %cst_352 : f32 to vector<5x1xf32>
    %720 = arith.divf %718, %719 : vector<5x1xf32>
    %721 = vector.broadcast %713 : vector<5x1xf32> to vector<5x32xf32>
    %722 = arith.subf %709, %721 : vector<5x32xf32>
    %cst_353 = arith.constant 9.99999974E-6 : f32
    %723 = vector.broadcast %cst_353 : f32 to vector<5x1xf32>
    %724 = arith.addf %720, %723 : vector<5x1xf32>
    %725 = math.rsqrt %724 : vector<5x1xf32>
    %726 = vector.broadcast %725 : vector<5x1xf32> to vector<5x32xf32>
    %727 = arith.mulf %722, %726 : vector<5x32xf32>
    %728 = vector.broadcast %582 : vector<1x32xf32> to vector<5x32xf32>
    %729 = arith.mulf %727, %728 : vector<5x32xf32>
    %730 = vector.broadcast %584 : vector<1x32xf32> to vector<5x32xf32>
    %731 = arith.addf %729, %730 : vector<5x32xf32>
    %c0_354 = arith.constant 0 : index
    %c0_355 = arith.constant 0 : index
    %c0_356 = arith.constant 0 : index
    %732 = vector.load %arg30[%c0_354, %c0_355, %c0_356] : memref<2x32x64xf32, #tpu.memory_space<vmem>>, vector<1x32x64xf32>
    %733 = vector.shape_cast %732 : vector<1x32x64xf32> to vector<32x64xf32>
    %c0_357 = arith.constant 0 : index
    %c0_358 = arith.constant 0 : index
    %c0_359 = arith.constant 0 : index
    %734 = vector.load %arg31[%c0_357, %c0_358, %c0_359] : memref<2x1x64xf32, #tpu.memory_space<vmem>>, vector<1x1x64xf32>
    %735 = vector.shape_cast %734 : vector<1x1x64xf32> to vector<1x64xf32>
    %c0_360 = arith.constant 0 : index
    %c0_361 = arith.constant 0 : index
    %c0_362 = arith.constant 0 : index
    %736 = vector.load %arg32[%c0_360, %c0_361, %c0_362] : memref<2x64x32xf32, #tpu.memory_space<vmem>>, vector<1x64x32xf32>
    %737 = vector.shape_cast %736 : vector<1x64x32xf32> to vector<64x32xf32>
    %c0_363 = arith.constant 0 : index
    %c0_364 = arith.constant 0 : index
    %c0_365 = arith.constant 0 : index
    %738 = vector.load %arg33[%c0_363, %c0_364, %c0_365] : memref<2x1x32xf32, #tpu.memory_space<vmem>>, vector<1x1x32xf32>
    %739 = vector.shape_cast %738 : vector<1x1x32xf32> to vector<1x32xf32>
    %c0_366 = arith.constant 0 : index
    %c0_367 = arith.constant 0 : index
    %c0_368 = arith.constant 0 : index
    %740 = vector.load %arg34[%c0_366, %c0_367, %c0_368] : memref<2x1x32xf32, #tpu.memory_space<vmem>>, vector<1x1x32xf32>
    %741 = vector.shape_cast %740 : vector<1x1x32xf32> to vector<1x32xf32>
    %c0_369 = arith.constant 0 : index
    %c0_370 = arith.constant 0 : index
    %c0_371 = arith.constant 0 : index
    %742 = vector.load %arg35[%c0_369, %c0_370, %c0_371] : memref<2x1x32xf32, #tpu.memory_space<vmem>>, vector<1x1x32xf32>
    %743 = vector.shape_cast %742 : vector<1x1x32xf32> to vector<1x32xf32>
    %cst_372 = arith.constant dense<0.000000e+00> : vector<5x64xf32>
    %744 = tpu.matmul %731, %733, %cst_372 {dimension_numbers = #tpu.dot_dimension_numbers<[1], [0], [0], [1], [0, 0, 1, 1], [], []>} : vector<5x32xf32>, vector<32x64xf32>, vector<5x64xf32> -> vector<5x64xf32>
    %745 = vector.broadcast %735 : vector<1x64xf32> to vector<5x64xf32>
    %746 = arith.addf %744, %745 : vector<5x64xf32>
    %cst_373 = arith.constant 0.000000e+00 : f32
    %747 = vector.broadcast %cst_373 : f32 to vector<5x64xf32>
    %748 = arith.maximumf %746, %747 : vector<5x64xf32>
    %cst_374 = arith.constant dense<0.000000e+00> : vector<5x32xf32>
    %749 = tpu.matmul %748, %737, %cst_374 {dimension_numbers = #tpu.dot_dimension_numbers<[1], [0], [0], [1], [0, 0, 1, 1], [], []>} : vector<5x64xf32>, vector<64x32xf32>, vector<5x32xf32> -> vector<5x32xf32>
    %750 = vector.broadcast %739 : vector<1x32xf32> to vector<5x32xf32>
    %751 = arith.addf %749, %750 : vector<5x32xf32>
    %752 = arith.addf %751, %731 : vector<5x32xf32>
    %cst_375 = arith.constant dense<0.000000e+00> : vector<5xf32>
    %753 = vector.multi_reduction <add>, %752, %cst_375 [1] : vector<5x32xf32> to vector<5xf32>
    %754 = vector.shape_cast %753 : vector<5xf32> to vector<5x1xf32>
    %cst_376 = arith.constant 3.200000e+01 : f32
    %755 = vector.broadcast %cst_376 : f32 to vector<5x1xf32>
    %756 = arith.divf %754, %755 : vector<5x1xf32>
    %757 = vector.broadcast %756 : vector<5x1xf32> to vector<5x32xf32>
    %758 = arith.subf %752, %757 : vector<5x32xf32>
    %759 = arith.mulf %758, %758 : vector<5x32xf32>
    %cst_377 = arith.constant dense<0.000000e+00> : vector<5xf32>
    %760 = vector.multi_reduction <add>, %759, %cst_377 [1] : vector<5x32xf32> to vector<5xf32>
    %761 = vector.shape_cast %760 : vector<5xf32> to vector<5x1xf32>
    %cst_378 = arith.constant 3.200000e+01 : f32
    %762 = vector.broadcast %cst_378 : f32 to vector<5x1xf32>
    %763 = arith.divf %761, %762 : vector<5x1xf32>
    %764 = vector.broadcast %756 : vector<5x1xf32> to vector<5x32xf32>
    %765 = arith.subf %752, %764 : vector<5x32xf32>
    %cst_379 = arith.constant 9.99999974E-6 : f32
    %766 = vector.broadcast %cst_379 : f32 to vector<5x1xf32>
    %767 = arith.addf %763, %766 : vector<5x1xf32>
    %768 = math.rsqrt %767 : vector<5x1xf32>
    %769 = vector.broadcast %768 : vector<5x1xf32> to vector<5x32xf32>
    %770 = arith.mulf %765, %769 : vector<5x32xf32>
    %771 = vector.broadcast %741 : vector<1x32xf32> to vector<5x32xf32>
    %772 = arith.mulf %770, %771 : vector<5x32xf32>
    %773 = vector.broadcast %743 : vector<1x32xf32> to vector<5x32xf32>
    %774 = arith.addf %772, %773 : vector<5x32xf32>
    %c1_380 = arith.constant 1 : index
    %c0_381 = arith.constant 0 : index
    %c0_382 = arith.constant 0 : index
    %775 = vector.load %arg18[%c1_380, %c0_381, %c0_382] : memref<2x32x96xf32, #tpu.memory_space<vmem>>, vector<1x32x96xf32>
    %776 = vector.shape_cast %775 : vector<1x32x96xf32> to vector<32x96xf32>
    %c1_383 = arith.constant 1 : index
    %c0_384 = arith.constant 0 : index
    %c0_385 = arith.constant 0 : index
    %777 = vector.load %arg19[%c1_383, %c0_384, %c0_385] : memref<2x1x96xf32, #tpu.memory_space<vmem>>, vector<1x1x96xf32>
    %778 = vector.shape_cast %777 : vector<1x1x96xf32> to vector<1x96xf32>
    %c1_386 = arith.constant 1 : index
    %c0_387 = arith.constant 0 : index
    %c0_388 = arith.constant 0 : index
    %779 = vector.load %arg20[%c1_386, %c0_387, %c0_388] : memref<2x32x32xf32, #tpu.memory_space<vmem>>, vector<1x32x32xf32>
    %780 = vector.shape_cast %779 : vector<1x32x32xf32> to vector<32x32xf32>
    %c1_389 = arith.constant 1 : index
    %c0_390 = arith.constant 0 : index
    %c0_391 = arith.constant 0 : index
    %781 = vector.load %arg21[%c1_389, %c0_390, %c0_391] : memref<2x1x32xf32, #tpu.memory_space<vmem>>, vector<1x1x32xf32>
    %782 = vector.shape_cast %781 : vector<1x1x32xf32> to vector<1x32xf32>
    %c1_392 = arith.constant 1 : index
    %c0_393 = arith.constant 0 : index
    %c0_394 = arith.constant 0 : index
    %783 = vector.load %arg22[%c1_392, %c0_393, %c0_394] : memref<2x1x32xf32, #tpu.memory_space<vmem>>, vector<1x1x32xf32>
    %784 = vector.shape_cast %783 : vector<1x1x32xf32> to vector<1x32xf32>
    %c1_395 = arith.constant 1 : index
    %c0_396 = arith.constant 0 : index
    %c0_397 = arith.constant 0 : index
    %785 = vector.load %arg23[%c1_395, %c0_396, %c0_397] : memref<2x1x32xf32, #tpu.memory_space<vmem>>, vector<1x1x32xf32>
    %786 = vector.shape_cast %785 : vector<1x1x32xf32> to vector<1x32xf32>
    %787 = vector.extract_strided_slice %776 {offsets = [0, 0], sizes = [32, 32], strides = [1, 1]} : vector<32x96xf32> to vector<32x32xf32>
    %cst_398 = arith.constant dense<0.000000e+00> : vector<5x32xf32>
    %788 = tpu.matmul %774, %787, %cst_398 {dimension_numbers = #tpu.dot_dimension_numbers<[1], [0], [0], [1], [0, 0, 1, 1], [], []>} : vector<5x32xf32>, vector<32x32xf32>, vector<5x32xf32> -> vector<5x32xf32>
    %789 = vector.extract_strided_slice %778 {offsets = [0, 0], sizes = [1, 32], strides = [1, 1]} : vector<1x96xf32> to vector<1x32xf32>
    %790 = vector.broadcast %789 : vector<1x32xf32> to vector<5x32xf32>
    %791 = arith.addf %788, %790 : vector<5x32xf32>
    %792 = vector.extract_strided_slice %776 {offsets = [0, 32], sizes = [32, 32], strides = [1, 1]} : vector<32x96xf32> to vector<32x32xf32>
    %cst_399 = arith.constant dense<0.000000e+00> : vector<5x32xf32>
    %793 = tpu.matmul %774, %792, %cst_399 {dimension_numbers = #tpu.dot_dimension_numbers<[1], [0], [0], [1], [0, 0, 1, 1], [], []>} : vector<5x32xf32>, vector<32x32xf32>, vector<5x32xf32> -> vector<5x32xf32>
    %794 = vector.extract_strided_slice %778 {offsets = [0, 32], sizes = [1, 32], strides = [1, 1]} : vector<1x96xf32> to vector<1x32xf32>
    %795 = vector.broadcast %794 : vector<1x32xf32> to vector<5x32xf32>
    %796 = arith.addf %793, %795 : vector<5x32xf32>
    %797 = vector.extract_strided_slice %776 {offsets = [0, 64], sizes = [32, 32], strides = [1, 1]} : vector<32x96xf32> to vector<32x32xf32>
    %cst_400 = arith.constant dense<0.000000e+00> : vector<5x32xf32>
    %798 = tpu.matmul %774, %797, %cst_400 {dimension_numbers = #tpu.dot_dimension_numbers<[1], [0], [0], [1], [0, 0, 1, 1], [], []>} : vector<5x32xf32>, vector<32x32xf32>, vector<5x32xf32> -> vector<5x32xf32>
    %799 = vector.extract_strided_slice %778 {offsets = [0, 64], sizes = [1, 32], strides = [1, 1]} : vector<1x96xf32> to vector<1x32xf32>
    %800 = vector.broadcast %799 : vector<1x32xf32> to vector<5x32xf32>
    %801 = arith.addf %798, %800 : vector<5x32xf32>
    %802 = vector.extract_strided_slice %791 {offsets = [0, 0], sizes = [5, 8], strides = [1, 1]} : vector<5x32xf32> to vector<5x8xf32>
    %803 = vector.extract_strided_slice %796 {offsets = [0, 0], sizes = [5, 8], strides = [1, 1]} : vector<5x32xf32> to vector<5x8xf32>
    %804 = vector.extract_strided_slice %801 {offsets = [0, 0], sizes = [5, 8], strides = [1, 1]} : vector<5x32xf32> to vector<5x8xf32>
    %805 = tpu.transpose %803, [1, 0] : vector<5x8xf32> -> vector<8x5xf32>
    %cst_401 = arith.constant dense<0.000000e+00> : vector<5x5xf32>
    %806 = tpu.matmul %802, %805, %cst_401 {dimension_numbers = #tpu.dot_dimension_numbers<[1], [0], [0], [1], [0, 0, 1, 1], [], []>} : vector<5x8xf32>, vector<8x5xf32>, vector<5x5xf32> -> vector<5x5xf32>
    %cst_402 = arith.constant 0.353553385 : f32
    %807 = vector.broadcast %cst_402 : f32 to vector<5x5xf32>
    %808 = arith.mulf %806, %807 : vector<5x5xf32>
    %cst_403 = arith.constant 5.000000e-01 : f32
    %809 = vector.broadcast %cst_403 : f32 to vector<5x5xf32>
    %810 = arith.cmpf ogt, %411, %809 : vector<5x5xf32>
    %cst_404 = arith.constant -1.000000e+09 : f32
    %811 = vector.broadcast %cst_404 : f32 to vector<5x5xf32>
    %812 = arith.select %810, %811, %808 : vector<5x5xi1>, vector<5x5xf32>
    %cst_405 = arith.constant dense<0xFF800000> : vector<5xf32>
    %813 = vector.multi_reduction <maximumf>, %812, %cst_405 [1] : vector<5x5xf32> to vector<5xf32>
    %814 = vector.shape_cast %813 : vector<5xf32> to vector<5x1xf32>
    %815 = vector.broadcast %814 : vector<5x1xf32> to vector<5x5xf32>
    %816 = arith.subf %812, %815 : vector<5x5xf32>
    %817 = math.exp %816 : vector<5x5xf32>
    %cst_406 = arith.constant dense<0.000000e+00> : vector<5xf32>
    %818 = vector.multi_reduction <add>, %817, %cst_406 [1] : vector<5x5xf32> to vector<5xf32>
    %819 = vector.shape_cast %818 : vector<5xf32> to vector<5x1xf32>
    %820 = vector.broadcast %819 : vector<5x1xf32> to vector<5x5xf32>
    %821 = arith.divf %817, %820 : vector<5x5xf32>
    %c0_407 = arith.constant 0 : index
    %c4_408 = arith.constant 4 : index
    %c0_409 = arith.constant 0 : index
    %c0_410 = arith.constant 0 : index
    %822 = vector.load %arg39[%c0_407, %c4_408, %c0_409, %c0_410] : memref<1x8x5x5xf32, #tpu.memory_space<vmem>>, vector<1x1x5x5xf32>
    %823 = vector.shape_cast %822 : vector<1x1x5x5xf32> to vector<5x5xf32>
    %824 = vector.shape_cast %821 : vector<5x5xf32> to vector<1x1x5x5xf32>
    tpu.vector_store %arg39[%c0_407, %c4_408, %c0_409, %c0_410], %824 {strides = array<i32>} : memref<1x8x5x5xf32, #tpu.memory_space<vmem>>, vector<1x1x5x5xf32>,
    %cst_411 = arith.constant dense<0.000000e+00> : vector<5x8xf32>
    %825 = tpu.matmul %821, %804, %cst_411 {dimension_numbers = #tpu.dot_dimension_numbers<[1], [0], [0], [1], [0, 0, 1, 1], [], []>} : vector<5x5xf32>, vector<5x8xf32>, vector<5x8xf32> -> vector<5x8xf32>
    %826 = vector.extract_strided_slice %780 {offsets = [0, 0], sizes = [8, 32], strides = [1, 1]} : vector<32x32xf32> to vector<8x32xf32>
    %cst_412 = arith.constant dense<0.000000e+00> : vector<5x32xf32>
    %827 = tpu.matmul %825, %826, %cst_412 {dimension_numbers = #tpu.dot_dimension_numbers<[1], [0], [0], [1], [0, 0, 1, 1], [], []>} : vector<5x8xf32>, vector<8x32xf32>, vector<5x32xf32> -> vector<5x32xf32>
    %828 = vector.extract_strided_slice %791 {offsets = [0, 8], sizes = [5, 8], strides = [1, 1]} : vector<5x32xf32> to vector<5x8xf32>
    %829 = vector.extract_strided_slice %796 {offsets = [0, 8], sizes = [5, 8], strides = [1, 1]} : vector<5x32xf32> to vector<5x8xf32>
    %830 = vector.extract_strided_slice %801 {offsets = [0, 8], sizes = [5, 8], strides = [1, 1]} : vector<5x32xf32> to vector<5x8xf32>
    %831 = tpu.transpose %829, [1, 0] : vector<5x8xf32> -> vector<8x5xf32>
    %cst_413 = arith.constant dense<0.000000e+00> : vector<5x5xf32>
    %832 = tpu.matmul %828, %831, %cst_413 {dimension_numbers = #tpu.dot_dimension_numbers<[1], [0], [0], [1], [0, 0, 1, 1], [], []>} : vector<5x8xf32>, vector<8x5xf32>, vector<5x5xf32> -> vector<5x5xf32>
    %cst_414 = arith.constant 0.353553385 : f32
    %833 = vector.broadcast %cst_414 : f32 to vector<5x5xf32>
    %834 = arith.mulf %832, %833 : vector<5x5xf32>
    %cst_415 = arith.constant 5.000000e-01 : f32
    %835 = vector.broadcast %cst_415 : f32 to vector<5x5xf32>
    %836 = arith.cmpf ogt, %411, %835 : vector<5x5xf32>
    %cst_416 = arith.constant -1.000000e+09 : f32
    %837 = vector.broadcast %cst_416 : f32 to vector<5x5xf32>
    %838 = arith.select %836, %837, %834 : vector<5x5xi1>, vector<5x5xf32>
    %cst_417 = arith.constant dense<0xFF800000> : vector<5xf32>
    %839 = vector.multi_reduction <maximumf>, %838, %cst_417 [1] : vector<5x5xf32> to vector<5xf32>
    %840 = vector.shape_cast %839 : vector<5xf32> to vector<5x1xf32>
    %841 = vector.broadcast %840 : vector<5x1xf32> to vector<5x5xf32>
    %842 = arith.subf %838, %841 : vector<5x5xf32>
    %843 = math.exp %842 : vector<5x5xf32>
    %cst_418 = arith.constant dense<0.000000e+00> : vector<5xf32>
    %844 = vector.multi_reduction <add>, %843, %cst_418 [1] : vector<5x5xf32> to vector<5xf32>
    %845 = vector.shape_cast %844 : vector<5xf32> to vector<5x1xf32>
    %846 = vector.broadcast %845 : vector<5x1xf32> to vector<5x5xf32>
    %847 = arith.divf %843, %846 : vector<5x5xf32>
    %c0_419 = arith.constant 0 : index
    %c5_420 = arith.constant 5 : index
    %c0_421 = arith.constant 0 : index
    %c0_422 = arith.constant 0 : index
    %848 = vector.load %arg39[%c0_419, %c5_420, %c0_421, %c0_422] : memref<1x8x5x5xf32, #tpu.memory_space<vmem>>, vector<1x1x5x5xf32>
    %849 = vector.shape_cast %848 : vector<1x1x5x5xf32> to vector<5x5xf32>
    %850 = vector.shape_cast %847 : vector<5x5xf32> to vector<1x1x5x5xf32>
    tpu.vector_store %arg39[%c0_419, %c5_420, %c0_421, %c0_422], %850 {strides = array<i32>} : memref<1x8x5x5xf32, #tpu.memory_space<vmem>>, vector<1x1x5x5xf32>,
    %cst_423 = arith.constant dense<0.000000e+00> : vector<5x8xf32>
    %851 = tpu.matmul %847, %830, %cst_423 {dimension_numbers = #tpu.dot_dimension_numbers<[1], [0], [0], [1], [0, 0, 1, 1], [], []>} : vector<5x5xf32>, vector<5x8xf32>, vector<5x8xf32> -> vector<5x8xf32>
    %852 = vector.extract_strided_slice %780 {offsets = [8, 0], sizes = [8, 32], strides = [1, 1]} : vector<32x32xf32> to vector<8x32xf32>
    %cst_424 = arith.constant dense<0.000000e+00> : vector<5x32xf32>
    %853 = tpu.matmul %851, %852, %cst_424 {dimension_numbers = #tpu.dot_dimension_numbers<[1], [0], [0], [1], [0, 0, 1, 1], [], []>} : vector<5x8xf32>, vector<8x32xf32>, vector<5x32xf32> -> vector<5x32xf32>
    %854 = arith.addf %827, %853 : vector<5x32xf32>
    %855 = vector.extract_strided_slice %791 {offsets = [0, 16], sizes = [5, 8], strides = [1, 1]} : vector<5x32xf32> to vector<5x8xf32>
    %856 = vector.extract_strided_slice %796 {offsets = [0, 16], sizes = [5, 8], strides = [1, 1]} : vector<5x32xf32> to vector<5x8xf32>
    %857 = vector.extract_strided_slice %801 {offsets = [0, 16], sizes = [5, 8], strides = [1, 1]} : vector<5x32xf32> to vector<5x8xf32>
    %858 = tpu.transpose %856, [1, 0] : vector<5x8xf32> -> vector<8x5xf32>
    %cst_425 = arith.constant dense<0.000000e+00> : vector<5x5xf32>
    %859 = tpu.matmul %855, %858, %cst_425 {dimension_numbers = #tpu.dot_dimension_numbers<[1], [0], [0], [1], [0, 0, 1, 1], [], []>} : vector<5x8xf32>, vector<8x5xf32>, vector<5x5xf32> -> vector<5x5xf32>
    %cst_426 = arith.constant 0.353553385 : f32
    %860 = vector.broadcast %cst_426 : f32 to vector<5x5xf32>
    %861 = arith.mulf %859, %860 : vector<5x5xf32>
    %cst_427 = arith.constant 5.000000e-01 : f32
    %862 = vector.broadcast %cst_427 : f32 to vector<5x5xf32>
    %863 = arith.cmpf ogt, %411, %862 : vector<5x5xf32>
    %cst_428 = arith.constant -1.000000e+09 : f32
    %864 = vector.broadcast %cst_428 : f32 to vector<5x5xf32>
    %865 = arith.select %863, %864, %861 : vector<5x5xi1>, vector<5x5xf32>
    %cst_429 = arith.constant dense<0xFF800000> : vector<5xf32>
    %866 = vector.multi_reduction <maximumf>, %865, %cst_429 [1] : vector<5x5xf32> to vector<5xf32>
    %867 = vector.shape_cast %866 : vector<5xf32> to vector<5x1xf32>
    %868 = vector.broadcast %867 : vector<5x1xf32> to vector<5x5xf32>
    %869 = arith.subf %865, %868 : vector<5x5xf32>
    %870 = math.exp %869 : vector<5x5xf32>
    %cst_430 = arith.constant dense<0.000000e+00> : vector<5xf32>
    %871 = vector.multi_reduction <add>, %870, %cst_430 [1] : vector<5x5xf32> to vector<5xf32>
    %872 = vector.shape_cast %871 : vector<5xf32> to vector<5x1xf32>
    %873 = vector.broadcast %872 : vector<5x1xf32> to vector<5x5xf32>
    %874 = arith.divf %870, %873 : vector<5x5xf32>
    %c0_431 = arith.constant 0 : index
    %c6_432 = arith.constant 6 : index
    %c0_433 = arith.constant 0 : index
    %c0_434 = arith.constant 0 : index
    %875 = vector.load %arg39[%c0_431, %c6_432, %c0_433, %c0_434] : memref<1x8x5x5xf32, #tpu.memory_space<vmem>>, vector<1x1x5x5xf32>
    %876 = vector.shape_cast %875 : vector<1x1x5x5xf32> to vector<5x5xf32>
    %877 = vector.shape_cast %874 : vector<5x5xf32> to vector<1x1x5x5xf32>
    tpu.vector_store %arg39[%c0_431, %c6_432, %c0_433, %c0_434], %877 {strides = array<i32>} : memref<1x8x5x5xf32, #tpu.memory_space<vmem>>, vector<1x1x5x5xf32>,
    %cst_435 = arith.constant dense<0.000000e+00> : vector<5x8xf32>
    %878 = tpu.matmul %874, %857, %cst_435 {dimension_numbers = #tpu.dot_dimension_numbers<[1], [0], [0], [1], [0, 0, 1, 1], [], []>} : vector<5x5xf32>, vector<5x8xf32>, vector<5x8xf32> -> vector<5x8xf32>
    %879 = vector.extract_strided_slice %780 {offsets = [16, 0], sizes = [8, 32], strides = [1, 1]} : vector<32x32xf32> to vector<8x32xf32>
    %cst_436 = arith.constant dense<0.000000e+00> : vector<5x32xf32>
    %880 = tpu.matmul %878, %879, %cst_436 {dimension_numbers = #tpu.dot_dimension_numbers<[1], [0], [0], [1], [0, 0, 1, 1], [], []>} : vector<5x8xf32>, vector<8x32xf32>, vector<5x32xf32> -> vector<5x32xf32>
    %881 = arith.addf %854, %880 : vector<5x32xf32>
    %882 = vector.extract_strided_slice %791 {offsets = [0, 24], sizes = [5, 8], strides = [1, 1]} : vector<5x32xf32> to vector<5x8xf32>
    %883 = vector.extract_strided_slice %796 {offsets = [0, 24], sizes = [5, 8], strides = [1, 1]} : vector<5x32xf32> to vector<5x8xf32>
    %884 = vector.extract_strided_slice %801 {offsets = [0, 24], sizes = [5, 8], strides = [1, 1]} : vector<5x32xf32> to vector<5x8xf32>
    %885 = tpu.transpose %883, [1, 0] : vector<5x8xf32> -> vector<8x5xf32>
    %cst_437 = arith.constant dense<0.000000e+00> : vector<5x5xf32>
    %886 = tpu.matmul %882, %885, %cst_437 {dimension_numbers = #tpu.dot_dimension_numbers<[1], [0], [0], [1], [0, 0, 1, 1], [], []>} : vector<5x8xf32>, vector<8x5xf32>, vector<5x5xf32> -> vector<5x5xf32>
    %cst_438 = arith.constant 0.353553385 : f32
    %887 = vector.broadcast %cst_438 : f32 to vector<5x5xf32>
    %888 = arith.mulf %886, %887 : vector<5x5xf32>
    %cst_439 = arith.constant 5.000000e-01 : f32
    %889 = vector.broadcast %cst_439 : f32 to vector<5x5xf32>
    %890 = arith.cmpf ogt, %411, %889 : vector<5x5xf32>
    %cst_440 = arith.constant -1.000000e+09 : f32
    %891 = vector.broadcast %cst_440 : f32 to vector<5x5xf32>
    %892 = arith.select %890, %891, %888 : vector<5x5xi1>, vector<5x5xf32>
    %cst_441 = arith.constant dense<0xFF800000> : vector<5xf32>
    %893 = vector.multi_reduction <maximumf>, %892, %cst_441 [1] : vector<5x5xf32> to vector<5xf32>
    %894 = vector.shape_cast %893 : vector<5xf32> to vector<5x1xf32>
    %895 = vector.broadcast %894 : vector<5x1xf32> to vector<5x5xf32>
    %896 = arith.subf %892, %895 : vector<5x5xf32>
    %897 = math.exp %896 : vector<5x5xf32>
    %cst_442 = arith.constant dense<0.000000e+00> : vector<5xf32>
    %898 = vector.multi_reduction <add>, %897, %cst_442 [1] : vector<5x5xf32> to vector<5xf32>
    %899 = vector.shape_cast %898 : vector<5xf32> to vector<5x1xf32>
    %900 = vector.broadcast %899 : vector<5x1xf32> to vector<5x5xf32>
    %901 = arith.divf %897, %900 : vector<5x5xf32>
    %c0_443 = arith.constant 0 : index
    %c7_444 = arith.constant 7 : index
    %c0_445 = arith.constant 0 : index
    %c0_446 = arith.constant 0 : index
    %902 = vector.load %arg39[%c0_443, %c7_444, %c0_445, %c0_446] : memref<1x8x5x5xf32, #tpu.memory_space<vmem>>, vector<1x1x5x5xf32>
    %903 = vector.shape_cast %902 : vector<1x1x5x5xf32> to vector<5x5xf32>
    %904 = vector.shape_cast %901 : vector<5x5xf32> to vector<1x1x5x5xf32>
    tpu.vector_store %arg39[%c0_443, %c7_444, %c0_445, %c0_446], %904 {strides = array<i32>} : memref<1x8x5x5xf32, #tpu.memory_space<vmem>>, vector<1x1x5x5xf32>,
    %cst_447 = arith.constant dense<0.000000e+00> : vector<5x8xf32>
    %905 = tpu.matmul %901, %884, %cst_447 {dimension_numbers = #tpu.dot_dimension_numbers<[1], [0], [0], [1], [0, 0, 1, 1], [], []>} : vector<5x5xf32>, vector<5x8xf32>, vector<5x8xf32> -> vector<5x8xf32>
    %906 = vector.extract_strided_slice %780 {offsets = [24, 0], sizes = [8, 32], strides = [1, 1]} : vector<32x32xf32> to vector<8x32xf32>
    %cst_448 = arith.constant dense<0.000000e+00> : vector<5x32xf32>
    %907 = tpu.matmul %905, %906, %cst_448 {dimension_numbers = #tpu.dot_dimension_numbers<[1], [0], [0], [1], [0, 0, 1, 1], [], []>} : vector<5x8xf32>, vector<8x32xf32>, vector<5x32xf32> -> vector<5x32xf32>
    %908 = arith.addf %881, %907 : vector<5x32xf32>
    %909 = vector.broadcast %782 : vector<1x32xf32> to vector<5x32xf32>
    %910 = arith.addf %908, %909 : vector<5x32xf32>
    %911 = arith.addf %910, %774 : vector<5x32xf32>
    %cst_449 = arith.constant dense<0.000000e+00> : vector<5xf32>
    %912 = vector.multi_reduction <add>, %911, %cst_449 [1] : vector<5x32xf32> to vector<5xf32>
    %913 = vector.shape_cast %912 : vector<5xf32> to vector<5x1xf32>
    %cst_450 = arith.constant 3.200000e+01 : f32
    %914 = vector.broadcast %cst_450 : f32 to vector<5x1xf32>
    %915 = arith.divf %913, %914 : vector<5x1xf32>
    %916 = vector.broadcast %915 : vector<5x1xf32> to vector<5x32xf32>
    %917 = arith.subf %911, %916 : vector<5x32xf32>
    %918 = arith.mulf %917, %917 : vector<5x32xf32>
    %cst_451 = arith.constant dense<0.000000e+00> : vector<5xf32>
    %919 = vector.multi_reduction <add>, %918, %cst_451 [1] : vector<5x32xf32> to vector<5xf32>
    %920 = vector.shape_cast %919 : vector<5xf32> to vector<5x1xf32>
    %cst_452 = arith.constant 3.200000e+01 : f32
    %921 = vector.broadcast %cst_452 : f32 to vector<5x1xf32>
    %922 = arith.divf %920, %921 : vector<5x1xf32>
    %923 = vector.broadcast %915 : vector<5x1xf32> to vector<5x32xf32>
    %924 = arith.subf %911, %923 : vector<5x32xf32>
    %cst_453 = arith.constant 9.99999974E-6 : f32
    %925 = vector.broadcast %cst_453 : f32 to vector<5x1xf32>
    %926 = arith.addf %922, %925 : vector<5x1xf32>
    %927 = math.rsqrt %926 : vector<5x1xf32>
    %928 = vector.broadcast %927 : vector<5x1xf32> to vector<5x32xf32>
    %929 = arith.mulf %924, %928 : vector<5x32xf32>
    %930 = vector.broadcast %784 : vector<1x32xf32> to vector<5x32xf32>
    %931 = arith.mulf %929, %930 : vector<5x32xf32>
    %932 = vector.broadcast %786 : vector<1x32xf32> to vector<5x32xf32>
    %933 = arith.addf %931, %932 : vector<5x32xf32>
    %c1_454 = arith.constant 1 : index
    %c0_455 = arith.constant 0 : index
    %c0_456 = arith.constant 0 : index
    %934 = vector.load %arg24[%c1_454, %c0_455, %c0_456] : memref<2x32x96xf32, #tpu.memory_space<vmem>>, vector<1x32x96xf32>
    %935 = vector.shape_cast %934 : vector<1x32x96xf32> to vector<32x96xf32>
    %c1_457 = arith.constant 1 : index
    %c0_458 = arith.constant 0 : index
    %c0_459 = arith.constant 0 : index
    %936 = vector.load %arg25[%c1_457, %c0_458, %c0_459] : memref<2x1x96xf32, #tpu.memory_space<vmem>>, vector<1x1x96xf32>
    %937 = vector.shape_cast %936 : vector<1x1x96xf32> to vector<1x96xf32>
    %c1_460 = arith.constant 1 : index
    %c0_461 = arith.constant 0 : index
    %c0_462 = arith.constant 0 : index
    %938 = vector.load %arg26[%c1_460, %c0_461, %c0_462] : memref<2x32x32xf32, #tpu.memory_space<vmem>>, vector<1x32x32xf32>
    %939 = vector.shape_cast %938 : vector<1x32x32xf32> to vector<32x32xf32>
    %c1_463 = arith.constant 1 : index
    %c0_464 = arith.constant 0 : index
    %c0_465 = arith.constant 0 : index
    %940 = vector.load %arg27[%c1_463, %c0_464, %c0_465] : memref<2x1x32xf32, #tpu.memory_space<vmem>>, vector<1x1x32xf32>
    %941 = vector.shape_cast %940 : vector<1x1x32xf32> to vector<1x32xf32>
    %c1_466 = arith.constant 1 : index
    %c0_467 = arith.constant 0 : index
    %c0_468 = arith.constant 0 : index
    %942 = vector.load %arg28[%c1_466, %c0_467, %c0_468] : memref<2x1x32xf32, #tpu.memory_space<vmem>>, vector<1x1x32xf32>
    %943 = vector.shape_cast %942 : vector<1x1x32xf32> to vector<1x32xf32>
    %c1_469 = arith.constant 1 : index
    %c0_470 = arith.constant 0 : index
    %c0_471 = arith.constant 0 : index
    %944 = vector.load %arg29[%c1_469, %c0_470, %c0_471] : memref<2x1x32xf32, #tpu.memory_space<vmem>>, vector<1x1x32xf32>
    %945 = vector.shape_cast %944 : vector<1x1x32xf32> to vector<1x32xf32>
    %946 = vector.extract_strided_slice %935 {offsets = [0, 0], sizes = [32, 32], strides = [1, 1]} : vector<32x96xf32> to vector<32x32xf32>
    %cst_472 = arith.constant dense<0.000000e+00> : vector<5x32xf32>
    %947 = tpu.matmul %933, %946, %cst_472 {dimension_numbers = #tpu.dot_dimension_numbers<[1], [0], [0], [1], [0, 0, 1, 1], [], []>} : vector<5x32xf32>, vector<32x32xf32>, vector<5x32xf32> -> vector<5x32xf32>
    %948 = vector.extract_strided_slice %937 {offsets = [0, 0], sizes = [1, 32], strides = [1, 1]} : vector<1x96xf32> to vector<1x32xf32>
    %949 = vector.broadcast %948 : vector<1x32xf32> to vector<5x32xf32>
    %950 = arith.addf %947, %949 : vector<5x32xf32>
    %951 = vector.extract_strided_slice %935 {offsets = [0, 32], sizes = [32, 32], strides = [1, 1]} : vector<32x96xf32> to vector<32x32xf32>
    %cst_473 = arith.constant dense<0.000000e+00> : vector<5x32xf32>
    %952 = tpu.matmul %407, %951, %cst_473 {dimension_numbers = #tpu.dot_dimension_numbers<[1], [0], [0], [1], [0, 0, 1, 1], [], []>} : vector<5x32xf32>, vector<32x32xf32>, vector<5x32xf32> -> vector<5x32xf32>
    %953 = vector.extract_strided_slice %937 {offsets = [0, 32], sizes = [1, 32], strides = [1, 1]} : vector<1x96xf32> to vector<1x32xf32>
    %954 = vector.broadcast %953 : vector<1x32xf32> to vector<5x32xf32>
    %955 = arith.addf %952, %954 : vector<5x32xf32>
    %956 = vector.extract_strided_slice %935 {offsets = [0, 64], sizes = [32, 32], strides = [1, 1]} : vector<32x96xf32> to vector<32x32xf32>
    %cst_474 = arith.constant dense<0.000000e+00> : vector<5x32xf32>
    %957 = tpu.matmul %407, %956, %cst_474 {dimension_numbers = #tpu.dot_dimension_numbers<[1], [0], [0], [1], [0, 0, 1, 1], [], []>} : vector<5x32xf32>, vector<32x32xf32>, vector<5x32xf32> -> vector<5x32xf32>
    %958 = vector.extract_strided_slice %937 {offsets = [0, 64], sizes = [1, 32], strides = [1, 1]} : vector<1x96xf32> to vector<1x32xf32>
    %959 = vector.broadcast %958 : vector<1x32xf32> to vector<5x32xf32>
    %960 = arith.addf %957, %959 : vector<5x32xf32>
    %961 = vector.extract_strided_slice %950 {offsets = [0, 0], sizes = [5, 8], strides = [1, 1]} : vector<5x32xf32> to vector<5x8xf32>
    %962 = vector.extract_strided_slice %955 {offsets = [0, 0], sizes = [5, 8], strides = [1, 1]} : vector<5x32xf32> to vector<5x8xf32>
    %963 = vector.extract_strided_slice %960 {offsets = [0, 0], sizes = [5, 8], strides = [1, 1]} : vector<5x32xf32> to vector<5x8xf32>
    %964 = tpu.transpose %962, [1, 0] : vector<5x8xf32> -> vector<8x5xf32>
    %cst_475 = arith.constant dense<0.000000e+00> : vector<5x5xf32>
    %965 = tpu.matmul %961, %964, %cst_475 {dimension_numbers = #tpu.dot_dimension_numbers<[1], [0], [0], [1], [0, 0, 1, 1], [], []>} : vector<5x8xf32>, vector<8x5xf32>, vector<5x5xf32> -> vector<5x5xf32>
    %cst_476 = arith.constant 0.353553385 : f32
    %966 = vector.broadcast %cst_476 : f32 to vector<5x5xf32>
    %967 = arith.mulf %965, %966 : vector<5x5xf32>
    %cst_477 = arith.constant 5.000000e-01 : f32
    %968 = vector.broadcast %cst_477 : f32 to vector<5x5xf32>
    %969 = arith.cmpf ogt, %413, %968 : vector<5x5xf32>
    %cst_478 = arith.constant -1.000000e+09 : f32
    %970 = vector.broadcast %cst_478 : f32 to vector<5x5xf32>
    %971 = arith.select %969, %970, %967 : vector<5x5xi1>, vector<5x5xf32>
    %cst_479 = arith.constant dense<0xFF800000> : vector<5xf32>
    %972 = vector.multi_reduction <maximumf>, %971, %cst_479 [1] : vector<5x5xf32> to vector<5xf32>
    %973 = vector.shape_cast %972 : vector<5xf32> to vector<5x1xf32>
    %974 = vector.broadcast %973 : vector<5x1xf32> to vector<5x5xf32>
    %975 = arith.subf %971, %974 : vector<5x5xf32>
    %976 = math.exp %975 : vector<5x5xf32>
    %cst_480 = arith.constant dense<0.000000e+00> : vector<5xf32>
    %977 = vector.multi_reduction <add>, %976, %cst_480 [1] : vector<5x5xf32> to vector<5xf32>
    %978 = vector.shape_cast %977 : vector<5xf32> to vector<5x1xf32>
    %979 = vector.broadcast %978 : vector<5x1xf32> to vector<5x5xf32>
    %980 = arith.divf %976, %979 : vector<5x5xf32>
    %c0_481 = arith.constant 0 : index
    %c4_482 = arith.constant 4 : index
    %c0_483 = arith.constant 0 : index
    %c0_484 = arith.constant 0 : index
    %981 = vector.load %arg40[%c0_481, %c4_482, %c0_483, %c0_484] : memref<1x8x5x5xf32, #tpu.memory_space<vmem>>, vector<1x1x5x5xf32>
    %982 = vector.shape_cast %981 : vector<1x1x5x5xf32> to vector<5x5xf32>
    %983 = vector.shape_cast %980 : vector<5x5xf32> to vector<1x1x5x5xf32>
    tpu.vector_store %arg40[%c0_481, %c4_482, %c0_483, %c0_484], %983 {strides = array<i32>} : memref<1x8x5x5xf32, #tpu.memory_space<vmem>>, vector<1x1x5x5xf32>,
    %cst_485 = arith.constant dense<0.000000e+00> : vector<5x8xf32>
    %984 = tpu.matmul %980, %963, %cst_485 {dimension_numbers = #tpu.dot_dimension_numbers<[1], [0], [0], [1], [0, 0, 1, 1], [], []>} : vector<5x5xf32>, vector<5x8xf32>, vector<5x8xf32> -> vector<5x8xf32>
    %985 = vector.extract_strided_slice %939 {offsets = [0, 0], sizes = [8, 32], strides = [1, 1]} : vector<32x32xf32> to vector<8x32xf32>
    %cst_486 = arith.constant dense<0.000000e+00> : vector<5x32xf32>
    %986 = tpu.matmul %984, %985, %cst_486 {dimension_numbers = #tpu.dot_dimension_numbers<[1], [0], [0], [1], [0, 0, 1, 1], [], []>} : vector<5x8xf32>, vector<8x32xf32>, vector<5x32xf32> -> vector<5x32xf32>
    %987 = vector.extract_strided_slice %950 {offsets = [0, 8], sizes = [5, 8], strides = [1, 1]} : vector<5x32xf32> to vector<5x8xf32>
    %988 = vector.extract_strided_slice %955 {offsets = [0, 8], sizes = [5, 8], strides = [1, 1]} : vector<5x32xf32> to vector<5x8xf32>
    %989 = vector.extract_strided_slice %960 {offsets = [0, 8], sizes = [5, 8], strides = [1, 1]} : vector<5x32xf32> to vector<5x8xf32>
    %990 = tpu.transpose %988, [1, 0] : vector<5x8xf32> -> vector<8x5xf32>
    %cst_487 = arith.constant dense<0.000000e+00> : vector<5x5xf32>
    %991 = tpu.matmul %987, %990, %cst_487 {dimension_numbers = #tpu.dot_dimension_numbers<[1], [0], [0], [1], [0, 0, 1, 1], [], []>} : vector<5x8xf32>, vector<8x5xf32>, vector<5x5xf32> -> vector<5x5xf32>
    %cst_488 = arith.constant 0.353553385 : f32
    %992 = vector.broadcast %cst_488 : f32 to vector<5x5xf32>
    %993 = arith.mulf %991, %992 : vector<5x5xf32>
    %cst_489 = arith.constant 5.000000e-01 : f32
    %994 = vector.broadcast %cst_489 : f32 to vector<5x5xf32>
    %995 = arith.cmpf ogt, %413, %994 : vector<5x5xf32>
    %cst_490 = arith.constant -1.000000e+09 : f32
    %996 = vector.broadcast %cst_490 : f32 to vector<5x5xf32>
    %997 = arith.select %995, %996, %993 : vector<5x5xi1>, vector<5x5xf32>
    %cst_491 = arith.constant dense<0xFF800000> : vector<5xf32>
    %998 = vector.multi_reduction <maximumf>, %997, %cst_491 [1] : vector<5x5xf32> to vector<5xf32>
    %999 = vector.shape_cast %998 : vector<5xf32> to vector<5x1xf32>
    %1000 = vector.broadcast %999 : vector<5x1xf32> to vector<5x5xf32>
    %1001 = arith.subf %997, %1000 : vector<5x5xf32>
    %1002 = math.exp %1001 : vector<5x5xf32>
    %cst_492 = arith.constant dense<0.000000e+00> : vector<5xf32>
    %1003 = vector.multi_reduction <add>, %1002, %cst_492 [1] : vector<5x5xf32> to vector<5xf32>
    %1004 = vector.shape_cast %1003 : vector<5xf32> to vector<5x1xf32>
    %1005 = vector.broadcast %1004 : vector<5x1xf32> to vector<5x5xf32>
    %1006 = arith.divf %1002, %1005 : vector<5x5xf32>
    %c0_493 = arith.constant 0 : index
    %c5_494 = arith.constant 5 : index
    %c0_495 = arith.constant 0 : index
    %c0_496 = arith.constant 0 : index
    %1007 = vector.load %arg40[%c0_493, %c5_494, %c0_495, %c0_496] : memref<1x8x5x5xf32, #tpu.memory_space<vmem>>, vector<1x1x5x5xf32>
    %1008 = vector.shape_cast %1007 : vector<1x1x5x5xf32> to vector<5x5xf32>
    %1009 = vector.shape_cast %1006 : vector<5x5xf32> to vector<1x1x5x5xf32>
    tpu.vector_store %arg40[%c0_493, %c5_494, %c0_495, %c0_496], %1009 {strides = array<i32>} : memref<1x8x5x5xf32, #tpu.memory_space<vmem>>, vector<1x1x5x5xf32>,
    %cst_497 = arith.constant dense<0.000000e+00> : vector<5x8xf32>
    %1010 = tpu.matmul %1006, %989, %cst_497 {dimension_numbers = #tpu.dot_dimension_numbers<[1], [0], [0], [1], [0, 0, 1, 1], [], []>} : vector<5x5xf32>, vector<5x8xf32>, vector<5x8xf32> -> vector<5x8xf32>
    %1011 = vector.extract_strided_slice %939 {offsets = [8, 0], sizes = [8, 32], strides = [1, 1]} : vector<32x32xf32> to vector<8x32xf32>
    %cst_498 = arith.constant dense<0.000000e+00> : vector<5x32xf32>
    %1012 = tpu.matmul %1010, %1011, %cst_498 {dimension_numbers = #tpu.dot_dimension_numbers<[1], [0], [0], [1], [0, 0, 1, 1], [], []>} : vector<5x8xf32>, vector<8x32xf32>, vector<5x32xf32> -> vector<5x32xf32>
    %1013 = arith.addf %986, %1012 : vector<5x32xf32>
    %1014 = vector.extract_strided_slice %950 {offsets = [0, 16], sizes = [5, 8], strides = [1, 1]} : vector<5x32xf32> to vector<5x8xf32>
    %1015 = vector.extract_strided_slice %955 {offsets = [0, 16], sizes = [5, 8], strides = [1, 1]} : vector<5x32xf32> to vector<5x8xf32>
    %1016 = vector.extract_strided_slice %960 {offsets = [0, 16], sizes = [5, 8], strides = [1, 1]} : vector<5x32xf32> to vector<5x8xf32>
    %1017 = tpu.transpose %1015, [1, 0] : vector<5x8xf32> -> vector<8x5xf32>
    %cst_499 = arith.constant dense<0.000000e+00> : vector<5x5xf32>
    %1018 = tpu.matmul %1014, %1017, %cst_499 {dimension_numbers = #tpu.dot_dimension_numbers<[1], [0], [0], [1], [0, 0, 1, 1], [], []>} : vector<5x8xf32>, vector<8x5xf32>, vector<5x5xf32> -> vector<5x5xf32>
    %cst_500 = arith.constant 0.353553385 : f32
    %1019 = vector.broadcast %cst_500 : f32 to vector<5x5xf32>
    %1020 = arith.mulf %1018, %1019 : vector<5x5xf32>
    %cst_501 = arith.constant 5.000000e-01 : f32
    %1021 = vector.broadcast %cst_501 : f32 to vector<5x5xf32>
    %1022 = arith.cmpf ogt, %413, %1021 : vector<5x5xf32>
    %cst_502 = arith.constant -1.000000e+09 : f32
    %1023 = vector.broadcast %cst_502 : f32 to vector<5x5xf32>
    %1024 = arith.select %1022, %1023, %1020 : vector<5x5xi1>, vector<5x5xf32>
    %cst_503 = arith.constant dense<0xFF800000> : vector<5xf32>
    %1025 = vector.multi_reduction <maximumf>, %1024, %cst_503 [1] : vector<5x5xf32> to vector<5xf32>
    %1026 = vector.shape_cast %1025 : vector<5xf32> to vector<5x1xf32>
    %1027 = vector.broadcast %1026 : vector<5x1xf32> to vector<5x5xf32>
    %1028 = arith.subf %1024, %1027 : vector<5x5xf32>
    %1029 = math.exp %1028 : vector<5x5xf32>
    %cst_504 = arith.constant dense<0.000000e+00> : vector<5xf32>
    %1030 = vector.multi_reduction <add>, %1029, %cst_504 [1] : vector<5x5xf32> to vector<5xf32>
    %1031 = vector.shape_cast %1030 : vector<5xf32> to vector<5x1xf32>
    %1032 = vector.broadcast %1031 : vector<5x1xf32> to vector<5x5xf32>
    %1033 = arith.divf %1029, %1032 : vector<5x5xf32>
    %c0_505 = arith.constant 0 : index
    %c6_506 = arith.constant 6 : index
    %c0_507 = arith.constant 0 : index
    %c0_508 = arith.constant 0 : index
    %1034 = vector.load %arg40[%c0_505, %c6_506, %c0_507, %c0_508] : memref<1x8x5x5xf32, #tpu.memory_space<vmem>>, vector<1x1x5x5xf32>
    %1035 = vector.shape_cast %1034 : vector<1x1x5x5xf32> to vector<5x5xf32>
    %1036 = vector.shape_cast %1033 : vector<5x5xf32> to vector<1x1x5x5xf32>
    tpu.vector_store %arg40[%c0_505, %c6_506, %c0_507, %c0_508], %1036 {strides = array<i32>} : memref<1x8x5x5xf32, #tpu.memory_space<vmem>>, vector<1x1x5x5xf32>,
    %cst_509 = arith.constant dense<0.000000e+00> : vector<5x8xf32>
    %1037 = tpu.matmul %1033, %1016, %cst_509 {dimension_numbers = #tpu.dot_dimension_numbers<[1], [0], [0], [1], [0, 0, 1, 1], [], []>} : vector<5x5xf32>, vector<5x8xf32>, vector<5x8xf32> -> vector<5x8xf32>
    %1038 = vector.extract_strided_slice %939 {offsets = [16, 0], sizes = [8, 32], strides = [1, 1]} : vector<32x32xf32> to vector<8x32xf32>
    %cst_510 = arith.constant dense<0.000000e+00> : vector<5x32xf32>
    %1039 = tpu.matmul %1037, %1038, %cst_510 {dimension_numbers = #tpu.dot_dimension_numbers<[1], [0], [0], [1], [0, 0, 1, 1], [], []>} : vector<5x8xf32>, vector<8x32xf32>, vector<5x32xf32> -> vector<5x32xf32>
    %1040 = arith.addf %1013, %1039 : vector<5x32xf32>
    %1041 = vector.extract_strided_slice %950 {offsets = [0, 24], sizes = [5, 8], strides = [1, 1]} : vector<5x32xf32> to vector<5x8xf32>
    %1042 = vector.extract_strided_slice %955 {offsets = [0, 24], sizes = [5, 8], strides = [1, 1]} : vector<5x32xf32> to vector<5x8xf32>
    %1043 = vector.extract_strided_slice %960 {offsets = [0, 24], sizes = [5, 8], strides = [1, 1]} : vector<5x32xf32> to vector<5x8xf32>
    %1044 = tpu.transpose %1042, [1, 0] : vector<5x8xf32> -> vector<8x5xf32>
    %cst_511 = arith.constant dense<0.000000e+00> : vector<5x5xf32>
    %1045 = tpu.matmul %1041, %1044, %cst_511 {dimension_numbers = #tpu.dot_dimension_numbers<[1], [0], [0], [1], [0, 0, 1, 1], [], []>} : vector<5x8xf32>, vector<8x5xf32>, vector<5x5xf32> -> vector<5x5xf32>
    %cst_512 = arith.constant 0.353553385 : f32
    %1046 = vector.broadcast %cst_512 : f32 to vector<5x5xf32>
    %1047 = arith.mulf %1045, %1046 : vector<5x5xf32>
    %cst_513 = arith.constant 5.000000e-01 : f32
    %1048 = vector.broadcast %cst_513 : f32 to vector<5x5xf32>
    %1049 = arith.cmpf ogt, %413, %1048 : vector<5x5xf32>
    %cst_514 = arith.constant -1.000000e+09 : f32
    %1050 = vector.broadcast %cst_514 : f32 to vector<5x5xf32>
    %1051 = arith.select %1049, %1050, %1047 : vector<5x5xi1>, vector<5x5xf32>
    %cst_515 = arith.constant dense<0xFF800000> : vector<5xf32>
    %1052 = vector.multi_reduction <maximumf>, %1051, %cst_515 [1] : vector<5x5xf32> to vector<5xf32>
    %1053 = vector.shape_cast %1052 : vector<5xf32> to vector<5x1xf32>
    %1054 = vector.broadcast %1053 : vector<5x1xf32> to vector<5x5xf32>
    %1055 = arith.subf %1051, %1054 : vector<5x5xf32>
    %1056 = math.exp %1055 : vector<5x5xf32>
    %cst_516 = arith.constant dense<0.000000e+00> : vector<5xf32>
    %1057 = vector.multi_reduction <add>, %1056, %cst_516 [1] : vector<5x5xf32> to vector<5xf32>
    %1058 = vector.shape_cast %1057 : vector<5xf32> to vector<5x1xf32>
    %1059 = vector.broadcast %1058 : vector<5x1xf32> to vector<5x5xf32>
    %1060 = arith.divf %1056, %1059 : vector<5x5xf32>
    %c0_517 = arith.constant 0 : index
    %c7_518 = arith.constant 7 : index
    %c0_519 = arith.constant 0 : index
    %c0_520 = arith.constant 0 : index
    %1061 = vector.load %arg40[%c0_517, %c7_518, %c0_519, %c0_520] : memref<1x8x5x5xf32, #tpu.memory_space<vmem>>, vector<1x1x5x5xf32>
    %1062 = vector.shape_cast %1061 : vector<1x1x5x5xf32> to vector<5x5xf32>
    %1063 = vector.shape_cast %1060 : vector<5x5xf32> to vector<1x1x5x5xf32>
    tpu.vector_store %arg40[%c0_517, %c7_518, %c0_519, %c0_520], %1063 {strides = array<i32>} : memref<1x8x5x5xf32, #tpu.memory_space<vmem>>, vector<1x1x5x5xf32>,
    %cst_521 = arith.constant dense<0.000000e+00> : vector<5x8xf32>
    %1064 = tpu.matmul %1060, %1043, %cst_521 {dimension_numbers = #tpu.dot_dimension_numbers<[1], [0], [0], [1], [0, 0, 1, 1], [], []>} : vector<5x5xf32>, vector<5x8xf32>, vector<5x8xf32> -> vector<5x8xf32>
    %1065 = vector.extract_strided_slice %939 {offsets = [24, 0], sizes = [8, 32], strides = [1, 1]} : vector<32x32xf32> to vector<8x32xf32>
    %cst_522 = arith.constant dense<0.000000e+00> : vector<5x32xf32>
    %1066 = tpu.matmul %1064, %1065, %cst_522 {dimension_numbers = #tpu.dot_dimension_numbers<[1], [0], [0], [1], [0, 0, 1, 1], [], []>} : vector<5x8xf32>, vector<8x32xf32>, vector<5x32xf32> -> vector<5x32xf32>
    %1067 = arith.addf %1040, %1066 : vector<5x32xf32>
    %1068 = vector.broadcast %941 : vector<1x32xf32> to vector<5x32xf32>
    %1069 = arith.addf %1067, %1068 : vector<5x32xf32>
    %1070 = arith.addf %1069, %933 : vector<5x32xf32>
    %cst_523 = arith.constant dense<0.000000e+00> : vector<5xf32>
    %1071 = vector.multi_reduction <add>, %1070, %cst_523 [1] : vector<5x32xf32> to vector<5xf32>
    %1072 = vector.shape_cast %1071 : vector<5xf32> to vector<5x1xf32>
    %cst_524 = arith.constant 3.200000e+01 : f32
    %1073 = vector.broadcast %cst_524 : f32 to vector<5x1xf32>
    %1074 = arith.divf %1072, %1073 : vector<5x1xf32>
    %1075 = vector.broadcast %1074 : vector<5x1xf32> to vector<5x32xf32>
    %1076 = arith.subf %1070, %1075 : vector<5x32xf32>
    %1077 = arith.mulf %1076, %1076 : vector<5x32xf32>
    %cst_525 = arith.constant dense<0.000000e+00> : vector<5xf32>
    %1078 = vector.multi_reduction <add>, %1077, %cst_525 [1] : vector<5x32xf32> to vector<5xf32>
    %1079 = vector.shape_cast %1078 : vector<5xf32> to vector<5x1xf32>
    %cst_526 = arith.constant 3.200000e+01 : f32
    %1080 = vector.broadcast %cst_526 : f32 to vector<5x1xf32>
    %1081 = arith.divf %1079, %1080 : vector<5x1xf32>
    %1082 = vector.broadcast %1074 : vector<5x1xf32> to vector<5x32xf32>
    %1083 = arith.subf %1070, %1082 : vector<5x32xf32>
    %cst_527 = arith.constant 9.99999974E-6 : f32
    %1084 = vector.broadcast %cst_527 : f32 to vector<5x1xf32>
    %1085 = arith.addf %1081, %1084 : vector<5x1xf32>
    %1086 = math.rsqrt %1085 : vector<5x1xf32>
    %1087 = vector.broadcast %1086 : vector<5x1xf32> to vector<5x32xf32>
    %1088 = arith.mulf %1083, %1087 : vector<5x32xf32>
    %1089 = vector.broadcast %943 : vector<1x32xf32> to vector<5x32xf32>
    %1090 = arith.mulf %1088, %1089 : vector<5x32xf32>
    %1091 = vector.broadcast %945 : vector<1x32xf32> to vector<5x32xf32>
    %1092 = arith.addf %1090, %1091 : vector<5x32xf32>
    %c1_528 = arith.constant 1 : index
    %c0_529 = arith.constant 0 : index
    %c0_530 = arith.constant 0 : index
    %1093 = vector.load %arg30[%c1_528, %c0_529, %c0_530] : memref<2x32x64xf32, #tpu.memory_space<vmem>>, vector<1x32x64xf32>
    %1094 = vector.shape_cast %1093 : vector<1x32x64xf32> to vector<32x64xf32>
    %c1_531 = arith.constant 1 : index
    %c0_532 = arith.constant 0 : index
    %c0_533 = arith.constant 0 : index
    %1095 = vector.load %arg31[%c1_531, %c0_532, %c0_533] : memref<2x1x64xf32, #tpu.memory_space<vmem>>, vector<1x1x64xf32>
    %1096 = vector.shape_cast %1095 : vector<1x1x64xf32> to vector<1x64xf32>
    %c1_534 = arith.constant 1 : index
    %c0_535 = arith.constant 0 : index
    %c0_536 = arith.constant 0 : index
    %1097 = vector.load %arg32[%c1_534, %c0_535, %c0_536] : memref<2x64x32xf32, #tpu.memory_space<vmem>>, vector<1x64x32xf32>
    %1098 = vector.shape_cast %1097 : vector<1x64x32xf32> to vector<64x32xf32>
    %c1_537 = arith.constant 1 : index
    %c0_538 = arith.constant 0 : index
    %c0_539 = arith.constant 0 : index
    %1099 = vector.load %arg33[%c1_537, %c0_538, %c0_539] : memref<2x1x32xf32, #tpu.memory_space<vmem>>, vector<1x1x32xf32>
    %1100 = vector.shape_cast %1099 : vector<1x1x32xf32> to vector<1x32xf32>
    %c1_540 = arith.constant 1 : index
    %c0_541 = arith.constant 0 : index
    %c0_542 = arith.constant 0 : index
    %1101 = vector.load %arg34[%c1_540, %c0_541, %c0_542] : memref<2x1x32xf32, #tpu.memory_space<vmem>>, vector<1x1x32xf32>
    %1102 = vector.shape_cast %1101 : vector<1x1x32xf32> to vector<1x32xf32>
    %c1_543 = arith.constant 1 : index
    %c0_544 = arith.constant 0 : index
    %c0_545 = arith.constant 0 : index
    %1103 = vector.load %arg35[%c1_543, %c0_544, %c0_545] : memref<2x1x32xf32, #tpu.memory_space<vmem>>, vector<1x1x32xf32>
    %1104 = vector.shape_cast %1103 : vector<1x1x32xf32> to vector<1x32xf32>
    %cst_546 = arith.constant dense<0.000000e+00> : vector<5x64xf32>
    %1105 = tpu.matmul %1092, %1094, %cst_546 {dimension_numbers = #tpu.dot_dimension_numbers<[1], [0], [0], [1], [0, 0, 1, 1], [], []>} : vector<5x32xf32>, vector<32x64xf32>, vector<5x64xf32> -> vector<5x64xf32>
    %1106 = vector.broadcast %1096 : vector<1x64xf32> to vector<5x64xf32>
    %1107 = arith.addf %1105, %1106 : vector<5x64xf32>
    %cst_547 = arith.constant 0.000000e+00 : f32
    %1108 = vector.broadcast %cst_547 : f32 to vector<5x64xf32>
    %1109 = arith.maximumf %1107, %1108 : vector<5x64xf32>
    %cst_548 = arith.constant dense<0.000000e+00> : vector<5x32xf32>
    %1110 = tpu.matmul %1109, %1098, %cst_548 {dimension_numbers = #tpu.dot_dimension_numbers<[1], [0], [0], [1], [0, 0, 1, 1], [], []>} : vector<5x64xf32>, vector<64x32xf32>, vector<5x32xf32> -> vector<5x32xf32>
    %1111 = vector.broadcast %1100 : vector<1x32xf32> to vector<5x32xf32>
    %1112 = arith.addf %1110, %1111 : vector<5x32xf32>
    %1113 = arith.addf %1112, %1092 : vector<5x32xf32>
    %cst_549 = arith.constant dense<0.000000e+00> : vector<5xf32>
    %1114 = vector.multi_reduction <add>, %1113, %cst_549 [1] : vector<5x32xf32> to vector<5xf32>
    %1115 = vector.shape_cast %1114 : vector<5xf32> to vector<5x1xf32>
    %cst_550 = arith.constant 3.200000e+01 : f32
    %1116 = vector.broadcast %cst_550 : f32 to vector<5x1xf32>
    %1117 = arith.divf %1115, %1116 : vector<5x1xf32>
    %1118 = vector.broadcast %1117 : vector<5x1xf32> to vector<5x32xf32>
    %1119 = arith.subf %1113, %1118 : vector<5x32xf32>
    %1120 = arith.mulf %1119, %1119 : vector<5x32xf32>
    %cst_551 = arith.constant dense<0.000000e+00> : vector<5xf32>
    %1121 = vector.multi_reduction <add>, %1120, %cst_551 [1] : vector<5x32xf32> to vector<5xf32>
    %1122 = vector.shape_cast %1121 : vector<5xf32> to vector<5x1xf32>
    %cst_552 = arith.constant 3.200000e+01 : f32
    %1123 = vector.broadcast %cst_552 : f32 to vector<5x1xf32>
    %1124 = arith.divf %1122, %1123 : vector<5x1xf32>
    %1125 = vector.broadcast %1117 : vector<5x1xf32> to vector<5x32xf32>
    %1126 = arith.subf %1113, %1125 : vector<5x32xf32>
    %cst_553 = arith.constant 9.99999974E-6 : f32
    %1127 = vector.broadcast %cst_553 : f32 to vector<5x1xf32>
    %1128 = arith.addf %1124, %1127 : vector<5x1xf32>
    %1129 = math.rsqrt %1128 : vector<5x1xf32>
    %1130 = vector.broadcast %1129 : vector<5x1xf32> to vector<5x32xf32>
    %1131 = arith.mulf %1126, %1130 : vector<5x32xf32>
    %1132 = vector.broadcast %1102 : vector<1x32xf32> to vector<5x32xf32>
    %1133 = arith.mulf %1131, %1132 : vector<5x32xf32>
    %1134 = vector.broadcast %1104 : vector<1x32xf32> to vector<5x32xf32>
    %1135 = arith.addf %1133, %1134 : vector<5x32xf32>
    %c0_554 = arith.constant 0 : index
    %c0_555 = arith.constant 0 : index
    %1136 = vector.load %arg36[%c0_554, %c0_555] : memref<32x128xf32, #tpu.memory_space<vmem>>, vector<32x128xf32>
    %cst_556 = arith.constant dense<0.000000e+00> : vector<5x128xf32>
    %1137 = tpu.matmul %1135, %1136, %cst_556 {dimension_numbers = #tpu.dot_dimension_numbers<[1], [0], [0], [1], [0, 0, 1, 1], [], []>} : vector<5x32xf32>, vector<32x128xf32>, vector<5x128xf32> -> vector<5x128xf32>
    %c0_557 = arith.constant 0 : index
    %c0_558 = arith.constant 0 : index
    %c0_559 = arith.constant 0 : index
    %1138 = vector.load %arg37[%c0_557, %c0_558, %c0_559] : memref<1x5x128xf32, #tpu.memory_space<vmem>>, vector<1x5x128xf32>
    %1139 = vector.shape_cast %1138 : vector<1x5x128xf32> to vector<5x128xf32>
    %1140 = vector.shape_cast %1137 : vector<5x128xf32> to vector<1x5x128xf32>
    tpu.vector_store %arg37[%c0_557, %c0_558, %c0_559], %1140 {strides = array<i32>} : memref<1x5x128xf32, #tpu.memory_space<vmem>>, vector<1x5x128xf32>,
    return
  }
  func.func @transform_0(%arg0: i32) -> (i32, i32, i32) {
    %c0_i32 = arith.constant 0 : i32
    %c0_i32_0 = arith.constant 0 : i32
    %c0_i32_1 = arith.constant 0 : i32
    return %arg0, %c0_i32, %c0_i32_0 : i32, i32, i32
  }
  func.func @transform_1(%arg0: i32) -> (i32, i32, i32) {
    %c0_i32 = arith.constant 0 : i32
    %c0_i32_0 = arith.constant 0 : i32
    %c0_i32_1 = arith.constant 0 : i32
    return %arg0, %c0_i32, %c0_i32_0 : i32, i32, i32
  }
  func.func @transform_2(%arg0: i32) -> (i32, i32, i32) {
    %c0_i32 = arith.constant 0 : i32
    %c0_i32_0 = arith.constant 0 : i32
    %c0_i32_1 = arith.constant 0 : i32
    return %arg0, %c0_i32, %c0_i32_0 : i32, i32, i32
  }
  func.func @transform_3(%arg0: i32) -> (i32, i32, i32) {
    %c0_i32 = arith.constant 0 : i32
    %c0_i32_0 = arith.constant 0 : i32
    %c0_i32_1 = arith.constant 0 : i32
    return %arg0, %c0_i32, %c0_i32_0 : i32, i32, i32
  }
  func.func @transform_4(%arg0: i32) -> (i32, i32, i32) {
    %c0_i32 = arith.constant 0 : i32
    %c0_i32_0 = arith.constant 0 : i32
    %c0_i32_1 = arith.constant 0 : i32
    return %arg0, %c0_i32, %c0_i32_0 : i32, i32, i32
  }
  func.func @transform_5(%arg0: i32) -> (i32, i32, i32) {
    %c0_i32 = arith.constant 0 : i32
    %c0_i32_0 = arith.constant 0 : i32
    %c0_i32_1 = arith.constant 0 : i32
    %c0_i32_2 = arith.constant 0 : i32
    return %c0_i32, %c0_i32_0, %c0_i32_1 : i32, i32, i32
  }
  func.func @transform_6(%arg0: i32) -> (i32, i32, i32) {
    %c0_i32 = arith.constant 0 : i32
    %c0_i32_0 = arith.constant 0 : i32
    %c0_i32_1 = arith.constant 0 : i32
    %c0_i32_2 = arith.constant 0 : i32
    return %c0_i32, %c0_i32_0, %c0_i32_1 : i32, i32, i32
  }
  func.func @transform_7(%arg0: i32) -> (i32, i32, i32) {
    %c0_i32 = arith.constant 0 : i32
    %c0_i32_0 = arith.constant 0 : i32
    %c0_i32_1 = arith.constant 0 : i32
    %c0_i32_2 = arith.constant 0 : i32
    return %c0_i32, %c0_i32_0, %c0_i32_1 : i32, i32, i32
  }
  func.func @transform_8(%arg0: i32) -> (i32, i32, i32) {
    %c0_i32 = arith.constant 0 : i32
    %c0_i32_0 = arith.constant 0 : i32
    %c0_i32_1 = arith.constant 0 : i32
    %c0_i32_2 = arith.constant 0 : i32
    return %c0_i32, %c0_i32_0, %c0_i32_1 : i32, i32, i32
  }
  func.func @transform_9(%arg0: i32) -> (i32, i32, i32) {
    %c0_i32 = arith.constant 0 : i32
    %c0_i32_0 = arith.constant 0 : i32
    %c0_i32_1 = arith.constant 0 : i32
    %c0_i32_2 = arith.constant 0 : i32
    return %c0_i32, %c0_i32_0, %c0_i32_1 : i32, i32, i32
  }
  func.func @transform_10(%arg0: i32) -> (i32, i32, i32) {
    %c0_i32 = arith.constant 0 : i32
    %c0_i32_0 = arith.constant 0 : i32
    %c0_i32_1 = arith.constant 0 : i32
    %c0_i32_2 = arith.constant 0 : i32
    return %c0_i32, %c0_i32_0, %c0_i32_1 : i32, i32, i32
  }
  func.func @transform_11(%arg0: i32) -> (i32, i32, i32) {
    %c0_i32 = arith.constant 0 : i32
    %c0_i32_0 = arith.constant 0 : i32
    %c0_i32_1 = arith.constant 0 : i32
    %c0_i32_2 = arith.constant 0 : i32
    return %c0_i32, %c0_i32_0, %c0_i32_1 : i32, i32, i32
  }
  func.func @transform_12(%arg0: i32) -> (i32, i32, i32) {
    %c0_i32 = arith.constant 0 : i32
    %c0_i32_0 = arith.constant 0 : i32
    %c0_i32_1 = arith.constant 0 : i32
    %c0_i32_2 = arith.constant 0 : i32
    return %c0_i32, %c0_i32_0, %c0_i32_1 : i32, i32, i32
  }
  func.func @transform_13(%arg0: i32) -> (i32, i32, i32) {
    %c0_i32 = arith.constant 0 : i32
    %c0_i32_0 = arith.constant 0 : i32
    %c0_i32_1 = arith.constant 0 : i32
    %c0_i32_2 = arith.constant 0 : i32
    return %c0_i32, %c0_i32_0, %c0_i32_1 : i32, i32, i32
  }
  func.func @transform_14(%arg0: i32) -> (i32, i32, i32) {
    %c0_i32 = arith.constant 0 : i32
    %c0_i32_0 = arith.constant 0 : i32
    %c0_i32_1 = arith.constant 0 : i32
    %c0_i32_2 = arith.constant 0 : i32
    return %c0_i32, %c0_i32_0, %c0_i32_1 : i32, i32, i32
  }
  func.func @transform_15(%arg0: i32) -> (i32, i32, i32) {
    %c0_i32 = arith.constant 0 : i32
    %c0_i32_0 = arith.constant 0 : i32
    %c0_i32_1 = arith.constant 0 : i32
    %c0_i32_2 = arith.constant 0 : i32
    return %c0_i32, %c0_i32_0, %c0_i32_1 : i32, i32, i32
  }
  func.func @transform_16(%arg0: i32) -> (i32, i32, i32) {
    %c0_i32 = arith.constant 0 : i32
    %c0_i32_0 = arith.constant 0 : i32
    %c0_i32_1 = arith.constant 0 : i32
    %c0_i32_2 = arith.constant 0 : i32
    return %c0_i32, %c0_i32_0, %c0_i32_1 : i32, i32, i32
  }
  func.func @transform_17(%arg0: i32) -> (i32, i32, i32) {
    %c0_i32 = arith.constant 0 : i32
    %c0_i32_0 = arith.constant 0 : i32
    %c0_i32_1 = arith.constant 0 : i32
    %c0_i32_2 = arith.constant 0 : i32
    return %c0_i32, %c0_i32_0, %c0_i32_1 : i32, i32, i32
  }
  func.func @transform_18(%arg0: i32) -> (i32, i32, i32) {
    %c0_i32 = arith.constant 0 : i32
    %c0_i32_0 = arith.constant 0 : i32
    %c0_i32_1 = arith.constant 0 : i32
    %c0_i32_2 = arith.constant 0 : i32
    return %c0_i32, %c0_i32_0, %c0_i32_1 : i32, i32, i32
  }
  func.func @transform_19(%arg0: i32) -> (i32, i32, i32) {
    %c0_i32 = arith.constant 0 : i32
    %c0_i32_0 = arith.constant 0 : i32
    %c0_i32_1 = arith.constant 0 : i32
    %c0_i32_2 = arith.constant 0 : i32
    return %c0_i32, %c0_i32_0, %c0_i32_1 : i32, i32, i32
  }
  func.func @transform_20(%arg0: i32) -> (i32, i32, i32) {
    %c0_i32 = arith.constant 0 : i32
    %c0_i32_0 = arith.constant 0 : i32
    %c0_i32_1 = arith.constant 0 : i32
    %c0_i32_2 = arith.constant 0 : i32
    return %c0_i32, %c0_i32_0, %c0_i32_1 : i32, i32, i32
  }
  func.func @transform_21(%arg0: i32) -> (i32, i32, i32) {
    %c0_i32 = arith.constant 0 : i32
    %c0_i32_0 = arith.constant 0 : i32
    %c0_i32_1 = arith.constant 0 : i32
    %c0_i32_2 = arith.constant 0 : i32
    return %c0_i32, %c0_i32_0, %c0_i32_1 : i32, i32, i32
  }
  func.func @transform_22(%arg0: i32) -> (i32, i32, i32) {
    %c0_i32 = arith.constant 0 : i32
    %c0_i32_0 = arith.constant 0 : i32
    %c0_i32_1 = arith.constant 0 : i32
    %c0_i32_2 = arith.constant 0 : i32
    return %c0_i32, %c0_i32_0, %c0_i32_1 : i32, i32, i32
  }
  func.func @transform_23(%arg0: i32) -> (i32, i32, i32) {
    %c0_i32 = arith.constant 0 : i32
    %c0_i32_0 = arith.constant 0 : i32
    %c0_i32_1 = arith.constant 0 : i32
    %c0_i32_2 = arith.constant 0 : i32
    return %c0_i32, %c0_i32_0, %c0_i32_1 : i32, i32, i32
  }
  func.func @transform_24(%arg0: i32) -> (i32, i32, i32) {
    %c0_i32 = arith.constant 0 : i32
    %c0_i32_0 = arith.constant 0 : i32
    %c0_i32_1 = arith.constant 0 : i32
    %c0_i32_2 = arith.constant 0 : i32
    return %c0_i32, %c0_i32_0, %c0_i32_1 : i32, i32, i32
  }
  func.func @transform_25(%arg0: i32) -> (i32, i32, i32) {
    %c0_i32 = arith.constant 0 : i32
    %c0_i32_0 = arith.constant 0 : i32
    %c0_i32_1 = arith.constant 0 : i32
    %c0_i32_2 = arith.constant 0 : i32
    return %c0_i32, %c0_i32_0, %c0_i32_1 : i32, i32, i32
  }
  func.func @transform_26(%arg0: i32) -> (i32, i32, i32) {
    %c0_i32 = arith.constant 0 : i32
    %c0_i32_0 = arith.constant 0 : i32
    %c0_i32_1 = arith.constant 0 : i32
    %c0_i32_2 = arith.constant 0 : i32
    return %c0_i32, %c0_i32_0, %c0_i32_1 : i32, i32, i32
  }
  func.func @transform_27(%arg0: i32) -> (i32, i32, i32) {
    %c0_i32 = arith.constant 0 : i32
    %c0_i32_0 = arith.constant 0 : i32
    %c0_i32_1 = arith.constant 0 : i32
    %c0_i32_2 = arith.constant 0 : i32
    return %c0_i32, %c0_i32_0, %c0_i32_1 : i32, i32, i32
  }
  func.func @transform_28(%arg0: i32) -> (i32, i32, i32) {
    %c0_i32 = arith.constant 0 : i32
    %c0_i32_0 = arith.constant 0 : i32
    %c0_i32_1 = arith.constant 0 : i32
    %c0_i32_2 = arith.constant 0 : i32
    return %c0_i32, %c0_i32_0, %c0_i32_1 : i32, i32, i32
  }
  func.func @transform_29(%arg0: i32) -> (i32, i32, i32) {
    %c0_i32 = arith.constant 0 : i32
    %c0_i32_0 = arith.constant 0 : i32
    %c0_i32_1 = arith.constant 0 : i32
    %c0_i32_2 = arith.constant 0 : i32
    return %c0_i32, %c0_i32_0, %c0_i32_1 : i32, i32, i32
  }
  func.func @transform_30(%arg0: i32) -> (i32, i32, i32) {
    %c0_i32 = arith.constant 0 : i32
    %c0_i32_0 = arith.constant 0 : i32
    %c0_i32_1 = arith.constant 0 : i32
    %c0_i32_2 = arith.constant 0 : i32
    return %c0_i32, %c0_i32_0, %c0_i32_1 : i32, i32, i32
  }
  func.func @transform_31(%arg0: i32) -> (i32, i32, i32) {
    %c0_i32 = arith.constant 0 : i32
    %c0_i32_0 = arith.constant 0 : i32
    %c0_i32_1 = arith.constant 0 : i32
    %c0_i32_2 = arith.constant 0 : i32
    return %c0_i32, %c0_i32_0, %c0_i32_1 : i32, i32, i32
  }
  func.func @transform_32(%arg0: i32) -> (i32, i32, i32) {
    %c0_i32 = arith.constant 0 : i32
    %c0_i32_0 = arith.constant 0 : i32
    %c0_i32_1 = arith.constant 0 : i32
    %c0_i32_2 = arith.constant 0 : i32
    return %c0_i32, %c0_i32_0, %c0_i32_1 : i32, i32, i32
  }
  func.func @transform_33(%arg0: i32) -> (i32, i32, i32) {
    %c0_i32 = arith.constant 0 : i32
    %c0_i32_0 = arith.constant 0 : i32
    %c0_i32_1 = arith.constant 0 : i32
    %c0_i32_2 = arith.constant 0 : i32
    return %c0_i32, %c0_i32_0, %c0_i32_1 : i32, i32, i32
  }
  func.func @transform_34(%arg0: i32) -> (i32, i32, i32) {
    %c0_i32 = arith.constant 0 : i32
    %c0_i32_0 = arith.constant 0 : i32
    %c0_i32_1 = arith.constant 0 : i32
    %c0_i32_2 = arith.constant 0 : i32
    return %c0_i32, %c0_i32_0, %c0_i32_1 : i32, i32, i32
  }
  func.func @transform_35(%arg0: i32) -> (i32, i32) {
    %c0_i32 = arith.constant 0 : i32
    %c0_i32_0 = arith.constant 0 : i32
    %c0_i32_1 = arith.constant 0 : i32
    return %c0_i32, %c0_i32_0 : i32, i32
  }
  func.func @transform_36(%arg0: i32) -> (i32, i32, i32) {
    %c0_i32 = arith.constant 0 : i32
    %c0_i32_0 = arith.constant 0 : i32
    %c0_i32_1 = arith.constant 0 : i32
    return %arg0, %c0_i32, %c0_i32_0 : i32, i32, i32
  }
  func.func @transform_37(%arg0: i32) -> (i32, i32, i32, i32) {
    %c0_i32 = arith.constant 0 : i32
    %c0_i32_0 = arith.constant 0 : i32
    %c0_i32_1 = arith.constant 0 : i32
    %c0_i32_2 = arith.constant 0 : i32
    return %arg0, %c0_i32, %c0_i32_0, %c0_i32_1 : i32, i32, i32, i32
  }
  func.func @transform_38(%arg0: i32) -> (i32, i32, i32, i32) {
    %c0_i32 = arith.constant 0 : i32
    %c0_i32_0 = arith.constant 0 : i32
    %c0_i32_1 = arith.constant 0 : i32
    %c0_i32_2 = arith.constant 0 : i32
    return %arg0, %c0_i32, %c0_i32_0, %c0_i32_1 : i32, i32, i32, i32
  }
  func.func @transform_39(%arg0: i32) -> (i32, i32, i32, i32) {
    %c0_i32 = arith.constant 0 : i32
    %c0_i32_0 = arith.constant 0 : i32
    %c0_i32_1 = arith.constant 0 : i32
    %c0_i32_2 = arith.constant 0 : i32
    return %arg0, %c0_i32, %c0_i32_0, %c0_i32_1 : i32, i32, i32, i32
  }
}

</mosaic_0001>

<bundles_post_ra>
// kernel: transformer_forward.1
= control target key start
LH: loop header
LB: loop body
LE: loop exit
PB: predicated region body
PF: predicated region fallthrough
CT: control target
= control target key end

     0   :  { %s11851_s6 = smov 1   ;;  %s11852_s10 = smov 2   ;;  %s13233_s0 = inlined_call_operand.smem [shape: u32[40], index: -1, kind: input, shape index: {}] }
   0x1   :  { %s11906_s5 = sld [smem:[%s13233_s0]]   ;;  %s11853_s14 = smov 3  }
   0x2   :  { %s11911_s9 = sld [smem:[%s13233_s0 + %s11851_s6]]   ;;  %s11854_s18 = smov 4  }
   0x3   :  { %s11916_s13 = sld [smem:[%s13233_s0 + %s11852_s10]]   ;;  %s11855_s22 = smov 5  }
   0x4   :  { %s11921_s17 = sld [smem:[%s13233_s0 + %s11853_s14]]   ;;  %s11856_s26 = smov 6  }
   0x5   :  { %s11926_s21 = sld [smem:[%s13233_s0 + %s11854_s18]]   ;;  %s11857_s30 = smov 7  }
   0x6   :  { %s11931_s25 = sld [smem:[%s13233_s0 + %s11855_s22]]   ;;  %s11858_s4 = smov 8  }
   0x7   :  { %13272 = sst [smem:[#allocation2_spill]] %s11906_s5  ;;  %s11859_s10 = smov 9  }
   0x8   :  { %13273 = sst [smem:[#allocation3_spill]] %s11911_s9  ;;  %s11860_s15 = smov 10  }
   0x9   :  { %13274 = sst [smem:[#allocation4_spill]] %s11916_s13  ;;  %s11861_s20 = smov 11  }
   0xa   :  { %13275 = sst [smem:[#allocation5_spill]] %s11921_s17  ;;  %s11863_s1 = smov 13  }
   0xb   :  { %13276 = sst [smem:[#allocation6_spill]] %s11926_s21  ;;  %s11864_s7 = smov 14  }
   0xc   :  { %13277 = sst [smem:[#allocation7_spill]] %s11931_s25  ;;  %s11866_s22 = smov 16  }
   0xd   :  { %s11936_s29 = sld [smem:[%s13233_s0 + %s11856_s26]]   ;;  %s11862_s26 = smov 12  }
   0xe   :  { %s11941_s3 = sld [smem:[%s13233_s0 + %s11857_s30]]   ;;  %s11867_s28 = smov 17  }
   0xf   :  { %s11946_s8 = sld [smem:[%s13233_s0 + %s11858_s4]]  }
  0x10   :  { %s11951_s14 = sld [smem:[%s13233_s0 + %s11859_s10]]  }
  0x11   :  { %s11956_s19 = sld [smem:[%s13233_s0 + %s11860_s15]]   ;;  %s11865_s15 = smov 15  }
  0x12   :  { %s11961_s24 = sld [smem:[%s13233_s0 + %s11861_s20]]  }
  0x13   :  { %s11966_s30 = sld [smem:[%s13233_s0 + %s11862_s26]]  }
  0x14   :  { %13278 = sst [smem:[#allocation8_spill]] %s11941_s3 }
  0x15   :  { %13279 = sst [smem:[#allocation9_spill]] %s11946_s8 }
  0x16   :  { %13280 = sst [smem:[#allocation10_spill]] %s11951_s14 }
  0x17   :  { %13281 = sst [smem:[#allocation11_spill]] %s11956_s19 }
  0x18   :  { %13282 = sst [smem:[#allocation12_spill]] %s11961_s24 }
  0x19   :  { %s11971_s6 = sld [smem:[%s13233_s0 + %s11863_s1]]  }
  0x1a   :  { %s11976_s12 = sld [smem:[%s13233_s0 + %s11864_s7]]   ;;  %s11868_s7 = smov 18  }
  0x1b   :  { %s11981_s20 = sld [smem:[%s13233_s0 + %s11865_s15]]   ;;  %s11869_s15 = smov 19  }
  0x1c   :  { %s11986_s27 = sld [smem:[%s13233_s0 + %s11866_s22]]   ;;  %s11870_s22 = smov 20  }
  0x1d   :  { %s11991_s4 = sld [smem:[%s13233_s0 + %s11867_s28]]   ;;  %s11871_s28 = smov 21  }
  0x1e   :  { %s11996_s21 = sld [smem:[%s13233_s0 + %s11868_s7]]   ;;  %s11872_s7 = smov 22  }
  0x1f   :  { %13283 = sst [smem:[#allocation13_spill]] %s11971_s6 }
  0x20   :  { %13284 = sst [smem:[#allocation14_spill]] %s11976_s12 }
  0x21   :  { %13285 = sst [smem:[#allocation15_spill]] %s11981_s20 }
  0x22   :  { %s12001_s17 = sld [smem:[%s13233_s0 + %s11869_s15]]   ;;  %s11873_s15 = smov 23  }
  0x23   :  { %13286 = sst [smem:[#allocation16_spill]] %s11991_s4 }
  0x24   :  { %13287 = sst [smem:[#allocation17_spill]] %s11996_s21 }
  0x25   :  { %s12006_s9 = sld [smem:[%s13233_s0 + %s11870_s22]]   ;;  %s11874_s22 = smov 24  }
  0x26   :  { %s12011_s4 = sld [smem:[%s13233_s0 + %s11871_s28]]   ;;  %s11875_s28 = smov 25  }
  0x27   :  { %s12016_s21 = sld [smem:[%s13233_s0 + %s11872_s7]]   ;;  %s11876_s7 = smov 26  }
  0x28   :  { %13288 = sst [smem:[#allocation18_spill]] %s12001_s17 }
  0x29   :  { %s12021_s17 = sld [smem:[%s13233_s0 + %s11873_s15]]   ;;  %s11877_s15 = smov 27  }
  0x2b   :  { %13289 = sst [smem:[#allocation19_spill]] %s12006_s9 }
  0x2c   :  { %13290 = sst [smem:[#allocation20_spill]] %s12011_s4 }
  0x2d   :  { %13291 = sst [smem:[#allocation21_spill]] %s12016_s21 }
  0x2e   :  { %s12026_s9 = sld [smem:[%s13233_s0 + %s11874_s22]]   ;;  %s11878_s22 = smov 28  }
  0x2f   :  { %13292 = sst [smem:[#allocation22_spill]] %s12021_s17 }
  0x30   :  { %s12031_s4 = sld [smem:[%s13233_s0 + %s11875_s28]]   ;;  %s11879_s28 = smov 29  }
  0x31   :  { %s12036_s21 = sld [smem:[%s13233_s0 + %s11876_s7]]   ;;  %s11880_s7 = smov 30  }
  0x32   :  { %s12041_s17 = sld [smem:[%s13233_s0 + %s11877_s15]]   ;;  %s11881_s15 = smov 31  }
  0x34   :  { %13293 = sst [smem:[#allocation23_spill]] %s12026_s9 }
  0x35   :  { %s12046_s9 = sld [smem:[%s13233_s0 + %s11878_s22]]   ;;  %s11882_s22 = smov 32  }
  0x36   :  { %13294 = sst [smem:[#allocation24_spill]] %s12031_s4 }
  0x37   :  { %13295 = sst [smem:[#allocation25_spill]] %s12036_s21 }
  0x38   :  { %13296 = sst [smem:[#allocation26_spill]] %s12041_s17 }
  0x39   :  { %s12051_s4 = sld [smem:[%s13233_s0 + %s11879_s28]]   ;;  %s11883_s28 = smov 33  }
  0x3a   :  { %s12056_s21 = sld [smem:[%s13233_s0 + %s11880_s7]]   ;;  %s11884_s7 = smov 34  }
  0x3b   :  { %13297 = sst [smem:[#allocation27_spill]] %s12046_s9 }
  0x3c   :  { %s12061_s17 = sld [smem:[%s13233_s0 + %s11881_s15]]   ;;  %s11885_s15 = smov 35  }
  0x3d   :  { %s12066_s9 = sld [smem:[%s13233_s0 + %s11882_s22]]   ;;  %s11886_s22 = smov 36  }
  0x3f   :  { %13298 = sst [smem:[#allocation28_spill]] %s12051_s4 }
  0x40   :  { %13299 = sst [smem:[#allocation29_spill]] %s12056_s21 }
  0x41   :  { %s12071_s4 = sld [smem:[%s13233_s0 + %s11883_s28]]   ;;  %s11887_s28 = smov 37  }
  0x42   :  { %13300 = sst [smem:[#allocation30_spill]] %s12061_s17 }
  0x43   :  { %13301 = sst [smem:[#allocation31_spill]] %s12066_s9 }
  0x44   :  { %s12076_s21 = sld [smem:[%s13233_s0 + %s11884_s7]]   ;;  %s11888_s7 = smov 38  }
  0x45   :  { %s12081_s17 = sld [smem:[%s13233_s0 + %s11885_s15]]   ;;  %s11889_s15 = smov 39  }
  0x46   :  { %s12086_s9 = sld [smem:[%s13233_s0 + %s11886_s22]]   ;;  %s12103_s22 = smov 0  }
  0x47   :  { %13302 = sst [smem:[#allocation32_spill]] %s12071_s4 }
  0x48   :  { %s12091_s4 = sld [smem:[%s13233_s0 + %s11887_s28]]  }
  0x4a   :  { %13303 = sst [smem:[#allocation33_spill]] %s12076_s21 }
  0x4b   :  { %13304 = sst [smem:[#allocation34_spill]] %s12081_s17 }
  0x4c   :  { %s12096_s21 = sld [smem:[%s13233_s0 + %s11888_s7]]  }
  0x4d   :  { %s12101_s17 = sld [smem:[%s13233_s0 + %s11889_s15]]  }
  0x4e   :  { %13305 = sst [smem:[#allocation35_spill]] %s12091_s4 }
  0x52   :  { %13306 = sst [smem:[#allocation36_spill]] %s12096_s21 }
  0x53   :  { %13307 = sst [smem:[#allocation37_spill]] %s12101_s17 }
  0x54 LB: > { %s13308_s25 = sld [smem:[#allocation7_spill]]  ;;  %s13309_s24 = sld [smem:[#allocation12_spill]]  ;;  %s11849_s22 = sphi %s12103_s22, %s90_s22  }
  0x55   : > { %s13310_s20 = sld [smem:[#allocation15_spill]]  ;;  %s13311_s19 = sld [smem:[#allocation11_spill]] }
  0x56   : > { %s13312_s14 = sld [smem:[#allocation10_spill]]  ;;  %s13313_s12 = sld [smem:[#allocation14_spill]] }
  0x57   : > { %s13314_s8 = sld [smem:[#allocation9_spill]]  ;;  %s13315_s6 = sld [smem:[#allocation13_spill]] }
  0x58   : > { %s13316_s3 = sld [smem:[#allocation8_spill]]  ;;  %s10084_s23 = sadd.s32 4294967295, %s11849_s22  }
  0x59   : > { %p10088_p0 = scmp.ge.s32.totalorder %s11849_s22, 1  ;;  %p1119_p1 = scmp.lt.s32.totalorder %s11849_s22, 3 }
  0x5b   : > { %p1120_p2 = pnand %p10088_p0, %p1119_p1 }
  0x5c   : > { %v1285_v0 = vld [vmem:[%s13308_s25] sm:$0xff] (!%p1120_p2)  ;;  %v1286_v1 = vld [vmem:[%s13308_s25 + $0x8] sm:$0xff] (!%p1120_p2)  ;;  %v1287_v2 = vld [vmem:[%s13308_s25 + $0x10] sm:$0xff] (!%p1120_p2)  ;;  %v11890_v5 = vmov (!%p1120_p2), 0.0|0.0   ;;  %s13317_s5 = sld [smem:[#allocation2_spill]] (!%p1120_p2)  ;;  %p1244_p3 = scmp.lt.s32.totalorder (!%p1120_p2), %s10084_s23, 1 }
  0x5d   : > { %1123 = sbr.rel (%p1120_p2) target bundleno = 19989 (0x4e15), region = 164  ;;  %v11607_v3 = vpack.i.bf16 (!%p1120_p2), %v1286_v1, %v1285_v0  ;;  %v1288_v4 = vld [vmem:[%s13308_s25 + $0x18] sm:$0xff] (!%p1120_p2)  ;;  %11372 = vmatprep.subr.bf16.mxu1 (!%p1120_p2), %v11890_v5  ;;  %11366 = vmatprep.subr.bf16.mxu0 (!%p1120_p2), %v11890_v5  ;;  %v11367_v6 = vpack.c.bf16 (!%p1120_p2), %v1286_v1, %v1285_v0  ;;  %v12118_v7 = vld [vmem:[%s11936_s29] ss:$0 sm:$0xff] (!%p1120_p2)  ;;  %vm11891_vm0 = vmmov (!%p1120_p2), 0   ;;  %v11892_v8 = vmov (!%p1120_p2), 0.0  }
  0x5e   : > { %10696 = vmatprep.mubr.msk.f32.mxu1 (!%p1120_p2), %vm11891_vm0, %v11892_v8  ;;  %10685 = vmatprep.mubr.msk.f32.mxu0 (!%p1120_p2), %vm11891_vm0, %v11892_v8  ;;  %s13257_s0 = smov (!%p1120_p2), 96   ;;  %v11612_v9 = vpack.i.bf16 (!%p1120_p2), %v1288_v4, %v1287_v2  ;;  %v11370_v10 = vpack.c.bf16 (!%p1120_p2), %v1288_v4, %v1287_v2  ;;  %s13259_s1 = smov (!%p1120_p2), 64   ;;  %vm1303_vm1 = vcmask (!%p1120_p2), 261120   ;;  %vm1551_vm2 = vcmask (!%p1120_p2), 64512   ;;  %v1291_v1 = vld [vmem:[%s13316_s3 + $0x8] sm:$0xff] (!%p1120_p2) }
  0x5f   : > { %11608 = vrot.lane.b32.xlu0 (!%p1120_p2), %v11607_v3, %s13257_s0  ;;  %11368 = vmatpush3.bf16.msra.mxu0 (!%p1120_p2), %v11367_v6  ;;  %s13262_s2 = smov (!%p1120_p2), 120   ;;  %s13318_s13 = sld [smem:[#allocation4_spill]] (!%p1120_p2)  ;;  %vm1631_vm4 = vcmask (!%p1120_p2), 36864   ;;  %vm1648_vm5 = vcmask (!%p1120_p2), 1044480   ;;  %vm1644_vm6 = vcmask (!%p1120_p2), 39936   ;;  %vm2534_vm7 = vcmask (!%p1120_p2), 258048  }
  0x60   : > { %11369 = vmatprep.subr.bf16.mxu0 (!%p1120_p2), %v11890_v5  ;;  %1393 = vrot.lane.b32.xlu1 (!%p1120_p2), %v12118_v7, %s13257_s0  ;;  %s13255_s10 = smov (!%p1120_p2), 112   ;;  %s13319_s4 = sld [smem:[#allocation35_spill]] (!%p1120_p2)  ;;  %vm2665_vm8 = vcmask (!%p1120_p2), 523264  }
  0x61   : > { %s13253_s16 = smov (!%p1120_p2), 104   ;;  %s13320_s18 = sld [smem:[#allocation16_spill]] (!%p1120_p2) }
  0x62   : > { %s13324_s21 = sld [smem:[#allocation36_spill]] (!%p1120_p2)  ;;  %s13334_s17 = sld [smem:[#allocation37_spill]] (!%p1120_p2) }
  0x63   : > { %11613 = vrot.lane.b32.xlu0 (!%p1120_p2), %v11612_v9, %s13257_s0  ;;  %11371 = vmatpush3.bf16.msra.mxu0 (!%p1120_p2), %v11370_v10 }
  0x64   : > { %s13350_s23 = smov (!%p1244_p3, %s10084_s23), 1  ;;  %11618 = vrot.lane.b32.xlu1 %v11607_v3, %s13259_s1  ;;  %11378 = vmatprep.subr.bf16.mxu0 %v11890_v5 }
  0x65   : > { %s12131_s26 = sshll.u32 %s13350_s23, 3  ;;  %s12205_s11 = sshll.u32 %s13350_s23, 6 }
  0x66   : > { %s1247_s28 = scalar_lea.vmem %s13317_s5, %s12131_s26  ;;  %s1255_s7 = scalar_lea.vmem %s13318_s13, %s12131_s26 }
  0x67   : > { %v12138_v11 = vld [vmem:[%s1247_s28] sm:$0x1f]  ;;  %11623 = vrot.lane.b32.xlu0 %v11612_v9, %s13259_s1  ;;  %s12209_s15 = scalar_lea.vmem %s13319_s4, %s12205_s11  ;;  %s13321_s23 = sld [smem:[#allocation17_spill]] }
  0x68   : > { %10686 = vmatmul.mubr.msk.f32.vlgmr.msra.gmra.mrb[0].mxu0 %vm1303_vm1, %v12138_v11  ;;  %v12180_v39 = vld [vmem:[%s1255_s7] sm:$0x1f]  ;;  %s13322_s28 = sld [smem:[#allocation3_spill]]  ;;  %s13332_s4 = smov 64  }
  0x69   : > { %10707 = vmatprep.mubr.msk.f32.mxu0 %vm11891_vm0, %v11892_v8  ;;  %vm1629_vm3 = vcmp.gt.f32.partialorder %v12180_v39, 0.5  ;;  %s13333_s5 = smov 112   ;;  %s13340_s13 = sld [smem:[#allocation30_spill]] }
  0x6e   : > { %s1251_s7 = scalar_lea.vmem %s13322_s28, %s12131_s26 }
  0xd1   : > { %v11609_v12 = vpop.permute.xlu0 %11608 }
  0xd2   : > { %v11611_v13 = vunpack.i.h.bf16 %v11609_v12  ;;  %v11610_v14 = vunpack.i.l.bf16 %v11609_v12  ;;  %v1394_v20 = vpop.permute.xlu1 %1393 }
  0xd4   : > { %v11373_v15 = vpack.c.bf16 %v11611_v13, %v11610_v14 }
  0xd5   : > { %v11614_v16 = vpop.permute.xlu0 %11613 }
  0xd6   : > { %v11616_v17 = vunpack.i.h.bf16 %v11614_v16  ;;  %v11615_v18 = vunpack.i.l.bf16 %v11614_v16  ;;  %11374 = vmatpush3.bf16.msra.mxu1 %v11373_v15  ;;  %v11619_v21 = vpop.permute.xlu1 %11618 }
  0xd7   : > { %11375 = vmatprep.subr.bf16.mxu1 %v11890_v5  ;;  %v11621_v23 = vunpack.i.h.bf16 %v11619_v21  ;;  %v11620_v24 = vunpack.i.l.bf16 %v11619_v21 }
  0xd8   : > { %v11376_v19 = vpack.c.bf16 %v11616_v17, %v11615_v18 }
  0xd9   : > { %v11624_v22 = vpop.permute.xlu0 %11623  ;;  %v11379_v28 = vpack.c.bf16 %v11621_v23, %v11620_v24 }
  0xda   : > { %11377 = vmatpush3.bf16.msra.mxu1 %v11376_v19  ;;  %v11626_v25 = vunpack.i.h.bf16 %v11624_v22  ;;  %v11625_v26 = vunpack.i.l.bf16 %v11624_v22 }
  0xdb   : > { %10710 = vmatprep.subr.mxu1 %v11892_v8  ;;  %11380 = vmatpush3.bf16.msra.mxu0 %v11379_v28 }
  0xdc   : > { %v11382_v31 = vpack.c.bf16 %v11626_v25, %v11625_v26  ;;  %11381 = vmatprep.subr.bf16.mxu0 %v11890_v5 }
  0xdd   : > { %10697 = vmatmul.mubr.msk.f32.vlgmr.msra.gmra.mrb[0].mxu1 %vm1303_vm1, %v12138_v11 }
  0xde   : > { %10712 = vmatprep.mubr.msk.f32.mxu1 %vm11891_vm0, %v11892_v8 }
  0xdf   : > { %11383 = vmatpush3.bf16.msra.mxu0 %v11382_v31 }
  0xe0   : > { %10720 = vmatprep.subr.mxu0 %v11892_v8 }
  0xe2   : > { %10708 = vmatmul.mubr.msk.f32.vlgmr.msra.gmra.mrb[2].mxu0 %vm1303_vm1, %v12138_v11 }
  0xe3   : > { %10722 = vmatprep.mubr.msk.f32.mxu0 %vm11891_vm0, %v11892_v8 }
 0x13b   : > { %v1373_v27 = vpop.f32.mrb[0].mxu0 }
 0x13c   : > { %v12152_v29 = vadd.f32 %v12118_v7, %v1373_v27  ;;  %v10687_v30 = vpop.f32.mrb[1].mxu0 }
 0x13e   : > { %1722 = vrot.lane.b32.xlu0 %v12152_v29, %s13262_s2 }
 0x1b0   : > { %v1462_v32 = vpop.f32.mrb[0].mxu1  ;;  %v1723_v38 = vpop.permute.xlu0 %1722 }
 0x1b1   : > { %v12162_v33 = vadd.f32 %v1462_v32, %v1394_v20  ;;  %v10698_v34 = vpop.f32.mrb[1].mxu1 }
 0x1b3   : > { %1724 = vrot.lane.b32.xlu1 %v12162_v33, %s13262_s2  ;;  %10711 = vmatpush3.xpose.msk.msra.mxu1 %vm1551_vm2, %v12162_v33 }
 0x1b4   : > { %10715 = vmatprep.subr.mxu1 %v11892_v8 }
 0x1b5   : > { %v1547_v35 = vpop.f32.mrb[2].mxu0 }
 0x1b6   : > { %10713 = vmatmul.mubr.msk.f32.vlgmr.msra.gmra.mrb[2].mxu1 %vm1551_vm2, %v12152_v29  ;;  %v10709_v36 = vpop.f32.mrb[3].mxu0 }
 0x1b7   : > { %10717 = vmatprep.mubr.msk.f32.mxu1 %vm11891_vm0, %v11892_v8 }
 0x225   : > { %v1725_v37 = vpop.permute.xlu1 %1724 }
 0x226   : > { %10721 = vmatpush3.xpose.msk.msra.mxu0 %vm1551_vm2, %v1725_v37  ;;  %v1292_v37 = vld [vmem:[%s13316_s3 + $0x10] sm:$0xff] }
 0x227   : > { %10730 = vmatprep.subr.mxu0 %v11892_v8 }
 0x229   : > { %10723 = vmatmul.mubr.msk.f32.vlgmr.msra.gmra.mrb[4].mxu0 %vm1551_vm2, %v1723_v38 }
 0x22a   : > { %10732 = vmatprep.mubr.msk.f32.mxu0 %vm11891_vm0, %v11892_v8  ;;  %10731 = vmatpush3.msra.mxu0 %v1291_v1 }
 0x22b   : > { %10740 = vmatprep.subr.mxu0 %v11892_v8 }
 0x289   : > { %v1624_v40 = vpop.f32.mrb[2].mxu1 }
 0x28a   : > { %v1628_v41 = vmul.f32 0.35355338, %v1624_v40  ;;  %v10714_v42 = vpop.f32.mrb[3].mxu1 }
 0x28c   : > { %v1630_v43 = vsel %vm1629_vm3, -1e+09, %v1628_v41 }
 0x28d   : > { %v1632_v44 = vsel %vm1631_vm4, %v1630_v43, -inf }
 0x28e   : > { %1633 = vmax.xlane.f32.xlu1 %v1632_v44 }
 0x2fc   : > { %v1796_v45 = vpop.f32.mrb[4].mxu0 }
 0x2fd   : > { %v1800_v46 = vmul.f32 0.35355338, %v1796_v45  ;;  %v10724_v47 = vpop.f32.mrb[5].mxu0 }
 0x2ff   : > { %v1801_v48 = vsel %vm1629_vm3, -1e+09, %v1800_v46 }
 0x300   : > { %v1802_v49 = vsel %vm1631_vm4, %v1801_v48, -inf }
 0x301   : > { %1803 = vmax.xlane.f32.xlu0 %v1802_v49 }
 0x317   : > { %1478 = vrot.lane.b32.xlu0 %v12118_v7, %s13259_s1  ;;  %v1290_v7 = vld [vmem:[%s13316_s3] sm:$0xff] }
 0x31b   : > { %v1634_v50 = vpop.xlane.xlu1 %1633  ;;  %2040 = vrot.lane.b32.xlu0 %v12162_v33, %s13255_s10 }
 0x31c   : > { %v1635_v51 = vsub.f32 %v1630_v43, %v1634_v50 }
 0x31e   : > { %v1636_v52 = vmul.f32 1.442695, %v1635_v51 }
 0x31f   : > { %2038 = vrot.lane.b32.xlu0 %v12152_v29, %s13255_s10 }
 0x320   : > { %11727 = vpow2.f32 %v1636_v52  ;;  %v1293_v52 = vld [vmem:[%s13316_s3 + $0x18] sm:$0xff] }
 0x32a   : > { %v11728_v53 = vpop.eup %11727 }
 0x32b   : > { %v1638_v54 = vsel %vm1631_vm4, %v11728_v53, 0.0 }
 0x32c   : > { %1639 = vadd.xlane.f32.xlu1 %v1638_v54 }
 0x38e   : > { %v1804_v55 = vpop.xlane.xlu0 %1803 }
 0x38f   : > { %v1805_v56 = vsub.f32 %v1801_v48, %v1804_v55 }
 0x391   : > { %v1806_v57 = vmul.f32 1.442695, %v1805_v56 }
 0x392   : > { %v1479_v58 = vpop.permute.xlu0 %1478 }
 0x393   : > { %11729 = vpow2.f32 %v1806_v57  ;;  %v12196_v59 = vadd.f32 %v1547_v35, %v1479_v58 }
 0x395   : > { %10716 = vmatpush3.msk.msra.mxu1 %vm1648_vm5, %v12196_v59 }
 0x396   : > { %10725 = vmatprep.subr.mxu1 %v11892_v8  ;;  %v2041_v12 = vpop.permute.xlu0 %2040 }
 0x39a   : > { %v2039_v15 = vpop.permute.xlu0 %2038 }
 0x39d   : > { %v11730_v60 = vpop.eup %11729 }
 0x39e   : > { %v1808_v61 = vsel %vm1631_vm4, %v11730_v60, 0.0 }
 0x39f   : > { %1809 = vadd.xlane.f32.xlu1 %v1808_v61  ;;  %v10128_v61 = vld [vmem:[%s13314_s8] ss:$0 sm:$0xff] }
 0x3b0   : > { %1815 = vrot.lane.b32.xlu1 %v12196_v59, %s13262_s2 }
 0x3b9   : > { %v1640_v62 = vpop.xlane.xlu1 %1639 }
 0x3ba   : > { %11731 = vrcp.f32 %v1640_v62 }
 0x3c4   : > { %v11732_v63 = vpop.eup %11731 }
 0x3c5   : > { %v1642_v0 = vmul.f32 %v11732_v63, %v11728_v53 }
 0x3c7   : > { %1643 = vst.msk [vmem:[%s12209_s15] sm:$0x1f] %vm1631_vm4, %v1642_v0  ;;  %10718 = vmatmul.mubr.msk.f32.vlgmr.msra.gmra.mrb[4].mxu1 %vm1644_vm6, %v1642_v0 }
 0x3c8   : > { %10727 = vmatprep.mubr.msk.f32.mxu1 %vm11891_vm0, %v11892_v8 }
 0x42c   : > { %v1810_v2 = vpop.xlane.xlu1 %1809 }
 0x42d   : > { %11733 = vrcp.f32 %v1810_v2 }
 0x430   : > { %v1816_v3 = vpop.permute.xlu1 %1815 }
 0x431   : > { %10726 = vmatpush3.msk.msra.mxu1 %vm1648_vm5, %v1816_v3 }
 0x432   : > { %10735 = vmatprep.subr.mxu1 %v11892_v8 }
 0x437   : > { %v11734_v4 = vpop.eup %11733 }
 0x438   : > { %v1812_v6 = vmul.f32 %v11734_v4, %v11730_v60 }
 0x43a   : > { %10111 = vst.msk [vmem:[%s12209_s15 + $0x8] sm:$0x1f] %vm1631_vm4, %v1812_v6  ;;  %10728 = vmatmul.mubr.msk.f32.vlgmr.msra.gmra.mrb[6].mxu1 %vm1644_vm6, %v1812_v6 }
 0x43b   : > { %10736 = vmatpush3.msra.mxu1 %v1290_v7  ;;  %10737 = vmatprep.mubr.msk.f32.mxu1 %vm11891_vm0, %v11892_v8 }
 0x43c   : > { %10745 = vmatprep.subr.mxu1 %v11892_v8 }
 0x49a   : > { %v1718_v9 = vpop.f32.mrb[4].mxu1 }
 0x49b   : > { %v10719_v10 = vpop.f32.mrb[5].mxu1  ;;  %10738 = vmatmul.mubr.msk.f32.vlgmr.msra.gmra.mrb[8].mxu1 %vm1551_vm2, %v1718_v9 }
 0x49c   : > { %10747 = vmatprep.mubr.msk.f32.mxu1 %vm11891_vm0, %v11892_v8 }
 0x50d   : > { %v1888_v13 = vpop.f32.mrb[6].mxu1 }
 0x50e   : > { %v10729_v14 = vpop.f32.mrb[7].mxu1  ;;  %10733 = vmatmul.mubr.msk.f32.vlgmr.msra.gmra.mrb[6].mxu0 %vm1551_vm2, %v1888_v13  ;;  %v2564_v13 = vld [vmem:[%s13309_s24 + $0x8] sm:$0xff] }
 0x50f   : > { %10741 = vmatpush3.xpose.msk.msra.mxu0 %vm1551_vm2, %v2041_v12  ;;  %10742 = vmatprep.mubr.msk.f32.mxu0 %vm11891_vm0, %v11892_v8  ;;  %v2563_v12 = vld [vmem:[%s13309_s24] sm:$0xff] }
 0x510   : > { %10750 = vmatprep.subr.mxu0 %v11892_v8  ;;  %v11385_v14 = vpack.c.bf16 %v2564_v13, %v2563_v12  ;;  %v10136_v13 = vld [vmem:[%s11986_s27] ss:$0 sm:$0xff] }
 0x512   : > { %10743 = vmatmul.mubr.msk.f32.vlgmr.msra.gmra.mrb[8].mxu0 %vm1551_vm2, %v2039_v15  ;;  %v2566_v15 = vld [vmem:[%s13309_s24 + $0x18] sm:$0xff] }
 0x513   : > { %10752 = vmatprep.mubr.msk.f32.mxu0 %vm11891_vm0, %v11892_v8  ;;  %10751 = vmatpush3.msra.mxu0 %v1292_v37 }
 0x514   : > { %10760 = vmatprep.subr.mxu0 %v11892_v8 }
 0x56e   : > { %v2034_v16 = vpop.f32.mrb[8].mxu1 }
 0x56f   : > { %v10739_v17 = vpop.f32.mrb[9].mxu1 }
 0x570   : > { %v2568_v17 = vld [vmem:[%s13315_s6] sm:$0xff] }
 0x5e1   : > { %v1961_v18 = vpop.f32.mrb[6].mxu0 }
 0x5e2   : > { %v12238_v19 = vadd.f32 %v2034_v16, %v1961_v18  ;;  %v10734_v20 = vpop.f32.mrb[7].mxu0  ;;  %v2569_v18 = vld [vmem:[%s13315_s6 + $0x8] sm:$0xff] }
 0x5e3   : > { %v11391_v20 = vpack.c.bf16 %v2569_v18, %v2568_v17 }
 0x5e5   : > { %v2112_v21 = vpop.f32.mrb[8].mxu0 }
 0x5e6   : > { %v2116_v22 = vmul.f32 0.35355338, %v2112_v21  ;;  %v10744_v23 = vpop.f32.mrb[9].mxu0  ;;  %v2571_v21 = vld [vmem:[%s13315_s6 + $0x18] sm:$0xff] }
 0x5e7   : > { %v2572_v23 = vld [vmem:[%s13315_s6 + $0x20] sm:$0xff] }
 0x5e8   : > { %v2117_v24 = vsel %vm1629_vm3, -1e+09, %v2116_v22 }
 0x5e9   : > { %v2118_v25 = vsel %vm1631_vm4, %v2117_v24, -inf }
 0x5ea   : > { %2119 = vmax.xlane.f32.xlu1 %v2118_v25 }
 0x5fb   : > { %2284 = vrot.lane.b32.xlu1 %v12162_v33, %s13253_s16 }
 0x5ff   : > { %2282 = vrot.lane.b32.xlu1 %v12152_v29, %s13253_s16 }
 0x677   : > { %v2120_v26 = vpop.xlane.xlu1 %2119 }
 0x678   : > { %v2121_v27 = vsub.f32 %v2117_v24, %v2120_v26  ;;  %v2573_v24 = vld [vmem:[%s13315_s6 + $0x28] sm:$0xff] }
 0x679   : > { %v11397_v25 = vpack.c.bf16 %v2573_v24, %v2572_v23 }
 0x67a   : > { %v2122_v28 = vmul.f32 1.442695, %v2121_v27 }
 0x67b   : > { %v2285_v33 = vpop.permute.xlu1 %2284 }
 0x67c   : > { %11735 = vpow2.f32 %v2122_v28 }
 0x67f   : > { %v2283_v36 = vpop.permute.xlu1 %2282 }
 0x686   : > { %v11736_v30 = vpop.eup %11735 }
 0x687   : > { %v2124_v31 = vsel %vm1631_vm4, %v11736_v30, 0.0 }
 0x688   : > { %2125 = vadd.xlane.f32.xlu0 %v2124_v31  ;;  %v10129_v31 = vld [vmem:[%s13312_s14] ss:$0 sm:$0xff] }
 0x69e   : > { %2131 = vrot.lane.b32.xlu0 %v12196_v59, %s13255_s10 }
 0x715   : > { %v2126_v32 = vpop.xlane.xlu0 %2125 }
 0x716   : > { %11737 = vrcp.f32 %v2126_v32 }
 0x719   : > { %v2132_v34 = vpop.permute.xlu0 %2131 }
 0x71a   : > { %10746 = vmatpush3.msk.msra.mxu1 %vm1648_vm5, %v2132_v34  ;;  %v10130_v34 = vld [vmem:[%s13311_s19] ss:$0 sm:$0xff] }
 0x71b   : > { %10755 = vmatprep.subr.mxu1 %v11892_v8 }
 0x720   : > { %v11738_v29 = vpop.eup %11737 }
 0x721   : > { %v2128_v35 = vmul.f32 %v11738_v29, %v11736_v30 }
 0x723   : > { %10118 = vst.msk [vmem:[%s12209_s15 + $0x10] sm:$0x1f] %vm1631_vm4, %v2128_v35  ;;  %10748 = vmatmul.mubr.msk.f32.vlgmr.msra.gmra.mrb[10].mxu1 %vm1644_vm6, %v2128_v35  ;;  %v2574_v35 = vld [vmem:[%s13315_s6 + $0x30] sm:$0xff] }
 0x724   : > { %10756 = vmatpush3.xpose.msk.msra.mxu1 %vm1551_vm2, %v2285_v33  ;;  %10757 = vmatprep.mubr.msk.f32.mxu1 %vm11891_vm0, %v11892_v8 }
 0x725   : > { %10765 = vmatprep.subr.mxu1 %v11892_v8 }
 0x727   : > { %10758 = vmatmul.mubr.msk.f32.vlgmr.msra.gmra.mrb[12].mxu1 %vm1551_vm2, %v2283_v36  ;;  %v2575_v36 = vld [vmem:[%s13315_s6 + $0x38] sm:$0xff] }
 0x728   : > { %10767 = vmatprep.mubr.msk.f32.mxu1 %vm11891_vm0, %v11892_v8  ;;  %10766 = vmatpush3.msra.mxu1 %v1293_v52  ;;  %v11400_v37 = vpack.c.bf16 %v2575_v36, %v2574_v35 }
 0x729   : > { %11390 = vmatprep.subr.bf16.mxu1 %v11890_v5 }
 0x7f6   : > { %v2204_v38 = vpop.f32.mrb[10].mxu1 }
 0x7f7   : > { %v10749_v40 = vpop.f32.mrb[11].mxu1  ;;  %10753 = vmatmul.mubr.msk.f32.vlgmr.msra.gmra.mrb[10].mxu0 %vm1551_vm2, %v2204_v38  ;;  %v10131_v38 = vld [vmem:[%s11966_s30] ss:$0 sm:$0xff] }
 0x7f8   : > { %10762 = vmatprep.mubr.msk.f32.mxu0 %vm11891_vm0, %v11892_v8 }
 0x7fa   : > { %v2356_v41 = vpop.f32.mrb[12].mxu1 }
 0x7fb   : > { %v2360_v42 = vmul.f32 0.35355338, %v2356_v41  ;;  %v10759_v43 = vpop.f32.mrb[13].mxu1 }
 0x7fd   : > { %v2361_v44 = vsel %vm1629_vm3, -1e+09, %v2360_v42 }
 0x7fe   : > { %v2362_v45 = vsel %vm1631_vm4, %v2361_v44, -inf }
 0x7ff   : > { %2363 = vmax.xlane.f32.xlu0 %v2362_v45 }
 0x815   : > { %2375 = vrot.lane.b32.xlu0 %v12196_v59, %s13253_s16 }
 0x88c   : > { %v2364_v46 = vpop.xlane.xlu0 %2363 }
 0x88d   : > { %v2365_v47 = vsub.f32 %v2361_v44, %v2364_v46  ;;  %v10133_v44 = vld [vmem:[%s13313_s12] ss:$0 sm:$0xff] }
 0x88f   : > { %v2366_v48 = vmul.f32 1.442695, %v2365_v47 }
 0x890   : > { %v2376_v49 = vpop.permute.xlu0 %2375 }
 0x891   : > { %11739 = vpow2.f32 %v2366_v48  ;;  %10761 = vmatpush3.msk.msra.mxu0 %vm1648_vm5, %v2376_v49 }
 0x892   : > { %11384 = vmatprep.subr.bf16.mxu0 %v11890_v5 }
 0x89b   : > { %v11740_v50 = vpop.eup %11739 }
 0x89c   : > { %v2368_v51 = vsel %vm1631_vm4, %v11740_v50, 0.0 }
 0x89d   : > { %2369 = vadd.xlane.f32.xlu1 %v2368_v51  ;;  %v10140_v51 = vld [vmem:[%s13308_s25 + $0x38] sm:$0xff] }
 0x8ca   : > { %v2277_v53 = vpop.f32.mrb[10].mxu0 }
 0x8cb   : > { %v2281_v54 = vadd.f32 %v2277_v53, %v12238_v19  ;;  %v10754_v55 = vpop.f32.mrb[11].mxu0  ;;  %v2570_v19 = vld [vmem:[%s13315_s6 + $0x10] sm:$0xff] }
 0x8cc   : > { %v11394_v22 = vpack.c.bf16 %v2571_v21, %v2570_v19 }
 0x92a   : > { %v2370_v56 = vpop.xlane.xlu1 %2369 }
 0x92b   : > { %11741 = vrcp.f32 %v2370_v56 }
 0x935   : > { %v11742_v57 = vpop.eup %11741 }
 0x936   : > { %v2372_v58 = vmul.f32 %v11742_v57, %v11740_v50  ;;  %v10139_v50 = vld [vmem:[%s13308_s25 + $0x30] sm:$0xff] }
 0x937   : > { %v11632_v52 = vpack.i.bf16 %v10140_v51, %v10139_v50 }
 0x938   : > { %10124 = vst.msk [vmem:[%s12209_s15 + $0x18] sm:$0x1f] %vm1631_vm4, %v2372_v58  ;;  %10763 = vmatmul.mubr.msk.f32.vlgmr.msra.gmra.mrb[12].mxu0 %vm1644_vm6, %v2372_v58  ;;  %v10137_v58 = vld [vmem:[%s13308_s25 + $0x20] sm:$0xff] }
 0x939   : > { %10778 = vmatprep.mubr.msk.f32.mxu0 %vm11891_vm0, %v11892_v8  ;;  %11386 = vmatpush3.bf16.msra.mxu0 %v11385_v14 }
 0x93a   : > { %11387 = vmatprep.subr.bf16.mxu0 %v11890_v5  ;;  %11633 = vrot.lane.b32.xlu0 %v11632_v52, %s13257_s0 }
 0x9ac   : > { %v11634_v12 = vpop.permute.xlu0 %11633 }
 0xa0b   : > { %v2448_v59 = vpop.f32.mrb[12].mxu0 }
 0xa0c   : > { %v10764_v60 = vpop.f32.mrb[13].mxu0  ;;  %10768 = vmatmul.mubr.msk.f32.vlgmr.msra.gmra.mrb[14].mxu1 %vm1551_vm2, %v2448_v59  ;;  %v10138_v59 = vld [vmem:[%s13308_s25 + $0x28] sm:$0xff]  ;;  %s13347_s25 = sld [smem:[#allocation33_spill]] }
 0xa0d   : > { %10797 = vmatprep.mubr.msk.f32.mxu1 %vm11891_vm0, %v11892_v8  ;;  %11392 = vmatpush3.bf16.msra.mxu1 %v11391_v20  ;;  %v11627_v60 = vpack.i.bf16 %v10138_v59, %v10137_v58 }
 0xa0e   : > { %11393 = vmatprep.subr.bf16.mxu1 %v11890_v5 }
 0xa11   : > { %11395 = vmatpush3.bf16.msra.mxu1 %v11394_v22 }
 0xa12   : > { %11396 = vmatprep.subr.bf16.mxu1 %v11890_v5 }
 0xa15   : > { %11398 = vmatpush3.bf16.msra.mxu1 %v11397_v25 }
 0xa16   : > { %11399 = vmatprep.subr.bf16.mxu1 %v11890_v5 }
 0xa19   : > { %11401 = vmatpush3.bf16.msra.mxu1 %v11400_v37 }
 0xa1a   : > { %11414 = vmatprep.subr.bf16.mxu1 %v11890_v5 }
 0xadf   : > { %v2521_v62 = vpop.f32.mrb[14].mxu1 }
 0xae0   : > { %v2525_v63 = vadd.f32 %v2521_v62, %v2281_v54  ;;  %v10769_v0 = vpop.f32.mrb[15].mxu1  ;;  %v11406_v62 = vpack.c.bf16 %v10140_v51, %v10139_v50 }
 0xae2   : > { %v2532_v1 = vadd.f32 %v10128_v61, %v2525_v63  ;;  %v11403_v61 = vpack.c.bf16 %v10138_v59, %v10137_v58  ;;  %v12329_v63 = vld [vmem:[%s11936_s29 + $0x1] ss:$0 sm:$0xff] }
 0xae3   : > { %2880 = vrot.lane.b32.xlu0 %v12329_v63, %s13257_s0 }
 0xae4   : > { %v2533_v2 = vadd.f32 %v2532_v1, %v12138_v11  ;;  %v2565_v11 = vld [vmem:[%s13309_s24 + $0x10] sm:$0xff] }
 0xae5   : > { %v11388_v16 = vpack.c.bf16 %v2566_v15, %v2565_v11  ;;  %v11636_v15 = vunpack.i.h.bf16 %v11634_v12 }
 0xae6   : > { %v2535_v3 = vsel %vm2534_vm7, %v2533_v2, 0.0 }
 0xae7   : > { %2536 = vadd.xlane.f32.xlu1 %v2535_v3  ;;  %11389 = vmatpush3.bf16.msra.mxu0 %v11388_v16  ;;  %v11635_v16 = vunpack.i.l.bf16 %v11634_v12 }
 0xae8   : > { %11402 = vmatprep.subr.bf16.mxu0 %v11890_v5 }
 0xae9   : > { %v11412_v18 = vpack.c.bf16 %v11636_v15, %v11635_v16 }
 0xb55   : > { %v2881_v21 = vpop.permute.xlu0 %2880 }
 0xb74   : > { %v2537_v4 = vpop.xlane.xlu1 %2536 }
 0xb75   : > { %v2539_v6 = vmul.f32 0.03125, %v2537_v4 }
 0xb77   : > { %v2540_v7 = vsub.f32 %v2533_v2, %v2539_v6 }
 0xb79   : > { %v2541_v9 = vmul.f32 %v2540_v7, %v2540_v7 }
 0xb7b   : > { %v2542_v10 = vsel %vm2534_vm7, %v2541_v9, 0.0  ;;  %v10135_v9 = vld [vmem:[%s13310_s20] ss:$0 sm:$0xff] }
 0xb7c   : > { %2543 = vadd.xlane.f32.xlu1 %v2542_v10 }
 0xc09   : > { %v2544_v26 = vpop.xlane.xlu1 %2543 }
 0xc0a   : > { %v2545_v27 = vmul.f32 0.03125, %v2544_v26 }
 0xc0c   : > { %v2546_v28 = vadd.f32 1e-05, %v2545_v27 }
 0xc0e   : > { %11743 = vrsqrt.f32 %v2546_v28 }
 0xc18   : > { %v11744_v30 = vpop.eup %11743 }
 0xc19   : > { %v2548_v32 = vmul.f32 %v11744_v30, %v2540_v7 }
 0xc1b   : > { %v2555_v29 = vmul.f32 %v10129_v31, %v2548_v32 }
 0xc1d   : > { %v2562_v33 = vadd.f32 %v10130_v34, %v2555_v29 }
 0xc1f   : > { %10779 = vmatmul.mubr.msk.f32.vlgmr.msra.gmra.mrb[14].mxu0 %vm1303_vm1, %v2562_v33 }
 0xc20   : > { %10808 = vmatprep.mubr.msk.f32.mxu0 %vm11891_vm0, %v11892_v8  ;;  %11404 = vmatpush3.bf16.msra.mxu0 %v11403_v61 }
 0xc21   : > { %11405 = vmatprep.subr.bf16.mxu0 %v11890_v5 }
 0xc24   : > { %11407 = vmatpush3.bf16.msra.mxu0 %v11406_v62 }
 0xc25   : > { %11408 = vmatprep.subr.bf16.mxu0 %v11890_v5 }
 0xcf2   : > { %v2654_v40 = vpop.f32.mrb[14].mxu0 }
 0xcf3   : > { %v2655_v41 = vadd.f32 %v10131_v38, %v2654_v40  ;;  %v10780_v42 = vpop.f32.mrb[15].mxu0 }
 0xcf5   : > { %v2658_v43 = vmax.f32 %v2655_v41, 0.0 }
 0xcf7   : > { %10798 = vmatmul.mubr.msk.f32.vlgmr.msra.gmra.mrb[16].mxu1 %vm2665_vm8, %v2658_v43 }
 0xcf8   : > { %10830 = vmatprep.mubr.msk.f32.mxu1 %vm11891_vm0, %v11892_v8 }
 0xdca   : > { %v2735_v45 = vpop.f32.mrb[16].mxu1 }
 0xdcb   : > { %v2736_v46 = vadd.f32 %v10133_v44, %v2735_v45  ;;  %v10799_v47 = vpop.f32.mrb[17].mxu1 }
 0xdcd   : > { %v2739_v48 = vadd.f32 %v2736_v46, %v2562_v33 }
 0xdcf   : > { %v2740_v49 = vsel %vm2534_vm7, %v2739_v48, 0.0 }
 0xdd0   : > { %2741 = vadd.xlane.f32.xlu1 %v2740_v49 }
 0xe5d   : > { %v2742_v53 = vpop.xlane.xlu1 %2741 }
 0xe5e   : > { %v2743_v54 = vmul.f32 0.03125, %v2742_v53 }
 0xe60   : > { %v2744_v55 = vsub.f32 %v2739_v48, %v2743_v54 }
 0xe62   : > { %v2745_v56 = vmul.f32 %v2744_v55, %v2744_v55 }
 0xe64   : > { %v2746_v57 = vsel %vm2534_vm7, %v2745_v56, 0.0 }
 0xe65   : > { %2747 = vadd.xlane.f32.xlu1 %v2746_v57 }
 0xe76   : > { %11628 = vrot.lane.b32.xlu1 %v11627_v60, %s13257_s0 }
 0xe7a   : > { %11643 = vrot.lane.b32.xlu1 %v11632_v52, %s13259_s1 }
 0xef2   : > { %v2748_v0 = vpop.xlane.xlu1 %2747 }
 0xef3   : > { %v2749_v1 = vmul.f32 0.03125, %v2748_v0  ;;  %v10143_v0 = vld [vmem:[%s13316_s3 + $0x28] sm:$0xff] }
 0xef5   : > { %v2750_v2 = vadd.f32 1e-05, %v2749_v1 }
 0xef6   : > { %v11629_v3 = vpop.permute.xlu1 %11628 }
 0xef7   : > { %11745 = vrsqrt.f32 %v2750_v2  ;;  %v11631_v6 = vunpack.i.h.bf16 %v11629_v3  ;;  %v11630_v7 = vunpack.i.l.bf16 %v11629_v3 }
 0xef9   : > { %v11409_v11 = vpack.c.bf16 %v11631_v6, %v11630_v7  ;;  %v10142_v6 = vld [vmem:[%s13316_s3 + $0x20] sm:$0xff] }
 0xefa   : > { %v11644_v28 = vpop.permute.xlu1 %11643 }
 0xefb   : > { %v11646_v34 = vunpack.i.h.bf16 %v11644_v28  ;;  %v11645_v29 = vunpack.i.l.bf16 %v11644_v28 }
 0xefd   : > { %v11418_v35 = vpack.c.bf16 %v11646_v34, %v11645_v29 }
 0xf01   : > { %v11746_v4 = vpop.eup %11745 }
 0xf02   : > { %v2752_v10 = vmul.f32 %v11746_v4, %v2744_v55 }
 0xf04   : > { %v2759_v14 = vmul.f32 %v10135_v9, %v2752_v10 }
 0xf06   : > { %v12335_v17 = vadd.f32 %v10136_v13, %v2759_v14 }
 0xf08   : > { %10809 = vmatmul.mubr.msk.f32.vlgmr.msra.gmra.mrb[16].mxu0 %vm1303_vm1, %v12335_v17 }
 0xf09   : > { %11410 = vmatpush3.bf16.msra.mxu0 %v11409_v11  ;;  %10819 = vmatprep.mubr.msk.f32.mxu0 %vm11891_vm0, %v11892_v8 }
 0xf0a   : > { %11411 = vmatprep.subr.bf16.mxu0 %v11890_v5 }
 0xf0d   : > { %11413 = vmatpush3.bf16.msra.mxu0 %v11412_v18 }
 0xf0e   : > { %10833 = vmatprep.subr.mxu0 %v11892_v8 }
 0xf10   : > { %10820 = vmatmul.mubr.msk.f32.vlgmr.msra.gmra.mrb[18].mxu0 %vm1303_vm1, %v12335_v17 }
 0xf11   : > { %10835 = vmatprep.mubr.msk.f32.mxu0 %vm11891_vm0, %v11892_v8 }
 0xfdb   : > { %v2860_v19 = vpop.f32.mrb[16].mxu0 }
 0xfdc   : > { %v10810_v20 = vpop.f32.mrb[17].mxu0  ;;  %v12355_v25 = vadd.f32 %v12329_v63, %v2860_v19 }
 0xfe3   : > { %v2949_v22 = vpop.f32.mrb[18].mxu0 }
 0xfe4   : > { %v12348_v23 = vadd.f32 %v2949_v22, %v2881_v21  ;;  %v10821_v24 = vpop.f32.mrb[19].mxu0 }
 0xfe6   : > { %3207 = vrot.lane.b32.xlu0 %v12348_v23, %s13262_s2  ;;  %10834 = vmatpush3.xpose.msk.msra.mxu0 %vm1551_vm2, %v12348_v23 }
 0xfe7   : > { %10843 = vmatprep.subr.mxu0 %v11892_v8 }
 0xfe9   : > { %10836 = vmatmul.mubr.msk.f32.vlgmr.msra.gmra.mrb[20].mxu0 %vm1551_vm2, %v12355_v25 }
 0xfea   : > { %3205 = vrot.lane.b32.xlu0 %v12355_v25, %s13262_s2  ;;  %10845 = vmatprep.mubr.msk.f32.mxu0 %vm11891_vm0, %v11892_v8 }
 0xfee   : > { %11638 = vrot.lane.b32.xlu0 %v11627_v60, %s13259_s1 }
0x1058   : > { %v3208_v26 = vpop.permute.xlu0 %3207 }
0x1059   : > { %10844 = vmatpush3.xpose.msk.msra.mxu0 %vm1551_vm2, %v3208_v26 }
0x105a   : > { %10853 = vmatprep.subr.mxu0 %v11892_v8 }
0x105c   : > { %v3206_v27 = vpop.permute.xlu0 %3205 }
0x105d   : > { %10846 = vmatmul.mubr.msk.f32.vlgmr.msra.gmra.mrb[22].mxu0 %vm1551_vm2, %v3206_v27 }
0x105e   : > { %10855 = vmatprep.mubr.msk.f32.mxu0 %vm11891_vm0, %v11892_v8  ;;  %10854 = vmatpush3.msra.mxu0 %v10143_v0 }
0x105f   : > { %10863 = vmatprep.subr.mxu0 %v11892_v8 }
0x1060   : > { %v11639_v30 = vpop.permute.xlu0 %11638 }
0x1061   : > { %v11641_v31 = vunpack.i.h.bf16 %v11639_v30  ;;  %v11640_v32 = vunpack.i.l.bf16 %v11639_v30 }
0x1063   : > { %v11415_v33 = vpack.c.bf16 %v11641_v31, %v11640_v32 }
0x1065   : > { %11416 = vmatpush3.bf16.msra.mxu1 %v11415_v33 }
0x1066   : > { %11417 = vmatprep.subr.bf16.mxu1 %v11890_v5 }
0x1069   : > { %11419 = vmatpush3.bf16.msra.mxu1 %v11418_v35 }
0x106a   : > { %10838 = vmatprep.subr.mxu1 %v11892_v8 }
0x106c   : > { %10831 = vmatmul.mubr.msk.f32.vlgmr.msra.gmra.mrb[18].mxu1 %vm1303_vm1, %v12335_v17 }
0x106d   : > { %10840 = vmatprep.mubr.msk.f32.mxu1 %vm11891_vm0, %v11892_v8 }
0x10bc   : > { %v3110_v36 = vpop.f32.mrb[20].mxu0 }
0x10bd   : > { %v3114_v37 = vmul.f32 0.35355338, %v3110_v36  ;;  %v10837_v38 = vpop.f32.mrb[21].mxu0 }
0x10bf   : > { %v3115_v40 = vsel %vm1629_vm3, -1e+09, %v3114_v37 }
0x10c0   : > { %v3116_v41 = vsel %vm1631_vm4, %v3115_v40, -inf }
0x10c1   : > { %3117 = vmax.xlane.f32.xlu0 %v3116_v41 }
0x10d7   : > { %2965 = vrot.lane.b32.xlu0 %v12329_v63, %s13259_s1 }
0x10db   : > { %3523 = vrot.lane.b32.xlu0 %v12348_v23, %s13255_s10 }
0x10df   : > { %3521 = vrot.lane.b32.xlu0 %v12355_v25, %s13255_s10 }
0x1130   : > { %v3279_v42 = vpop.f32.mrb[22].mxu0 }
0x1131   : > { %v3283_v43 = vmul.f32 0.35355338, %v3279_v42  ;;  %v10847_v44 = vpop.f32.mrb[23].mxu0 }
0x1133   : > { %v3284_v45 = vsel %vm1629_vm3, -1e+09, %v3283_v43 }
0x1134   : > { %v3285_v46 = vsel %vm1631_vm4, %v3284_v45, -inf }
0x1135   : > { %3286 = vmax.xlane.f32.xlu1 %v3285_v46 }
0x113f   : > { %v3034_v47 = vpop.f32.mrb[18].mxu1 }
0x1140   : > { %v10832_v48 = vpop.f32.mrb[19].mxu1 }
0x114e   : > { %v3118_v49 = vpop.xlane.xlu0 %3117 }
0x114f   : > { %v3119_v50 = vsub.f32 %v3115_v40, %v3118_v49 }
0x1151   : > { %v3120_v51 = vmul.f32 1.442695, %v3119_v50  ;;  %v10145_v50 = vld [vmem:[%s13316_s3 + $0x38] sm:$0xff] }
0x1152   : > { %v2966_v52 = vpop.permute.xlu0 %2965 }
0x1153   : > { %11747 = vpow2.f32 %v3120_v51  ;;  %v12388_v53 = vadd.f32 %v3034_v47, %v2966_v52 }
0x1155   : > { %10839 = vmatpush3.msk.msra.mxu1 %vm1648_vm5, %v12388_v53 }
0x1156   : > { %10848 = vmatprep.subr.mxu1 %v11892_v8  ;;  %v3524_v10 = vpop.permute.xlu0 %3523 }
0x115a   : > { %v3522_v14 = vpop.permute.xlu0 %3521 }
0x115d   : > { %v11748_v54 = vpop.eup %11747 }
0x115e   : > { %v3122_v55 = vsel %vm1631_vm4, %v11748_v54, 0.0 }
0x115f   : > { %3123 = vadd.xlane.f32.xlu1 %v3122_v55 }
0x11c2   : > { %v3287_v56 = vpop.xlane.xlu1 %3286 }
0x11c3   : > { %v3288_v57 = vsub.f32 %v3284_v45, %v3287_v56 }
0x11c5   : > { %v3289_v58 = vmul.f32 1.442695, %v3288_v57 }
0x11c7   : > { %11749 = vpow2.f32 %v3289_v58 }
0x11d1   : > { %v11750_v59 = vpop.eup %11749 }
0x11d2   : > { %v3291_v60 = vsel %vm1631_vm4, %v11750_v59, 0.0 }
0x11d3   : > { %3292 = vadd.xlane.f32.xlu1 %v3291_v60 }
0x11e4   : > { %3298 = vrot.lane.b32.xlu1 %v12388_v53, %s13262_s2 }
0x11ec   : > { %v3124_v61 = vpop.xlane.xlu1 %3123 }
0x11ed   : > { %11751 = vrcp.f32 %v3124_v61 }
0x11f7   : > { %v11752_v62 = vpop.eup %11751 }
0x11f8   : > { %v3126_v63 = vmul.f32 %v11752_v62, %v11748_v54 }
0x11fa   : > { %10155 = vst.msk [vmem:[%s12209_s15 + $0x20] sm:$0x1f] %vm1631_vm4, %v3126_v63  ;;  %10841 = vmatmul.mubr.msk.f32.vlgmr.msra.gmra.mrb[20].mxu1 %vm1644_vm6, %v3126_v63 }
0x11fb   : > { %10850 = vmatprep.mubr.msk.f32.mxu1 %vm11891_vm0, %v11892_v8 }
0x1260   : > { %v3293_v1 = vpop.xlane.xlu1 %3292 }
0x1261   : > { %11753 = vrcp.f32 %v3293_v1 }
0x1264   : > { %v3299_v2 = vpop.permute.xlu1 %3298 }
0x1265   : > { %10849 = vmatpush3.msk.msra.mxu1 %vm1648_vm5, %v3299_v2  ;;  %v12473_v2 = vld [vmem:[%s13320_s18 + $0x10] sm:$0xff] }
0x1266   : > { %10858 = vmatprep.subr.mxu1 %v11892_v8 }
0x126b   : > { %v11754_v3 = vpop.eup %11753 }
0x126c   : > { %v3295_v4 = vmul.f32 %v11754_v3, %v11750_v59  ;;  %v10177_v59 = vld [vmem:[%s13314_s8 + $0x1] ss:$0 sm:$0xff]  ;;  %v4259_v3 = vld [vmem:[%s13320_s18 + $0x18] sm:$0xff]  ;;  %s13338_s8 = sld [smem:[#allocation25_spill]] }
0x126e   : > { %10160 = vst.msk [vmem:[%s12209_s15 + $0x28] sm:$0x1f] %vm1631_vm4, %v3295_v4  ;;  %10851 = vmatmul.mubr.msk.f32.vlgmr.msra.gmra.mrb[22].mxu1 %vm1644_vm6, %v3295_v4  ;;  %v12477_v4 = vpack.i.bf16 %v4259_v3, %v12473_v2 }
0x126f   : > { %10859 = vmatpush3.msra.mxu1 %v10142_v6  ;;  %10860 = vmatprep.mubr.msk.f32.mxu1 %vm11891_vm0, %v11892_v8 }
0x1270   : > { %10868 = vmatprep.subr.mxu1 %v11892_v8 }
0x12cd   : > { %v3201_v7 = vpop.f32.mrb[20].mxu1 }
0x12ce   : > { %v10842_v9 = vpop.f32.mrb[21].mxu1  ;;  %10861 = vmatmul.mubr.msk.f32.vlgmr.msra.gmra.mrb[24].mxu1 %vm1551_vm2, %v3201_v7 }
0x12cf   : > { %10870 = vmatprep.mubr.msk.f32.mxu1 %vm11891_vm0, %v11892_v8 }
0x1341   : > { %v3371_v12 = vpop.f32.mrb[22].mxu1 }
0x1342   : > { %v10852_v13 = vpop.f32.mrb[23].mxu1  ;;  %10856 = vmatmul.mubr.msk.f32.vlgmr.msra.gmra.mrb[24].mxu0 %vm1551_vm2, %v3371_v12  ;;  %v4256_v12 = vld [vmem:[%s13320_s18] sm:$0xff] }
0x1343   : > { %10864 = vmatpush3.xpose.msk.msra.mxu0 %vm1551_vm2, %v3524_v10  ;;  %10865 = vmatprep.mubr.msk.f32.mxu0 %vm11891_vm0, %v11892_v8  ;;  %v4257_v13 = vld [vmem:[%s13320_s18 + $0x8] sm:$0xff] }
0x1344   : > { %10873 = vmatprep.subr.mxu0 %v11892_v8 }
0x1346   : > { %10866 = vmatmul.mubr.msk.f32.vlgmr.msra.gmra.mrb[26].mxu0 %vm1551_vm2, %v3522_v14  ;;  %v12484_v14 = vpack.i.bf16 %v4257_v13, %v4256_v12 }
0x1347   : > { %10875 = vmatprep.mubr.msk.f32.mxu0 %vm11891_vm0, %v11892_v8 }
0x13a1   : > { %v3517_v11 = vpop.f32.mrb[24].mxu1 }
0x13a2   : > { %v10862_v15 = vpop.f32.mrb[25].mxu1 }
0x13a3   : > { %v10181_v15 = vld [vmem:[%s13309_s24 + $0x28] sm:$0xff] }
0x1415   : > { %v3444_v16 = vpop.f32.mrb[24].mxu0 }
0x1416   : > { %v3518_v18 = vadd.f32 %v3517_v11, %v3444_v16  ;;  %v10857_v19 = vpop.f32.mrb[25].mxu0  ;;  %v10180_v11 = vld [vmem:[%s13309_s24 + $0x20] sm:$0xff] }
0x1417   : > { %v11421_v16 = vpack.c.bf16 %v10181_v15, %v10180_v11  ;;  %v10183_v19 = vld [vmem:[%s13309_s24 + $0x38] sm:$0xff] }
0x1419   : > { %v3595_v20 = vpop.f32.mrb[26].mxu0 }
0x141a   : > { %v3599_v21 = vmul.f32 0.35355338, %v3595_v20  ;;  %v10867_v22 = vpop.f32.mrb[27].mxu0 }
0x141b   : > { %v10185_v22 = vld [vmem:[%s13315_s6 + $0x40] sm:$0xff] }
0x141c   : > { %v3600_v24 = vsel %vm1629_vm3, -1e+09, %v3599_v21  ;;  %v12495_v21 = vld [vmem:[%s13321_s23] ss:$0 sm:$0xff] }
0x141d   : > { %v3601_v26 = vsel %vm1631_vm4, %v3600_v24, -inf }
0x141e   : > { %3602 = vmax.xlane.f32.xlu0 %v3601_v26 }
0x1434   : > { %3614 = vrot.lane.b32.xlu0 %v12388_v53, %s13255_s10 }
0x1438   : > { %3765 = vrot.lane.b32.xlu0 %v12355_v25, %s13253_s16 }
0x14ab   : > { %v3603_v27 = vpop.xlane.xlu0 %3602 }
0x14ac   : > { %v3604_v28 = vsub.f32 %v3600_v24, %v3603_v27  ;;  %v10186_v24 = vld [vmem:[%s13315_s6 + $0x48] sm:$0xff]  ;;  %v10187_v27 = vld [vmem:[%s13315_s6 + $0x50] sm:$0xff] }
0x14ad   : > { %v11427_v26 = vpack.c.bf16 %v10186_v24, %v10185_v22 }
0x14ae   : > { %v3605_v30 = vmul.f32 1.442695, %v3604_v28  ;;  %v10188_v28 = vld [vmem:[%s13315_s6 + $0x58] sm:$0xff] }
0x14af   : > { %v3615_v31 = vpop.permute.xlu0 %3614 }
0x14b0   : > { %11755 = vpow2.f32 %v3605_v30  ;;  %10869 = vmatpush3.msk.msra.mxu1 %vm1648_vm5, %v3615_v31  ;;  %v11430_v30 = vpack.c.bf16 %v10188_v28, %v10187_v27  ;;  %v10189_v31 = vld [vmem:[%s13315_s6 + $0x60] sm:$0xff] }
0x14b1   : > { %10878 = vmatprep.subr.mxu1 %v11892_v8 }
0x14b3   : > { %v3766_v36 = vpop.permute.xlu0 %3765 }
0x14ba   : > { %v11756_v32 = vpop.eup %11755 }
0x14bb   : > { %v3607_v34 = vsel %vm1631_vm4, %v11756_v32, 0.0 }
0x14bc   : > { %3608 = vadd.xlane.f32.xlu1 %v3607_v34 }
0x14cd   : > { %3767 = vrot.lane.b32.xlu1 %v12348_v23, %s13253_s16  ;;  %v10144_v23 = vld [vmem:[%s13316_s3 + $0x30] sm:$0xff]  ;;  %s13331_s3 = sld [smem:[#allocation6_spill]] }
0x14ce   : > { %10874 = vmatpush3.msra.mxu0 %v10144_v23 }
0x14cf   : > { %10883 = vmatprep.subr.mxu0 %v11892_v8 }
0x1549   : > { %v3609_v29 = vpop.xlane.xlu1 %3608 }
0x154a   : > { %11757 = vrcp.f32 %v3609_v29 }
0x154d   : > { %v3768_v35 = vpop.permute.xlu1 %3767 }
0x1554   : > { %v11758_v25 = vpop.eup %11757 }
0x1555   : > { %v3611_v33 = vmul.f32 %v11758_v25, %v11756_v32  ;;  %v10190_v32 = vld [vmem:[%s13315_s6 + $0x68] sm:$0xff] }
0x1556   : > { %v11433_v34 = vpack.c.bf16 %v10190_v32, %v10189_v31 }
0x1557   : > { %10167 = vst.msk [vmem:[%s12209_s15 + $0x30] sm:$0x1f] %vm1631_vm4, %v3611_v33  ;;  %10871 = vmatmul.mubr.msk.f32.vlgmr.msra.gmra.mrb[26].mxu1 %vm1644_vm6, %v3611_v33 }
0x1558   : > { %10879 = vmatpush3.xpose.msk.msra.mxu1 %vm1551_vm2, %v3768_v35  ;;  %10880 = vmatprep.mubr.msk.f32.mxu1 %vm11891_vm0, %v11892_v8 }
0x1559   : > { %10888 = vmatprep.subr.mxu1 %v11892_v8 }
0x155b   : > { %10881 = vmatmul.mubr.msk.f32.vlgmr.msra.gmra.mrb[28].mxu1 %vm1551_vm2, %v3766_v36  ;;  %v10178_v36 = vld [vmem:[%s13312_s14 + $0x1] ss:$0 sm:$0xff]  ;;  %s13341_s14 = sld [smem:[#allocation26_spill]] }
0x155c   : > { %10890 = vmatprep.mubr.msk.f32.mxu1 %vm11891_vm0, %v11892_v8  ;;  %10889 = vmatpush3.msra.mxu1 %v10145_v50  ;;  %v12520_v50 = vld [vmem:[%s1251_s7] sm:$0x1f]  ;;  %s13325_s7 = sld [smem:[#allocation18_spill]] }
0x155d   : > { %11426 = vmatprep.subr.bf16.mxu1 %v11890_v5 }
0x162a   : > { %v3687_v37 = vpop.f32.mrb[26].mxu1 }
0x162b   : > { %v10872_v38 = vpop.f32.mrb[27].mxu1  ;;  %10876 = vmatmul.mubr.msk.f32.vlgmr.msra.gmra.mrb[28].mxu0 %vm1551_vm2, %v3687_v37  ;;  %v10179_v37 = vld [vmem:[%s13311_s19 + $0x1] ss:$0 sm:$0xff]  ;;  %s13343_s19 = sld [smem:[#allocation29_spill]] }
0x162c   : > { %10885 = vmatprep.mubr.msk.f32.mxu0 %vm11891_vm0, %v11892_v8 }
0x162e   : > { %v3839_v40 = vpop.f32.mrb[28].mxu1 }
0x162f   : > { %v3843_v41 = vmul.f32 0.35355338, %v3839_v40  ;;  %v10882_v42 = vpop.f32.mrb[29].mxu1  ;;  %v11439_v40 = vpack.c.bf16 %v4257_v13, %v4256_v12 }
0x1631   : > { %v3844_v43 = vsel %vm1629_vm3, -1e+09, %v3843_v41 }
0x1632   : > { %v3845_v44 = vsel %vm1631_vm4, %v3844_v43, -inf }
0x1633   : > { %3846 = vmax.xlane.f32.xlu1 %v3845_v44 }
0x16c0   : > { %v3847_v45 = vpop.xlane.xlu1 %3846 }
0x16c1   : > { %v3848_v46 = vsub.f32 %v3844_v43, %v3847_v45  ;;  %v11442_v45 = vpack.c.bf16 %v4259_v3, %v12473_v2 }
0x16c3   : > { %v3849_v47 = vmul.f32 1.442695, %v3848_v46 }
0x16c5   : > { %11759 = vpow2.f32 %v3849_v47 }
0x16cf   : > { %v11760_v48 = vpop.eup %11759 }
0x16d0   : > { %v3851_v49 = vsel %vm1631_vm4, %v11760_v48, 0.0 }
0x16d1   : > { %3852 = vadd.xlane.f32.xlu0 %v3851_v49 }
0x16e7   : > { %3858 = vrot.lane.b32.xlu0 %v12388_v53, %s13253_s16 }
0x16eb   : > { %11653 = vrot.lane.b32.xlu0 %v12477_v4, %s13257_s0 }
0x16ef   : > { %4363 = vrot.lane.b32.xlu0 %v12495_v21, %s13257_s0 }
0x16fe   : > { %v3760_v39 = vpop.f32.mrb[28].mxu0 }
0x16ff   : > { %v3764_v51 = vadd.f32 %v3760_v39, %v3518_v18  ;;  %v10877_v52 = vpop.f32.mrb[29].mxu0  ;;  %v10182_v18 = vld [vmem:[%s13309_s24 + $0x30] sm:$0xff]  ;;  %s13346_s24 = sld [smem:[#allocation32_spill]] }
0x1700   : > { %v11424_v20 = vpack.c.bf16 %v10183_v19, %v10182_v18  ;;  %v10192_v52 = vld [vmem:[%s13315_s6 + $0x78] sm:$0xff] }
0x175e   : > { %v3853_v54 = vpop.xlane.xlu0 %3852 }
0x175f   : > { %11761 = vrcp.f32 %v3853_v54 }
0x1762   : > { %v3859_v55 = vpop.permute.xlu0 %3858 }
0x1763   : > { %10884 = vmatpush3.msk.msra.mxu0 %vm1648_vm5, %v3859_v55  ;;  %v10196_v55 = vld [vmem:[%s11966_s30 + $0x1] ss:$0 sm:$0xff] }
0x1764   : > { %11420 = vmatprep.subr.bf16.mxu0 %v11890_v5 }
0x1766   : > { %v11654_v46 = vpop.permute.xlu0 %11653 }
0x1767   : > { %v11655_v49 = vunpack.i.l.bf16 %v11654_v46 }
0x1769   : > { %v11762_v56 = vpop.eup %11761 }
0x176a   : > { %v3855_v57 = vmul.f32 %v11762_v56, %v11760_v48  ;;  %v11656_v48 = vunpack.i.h.bf16 %v11654_v46  ;;  %v4262_v46 = vld [vmem:[%s13325_s7 + $0x8] sm:$0xff] }
0x176c   : > { %10173 = vst.msk [vmem:[%s12209_s15 + $0x38] sm:$0x1f] %vm1631_vm4, %v3855_v57  ;;  %10886 = vmatmul.mubr.msk.f32.vlgmr.msra.gmra.mrb[30].mxu0 %vm1644_vm6, %v3855_v57  ;;  %v11448_v39 = vpack.c.bf16 %v11656_v48, %v11655_v49  ;;  %s13323_s15 = sld [smem:[#allocation5_spill]] }
0x176d   : > { %10901 = vmatprep.mubr.msk.f32.mxu0 %vm11891_vm0, %v11892_v8  ;;  %11422 = vmatpush3.bf16.msra.mxu0 %v11421_v16 }
0x176e   : > { %11423 = vmatprep.subr.bf16.mxu0 %v11890_v5 }
0x1771   : > { %11425 = vmatpush3.bf16.msra.mxu0 %v11424_v20 }
0x1772   : > { %11438 = vmatprep.subr.bf16.mxu0 %v11890_v5  ;;  %s1259_s28 = scalar_lea.vmem %s13323_s15, %s12131_s26  ;;  %s12601_s15 = scalar_lea.vmem %s13324_s21, %s12205_s11 }
0x1773   : > { %v12575_v15 = vld [vmem:[%s1259_s28] sm:$0x1f]  ;;  %s13326_s28 = sld [smem:[#allocation19_spill]]  ;;  %s13345_s21 = smov 96  }
0x1774   : > { %vm4598_vm9 = vcmp.gt.f32.partialorder %v12575_v15, 0.5 }
0x183f   : > { %v3931_v53 = vpop.f32.mrb[30].mxu0 }
0x1840   : > { %v10887_v58 = vpop.f32.mrb[31].mxu0  ;;  %10891 = vmatmul.mubr.msk.f32.vlgmr.msra.gmra.mrb[30].mxu1 %vm1551_vm2, %v3931_v53 }
0x1841   : > { %10920 = vmatprep.mubr.msk.f32.mxu1 %vm11891_vm0, %v11892_v8  ;;  %11428 = vmatpush3.bf16.msra.mxu1 %v11427_v26 }
0x1842   : > { %11429 = vmatprep.subr.bf16.mxu1 %v11890_v5 }
0x1845   : > { %11431 = vmatpush3.bf16.msra.mxu1 %v11430_v30 }
0x1846   : > { %11432 = vmatprep.subr.bf16.mxu1 %v11890_v5 }
0x1849   : > { %11434 = vmatpush3.bf16.msra.mxu1 %v11433_v34 }
0x184a   : > { %11435 = vmatprep.subr.bf16.mxu1 %v11890_v5 }
0x1913   : > { %v4004_v60 = vpop.f32.mrb[30].mxu1 }
0x1914   : > { %v4008_v61 = vadd.f32 %v4004_v60, %v3764_v51  ;;  %v10892_v62 = vpop.f32.mrb[31].mxu1  ;;  %v10191_v51 = vld [vmem:[%s13315_s6 + $0x70] sm:$0xff]  ;;  %s12775_s6 = scalar_lea.vmem %s13334_s17, %s12205_s11  ;;  %s13337_s11 = smov 104  }
0x1915   : > { %v11436_v54 = vpack.c.bf16 %v10192_v52, %v10191_v51  ;;  %v4364_v62 = vpop.permute.xlu0 %4363  ;;  %v4261_v51 = vld [vmem:[%s13325_s7] sm:$0xff]  ;;  %s13342_s17 = sld [smem:[#allocation27_spill]] }
0x1916   : > { %v4015_v63 = vadd.f32 %v10177_v59, %v4008_v61 }
0x1917   : > { %11437 = vmatpush3.bf16.msra.mxu1 %v11436_v54 }
0x1918   : > { %v4016_v0 = vadd.f32 %v4015_v63, %v12335_v17  ;;  %11450 = vmatprep.subr.bf16.mxu1 %v11890_v5 }
0x191a   : > { %v4017_v1 = vsel %vm2534_vm7, %v4016_v0, 0.0 }
0x191b   : > { %4018 = vadd.xlane.f32.xlu1 %v4017_v1 }
0x19a8   : > { %v4019_v6 = vpop.xlane.xlu1 %4018 }
0x19a9   : > { %v4020_v7 = vmul.f32 0.03125, %v4019_v6 }
0x19ab   : > { %v4021_v9 = vsub.f32 %v4016_v0, %v4020_v7 }
0x19ad   : > { %v4022_v17 = vmul.f32 %v4021_v9, %v4021_v9 }
0x19af   : > { %v4023_v10 = vsel %vm2534_vm7, %v4022_v17, 0.0 }
0x19b0   : > { %4024 = vadd.xlane.f32.xlu1 %v4023_v10 }
0x19c1   : > { %11648 = vrot.lane.b32.xlu1 %v12484_v14, %s13257_s0 }
0x1a3d   : > { %v4025_v29 = vpop.xlane.xlu1 %4024 }
0x1a3e   : > { %v4026_v25 = vmul.f32 0.03125, %v4025_v29 }
0x1a40   : > { %v4027_v33 = vadd.f32 1e-05, %v4026_v25 }
0x1a41   : > { %v11649_v42 = vpop.permute.xlu1 %11648 }
0x1a42   : > { %11763 = vrsqrt.f32 %v4027_v33  ;;  %v11651_v43 = vunpack.i.h.bf16 %v11649_v42  ;;  %v11650_v44 = vunpack.i.l.bf16 %v11649_v42 }
0x1a44   : > { %v11445_v47 = vpack.c.bf16 %v11651_v43, %v11650_v44 }
0x1a4c   : > { %v11764_v35 = vpop.eup %11763 }
0x1a4d   : > { %v4029_v23 = vmul.f32 %v11764_v35, %v4021_v9 }
0x1a4f   : > { %v4036_v38 = vmul.f32 %v10178_v36, %v4029_v23 }
0x1a51   : > { %v12510_v41 = vadd.f32 %v10179_v37, %v4036_v38 }
0x1a53   : > { %10902 = vmatmul.mubr.msk.f32.vlgmr.msra.gmra.mrb[32].mxu0 %vm1303_vm1, %v12510_v41 }
0x1a54   : > { %11440 = vmatpush3.bf16.msra.mxu0 %v11439_v40  ;;  %10931 = vmatprep.mubr.msk.f32.mxu0 %vm11891_vm0, %v11892_v8 }
0x1a55   : > { %11441 = vmatprep.subr.bf16.mxu0 %v11890_v5 }
0x1a58   : > { %11443 = vmatpush3.bf16.msra.mxu0 %v11442_v45 }
0x1a59   : > { %11444 = vmatprep.subr.bf16.mxu0 %v11890_v5 }
0x1a5b   : > { %10932 = vmatmul.mubr.msk.f32.vlgmr.msra.gmra.mrb[34].mxu0 %vm1303_vm1, %v12520_v50 }
0x1a5c   : > { %11446 = vmatpush3.bf16.msra.mxu0 %v11445_v47  ;;  %10942 = vmatprep.mubr.msk.f32.mxu0 %vm11891_vm0, %v11892_v8 }
0x1a5d   : > { %11447 = vmatprep.subr.bf16.mxu0 %v11890_v5 }
0x1a60   : > { %11449 = vmatpush3.bf16.msra.mxu0 %v11448_v39 }
0x1a61   : > { %10956 = vmatprep.subr.mxu0 %v11892_v8 }
0x1a63   : > { %10943 = vmatmul.mubr.msk.f32.vlgmr.msra.gmra.mrb[36].mxu0 %vm1303_vm1, %v12520_v50 }
0x1a64   : > { %10958 = vmatprep.mubr.msk.f32.mxu0 %vm11891_vm0, %v11892_v8 }
0x1b26   : > { %v4141_v56 = vpop.f32.mrb[32].mxu0 }
0x1b27   : > { %v4142_v57 = vadd.f32 %v10196_v55, %v4141_v56  ;;  %v10903_v53 = vpop.f32.mrb[33].mxu0 }
0x1b29   : > { %v4145_v58 = vmax.f32 %v4142_v57, 0.0 }
0x1b2b   : > { %10921 = vmatmul.mubr.msk.f32.vlgmr.msra.gmra.mrb[32].mxu1 %vm2665_vm8, %v4145_v58 }
0x1b2c   : > { %10953 = vmatprep.mubr.msk.f32.mxu1 %vm11891_vm0, %v11892_v8 }
0x1b2e   : > { %v4343_v59 = vpop.f32.mrb[34].mxu0 }
0x1b2f   : > { %v12541_v60 = vadd.f32 %v12495_v21, %v4343_v59  ;;  %v10933_v61 = vpop.f32.mrb[35].mxu0 }
0x1b31   : > { %4688 = vrot.lane.b32.xlu0 %v12541_v60, %s13262_s2 }
0x1b35   : > { %11663 = vrot.lane.b32.xlu0 %v12477_v4, %s13259_s1 }
0x1b36   : > { %v4432_v63 = vpop.f32.mrb[36].mxu0 }
0x1b37   : > { %v12547_v0 = vadd.f32 %v4432_v63, %v4364_v62  ;;  %v10944_v1 = vpop.f32.mrb[37].mxu0 }
0x1b39   : > { %4690 = vrot.lane.b32.xlu1 %v12547_v0, %s13262_s2  ;;  %10957 = vmatpush3.xpose.msk.msra.mxu0 %vm1551_vm2, %v12547_v0 }
0x1b3a   : > { %10966 = vmatprep.subr.mxu0 %v11892_v8 }
0x1b3c   : > { %10959 = vmatmul.mubr.msk.f32.vlgmr.msra.gmra.mrb[38].mxu0 %vm1551_vm2, %v12541_v60 }
0x1b3d   : > { %10968 = vmatprep.mubr.msk.f32.mxu0 %vm11891_vm0, %v11892_v8  ;;  %11658 = vrot.lane.b32.xlu1 %v12484_v14, %s13259_s1 }
0x1ba3   : > { %v4689_v2 = vpop.permute.xlu0 %4688 }
0x1ba7   : > { %v11664_v4 = vpop.permute.xlu0 %11663 }
0x1ba8   : > { %v11666_v17 = vunpack.i.h.bf16 %v11664_v4  ;;  %v11665_v10 = vunpack.i.l.bf16 %v11664_v4 }
0x1baa   : > { %v11454_v13 = vpack.c.bf16 %v11666_v17, %v11665_v10 }
0x1bab   : > { %v4691_v3 = vpop.permute.xlu1 %4690 }
0x1bac   : > { %10967 = vmatpush3.xpose.msk.msra.mxu0 %vm1551_vm2, %v4691_v3 }
0x1bad   : > { %10976 = vmatprep.subr.mxu0 %v11892_v8 }
0x1baf   : > { %10969 = vmatmul.mubr.msk.f32.vlgmr.msra.gmra.mrb[40].mxu0 %vm1551_vm2, %v4689_v2  ;;  %v11659_v6 = vpop.permute.xlu1 %11658 }
0x1bb0   : > { %v11661_v7 = vunpack.i.h.bf16 %v11659_v6  ;;  %v11660_v9 = vunpack.i.l.bf16 %v11659_v6  ;;  %10978 = vmatprep.mubr.msk.f32.mxu0 %vm11891_vm0, %v11892_v8  ;;  %10977 = vmatpush3.msra.mxu0 %v4262_v46 }
0x1bb1   : > { %10986 = vmatprep.subr.mxu0 %v11892_v8 }
0x1bb2   : > { %v11451_v12 = vpack.c.bf16 %v11661_v7, %v11660_v9 }
0x1bb4   : > { %11452 = vmatpush3.bf16.msra.mxu1 %v11451_v12 }
0x1bb5   : > { %11453 = vmatprep.subr.bf16.mxu1 %v11890_v5 }
0x1bb8   : > { %11455 = vmatpush3.bf16.msra.mxu1 %v11454_v13 }
0x1bb9   : > { %10961 = vmatprep.subr.mxu1 %v11892_v8 }
0x1bbb   : > { %10954 = vmatmul.mubr.msk.f32.vlgmr.msra.gmra.mrb[34].mxu1 %vm1303_vm1, %v12520_v50 }
0x1bbc   : > { %10963 = vmatprep.mubr.msk.f32.mxu1 %vm11891_vm0, %v11892_v8 }
0x1bfe   : > { %v12571_v14 = vpop.f32.mrb[32].mxu1 }
0x1bff   : > { %v10922_v11 = vpop.f32.mrb[33].mxu1 }
0x1c0f   : > { %v4593_v16 = vpop.f32.mrb[38].mxu0 }
0x1c10   : > { %v4597_v18 = vmul.f32 0.35355338, %v4593_v16  ;;  %v10960_v19 = vpop.f32.mrb[39].mxu0 }
0x1c11   : > { %v4263_v19 = vld [vmem:[%s13325_s7 + $0x10] sm:$0xff] }
0x1c12   : > { %v4599_v20 = vsel %vm4598_vm9, -1e+09, %v4597_v18 }
0x1c13   : > { %v4600_v22 = vsel %vm1631_vm4, %v4599_v20, -inf }
0x1c14   : > { %4601 = vmax.xlane.f32.xlu1 %v4600_v22 }
0x1c82   : > { %v4762_v24 = vpop.f32.mrb[40].mxu0 }
0x1c83   : > { %v4766_v26 = vmul.f32 0.35355338, %v4762_v24  ;;  %v10970_v27 = vpop.f32.mrb[41].mxu0 }
0x1c85   : > { %v4767_v28 = vsel %vm4598_vm9, -1e+09, %v4766_v26 }
0x1c86   : > { %v4768_v30 = vsel %vm1631_vm4, %v4767_v28, -inf }
0x1c87   : > { %4769 = vmax.xlane.f32.xlu0 %v4768_v30 }
0x1c8e   : > { %v4517_v33 = vpop.f32.mrb[34].mxu1 }
0x1c8f   : > { %v10955_v35 = vpop.f32.mrb[35].mxu1 }
0x1c9d   : > { %4448 = vrot.lane.b32.xlu0 %v12495_v21, %s13259_s1 }
0x1ca1   : > { %v4602_v31 = vpop.xlane.xlu1 %4601  ;;  %5006 = vrot.lane.b32.xlu0 %v12547_v0, %s13255_s10 }
0x1ca2   : > { %v4603_v32 = vsub.f32 %v4599_v20, %v4602_v31 }
0x1ca4   : > { %v4604_v34 = vmul.f32 1.442695, %v4603_v32 }
0x1ca5   : > { %5004 = vrot.lane.b32.xlu0 %v12541_v60, %s13255_s10 }
0x1ca6   : > { %11765 = vpow2.f32 %v4604_v34 }
0x1cb0   : > { %v11766_v29 = vpop.eup %11765 }
0x1cb1   : > { %v4606_v25 = vsel %vm1631_vm4, %v11766_v29, 0.0 }
0x1cb2   : > { %4607 = vadd.xlane.f32.xlu1 %v4606_v25  ;;  %v10198_v25 = vld [vmem:[%s13313_s12 + $0x1] ss:$0 sm:$0xff]  ;;  %s13339_s12 = sld [smem:[#allocation28_spill]] }
0x1d14   : > { %v4770_v36 = vpop.xlane.xlu0 %4769 }
0x1d15   : > { %v4771_v21 = vsub.f32 %v4767_v28, %v4770_v36 }
0x1d17   : > { %v4772_v23 = vmul.f32 1.442695, %v4771_v21 }
0x1d18   : > { %v4449_v37 = vpop.permute.xlu0 %4448 }
0x1d19   : > { %11767 = vpow2.f32 %v4772_v23  ;;  %v12591_v38 = vadd.f32 %v4517_v33, %v4449_v37  ;;  %v4222_v33 = vadd.f32 %v10198_v25, %v12571_v14  ;;  %v4264_v37 = vld [vmem:[%s13325_s7 + $0x18] sm:$0xff]  ;;  %v10201_v25 = vld [vmem:[%s11986_s27 + $0x1] ss:$0 sm:$0xff] }
0x1d1b   : > { %10962 = vmatpush3.msk.msra.mxu1 %vm1648_vm5, %v12591_v38  ;;  %v4225_v21 = vadd.f32 %v4222_v33, %v12510_v41 }
0x1d1c   : > { %10971 = vmatprep.subr.mxu1 %v11892_v8  ;;  %v5007_v55 = vpop.permute.xlu0 %5006 }
0x1d1d   : > { %v4226_v23 = vsel %vm2534_vm7, %v4225_v21, 0.0 }
0x1d20   : > { %v5005_v53 = vpop.permute.xlu0 %5004 }
0x1d23   : > { %v11768_v40 = vpop.eup %11767 }
0x1d24   : > { %v4774_v42 = vsel %vm1631_vm4, %v11768_v40, 0.0 }
0x1d25   : > { %4775 = vadd.xlane.f32.xlu1 %v4774_v42 }
0x1d36   : > { %4781 = vrot.lane.b32.xlu1 %v12591_v38, %s13262_s2 }
0x1d3f   : > { %v4608_v43 = vpop.xlane.xlu1 %4607 }
0x1d40   : > { %11769 = vrcp.f32 %v4608_v43 }
0x1d4a   : > { %v11770_v44 = vpop.eup %11769 }
0x1d4b   : > { %v4610_v45 = vmul.f32 %v11770_v44, %v11766_v29 }
0x1d4d   : > { %4611 = vst.msk [vmem:[%s12601_s15] sm:$0x1f] %vm1631_vm4, %v4610_v45  ;;  %10964 = vmatmul.mubr.msk.f32.vlgmr.msra.gmra.mrb[36].mxu1 %vm1644_vm6, %v4610_v45 }
0x1d4e   : > { %10973 = vmatprep.mubr.msk.f32.mxu1 %vm11891_vm0, %v11892_v8 }
0x1db2   : > { %v4776_v47 = vpop.xlane.xlu1 %4775 }
0x1db3   : > { %11771 = vrcp.f32 %v4776_v47 }
0x1db6   : > { %v4782_v48 = vpop.permute.xlu1 %4781 }
0x1db7   : > { %10972 = vmatpush3.msk.msra.mxu1 %vm1648_vm5, %v4782_v48  ;;  %v10229_v48 = vld [vmem:[%s13326_s28] ss:$0 sm:$0xff] }
0x1db8   : > { %10981 = vmatprep.subr.mxu1 %v11892_v8 }
0x1dbd   : > { %v11772_v49 = vpop.eup %11771 }
0x1dbe   : > { %v4778_v39 = vmul.f32 %v11772_v49, %v11768_v40 }
0x1dc0   : > { %10212 = vst.msk [vmem:[%s12601_s15 + $0x8] sm:$0x1f] %vm1631_vm4, %v4778_v39  ;;  %10974 = vmatmul.mubr.msk.f32.vlgmr.msra.gmra.mrb[38].mxu1 %vm1644_vm6, %v4778_v39 }
0x1dc1   : > { %10982 = vmatpush3.msra.mxu1 %v4261_v51  ;;  %10983 = vmatprep.mubr.msk.f32.mxu1 %vm11891_vm0, %v11892_v8 }
0x1dc2   : > { %10991 = vmatprep.subr.mxu1 %v11892_v8 }
0x1e20   : > { %v4684_v52 = vpop.f32.mrb[36].mxu1 }
0x1e21   : > { %v10965_v54 = vpop.f32.mrb[37].mxu1  ;;  %10984 = vmatmul.mubr.msk.f32.vlgmr.msra.gmra.mrb[40].mxu1 %vm1551_vm2, %v4684_v52 }
0x1e22   : > { %10993 = vmatprep.mubr.msk.f32.mxu1 %vm11891_vm0, %v11892_v8 }
0x1e93   : > { %v4854_v56 = vpop.f32.mrb[38].mxu1 }
0x1e94   : > { %v10975_v57 = vpop.f32.mrb[39].mxu1  ;;  %10979 = vmatmul.mubr.msk.f32.vlgmr.msra.gmra.mrb[42].mxu0 %vm1551_vm2, %v4854_v56 }
0x1e95   : > { %10987 = vmatpush3.xpose.msk.msra.mxu0 %vm1551_vm2, %v5007_v55  ;;  %10988 = vmatprep.mubr.msk.f32.mxu0 %vm11891_vm0, %v11892_v8 }
0x1e96   : > { %10996 = vmatprep.subr.mxu0 %v11892_v8 }
0x1e98   : > { %10989 = vmatmul.mubr.msk.f32.vlgmr.msra.gmra.mrb[44].mxu0 %vm1551_vm2, %v5005_v53 }
0x1e99   : > { %10998 = vmatprep.mubr.msk.f32.mxu0 %vm11891_vm0, %v11892_v8  ;;  %10997 = vmatpush3.msra.mxu0 %v4263_v19 }
0x1e9a   : > { %11006 = vmatprep.subr.mxu0 %v11892_v8 }
0x1ef4   : > { %v5000_v58 = vpop.f32.mrb[40].mxu1 }
0x1ef5   : > { %v10985_v59 = vpop.f32.mrb[41].mxu1 }
0x1f67   : > { %v4927_v61 = vpop.f32.mrb[42].mxu0 }
0x1f68   : > { %v12630_v62 = vadd.f32 %v5000_v58, %v4927_v61  ;;  %v10980_v63 = vpop.f32.mrb[43].mxu0 }
0x1f6b   : > { %v5078_v1 = vpop.f32.mrb[44].mxu0 }
0x1f6c   : > { %v5082_v2 = vmul.f32 0.35355338, %v5078_v1  ;;  %v10990_v3 = vpop.f32.mrb[45].mxu0 }
0x1f6e   : > { %v5083_v4 = vsel %vm4598_vm9, -1e+09, %v5082_v2 }
0x1f6f   : > { %v5084_v6 = vsel %vm1631_vm4, %v5083_v4, -inf }
0x1f70   : > { %5085 = vmax.xlane.f32.xlu1 %v5084_v6 }
0x1f81   : > { %5250 = vrot.lane.b32.xlu1 %v12547_v0, %s13253_s16 }
0x1f85   : > { %5248 = vrot.lane.b32.xlu1 %v12541_v60, %s13253_s16 }
0x1ffd   : > { %v5086_v7 = vpop.xlane.xlu1 %5085 }
0x1ffe   : > { %v5087_v9 = vsub.f32 %v5083_v4, %v5086_v7 }
0x2000   : > { %v5088_v17 = vmul.f32 1.442695, %v5087_v9 }
0x2001   : > { %v5251_v0 = vpop.permute.xlu1 %5250 }
0x2002   : > { %11773 = vpow2.f32 %v5088_v17 }
0x2005   : > { %v5249_v18 = vpop.permute.xlu1 %5248 }
0x200c   : > { %v11774_v10 = vpop.eup %11773 }
0x200d   : > { %v5090_v12 = vsel %vm1631_vm4, %v11774_v10, 0.0 }
0x200e   : > { %5091 = vadd.xlane.f32.xlu0 %v5090_v12 }
0x2024   : > { %5097 = vrot.lane.b32.xlu0 %v12591_v38, %s13255_s10  ;;  %s13328_s10 = sld [smem:[#allocation23_spill]] }
0x209b   : > { %v5092_v13 = vpop.xlane.xlu0 %5091 }
0x209c   : > { %11775 = vrcp.f32 %v5092_v13 }
0x209f   : > { %v5098_v11 = vpop.permute.xlu0 %5097 }
0x20a0   : > { %10992 = vmatpush3.msk.msra.mxu1 %vm1648_vm5, %v5098_v11 }
0x20a1   : > { %11001 = vmatprep.subr.mxu1 %v11892_v8 }
0x20a6   : > { %v11776_v60 = vpop.eup %11775 }
0x20a7   : > { %v5094_v16 = vmul.f32 %v11776_v60, %v11774_v10 }
0x20a9   : > { %10219 = vst.msk [vmem:[%s12601_s15 + $0x10] sm:$0x1f] %vm1631_vm4, %v5094_v16  ;;  %10994 = vmatmul.mubr.msk.f32.vlgmr.msra.gmra.mrb[42].mxu1 %vm1644_vm6, %v5094_v16 }
0x20aa   : > { %11002 = vmatpush3.xpose.msk.msra.mxu1 %vm1551_vm2, %v5251_v0  ;;  %11003 = vmatprep.mubr.msk.f32.mxu1 %vm11891_vm0, %v11892_v8 }
0x20ab   : > { %11011 = vmatprep.subr.mxu1 %v11892_v8 }
0x20ad   : > { %11004 = vmatmul.mubr.msk.f32.vlgmr.msra.gmra.mrb[44].mxu1 %vm1551_vm2, %v5249_v18 }
0x20ae   : > { %11013 = vmatprep.mubr.msk.f32.mxu1 %vm11891_vm0, %v11892_v8  ;;  %11012 = vmatpush3.msra.mxu1 %v4264_v37 }
0x20af   : > { %11462 = vmatprep.subr.bf16.mxu1 %v11890_v5 }
0x217c   : > { %v5170_v20 = vpop.f32.mrb[42].mxu1 }
0x217d   : > { %v10995_v22 = vpop.f32.mrb[43].mxu1  ;;  %10999 = vmatmul.mubr.msk.f32.vlgmr.msra.gmra.mrb[46].mxu0 %vm1551_vm2, %v5170_v20 }
0x217e   : > { %11008 = vmatprep.mubr.msk.f32.mxu0 %vm11891_vm0, %v11892_v8 }
0x2180   : > { %v5322_v24 = vpop.f32.mrb[44].mxu1 }
0x2181   : > { %v5326_v26 = vmul.f32 0.35355338, %v5322_v24  ;;  %v11005_v27 = vpop.f32.mrb[45].mxu1 }
0x2183   : > { %v5327_v28 = vsel %vm4598_vm9, -1e+09, %v5326_v26 }
0x2184   : > { %v5328_v30 = vsel %vm1631_vm4, %v5327_v28, -inf }
0x2185   : > { %5329 = vmax.xlane.f32.xlu0 %v5328_v30 }
0x219b   : > { %5341 = vrot.lane.b32.xlu0 %v12591_v38, %s13253_s16  ;;  %s13327_s16 = sld [smem:[#allocation22_spill]] }
0x21a1   : > { %v5529_v58 = vld [vmem:[%s13327_s16 + $0x10] sm:$0xff]  ;;  %v5530_v59 = vld [vmem:[%s13327_s16 + $0x18] sm:$0xff]  ;;  %v5527_v63 = vld [vmem:[%s13327_s16] sm:$0xff] }
0x21a2   : > { %v11672_v61 = vpack.i.bf16 %v5530_v59, %v5529_v58  ;;  %v5528_v1 = vld [vmem:[%s13327_s16 + $0x8] sm:$0xff]  ;;  %v11460_v17 = vpack.c.bf16 %v5530_v59, %v5529_v58 }
0x21a3   : > { %v11457_v9 = vpack.c.bf16 %v5528_v1, %v5527_v63 }
0x21a4   : > { %11673 = vrot.lane.b32.xlu0 %v11672_v61, %s13257_s0 }
0x2212   : > { %v5330_v31 = vpop.xlane.xlu0 %5329 }
0x2213   : > { %v5331_v32 = vsub.f32 %v5327_v28, %v5330_v31  ;;  %v10200_v31 = vld [vmem:[%s13310_s20 + $0x1] ss:$0 sm:$0xff]  ;;  %s13344_s20 = sld [smem:[#allocation31_spill]] }
0x2215   : > { %v5332_v34 = vmul.f32 1.442695, %v5331_v32 }
0x2216   : > { %v5342_v29 = vpop.permute.xlu0 %5341 }
0x2217   : > { %11777 = vpow2.f32 %v5332_v34  ;;  %11007 = vmatpush3.msk.msra.mxu0 %vm1648_vm5, %v5342_v29 }
0x2218   : > { %11456 = vmatprep.subr.bf16.mxu0 %v11890_v5 }
0x221a   : > { %v11674_v11 = vpop.permute.xlu0 %11673 }
0x221b   : > { %v11676_v20 = vunpack.i.h.bf16 %v11674_v11  ;;  %v11675_v27 = vunpack.i.l.bf16 %v11674_v11 }
0x221d   : > { %v11466_v32 = vpack.c.bf16 %v11676_v20, %v11675_v27 }
0x2221   : > { %v11778_v35 = vpop.eup %11777 }
0x2222   : > { %v5334_v36 = vsel %vm1631_vm4, %v11778_v35, 0.0 }
0x2223   : > { %5335 = vadd.xlane.f32.xlu1 %v5334_v36 }
0x2227   : > { %4227 = vadd.xlane.f32.xlu1 %v4226_v23 }
0x2250   : > { %v5243_v38 = vpop.f32.mrb[46].mxu0 }
0x2251   : > { %v5247_v40 = vadd.f32 %v5243_v38, %v12630_v62  ;;  %v11000_v42 = vpop.f32.mrb[47].mxu0  ;;  %v12690_v62 = vld [vmem:[%s13328_s10] ss:$0 sm:$0xff] }
0x2252   : > { %5634 = vrot.lane.b32.xlu0 %v12690_v62, %s13257_s0 }
0x22b0   : > { %v5336_v14 = vpop.xlane.xlu1 %5335 }
0x22b1   : > { %11779 = vrcp.f32 %v5336_v14 }
0x22b4   : > { %v4228_v46 = vpop.xlane.xlu1 %4227 }
0x22b5   : > { %v4229_v47 = vmul.f32 0.03125, %v4228_v46 }
0x22b7   : > { %v4230_v52 = vsub.f32 %v4225_v21, %v4229_v47 }
0x22b9   : > { %v4231_v57 = vmul.f32 %v4230_v52, %v4230_v52 }
0x22bb   : > { %v11780_v43 = vpop.eup %11779  ;;  %v4232_v53 = vsel %vm2534_vm7, %v4231_v57, 0.0 }
0x22bc   : > { %v5338_v44 = vmul.f32 %v11780_v43, %v11778_v35 }
0x22be   : > { %10225 = vst.msk [vmem:[%s12601_s15 + $0x18] sm:$0x1f] %vm1631_vm4, %v5338_v44  ;;  %11009 = vmatmul.mubr.msk.f32.vlgmr.msra.gmra.mrb[48].mxu0 %vm1644_vm6, %v5338_v44 }
0x22bf   : > { %11024 = vmatprep.mubr.msk.f32.mxu0 %vm11891_vm0, %v11892_v8  ;;  %11458 = vmatpush3.bf16.msra.mxu0 %v11457_v9 }
0x22c0   : > { %11459 = vmatprep.subr.bf16.mxu0 %v11890_v5 }
0x22c3   : > { %11461 = vmatpush3.bf16.msra.mxu0 %v11460_v17 }
0x22c4   : > { %11468 = vmatprep.subr.bf16.mxu0 %v11890_v5  ;;  %v5635_v22 = vpop.permute.xlu0 %5634 }
0x2391   : > { %v5414_v41 = vpop.f32.mrb[48].mxu0 }
0x2392   : > { %v11010_v45 = vpop.f32.mrb[49].mxu0  ;;  %11014 = vmatmul.mubr.msk.f32.vlgmr.msra.gmra.mrb[46].mxu1 %vm1551_vm2, %v5414_v41 }
0x2393   : > { %11035 = vmatprep.mubr.msk.f32.mxu1 %vm11891_vm0, %v11892_v8 }
0x2465   : > { %v5487_v49 = vpop.f32.mrb[46].mxu1 }
0x2466   : > { %v5491_v39 = vadd.f32 %v5487_v49, %v5247_v40  ;;  %v11015_v51 = vpop.f32.mrb[47].mxu1 }
0x2468   : > { %v5498_v54 = vadd.f32 %v10229_v48, %v5491_v39 }
0x246a   : > { %v5499_v55 = vadd.f32 %v5498_v54, %v12520_v50  ;;  %v11677_v50 = vpack.i.bf16 %v5528_v1, %v5527_v63 }
0x246c   : > { %v5500_v56 = vsel %vm2534_vm7, %v5499_v55, 0.0  ;;  %11678 = vrot.lane.b32.xlu0 %v11677_v50, %s13259_s1 }
0x246d   : > { %5501 = vadd.xlane.f32.xlu1 %v5500_v56 }
0x2470   : > { %11683 = vrot.lane.b32.xlu0 %v11672_v61, %s13259_s1  ;;  %s13330_s1 = sld [smem:[#allocation21_spill]] }
0x2471   : > { %4233 = vadd.xlane.f32.xlu1 %v4232_v53 }
0x2476   : > { %v10231_v40 = vld [vmem:[%s13330_s1] ss:$0 sm:$0xff] }
0x24de   : > { %v11679_v29 = vpop.permute.xlu0 %11678 }
0x24df   : > { %v11681_v36 = vunpack.i.h.bf16 %v11679_v29  ;;  %v11680_v21 = vunpack.i.l.bf16 %v11679_v29 }
0x24e1   : > { %v11469_v14 = vpack.c.bf16 %v11681_v36, %v11680_v21 }
0x24e2   : > { %v11684_v38 = vpop.permute.xlu0 %11683 }
0x24e3   : > { %v11686_v43 = vunpack.i.h.bf16 %v11684_v38  ;;  %v11685_v44 = vunpack.i.l.bf16 %v11684_v38 }
0x24e5   : > { %v11472_v45 = vpack.c.bf16 %v11686_v43, %v11685_v44 }
0x24fa   : > { %v5502_v2 = vpop.xlane.xlu1 %5501 }
0x24fb   : > { %v5503_v3 = vmul.f32 0.03125, %v5502_v2 }
0x24fd   : > { %v5504_v4 = vsub.f32 %v5499_v55, %v5503_v3 }
0x24fe   : > { %v4234_v10 = vpop.xlane.xlu1 %4233 }
0x24ff   : > { %v5505_v6 = vmul.f32 %v5504_v4, %v5504_v4  ;;  %v4235_v12 = vmul.f32 0.03125, %v4234_v10 }
0x2501   : > { %v5506_v7 = vsel %vm2534_vm7, %v5505_v6, 0.0  ;;  %v4236_v13 = vadd.f32 1e-05, %v4235_v12 }
0x2502   : > { %5507 = vadd.xlane.f32.xlu1 %v5506_v7 }
0x2503   : > { %11781 = vrsqrt.f32 %v4236_v13 }
0x250d   : > { %v11782_v16 = vpop.eup %11781 }
0x250e   : > { %v4238_v28 = vmul.f32 %v11782_v16, %v4230_v52 }
0x2510   : > { %v4245_v34 = vmul.f32 %v10200_v31, %v4238_v28 }
0x2512   : > { %v12705_v33 = vadd.f32 %v10201_v25, %v4245_v34 }
0x2513   : > { %11668 = vrot.lane.b32.xlu1 %v11677_v50, %s13257_s0  ;;  %s13329_s0 = sld [smem:[#allocation20_spill]] }
0x2519   : > { %v10230_v23 = vld [vmem:[%s13329_s0] ss:$0 sm:$0xff] }
0x258f   : > { %v5508_v60 = vpop.xlane.xlu1 %5507 }
0x2590   : > { %v5509_v0 = vmul.f32 0.03125, %v5508_v60 }
0x2592   : > { %v5510_v18 = vadd.f32 1e-05, %v5509_v0 }
0x2593   : > { %v11669_v19 = vpop.permute.xlu1 %11668 }
0x2594   : > { %11783 = vrsqrt.f32 %v5510_v18  ;;  %v11671_v24 = vunpack.i.h.bf16 %v11669_v19  ;;  %v11670_v26 = vunpack.i.l.bf16 %v11669_v19 }
0x2596   : > { %v11463_v30 = vpack.c.bf16 %v11671_v24, %v11670_v26 }
0x2598   : > { %11464 = vmatpush3.bf16.msra.mxu1 %v11463_v30 }
0x2599   : > { %11465 = vmatprep.subr.bf16.mxu1 %v11890_v5 }
0x259c   : > { %11467 = vmatpush3.bf16.msra.mxu1 %v11466_v32 }
0x259d   : > { %11049 = vmatprep.subr.mxu1 %v11892_v8 }
0x259e   : > { %v11784_v35 = vpop.eup %11783 }
0x259f   : > { %v5512_v37 = vmul.f32 %v11784_v35, %v5504_v4  ;;  %11036 = vmatmul.mubr.msk.f32.vlgmr.msra.gmra.mrb[48].mxu1 %vm1303_vm1, %v12705_v33 }
0x25a0   : > { %11051 = vmatprep.mubr.msk.f32.mxu1 %vm11891_vm0, %v11892_v8 }
0x25a1   : > { %v5519_v42 = vmul.f32 %v10230_v23, %v5512_v37 }
0x25a3   : > { %v12714_v41 = vadd.f32 %v10231_v40, %v5519_v42 }
0x25a5   : > { %11025 = vmatmul.mubr.msk.f32.vlgmr.msra.gmra.mrb[50].mxu0 %vm1303_vm1, %v12714_v41 }
0x25a6   : > { %11470 = vmatpush3.bf16.msra.mxu0 %v11469_v14  ;;  %11046 = vmatprep.mubr.msk.f32.mxu0 %vm11891_vm0, %v11892_v8 }
0x25a7   : > { %11471 = vmatprep.subr.bf16.mxu0 %v11890_v5 }
0x25aa   : > { %11473 = vmatpush3.bf16.msra.mxu0 %v11472_v45 }
0x25ab   : > { %11059 = vmatprep.subr.mxu0 %v11892_v8 }
0x25ad   : > { %11047 = vmatmul.mubr.msk.f32.vlgmr.msra.gmra.mrb[52].mxu0 %vm1303_vm1, %v12705_v33 }
0x25ae   : > { %11061 = vmatprep.mubr.msk.f32.mxu0 %vm11891_vm0, %v11892_v8 }
0x2672   : > { %v5706_v46 = vpop.f32.mrb[48].mxu1 }
0x2673   : > { %v12726_v47 = vadd.f32 %v5706_v46, %v5635_v22  ;;  %v11037_v48 = vpop.f32.mrb[49].mxu1 }
0x2675   : > { %5964 = vrot.lane.b32.xlu0 %v12726_v47, %s13262_s2  ;;  %11050 = vmatpush3.xpose.msk.msra.mxu1 %vm1551_vm2, %v12726_v47 }
0x2676   : > { %11054 = vmatprep.subr.mxu1 %v11892_v8 }
0x2678   : > { %v5614_v49 = vpop.f32.mrb[50].mxu0 }
0x2679   : > { %v12734_v39 = vadd.f32 %v12690_v62, %v5614_v49  ;;  %v11026_v51 = vpop.f32.mrb[51].mxu0 }
0x267b   : > { %5962 = vrot.lane.b32.xlu1 %v12734_v39, %s13262_s2  ;;  %11052 = vmatmul.mubr.msk.f32.vlgmr.msra.gmra.mrb[50].mxu1 %vm1551_vm2, %v12734_v39  ;;  %s1263_s2 = scalar_lea.vmem %s13331_s3, %s12131_s26  ;;  %s13335_s3 = sld [smem:[#allocation24_spill]] }
0x267c   : > { %11056 = vmatprep.mubr.msk.f32.mxu1 %vm11891_vm0, %v11892_v8  ;;  %v12749_v57 = vld [vmem:[%s1263_s2] sm:$0x1f]  ;;  %s13336_s2 = smov 120  }
0x267d   : > { %vm5872_vm10 = vcmp.gt.f32.partialorder %v12749_v57, 0.5 }
0x2680   : > { %v5791_v52 = vpop.f32.mrb[52].mxu0 }
0x2681   : > { %v11048_v54 = vpop.f32.mrb[53].mxu0  ;;  %v5533_v22 = vld [vmem:[%s13335_s3 + $0x8] sm:$0xff]  ;;  %v5532_v30 = vld [vmem:[%s13335_s3] sm:$0xff] }
0x26e7   : > { %v5965_v55 = vpop.permute.xlu0 %5964 }
0x26e8   : > { %11060 = vmatpush3.xpose.msk.msra.mxu0 %vm1551_vm2, %v5965_v55 }
0x26e9   : > { %11069 = vmatprep.subr.mxu0 %v11892_v8 }
0x26ed   : > { %v5963_v56 = vpop.permute.xlu1 %5962 }
0x26ee   : > { %11062 = vmatmul.mubr.msk.f32.vlgmr.msra.gmra.mrb[54].mxu0 %vm1551_vm2, %v5963_v56 }
0x26ef   : > { %11071 = vmatprep.mubr.msk.f32.mxu0 %vm11891_vm0, %v11892_v8  ;;  %11070 = vmatpush3.msra.mxu0 %v5533_v22 }
0x26f0   : > { %11079 = vmatprep.subr.mxu0 %v11892_v8 }
0x274e   : > { %v5867_v53 = vpop.f32.mrb[50].mxu1 }
0x274f   : > { %v5871_v58 = vmul.f32 0.35355338, %v5867_v53  ;;  %v11053_v59 = vpop.f32.mrb[51].mxu1 }
0x2751   : > { %v5873_v61 = vsel %vm5872_vm10, -1e+09, %v5871_v58 }
0x2752   : > { %v5874_v63 = vsel %vm1631_vm4, %v5873_v61, -inf }
0x2753   : > { %5875 = vmax.xlane.f32.xlu0 %v5874_v63 }
0x2769   : > { %5722 = vrot.lane.b32.xlu0 %v12690_v62, %s13332_s4 }
0x276d   : > { %6280 = vrot.lane.b32.xlu0 %v12726_v47, %s13333_s5 }
0x2771   : > { %6278 = vrot.lane.b32.xlu0 %v12734_v39, %s13333_s5 }
0x27c1   : > { %v6036_v1 = vpop.f32.mrb[54].mxu0 }
0x27c2   : > { %v6040_v50 = vmul.f32 0.35355338, %v6036_v1  ;;  %v11063_v2 = vpop.f32.mrb[55].mxu0 }
0x27c4   : > { %v6041_v3 = vsel %vm5872_vm10, -1e+09, %v6040_v50 }
0x27c5   : > { %v6042_v4 = vsel %vm1631_vm4, %v6041_v3, -inf }
0x27c6   : > { %6043 = vmax.xlane.f32.xlu1 %v6042_v4 }
0x27e0   : > { %v5876_v6 = vpop.xlane.xlu0 %5875 }
0x27e1   : > { %v5877_v7 = vsub.f32 %v5873_v61, %v5876_v6 }
0x27e3   : > { %v5878_v9 = vmul.f32 1.442695, %v5877_v7 }
0x27e4   : > { %v5723_v17 = vpop.permute.xlu0 %5722 }
0x27e5   : > { %11785 = vpow2.f32 %v5878_v9  ;;  %v12764_v62 = vadd.f32 %v5791_v52, %v5723_v17  ;;  %v5535_v17 = vld [vmem:[%s13335_s3 + $0x18] sm:$0xff] }
0x27e7   : > { %11055 = vmatpush3.msk.msra.mxu1 %vm1648_vm5, %v12764_v62 }
0x27e8   : > { %11064 = vmatprep.subr.mxu1 %v11892_v8  ;;  %v6281_v34 = vpop.permute.xlu0 %6280 }
0x27ec   : > { %v6279_v35 = vpop.permute.xlu0 %6278 }
0x27ef   : > { %v11786_v10 = vpop.eup %11785 }
0x27f0   : > { %v5880_v12 = vsel %vm1631_vm4, %v11786_v10, 0.0 }
0x27f1   : > { %5881 = vadd.xlane.f32.xlu1 %v5880_v12 }
0x2853   : > { %v6044_v13 = vpop.xlane.xlu1 %6043 }
0x2854   : > { %v6045_v11 = vsub.f32 %v6041_v3, %v6044_v13 }
0x2856   : > { %v6046_v60 = vmul.f32 1.442695, %v6045_v11 }
0x2858   : > { %11787 = vpow2.f32 %v6046_v60 }
0x2862   : > { %v11788_v0 = vpop.eup %11787 }
0x2863   : > { %v6048_v16 = vsel %vm1631_vm4, %v11788_v0, 0.0 }
0x2864   : > { %6049 = vadd.xlane.f32.xlu1 %v6048_v16 }
0x2875   : > { %6055 = vrot.lane.b32.xlu1 %v12764_v62, %s13336_s2 }
0x287e   : > { %v5882_v18 = vpop.xlane.xlu1 %5881 }
0x287f   : > { %11789 = vrcp.f32 %v5882_v18 }
0x2889   : > { %v11790_v19 = vpop.eup %11789 }
0x288a   : > { %v5884_v20 = vmul.f32 %v11790_v19, %v11786_v10  ;;  %v10259_v19 = vld [vmem:[%s13338_s8] ss:$0 sm:$0xff] }
0x288c   : > { %5885 = vst.msk [vmem:[%s12775_s6] sm:$0x1f] %vm1631_vm4, %v5884_v20  ;;  %11057 = vmatmul.mubr.msk.f32.vlgmr.msra.gmra.mrb[52].mxu1 %vm1644_vm6, %v5884_v20 }
0x288d   : > { %11066 = vmatprep.mubr.msk.f32.mxu1 %vm11891_vm0, %v11892_v8 }
0x28f1   : > { %v6050_v24 = vpop.xlane.xlu1 %6049 }
0x28f2   : > { %11791 = vrcp.f32 %v6050_v24 }
0x28f5   : > { %v6056_v26 = vpop.permute.xlu1 %6055 }
0x28f6   : > { %11065 = vmatpush3.msk.msra.mxu1 %vm1648_vm5, %v6056_v26 }
0x28f7   : > { %11074 = vmatprep.subr.mxu1 %v11892_v8 }
0x28fc   : > { %v11792_v27 = vpop.eup %11791 }
0x28fd   : > { %v6052_v28 = vmul.f32 %v11792_v27, %v11788_v0 }
0x28ff   : > { %10242 = vst.msk [vmem:[%s12775_s6 + $0x8] sm:$0x1f] %vm1631_vm4, %v6052_v28  ;;  %11067 = vmatmul.mubr.msk.f32.vlgmr.msra.gmra.mrb[54].mxu1 %vm1644_vm6, %v6052_v28 }
0x2900   : > { %11075 = vmatpush3.msra.mxu1 %v5532_v30  ;;  %11076 = vmatprep.mubr.msk.f32.mxu1 %vm11891_vm0, %v11892_v8 }
0x2901   : > { %11084 = vmatprep.subr.mxu1 %v11892_v8 }
0x295f   : > { %v5958_v31 = vpop.f32.mrb[52].mxu1 }
0x2960   : > { %v11058_v32 = vpop.f32.mrb[53].mxu1  ;;  %11077 = vmatmul.mubr.msk.f32.vlgmr.msra.gmra.mrb[56].mxu1 %vm1551_vm2, %v5958_v31 }
0x2961   : > { %11086 = vmatprep.mubr.msk.f32.mxu1 %vm11891_vm0, %v11892_v8 }
0x29d2   : > { %v6128_v29 = vpop.f32.mrb[54].mxu1 }
0x29d3   : > { %v11068_v25 = vpop.f32.mrb[55].mxu1  ;;  %11072 = vmatmul.mubr.msk.f32.vlgmr.msra.gmra.mrb[56].mxu0 %vm1551_vm2, %v6128_v29 }
0x29d4   : > { %11080 = vmatpush3.xpose.msk.msra.mxu0 %vm1551_vm2, %v6281_v34  ;;  %11081 = vmatprep.mubr.msk.f32.mxu0 %vm11891_vm0, %v11892_v8  ;;  %v6801_v25 = vld [vmem:[%s13339_s12] sm:$0xff] }
0x29d5   : > { %11089 = vmatprep.subr.mxu0 %v11892_v8 }
0x29d7   : > { %11082 = vmatmul.mubr.msk.f32.vlgmr.msra.gmra.mrb[58].mxu0 %vm1551_vm2, %v6279_v35  ;;  %v6802_v35 = vld [vmem:[%s13339_s12 + $0x8] sm:$0xff] }
0x29d8   : > { %11091 = vmatprep.mubr.msk.f32.mxu0 %vm11891_vm0, %v11892_v8 }
0x2a33   : > { %v6274_v36 = vpop.f32.mrb[56].mxu1 }
0x2a34   : > { %v11078_v21 = vpop.f32.mrb[57].mxu1 }
0x2a35   : > { %v6804_v21 = vld [vmem:[%s13339_s12 + $0x18] sm:$0xff] }
0x2aa6   : > { %v6201_v23 = vpop.f32.mrb[56].mxu0 }
0x2aa7   : > { %v6275_v37 = vadd.f32 %v6274_v36, %v6201_v23  ;;  %v11073_v38 = vpop.f32.mrb[57].mxu0  ;;  %v11475_v36 = vpack.c.bf16 %v6802_v35, %v6801_v25  ;;  %v10266_v25 = vld [vmem:[%s13346_s24] ss:$0 sm:$0xff] }
0x2aa8   : > { %v6807_v38 = vld [vmem:[%s13340_s13 + $0x8] sm:$0xff] }
0x2aaa   : > { %v6352_v40 = vpop.f32.mrb[58].mxu0 }
0x2aab   : > { %v6356_v42 = vmul.f32 0.35355338, %v6352_v40  ;;  %v11083_v14 = vpop.f32.mrb[59].mxu0  ;;  %v6808_v40 = vld [vmem:[%s13340_s13 + $0x10] sm:$0xff] }
0x2aac   : > { %v6809_v14 = vld [vmem:[%s13340_s13 + $0x18] sm:$0xff] }
0x2aad   : > { %v6357_v43 = vsel %vm5872_vm10, -1e+09, %v6356_v42 }
0x2aae   : > { %v6358_v44 = vsel %vm1631_vm4, %v6357_v43, -inf }
0x2aaf   : > { %6359 = vmax.xlane.f32.xlu0 %v6358_v44  ;;  %v6810_v44 = vld [vmem:[%s13340_s13 + $0x20] sm:$0xff] }
0x2ac5   : > { %6371 = vrot.lane.b32.xlu0 %v12764_v62, %s13333_s5 }
0x2ac9   : > { %6522 = vrot.lane.b32.xlu0 %v12734_v39, %s13337_s11 }
0x2b3c   : > { %v6360_v45 = vpop.xlane.xlu0 %6359 }
0x2b3d   : > { %v6361_v46 = vsub.f32 %v6357_v43, %v6360_v45  ;;  %v11484_v43 = vpack.c.bf16 %v6809_v14, %v6808_v40  ;;  %v6811_v45 = vld [vmem:[%s13340_s13 + $0x28] sm:$0xff] }
0x2b3f   : > { %v6362_v48 = vmul.f32 1.442695, %v6361_v46  ;;  %v11487_v46 = vpack.c.bf16 %v6811_v45, %v6810_v44 }
0x2b40   : > { %v6372_v49 = vpop.permute.xlu0 %6371 }
0x2b41   : > { %11793 = vpow2.f32 %v6362_v48  ;;  %11085 = vmatpush3.msk.msra.mxu1 %vm1648_vm5, %v6372_v49 }
0x2b42   : > { %11094 = vmatprep.subr.mxu1 %v11892_v8 }
0x2b44   : > { %v6523_v53 = vpop.permute.xlu0 %6522 }
0x2b4b   : > { %v11794_v51 = vpop.eup %11793 }
0x2b4c   : > { %v6364_v52 = vsel %vm1631_vm4, %v11794_v51, 0.0 }
0x2b4d   : > { %6365 = vadd.xlane.f32.xlu1 %v6364_v52 }
0x2b5e   : > { %6524 = vrot.lane.b32.xlu1 %v12726_v47, %s13337_s11  ;;  %v5534_v47 = vld [vmem:[%s13335_s3 + $0x10] sm:$0xff] }
0x2b5f   : > { %11090 = vmatpush3.msra.mxu0 %v5534_v47  ;;  %v6812_v47 = vld [vmem:[%s13340_s13 + $0x30] sm:$0xff] }
0x2b60   : > { %11099 = vmatprep.subr.mxu0 %v11892_v8 }
0x2bda   : > { %v6366_v54 = vpop.xlane.xlu1 %6365 }
0x2bdb   : > { %11795 = vrcp.f32 %v6366_v54  ;;  %v10260_v54 = vld [vmem:[%s13341_s14] ss:$0 sm:$0xff] }
0x2bde   : > { %v6525_v56 = vpop.permute.xlu1 %6524 }
0x2be5   : > { %v11796_v39 = vpop.eup %11795 }
0x2be6   : > { %v6368_v55 = vmul.f32 %v11796_v39, %v11794_v51 }
0x2be8   : > { %10249 = vst.msk [vmem:[%s12775_s6 + $0x10] sm:$0x1f] %vm1631_vm4, %v6368_v55  ;;  %11087 = vmatmul.mubr.msk.f32.vlgmr.msra.gmra.mrb[58].mxu1 %vm1644_vm6, %v6368_v55  ;;  %v10261_v55 = vld [vmem:[%s13342_s17] ss:$0 sm:$0xff] }
0x2be9   : > { %11095 = vmatpush3.xpose.msk.msra.mxu1 %vm1551_vm2, %v6525_v56  ;;  %11096 = vmatprep.mubr.msk.f32.mxu1 %vm11891_vm0, %v11892_v8 }
0x2bea   : > { %11104 = vmatprep.subr.mxu1 %v11892_v8 }
0x2bec   : > { %11097 = vmatmul.mubr.msk.f32.vlgmr.msra.gmra.mrb[60].mxu1 %vm1551_vm2, %v6523_v53 }
0x2bed   : > { %11106 = vmatprep.mubr.msk.f32.mxu1 %vm11891_vm0, %v11892_v8  ;;  %11105 = vmatpush3.msra.mxu1 %v5535_v17 }
0x2bee   : > { %11480 = vmatprep.subr.bf16.mxu1 %v11890_v5 }
0x2cbb   : > { %v6444_v58 = vpop.f32.mrb[58].mxu1 }
0x2cbc   : > { %v11088_v59 = vpop.f32.mrb[59].mxu1  ;;  %11092 = vmatmul.mubr.msk.f32.vlgmr.msra.gmra.mrb[60].mxu0 %vm1551_vm2, %v6444_v58  ;;  %v6813_v58 = vld [vmem:[%s13340_s13 + $0x38] sm:$0xff] }
0x2cbd   : > { %11101 = vmatprep.mubr.msk.f32.mxu0 %vm11891_vm0, %v11892_v8  ;;  %v11490_v59 = vpack.c.bf16 %v6813_v58, %v6812_v47 }
0x2cbf   : > { %v6596_v61 = vpop.f32.mrb[60].mxu1 }
0x2cc0   : > { %v6600_v63 = vmul.f32 0.35355338, %v6596_v61  ;;  %v11098_v1 = vpop.f32.mrb[61].mxu1  ;;  %v10262_v61 = vld [vmem:[%s13343_s19] ss:$0 sm:$0xff] }
0x2cc2   : > { %v6601_v50 = vsel %vm5872_vm10, -1e+09, %v6600_v63 }
0x2cc3   : > { %v6602_v2 = vsel %vm1631_vm4, %v6601_v50, -inf }
0x2cc4   : > { %6603 = vmax.xlane.f32.xlu1 %v6602_v2 }
0x2d51   : > { %v6604_v3 = vpop.xlane.xlu1 %6603 }
0x2d52   : > { %v6605_v4 = vsub.f32 %v6601_v50, %v6604_v3  ;;  %v10264_v3 = vld [vmem:[%s13344_s20] ss:$0 sm:$0xff] }
0x2d54   : > { %v6606_v6 = vmul.f32 1.442695, %v6605_v4 }
0x2d56   : > { %11797 = vpow2.f32 %v6606_v6 }
0x2d60   : > { %v11798_v7 = vpop.eup %11797 }
0x2d61   : > { %v6608_v9 = vsel %vm1631_vm4, %v11798_v7, 0.0 }
0x2d62   : > { %6609 = vadd.xlane.f32.xlu0 %v6608_v9 }
0x2d78   : > { %6615 = vrot.lane.b32.xlu0 %v12764_v62, %s13337_s11 }
0x2d8f   : > { %v6517_v10 = vpop.f32.mrb[60].mxu0 }
0x2d90   : > { %v6521_v12 = vadd.f32 %v6517_v10, %v6275_v37  ;;  %v11093_v13 = vpop.f32.mrb[61].mxu0  ;;  %v6806_v37 = vld [vmem:[%s13340_s13] sm:$0xff]  ;;  %v10270_v10 = vld [vmem:[%s13320_s18 + $0x30] sm:$0xff] }
0x2d91   : > { %v11481_v42 = vpack.c.bf16 %v6807_v38, %v6806_v37 }
0x2def   : > { %v6610_v11 = vpop.xlane.xlu0 %6609 }
0x2df0   : > { %11799 = vrcp.f32 %v6610_v11 }
0x2df3   : > { %v6616_v60 = vpop.permute.xlu0 %6615 }
0x2df4   : > { %11100 = vmatpush3.msk.msra.mxu0 %vm1648_vm5, %v6616_v60 }
0x2df5   : > { %11474 = vmatprep.subr.bf16.mxu0 %v11890_v5 }
0x2dfa   : > { %v11800_v0 = vpop.eup %11799 }
0x2dfb   : > { %v6612_v16 = vmul.f32 %v11800_v0, %v11798_v7 }
0x2dfd   : > { %10255 = vst.msk [vmem:[%s12775_s6 + $0x18] sm:$0x1f] %vm1631_vm4, %v6612_v16  ;;  %11102 = vmatmul.mubr.msk.f32.vlgmr.msra.gmra.mrb[62].mxu0 %vm1644_vm6, %v6612_v16 }
0x2dfe   : > { %11117 = vmatprep.mubr.msk.f32.mxu0 %vm11891_vm0, %v11892_v8  ;;  %11476 = vmatpush3.bf16.msra.mxu0 %v11475_v36 }
0x2dff   : > { %11477 = vmatprep.subr.bf16.mxu0 %v11890_v5 }
0x2ed0   : > { %v6688_v62 = vpop.f32.mrb[62].mxu0 }
0x2ed1   : > { %v11103_v18 = vpop.f32.mrb[63].mxu0  ;;  %11107 = vmatmul.mubr.msk.f32.vlgmr.msra.gmra.mrb[62].mxu1 %vm1551_vm2, %v6688_v62 }
0x2ed2   : > { %11136 = vmatprep.mubr.msk.f32.mxu1 %vm11891_vm0, %v11892_v8  ;;  %11482 = vmatpush3.bf16.msra.mxu1 %v11481_v42  ;;  %v10268_v18 = vld [vmem:[%s13320_s18 + $0x20] sm:$0xff] }
0x2ed3   : > { %11483 = vmatprep.subr.bf16.mxu1 %v11890_v5 }
0x2ed6   : > { %11485 = vmatpush3.bf16.msra.mxu1 %v11484_v43 }
0x2ed7   : > { %11486 = vmatprep.subr.bf16.mxu1 %v11890_v5 }
0x2eda   : > { %11488 = vmatpush3.bf16.msra.mxu1 %v11487_v46 }
0x2edb   : > { %11489 = vmatprep.subr.bf16.mxu1 %v11890_v5 }
0x2ede   : > { %11491 = vmatpush3.bf16.msra.mxu1 %v11490_v59 }
0x2edf   : > { %11504 = vmatprep.subr.bf16.mxu1 %v11890_v5 }
0x2fa4   : > { %v6761_v20 = vpop.f32.mrb[62].mxu1 }
0x2fa5   : > { %v6765_v22 = vadd.f32 %v6761_v20, %v6521_v12  ;;  %v11108_v24 = vpop.f32.mrb[63].mxu1  ;;  %v10271_v12 = vld [vmem:[%s13320_s18 + $0x38] sm:$0xff] }
0x2fa6   : > { %v12884_v13 = vpack.i.bf16 %v10271_v12, %v10270_v10  ;;  %v11496_v24 = vpack.c.bf16 %v10271_v12, %v10270_v10 }
0x2fa7   : > { %v6772_v26 = vadd.f32 %v10259_v19, %v6765_v22  ;;  %v10269_v19 = vld [vmem:[%s13320_s18 + $0x28] sm:$0xff] }
0x2fa8   : > { %11693 = vrot.lane.b32.xlu0 %v12884_v13, %s13345_s21  ;;  %v11687_v20 = vpack.i.bf16 %v10269_v19, %v10268_v18  ;;  %v11493_v22 = vpack.c.bf16 %v10269_v19, %v10268_v18 }
0x2fa9   : > { %v6773_v27 = vadd.f32 %v6772_v26, %v12714_v41  ;;  %v6803_v41 = vld [vmem:[%s13339_s12 + $0x10] sm:$0xff]  ;;  %v12895_v26 = vld [vmem:[%s13321_s23 + $0x1] ss:$0 sm:$0xff] }
0x2faa   : > { %v11478_v23 = vpack.c.bf16 %v6804_v21, %v6803_v41  ;;  %v10267_v41 = vld [vmem:[%s13347_s25] ss:$0 sm:$0xff] }
0x2fab   : > { %v6774_v28 = vsel %vm2534_vm7, %v6773_v27, 0.0 }
0x2fac   : > { %6775 = vadd.xlane.f32.xlu1 %v6774_v28  ;;  %11479 = vmatpush3.bf16.msra.mxu0 %v11478_v23 }
0x2fad   : > { %11492 = vmatprep.subr.bf16.mxu0 %v11890_v5  ;;  %7117 = vrot.lane.b32.xlu0 %v12895_v26, %s13345_s21 }
0x301a   : > { %v11694_v36 = vpop.permute.xlu0 %11693 }
0x301b   : > { %v11696_v37 = vunpack.i.h.bf16 %v11694_v36  ;;  %v11695_v38 = vunpack.i.l.bf16 %v11694_v36 }
0x301d   : > { %v11502_v42 = vpack.c.bf16 %v11696_v37, %v11695_v38 }
0x3039   : > { %v6776_v30 = vpop.xlane.xlu1 %6775 }
0x303a   : > { %v6777_v31 = vmul.f32 0.03125, %v6776_v30 }
0x303c   : > { %v6778_v32 = vsub.f32 %v6773_v27, %v6777_v31 }
0x303e   : > { %v6779_v34 = vmul.f32 %v6778_v32, %v6778_v32 }
0x3040   : > { %v6780_v29 = vsel %vm2534_vm7, %v6779_v34, 0.0 }
0x3041   : > { %6781 = vadd.xlane.f32.xlu1 %v6780_v29 }
0x30ce   : > { %v6782_v48 = vpop.xlane.xlu1 %6781 }
0x30cf   : > { %v6783_v49 = vmul.f32 0.03125, %v6782_v48 }
0x30d1   : > { %v6784_v51 = vadd.f32 1e-05, %v6783_v49  ;;  %v7118_v49 = vpop.permute.xlu0 %7117 }
0x30d3   : > { %11801 = vrsqrt.f32 %v6784_v51 }
0x30dd   : > { %v11802_v52 = vpop.eup %11801 }
0x30de   : > { %v6786_v39 = vmul.f32 %v11802_v52, %v6778_v32 }
0x30e0   : > { %v6793_v56 = vmul.f32 %v10260_v54, %v6786_v39 }
0x30e2   : > { %v6800_v53 = vadd.f32 %v10261_v55, %v6793_v56 }
0x30e4   : > { %11118 = vmatmul.mubr.msk.f32.vlgmr.msra.gmra.mrb[64].mxu0 %vm1303_vm1, %v6800_v53 }
0x30e5   : > { %11147 = vmatprep.mubr.msk.f32.mxu0 %vm11891_vm0, %v11892_v8  ;;  %11494 = vmatpush3.bf16.msra.mxu0 %v11493_v22 }
0x30e6   : > { %11495 = vmatprep.subr.bf16.mxu0 %v11890_v5 }
0x30e9   : > { %11497 = vmatpush3.bf16.msra.mxu0 %v11496_v24 }
0x30ea   : > { %11498 = vmatprep.subr.bf16.mxu0 %v11890_v5 }
0x31b7   : > { %v6892_v63 = vpop.f32.mrb[64].mxu0 }
0x31b8   : > { %v6893_v1 = vadd.f32 %v10262_v61, %v6892_v63  ;;  %v11119_v50 = vpop.f32.mrb[65].mxu0 }
0x31ba   : > { %v6896_v2 = vmax.f32 %v6893_v1, 0.0 }
0x31bc   : > { %11137 = vmatmul.mubr.msk.f32.vlgmr.msra.gmra.mrb[64].mxu1 %vm2665_vm8, %v6896_v2 }
0x31bd   : > { %11169 = vmatprep.mubr.msk.f32.mxu1 %vm11891_vm0, %v11892_v8 }
0x328f   : > { %v6972_v4 = vpop.f32.mrb[64].mxu1 }
0x3290   : > { %v6973_v6 = vadd.f32 %v10264_v3, %v6972_v4  ;;  %v11138_v7 = vpop.f32.mrb[65].mxu1 }
0x3292   : > { %v6976_v9 = vadd.f32 %v6973_v6, %v6800_v53 }
0x3294   : > { %v6977_v17 = vsel %vm2534_vm7, %v6976_v9, 0.0 }
0x3295   : > { %6978 = vadd.xlane.f32.xlu1 %v6977_v17 }
0x3322   : > { %v6979_v11 = vpop.xlane.xlu1 %6978 }
0x3323   : > { %v6980_v60 = vmul.f32 0.03125, %v6979_v11 }
0x3325   : > { %v6981_v0 = vsub.f32 %v6976_v9, %v6980_v60 }
0x3327   : > { %v6982_v16 = vmul.f32 %v6981_v0, %v6981_v0 }
0x3329   : > { %v6983_v62 = vsel %vm2534_vm7, %v6982_v16, 0.0 }
0x332a   : > { %6984 = vadd.xlane.f32.xlu1 %v6983_v62 }
0x333b   : > { %11688 = vrot.lane.b32.xlu1 %v11687_v20, %s13345_s21 }
0x333f   : > { %11698 = vrot.lane.b32.xlu1 %v11687_v20, %s13332_s4 }
0x33b7   : > { %v6985_v27 = vpop.xlane.xlu1 %6984 }
0x33b8   : > { %v6986_v28 = vmul.f32 0.03125, %v6985_v27 }
0x33ba   : > { %v6987_v30 = vadd.f32 1e-05, %v6986_v28 }
0x33bb   : > { %v11689_v31 = vpop.permute.xlu1 %11688 }
0x33bc   : > { %11803 = vrsqrt.f32 %v6987_v30  ;;  %v11691_v34 = vunpack.i.h.bf16 %v11689_v31  ;;  %v11690_v29 = vunpack.i.l.bf16 %v11689_v31  ;;  %v10274_v30 = vld [vmem:[%s13325_s7 + $0x28] sm:$0xff] }
0x33be   : > { %v11499_v23 = vpack.c.bf16 %v11691_v34, %v11690_v29 }
0x33bf   : > { %v11699_v44 = vpop.permute.xlu1 %11698 }
0x33c0   : > { %v11701_v45 = vunpack.i.h.bf16 %v11699_v44  ;;  %v11700_v46 = vunpack.i.l.bf16 %v11699_v44 }
0x33c2   : > { %v11505_v48 = vpack.c.bf16 %v11701_v45, %v11700_v46 }
0x33c4   : > { %11506 = vmatpush3.bf16.msra.mxu1 %v11505_v48 }
0x33c5   : > { %11507 = vmatprep.subr.bf16.mxu1 %v11890_v5 }
0x33c6   : > { %v11804_v32 = vpop.eup %11803 }
0x33c7   : > { %v6989_v35 = vmul.f32 %v11804_v32, %v6981_v0 }
0x33c9   : > { %v6996_v21 = vmul.f32 %v10266_v25, %v6989_v35  ;;  %v10273_v25 = vld [vmem:[%s13325_s7 + $0x20] sm:$0xff] }
0x33cb   : > { %v12901_v40 = vadd.f32 %v10267_v41, %v6996_v21 }
0x33cd   : > { %11148 = vmatmul.mubr.msk.f32.vlgmr.msra.gmra.mrb[66].mxu0 %vm1303_vm1, %v12901_v40 }
0x33ce   : > { %11500 = vmatpush3.bf16.msra.mxu0 %v11499_v23  ;;  %11158 = vmatprep.mubr.msk.f32.mxu0 %vm11891_vm0, %v11892_v8 }
0x33cf   : > { %11501 = vmatprep.subr.bf16.mxu0 %v11890_v5 }
0x33d2   : > { %11503 = vmatpush3.bf16.msra.mxu0 %v11502_v42 }
0x33d3   : > { %11172 = vmatprep.subr.mxu0 %v11892_v8 }
0x33d5   : > { %11159 = vmatmul.mubr.msk.f32.vlgmr.msra.gmra.mrb[68].mxu0 %vm1303_vm1, %v12901_v40 }
0x33d6   : > { %11174 = vmatprep.mubr.msk.f32.mxu0 %vm11891_vm0, %v11892_v8 }
0x34a0   : > { %v7097_v14 = vpop.f32.mrb[66].mxu0 }
0x34a1   : > { %v11149_v43 = vpop.f32.mrb[67].mxu0  ;;  %v12922_v39 = vadd.f32 %v12895_v26, %v7097_v14 }
0x34a8   : > { %v7186_v51 = vpop.f32.mrb[68].mxu0 }
0x34a9   : > { %v12915_v52 = vadd.f32 %v7186_v51, %v7118_v49  ;;  %v11160_v54 = vpop.f32.mrb[69].mxu0 }
0x34ab   : > { %7444 = vrot.lane.b32.xlu0 %v12915_v52, %s13336_s2  ;;  %11173 = vmatpush3.xpose.msk.msra.mxu0 %vm1551_vm2, %v12915_v52 }
0x34ac   : > { %11182 = vmatprep.subr.mxu0 %v11892_v8 }
0x34ae   : > { %11175 = vmatmul.mubr.msk.f32.vlgmr.msra.gmra.mrb[70].mxu0 %vm1551_vm2, %v12922_v39 }
0x34af   : > { %7442 = vrot.lane.b32.xlu0 %v12922_v39, %s13336_s2  ;;  %11184 = vmatprep.mubr.msk.f32.mxu0 %vm11891_vm0, %v11892_v8 }
0x34b3   : > { %11703 = vrot.lane.b32.xlu0 %v12884_v13, %s13332_s4 }
0x351d   : > { %v7445_v55 = vpop.permute.xlu0 %7444 }
0x351e   : > { %11183 = vmatpush3.xpose.msk.msra.mxu0 %vm1551_vm2, %v7445_v55 }
0x351f   : > { %11192 = vmatprep.subr.mxu0 %v11892_v8 }
0x3521   : > { %v7443_v56 = vpop.permute.xlu0 %7442 }
0x3522   : > { %11185 = vmatmul.mubr.msk.f32.vlgmr.msra.gmra.mrb[72].mxu0 %vm1551_vm2, %v7443_v56 }
0x3523   : > { %11194 = vmatprep.mubr.msk.f32.mxu0 %vm11891_vm0, %v11892_v8  ;;  %11193 = vmatpush3.msra.mxu0 %v10274_v30 }
0x3524   : > { %11202 = vmatprep.subr.mxu0 %v11892_v8 }
0x3525   : > { %v11704_v53 = vpop.permute.xlu0 %11703 }
0x3526   : > { %v11706_v47 = vunpack.i.h.bf16 %v11704_v53  ;;  %v11705_v58 = vunpack.i.l.bf16 %v11704_v53 }
0x3528   : > { %v11508_v59 = vpack.c.bf16 %v11706_v47, %v11705_v58 }
0x352a   : > { %11509 = vmatpush3.bf16.msra.mxu1 %v11508_v59 }
0x352b   : > { %11177 = vmatprep.subr.mxu1 %v11892_v8 }
0x352d   : > { %11170 = vmatmul.mubr.msk.f32.vlgmr.msra.gmra.mrb[66].mxu1 %vm1303_vm1, %v12901_v40 }
0x352e   : > { %11179 = vmatprep.mubr.msk.f32.mxu1 %vm11891_vm0, %v11892_v8 }
0x3581   : > { %v7347_v61 = vpop.f32.mrb[70].mxu0 }
0x3582   : > { %v7351_v63 = vmul.f32 0.35355338, %v7347_v61  ;;  %v11176_v1 = vpop.f32.mrb[71].mxu0 }
0x3583   : > { %v10275_v1 = vld [vmem:[%s13325_s7 + $0x30] sm:$0xff] }
0x3584   : > { %v7352_v50 = vsel %vm4598_vm9, -1e+09, %v7351_v63 }
0x3585   : > { %v7353_v2 = vsel %vm1631_vm4, %v7352_v50, -inf }
0x3586   : > { %7354 = vmax.xlane.f32.xlu1 %v7353_v2 }
0x35f5   : > { %v7516_v3 = vpop.f32.mrb[72].mxu0 }
0x35f6   : > { %v7520_v4 = vmul.f32 0.35355338, %v7516_v3  ;;  %v11186_v6 = vpop.f32.mrb[73].mxu0 }
0x35f8   : > { %v7521_v7 = vsel %vm4598_vm9, -1e+09, %v7520_v4 }
0x35f9   : > { %v7522_v9 = vsel %vm1631_vm4, %v7521_v7, -inf }
0x35fa   : > { %7523 = vmax.xlane.f32.xlu0 %v7522_v9 }
0x3600   : > { %v7271_v17 = vpop.f32.mrb[66].mxu1 }
0x3601   : > { %v11171_v10 = vpop.f32.mrb[67].mxu1 }
0x3610   : > { %7202 = vrot.lane.b32.xlu0 %v12895_v26, %s13332_s4 }
0x3613   : > { %v7355_v12 = vpop.xlane.xlu1 %7354 }
0x3614   : > { %v7356_v13 = vsub.f32 %v7352_v50, %v7355_v12  ;;  %7760 = vrot.lane.b32.xlu0 %v12915_v52, %s13333_s5 }
0x3616   : > { %v7357_v11 = vmul.f32 1.442695, %v7356_v13 }
0x3618   : > { %11805 = vpow2.f32 %v7357_v11  ;;  %7758 = vrot.lane.b32.xlu0 %v12922_v39, %s13333_s5 }
0x3622   : > { %v11806_v60 = vpop.eup %11805 }
0x3623   : > { %v7359_v0 = vsel %vm1631_vm4, %v11806_v60, 0.0 }
0x3624   : > { %7360 = vadd.xlane.f32.xlu1 %v7359_v0 }
0x3687   : > { %v7524_v16 = vpop.xlane.xlu0 %7523 }
0x3688   : > { %v7525_v62 = vsub.f32 %v7521_v7, %v7524_v16 }
0x368a   : > { %v7526_v18 = vmul.f32 1.442695, %v7525_v62 }
0x368b   : > { %v7203_v19 = vpop.permute.xlu0 %7202 }
0x368c   : > { %11807 = vpow2.f32 %v7526_v18  ;;  %v12956_v20 = vadd.f32 %v7271_v17, %v7203_v19 }
0x368e   : > { %11178 = vmatpush3.msk.msra.mxu1 %vm1648_vm5, %v12956_v20 }
0x368f   : > { %11187 = vmatprep.subr.mxu1 %v11892_v8  ;;  %v7761_v41 = vpop.permute.xlu0 %7760 }
0x3693   : > { %v7759_v37 = vpop.permute.xlu0 %7758 }
0x3696   : > { %v11808_v22 = vpop.eup %11807 }
0x3697   : > { %v7528_v24 = vsel %vm1631_vm4, %v11808_v22, 0.0 }
0x3698   : > { %7529 = vadd.xlane.f32.xlu1 %v7528_v24 }
0x36a9   : > { %7535 = vrot.lane.b32.xlu1 %v12956_v20, %s13336_s2 }
0x36b1   : > { %v7361_v26 = vpop.xlane.xlu1 %7360 }
0x36b2   : > { %11809 = vrcp.f32 %v7361_v26  ;;  %v10308_v26 = vld [vmem:[%s13326_s28 + $0x1] ss:$0 sm:$0xff] }
0x36bc   : > { %v11810_v27 = vpop.eup %11809 }
0x36bd   : > { %v7363_v28 = vmul.f32 %v11810_v27, %v11806_v60  ;;  %v10276_v60 = vld [vmem:[%s13325_s7 + $0x38] sm:$0xff] }
0x36bf   : > { %10286 = vst.msk [vmem:[%s12601_s15 + $0x20] sm:$0x1f] %vm1631_vm4, %v7363_v28  ;;  %11180 = vmatmul.mubr.msk.f32.vlgmr.msra.gmra.mrb[68].mxu1 %vm1644_vm6, %v7363_v28 }
0x36c0   : > { %11189 = vmatprep.mubr.msk.f32.mxu1 %vm11891_vm0, %v11892_v8 }
0x3725   : > { %v7530_v31 = vpop.xlane.xlu1 %7529 }
0x3726   : > { %11811 = vrcp.f32 %v7530_v31 }
0x3729   : > { %v7536_v32 = vpop.permute.xlu1 %7535 }
0x372a   : > { %11188 = vmatpush3.msk.msra.mxu1 %vm1648_vm5, %v7536_v32 }
0x372b   : > { %11197 = vmatprep.subr.mxu1 %v11892_v8 }
0x3730   : > { %v11812_v34 = vpop.eup %11811 }
0x3731   : > { %v7532_v29 = vmul.f32 %v11812_v34, %v11808_v22 }
0x3733   : > { %10291 = vst.msk [vmem:[%s12601_s15 + $0x28] sm:$0x1f] %vm1631_vm4, %v7532_v29  ;;  %11190 = vmatmul.mubr.msk.f32.vlgmr.msra.gmra.mrb[70].mxu1 %vm1644_vm6, %v7532_v29  ;;  %v10313_v29 = vld [vmem:[%s13327_s16 + $0x30] sm:$0xff] }
0x3734   : > { %11198 = vmatpush3.msra.mxu1 %v10273_v25  ;;  %11199 = vmatprep.mubr.msk.f32.mxu1 %vm11891_vm0, %v11892_v8  ;;  %v10314_v25 = vld [vmem:[%s13327_s16 + $0x38] sm:$0xff] }
0x3735   : > { %11207 = vmatprep.subr.mxu1 %v11892_v8 }
0x3792   : > { %v7438_v35 = vpop.f32.mrb[68].mxu1 }
0x3793   : > { %v11181_v36 = vpop.f32.mrb[69].mxu1  ;;  %11200 = vmatmul.mubr.msk.f32.vlgmr.msra.gmra.mrb[72].mxu1 %vm1551_vm2, %v7438_v35  ;;  %v11712_v35 = vpack.i.bf16 %v10314_v25, %v10313_v29 }
0x3794   : > { %11209 = vmatprep.mubr.msk.f32.mxu1 %vm11891_vm0, %v11892_v8  ;;  %v13043_v36 = vld [vmem:[%s13328_s10 + $0x1] ss:$0 sm:$0xff] }
0x3806   : > { %v7608_v21 = vpop.f32.mrb[70].mxu1 }
0x3807   : > { %v11191_v23 = vpop.f32.mrb[71].mxu1  ;;  %11195 = vmatmul.mubr.msk.f32.vlgmr.msra.gmra.mrb[74].mxu0 %vm1551_vm2, %v7608_v21  ;;  %v10312_v21 = vld [vmem:[%s13327_s16 + $0x28] sm:$0xff] }
0x3808   : > { %11203 = vmatpush3.xpose.msk.msra.mxu0 %vm1551_vm2, %v7761_v41  ;;  %11204 = vmatprep.mubr.msk.f32.mxu0 %vm11891_vm0, %v11892_v8  ;;  %v10311_v41 = vld [vmem:[%s13327_s16 + $0x20] sm:$0xff] }
0x3809   : > { %11212 = vmatprep.subr.mxu0 %v11892_v8  ;;  %v11717_v23 = vpack.i.bf16 %v10312_v21, %v10311_v41 }
0x380b   : > { %11205 = vmatmul.mubr.msk.f32.vlgmr.msra.gmra.mrb[76].mxu0 %vm1551_vm2, %v7759_v37 }
0x380c   : > { %11214 = vmatprep.mubr.msk.f32.mxu0 %vm11891_vm0, %v11892_v8  ;;  %11213 = vmatpush3.msra.mxu0 %v10275_v1  ;;  %v10309_v1 = vld [vmem:[%s13329_s0 + $0x1] ss:$0 sm:$0xff] }
0x380d   : > { %11222 = vmatprep.subr.mxu0 %v11892_v8 }
0x3866   : > { %v7754_v38 = vpop.f32.mrb[72].mxu1 }
0x3867   : > { %v11201_v42 = vpop.f32.mrb[73].mxu1 }
0x38da   : > { %v7681_v14 = vpop.f32.mrb[74].mxu0 }
0x38db   : > { %v7755_v43 = vadd.f32 %v7754_v38, %v7681_v14  ;;  %v11196_v44 = vpop.f32.mrb[75].mxu0 }
0x38dc   : > { %v11514_v44 = vpack.c.bf16 %v10314_v25, %v10313_v29 }
0x38de   : > { %v7832_v45 = vpop.f32.mrb[76].mxu0 }
0x38df   : > { %v7836_v46 = vmul.f32 0.35355338, %v7832_v45  ;;  %v11206_v48 = vpop.f32.mrb[77].mxu0 }
0x38e1   : > { %v7837_v49 = vsel %vm4598_vm9, -1e+09, %v7836_v46 }
0x38e2   : > { %v7838_v51 = vsel %vm1631_vm4, %v7837_v49, -inf }
0x38e3   : > { %7839 = vmax.xlane.f32.xlu1 %v7838_v51 }
0x38f4   : > { %8004 = vrot.lane.b32.xlu1 %v12915_v52, %s13337_s11 }
0x38f8   : > { %8002 = vrot.lane.b32.xlu1 %v12922_v39, %s13337_s11 }
0x3970   : > { %v7840_v54 = vpop.xlane.xlu1 %7839 }
0x3971   : > { %v7841_v55 = vsub.f32 %v7837_v49, %v7840_v54 }
0x3973   : > { %v7842_v56 = vmul.f32 1.442695, %v7841_v55 }
0x3974   : > { %v8005_v39 = vpop.permute.xlu1 %8004 }
0x3975   : > { %11813 = vpow2.f32 %v7842_v56 }
0x3978   : > { %v8003_v63 = vpop.permute.xlu1 %8002 }
0x397f   : > { %v11814_v53 = vpop.eup %11813 }
0x3980   : > { %v7844_v47 = vsel %vm1631_vm4, %v11814_v53, 0.0 }
0x3981   : > { %7845 = vadd.xlane.f32.xlu0 %v7844_v47 }
0x3997   : > { %7851 = vrot.lane.b32.xlu0 %v12956_v20, %s13333_s5 }
0x3a0e   : > { %v7846_v58 = vpop.xlane.xlu0 %7845 }
0x3a0f   : > { %11815 = vrcp.f32 %v7846_v58 }
0x3a12   : > { %v7852_v59 = vpop.permute.xlu0 %7851 }
0x3a13   : > { %11208 = vmatpush3.msk.msra.mxu1 %vm1648_vm5, %v7852_v59 }
0x3a14   : > { %11217 = vmatprep.subr.mxu1 %v11892_v8 }
0x3a19   : > { %v11816_v52 = vpop.eup %11815 }
0x3a1a   : > { %v7848_v61 = vmul.f32 %v11816_v52, %v11814_v53 }
0x3a1c   : > { %10298 = vst.msk [vmem:[%s12601_s15 + $0x30] sm:$0x1f] %vm1631_vm4, %v7848_v61  ;;  %11210 = vmatmul.mubr.msk.f32.vlgmr.msra.gmra.mrb[74].mxu1 %vm1644_vm6, %v7848_v61 }
0x3a1d   : > { %11218 = vmatpush3.xpose.msk.msra.mxu1 %vm1551_vm2, %v8005_v39  ;;  %11219 = vmatprep.mubr.msk.f32.mxu1 %vm11891_vm0, %v11892_v8 }
0x3a1e   : > { %11227 = vmatprep.subr.mxu1 %v11892_v8 }
0x3a20   : > { %11220 = vmatmul.mubr.msk.f32.vlgmr.msra.gmra.mrb[76].mxu1 %vm1551_vm2, %v8003_v63 }
0x3a21   : > { %11229 = vmatprep.mubr.msk.f32.mxu1 %vm11891_vm0, %v11892_v8  ;;  %11228 = vmatpush3.msra.mxu1 %v10276_v60 }
0x3a22   : > { %11516 = vmatprep.subr.bf16.mxu1 %v11890_v5 }
0x3aef   : > { %v7924_v50 = vpop.f32.mrb[74].mxu1 }
0x3af0   : > { %v11211_v2 = vpop.f32.mrb[75].mxu1  ;;  %11215 = vmatmul.mubr.msk.f32.vlgmr.msra.gmra.mrb[78].mxu0 %vm1551_vm2, %v7924_v50 }
0x3af1   : > { %11224 = vmatprep.mubr.msk.f32.mxu0 %vm11891_vm0, %v11892_v8 }
0x3af3   : > { %v8076_v3 = vpop.f32.mrb[76].mxu1 }
0x3af4   : > { %v8080_v4 = vmul.f32 0.35355338, %v8076_v3  ;;  %v11221_v6 = vpop.f32.mrb[77].mxu1  ;;  %v10310_v3 = vld [vmem:[%s13330_s1 + $0x1] ss:$0 sm:$0xff] }
0x3af6   : > { %v8081_v7 = vsel %vm4598_vm9, -1e+09, %v8080_v4 }
0x3af7   : > { %v8082_v9 = vsel %vm1631_vm4, %v8081_v7, -inf }
0x3af8   : > { %8083 = vmax.xlane.f32.xlu0 %v8082_v9 }
0x3b0e   : > { %8095 = vrot.lane.b32.xlu0 %v12956_v20, %s13337_s11 }
0x3b12   : > { %11713 = vrot.lane.b32.xlu0 %v11712_v35, %s13345_s21 }
0x3b16   : > { %8394 = vrot.lane.b32.xlu0 %v13043_v36, %s13345_s21 }
0x3b1a   : > { %11718 = vrot.lane.b32.xlu0 %v11717_v23, %s13332_s4 }
0x3b85   : > { %v8084_v17 = vpop.xlane.xlu0 %8083 }
0x3b86   : > { %v8085_v10 = vsub.f32 %v8081_v7, %v8084_v17 }
0x3b88   : > { %v8086_v12 = vmul.f32 1.442695, %v8085_v10 }
0x3b89   : > { %v8096_v13 = vpop.permute.xlu0 %8095 }
0x3b8a   : > { %11817 = vpow2.f32 %v8086_v12  ;;  %11223 = vmatpush3.msk.msra.mxu0 %vm1648_vm5, %v8096_v13 }
0x3b8b   : > { %11510 = vmatprep.subr.bf16.mxu0 %v11890_v5 }
0x3b8d   : > { %v11714_v46 = vpop.permute.xlu0 %11713 }
0x3b8e   : > { %v11716_v54 = vunpack.i.h.bf16 %v11714_v46  ;;  %v11715_v53 = vunpack.i.l.bf16 %v11714_v46 }
0x3b90   : > { %v11520_v59 = vpack.c.bf16 %v11716_v54, %v11715_v53  ;;  %v10316_v54 = vld [vmem:[%s13335_s3 + $0x20] sm:$0xff] }
0x3b91   : > { %v8395_v47 = vpop.permute.xlu0 %8394 }
0x3b94   : > { %v11818_v11 = vpop.eup %11817 }
0x3b95   : > { %v8088_v15 = vsel %vm1631_vm4, %v11818_v11, 0.0  ;;  %v11719_v52 = vpop.permute.xlu0 %11718 }
0x3b96   : > { %8089 = vadd.xlane.f32.xlu1 %v8088_v15  ;;  %v11721_v61 = vunpack.i.h.bf16 %v11719_v52  ;;  %v11720_v63 = vunpack.i.l.bf16 %v11719_v52 }
0x3b98   : > { %v11523_v6 = vpack.c.bf16 %v11721_v61, %v11720_v63 }
0x3bc3   : > { %v7997_v0 = vpop.f32.mrb[78].mxu0 }
0x3bc4   : > { %v8001_v16 = vadd.f32 %v7997_v0, %v7755_v43  ;;  %v11216_v62 = vpop.f32.mrb[79].mxu0  ;;  %v11511_v43 = vpack.c.bf16 %v10312_v21, %v10311_v41 }
0x3c23   : > { %v8090_v18 = vpop.xlane.xlu1 %8089 }
0x3c24   : > { %11819 = vrcp.f32 %v8090_v18 }
0x3c2e   : > { %v11820_v19 = vpop.eup %11819 }
0x3c2f   : > { %v8092_v20 = vmul.f32 %v11820_v19, %v11818_v11 }
0x3c31   : > { %10304 = vst.msk [vmem:[%s12601_s15 + $0x38] sm:$0x1f] %vm1631_vm4, %v8092_v20  ;;  %11225 = vmatmul.mubr.msk.f32.vlgmr.msra.gmra.mrb[80].mxu0 %vm1644_vm6, %v8092_v20 }
0x3c32   : > { %11240 = vmatprep.mubr.msk.f32.mxu0 %vm11891_vm0, %v11892_v8  ;;  %11512 = vmatpush3.bf16.msra.mxu0 %v11511_v43 }
0x3c33   : > { %11513 = vmatprep.subr.bf16.mxu0 %v11890_v5 }
0x3c36   : > { %11515 = vmatpush3.bf16.msra.mxu0 %v11514_v44 }
0x3c37   : > { %11522 = vmatprep.subr.bf16.mxu0 %v11890_v5 }
0x3d04   : > { %v8168_v22 = vpop.f32.mrb[80].mxu0 }
0x3d05   : > { %v11226_v24 = vpop.f32.mrb[81].mxu0  ;;  %11230 = vmatmul.mubr.msk.f32.vlgmr.msra.gmra.mrb[78].mxu1 %vm1551_vm2, %v8168_v22 }
0x3d06   : > { %11251 = vmatprep.mubr.msk.f32.mxu1 %vm11891_vm0, %v11892_v8 }
0x3dd8   : > { %v8241_v27 = vpop.f32.mrb[78].mxu1 }
0x3dd9   : > { %v8245_v28 = vadd.f32 %v8241_v27, %v8001_v16  ;;  %v11231_v30 = vpop.f32.mrb[79].mxu1 }
0x3ddb   : > { %v8252_v31 = vadd.f32 %v10308_v26, %v8245_v28 }
0x3ddd   : > { %v8253_v32 = vadd.f32 %v8252_v31, %v12901_v40 }
0x3ddf   : > { %v8254_v34 = vsel %vm2534_vm7, %v8253_v32, 0.0 }
0x3de0   : > { %8255 = vadd.xlane.f32.xlu1 %v8254_v34 }
0x3e6d   : > { %v8256_v37 = vpop.xlane.xlu1 %8255 }
0x3e6e   : > { %v8257_v40 = vmul.f32 0.03125, %v8256_v37 }
0x3e70   : > { %v8258_v38 = vsub.f32 %v8253_v32, %v8257_v40 }
0x3e72   : > { %v8259_v42 = vmul.f32 %v8258_v38, %v8258_v38 }
0x3e74   : > { %v8260_v14 = vsel %vm2534_vm7, %v8259_v42, 0.0 }
0x3e75   : > { %8261 = vadd.xlane.f32.xlu1 %v8260_v14 }
0x3e86   : > { %11708 = vrot.lane.b32.xlu1 %v11717_v23, %s13345_s21  ;;  %s1267_s21 = scalar_lea.vmem %s12086_s9, %s12131_s26 }
0x3e8a   : > { %11723 = vrot.lane.b32.xlu1 %v11712_v35, %s13332_s4 }
0x3f02   : > { %v8262_v45 = vpop.xlane.xlu1 %8261 }
0x3f03   : > { %v8263_v48 = vmul.f32 0.03125, %v8262_v45  ;;  %v10317_v45 = vld [vmem:[%s13335_s3 + $0x28] sm:$0xff] }
0x3f05   : > { %v8264_v49 = vadd.f32 1e-05, %v8263_v48 }
0x3f06   : > { %v11709_v51 = vpop.permute.xlu1 %11708 }
0x3f07   : > { %11821 = vrsqrt.f32 %v8264_v49  ;;  %v11711_v55 = vunpack.i.h.bf16 %v11709_v51  ;;  %v11710_v56 = vunpack.i.l.bf16 %v11709_v51 }
0x3f09   : > { %v11517_v58 = vpack.c.bf16 %v11711_v55, %v11710_v56 }
0x3f0a   : > { %v11724_v2 = vpop.permute.xlu1 %11723 }
0x3f0b   : > { %11518 = vmatpush3.bf16.msra.mxu1 %v11517_v58  ;;  %v11726_v7 = vunpack.i.h.bf16 %v11724_v2  ;;  %v11725_v9 = vunpack.i.l.bf16 %v11724_v2 }
0x3f0c   : > { %11519 = vmatprep.subr.bf16.mxu1 %v11890_v5 }
0x3f0d   : > { %v11526_v10 = vpack.c.bf16 %v11726_v7, %v11725_v9 }
0x3f0f   : > { %11521 = vmatpush3.bf16.msra.mxu1 %v11520_v59 }
0x3f10   : > { %11265 = vmatprep.subr.mxu1 %v11892_v8 }
0x3f11   : > { %v11822_v39 = vpop.eup %11821 }
0x3f12   : > { %v8266_v50 = vmul.f32 %v11822_v39, %v8258_v38  ;;  %11252 = vmatmul.mubr.msk.f32.vlgmr.msra.gmra.mrb[80].mxu1 %vm1303_vm1, %v12705_v33 }
0x3f13   : > { %11267 = vmatprep.mubr.msk.f32.mxu1 %vm11891_vm0, %v11892_v8 }
0x3f14   : > { %v8273_v4 = vmul.f32 %v10309_v1, %v8266_v50 }
0x3f16   : > { %v13063_v17 = vadd.f32 %v10310_v3, %v8273_v4 }
0x3f18   : > { %11241 = vmatmul.mubr.msk.f32.vlgmr.msra.gmra.mrb[82].mxu0 %vm1303_vm1, %v13063_v17 }
0x3f19   : > { %11524 = vmatpush3.bf16.msra.mxu0 %v11523_v6  ;;  %11262 = vmatprep.mubr.msk.f32.mxu0 %vm11891_vm0, %v11892_v8 }
0x3f1a   : > { %11525 = vmatprep.subr.bf16.mxu0 %v11890_v5 }
0x3f1d   : > { %11527 = vmatpush3.bf16.msra.mxu0 %v11526_v10 }
0x3f1e   : > { %11275 = vmatprep.subr.mxu0 %v11892_v8 }
0x3f20   : > { %11263 = vmatmul.mubr.msk.f32.vlgmr.msra.gmra.mrb[84].mxu0 %vm1303_vm1, %v12705_v33 }
0x3f21   : > { %11277 = vmatprep.mubr.msk.f32.mxu0 %vm11891_vm0, %v11892_v8 }
0x3fe5   : > { %v8463_v12 = vpop.f32.mrb[80].mxu1 }
0x3fe6   : > { %v13075_v13 = vadd.f32 %v8463_v12, %v8395_v47  ;;  %v11253_v11 = vpop.f32.mrb[81].mxu1 }
0x3fe8   : > { %8721 = vrot.lane.b32.xlu0 %v13075_v13, %s13336_s2  ;;  %11266 = vmatpush3.xpose.msk.msra.mxu1 %vm1551_vm2, %v13075_v13 }
0x3fe9   : > { %11270 = vmatprep.subr.mxu1 %v11892_v8 }
0x3feb   : > { %v8374_v15 = vpop.f32.mrb[82].mxu0 }
0x3fec   : > { %v13083_v60 = vadd.f32 %v13043_v36, %v8374_v15  ;;  %v11242_v33 = vpop.f32.mrb[83].mxu0 }
0x3fee   : > { %8719 = vrot.lane.b32.xlu1 %v13083_v60, %s13336_s2  ;;  %11268 = vmatmul.mubr.msk.f32.vlgmr.msra.gmra.mrb[82].mxu1 %vm1551_vm2, %v13083_v60 }
0x3fef   : > { %11272 = vmatprep.mubr.msk.f32.mxu1 %vm11891_vm0, %v11892_v8 }
0x3ff3   : > { %v8548_v0 = vpop.f32.mrb[84].mxu0 }
0x3ff4   : > { %v11264_v16 = vpop.f32.mrb[85].mxu0 }
0x405a   : > { %v8722_v62 = vpop.permute.xlu0 %8721 }
0x405b   : > { %11276 = vmatpush3.xpose.msk.msra.mxu0 %vm1551_vm2, %v8722_v62 }
0x405c   : > { %11285 = vmatprep.subr.mxu0 %v11892_v8 }
0x4060   : > { %v8720_v18 = vpop.permute.xlu1 %8719 }
0x4061   : > { %11278 = vmatmul.mubr.msk.f32.vlgmr.msra.gmra.mrb[86].mxu0 %vm1551_vm2, %v8720_v18 }
0x4062   : > { %11287 = vmatprep.mubr.msk.f32.mxu0 %vm11891_vm0, %v11892_v8  ;;  %11286 = vmatpush3.msra.mxu0 %v10317_v45 }
0x4063   : > { %11295 = vmatprep.subr.mxu0 %v11892_v8 }
0x40c1   : > { %v8624_v19 = vpop.f32.mrb[82].mxu1 }
0x40c2   : > { %v8628_v20 = vmul.f32 0.35355338, %v8624_v19  ;;  %v11269_v22 = vpop.f32.mrb[83].mxu1 }
0x40c4   : > { %v8629_v24 = vsel %vm5872_vm10, -1e+09, %v8628_v20 }
0x40c5   : > { %v8630_v26 = vsel %vm1631_vm4, %v8629_v24, -inf }
0x40c6   : > { %8631 = vmax.xlane.f32.xlu0 %v8630_v26 }
0x40dc   : > { %8479 = vrot.lane.b32.xlu0 %v13043_v36, %s13332_s4 }
0x40e0   : > { %9037 = vrot.lane.b32.xlu0 %v13075_v13, %s13333_s5 }
0x40e4   : > { %9035 = vrot.lane.b32.xlu0 %v13083_v60, %s13333_s5 }
0x4134   : > { %v8793_v27 = vpop.f32.mrb[86].mxu0 }
0x4135   : > { %v8797_v28 = vmul.f32 0.35355338, %v8793_v27  ;;  %v11279_v30 = vpop.f32.mrb[87].mxu0 }
0x4137   : > { %v8798_v31 = vsel %vm5872_vm10, -1e+09, %v8797_v28 }
0x4138   : > { %v8799_v32 = vsel %vm1631_vm4, %v8798_v31, -inf }
0x4139   : > { %8800 = vmax.xlane.f32.xlu1 %v8799_v32 }
0x4153   : > { %v8632_v34 = vpop.xlane.xlu0 %8631 }
0x4154   : > { %v8633_v29 = vsub.f32 %v8629_v24, %v8632_v34 }
0x4156   : > { %v8634_v25 = vmul.f32 1.442695, %v8633_v29  ;;  %v10319_v29 = vld [vmem:[%s13335_s3 + $0x38] sm:$0xff] }
0x4157   : > { %v8480_v35 = vpop.permute.xlu0 %8479 }
0x4158   : > { %11823 = vpow2.f32 %v8634_v25  ;;  %v13108_v36 = vadd.f32 %v8548_v0, %v8480_v35 }
0x415a   : > { %11271 = vmatpush3.msk.msra.mxu1 %vm1648_vm5, %v13108_v36 }
0x415b   : > { %11280 = vmatprep.subr.mxu1 %v11892_v8  ;;  %v9038_v53 = vpop.permute.xlu0 %9037 }
0x415f   : > { %v9036_v59 = vpop.permute.xlu0 %9035 }
0x4162   : > { %v11824_v41 = vpop.eup %11823 }
0x4163   : > { %v8636_v21 = vsel %vm1631_vm4, %v11824_v41, 0.0 }
0x4164   : > { %8637 = vadd.xlane.f32.xlu1 %v8636_v21 }
0x41c6   : > { %v8801_v23 = vpop.xlane.xlu1 %8800 }
0x41c7   : > { %v8802_v37 = vsub.f32 %v8798_v31, %v8801_v23 }
0x41c9   : > { %v8803_v40 = vmul.f32 1.442695, %v8802_v37 }
0x41cb   : > { %11825 = vpow2.f32 %v8803_v40 }
0x41d5   : > { %v11826_v38 = vpop.eup %11825 }
0x41d6   : > { %v8805_v42 = vsel %vm1631_vm4, %v11826_v38, 0.0 }
0x41d7   : > { %8806 = vadd.xlane.f32.xlu1 %v8805_v42 }
0x41e8   : > { %8812 = vrot.lane.b32.xlu1 %v13108_v36, %s13336_s2 }
0x41f1   : > { %v8638_v14 = vpop.xlane.xlu1 %8637 }
0x41f2   : > { %11827 = vrcp.f32 %v8638_v14 }
0x41fc   : > { %v11828_v43 = vpop.eup %11827 }
0x41fd   : > { %v8640_v44 = vmul.f32 %v11828_v43, %v11824_v41 }
0x41ff   : > { %10329 = vst.msk [vmem:[%s12775_s6 + $0x20] sm:$0x1f] %vm1631_vm4, %v8640_v44  ;;  %11273 = vmatmul.mubr.msk.f32.vlgmr.msra.gmra.mrb[84].mxu1 %vm1644_vm6, %v8640_v44 }
0x4200   : > { %11282 = vmatprep.mubr.msk.f32.mxu1 %vm11891_vm0, %v11892_v8 }
0x4264   : > { %v8807_v46 = vpop.xlane.xlu1 %8806 }
0x4265   : > { %11829 = vrcp.f32 %v8807_v46 }
0x4268   : > { %v8813_v48 = vpop.permute.xlu1 %8812 }
0x4269   : > { %11281 = vmatpush3.msk.msra.mxu1 %vm1648_vm5, %v8813_v48 }
0x426a   : > { %11290 = vmatprep.subr.mxu1 %v11892_v8 }
0x426f   : > { %v11830_v49 = vpop.eup %11829 }
0x4270   : > { %v8809_v51 = vmul.f32 %v11830_v49, %v11826_v38  ;;  %v10351_v38 = vld [vmem:[%s13338_s8 + $0x1] ss:$0 sm:$0xff] }
0x4272   : > { %10334 = vst.msk [vmem:[%s12775_s6 + $0x28] sm:$0x1f] %vm1631_vm4, %v8809_v51  ;;  %11283 = vmatmul.mubr.msk.f32.vlgmr.msra.gmra.mrb[86].mxu1 %vm1644_vm6, %v8809_v51 }
0x4273   : > { %11291 = vmatpush3.msra.mxu1 %v10316_v54  ;;  %11292 = vmatprep.mubr.msk.f32.mxu1 %vm11891_vm0, %v11892_v8 }
0x4274   : > { %11300 = vmatprep.subr.mxu1 %v11892_v8 }
0x42d2   : > { %v8715_v55 = vpop.f32.mrb[84].mxu1 }
0x42d3   : > { %v11274_v56 = vpop.f32.mrb[85].mxu1  ;;  %11293 = vmatmul.mubr.msk.f32.vlgmr.msra.gmra.mrb[88].mxu1 %vm1551_vm2, %v8715_v55 }
0x42d4   : > { %11302 = vmatprep.mubr.msk.f32.mxu1 %vm11891_vm0, %v11892_v8  ;;  %v10354_v56 = vld [vmem:[%s13339_s12 + $0x20] sm:$0xff] }
0x4345   : > { %v8885_v47 = vpop.f32.mrb[86].mxu1 }
0x4346   : > { %v11284_v58 = vpop.f32.mrb[87].mxu1  ;;  %11288 = vmatmul.mubr.msk.f32.vlgmr.msra.gmra.mrb[88].mxu0 %vm1551_vm2, %v8885_v47 }
0x4347   : > { %11296 = vmatpush3.xpose.msk.msra.mxu0 %vm1551_vm2, %v9038_v53  ;;  %11297 = vmatprep.mubr.msk.f32.mxu0 %vm11891_vm0, %v11892_v8  ;;  %v10355_v53 = vld [vmem:[%s13339_s12 + $0x28] sm:$0xff]  ;;  %v10357_v58 = vld [vmem:[%s13339_s12 + $0x38] sm:$0xff] }
0x4348   : > { %11305 = vmatprep.subr.mxu0 %v11892_v8  ;;  %v11529_v47 = vpack.c.bf16 %v10355_v53, %v10354_v56 }
0x434a   : > { %11298 = vmatmul.mubr.msk.f32.vlgmr.msra.gmra.mrb[90].mxu0 %vm1551_vm2, %v9036_v59 }
0x434b   : > { %11307 = vmatprep.mubr.msk.f32.mxu0 %vm11891_vm0, %v11892_v8 }
0x43a6   : > { %v9031_v52 = vpop.f32.mrb[88].mxu1 }
0x43a7   : > { %v11294_v39 = vpop.f32.mrb[89].mxu1 }
0x43a8   : > { %v10360_v39 = vld [vmem:[%s13340_s13 + $0x48] sm:$0xff] }
0x4419   : > { %v8958_v61 = vpop.f32.mrb[88].mxu0 }
0x441a   : > { %v9032_v63 = vadd.f32 %v9031_v52, %v8958_v61  ;;  %v11289_v1 = vpop.f32.mrb[89].mxu0  ;;  %v10359_v52 = vld [vmem:[%s13340_s13 + $0x40] sm:$0xff]  ;;  %v10361_v61 = vld [vmem:[%s13340_s13 + $0x50] sm:$0xff] }
0x441b   : > { %v10362_v1 = vld [vmem:[%s13340_s13 + $0x58] sm:$0xff] }
0x441d   : > { %v9109_v50 = vpop.f32.mrb[90].mxu0 }
0x441e   : > { %v9113_v2 = vmul.f32 0.35355338, %v9109_v50  ;;  %v11299_v3 = vpop.f32.mrb[91].mxu0  ;;  %v11538_v50 = vpack.c.bf16 %v10362_v1, %v10361_v61 }
0x441f   : > { %v10364_v3 = vld [vmem:[%s13340_s13 + $0x68] sm:$0xff] }
0x4420   : > { %v9114_v4 = vsel %vm5872_vm10, -1e+09, %v9113_v2  ;;  %v10363_v2 = vld [vmem:[%s13340_s13 + $0x60] sm:$0xff] }
0x4421   : > { %v9115_v6 = vsel %vm1631_vm4, %v9114_v4, -inf }
0x4422   : > { %9116 = vmax.xlane.f32.xlu0 %v9115_v6 }
0x4438   : > { %9128 = vrot.lane.b32.xlu0 %v13108_v36, %s13333_s5  ;;  %s13348_s5 = sld [smem:[#allocation34_spill]] }
0x443c   : > { %9279 = vrot.lane.b32.xlu0 %v13083_v60, %s13337_s11 }
0x44af   : > { %v9117_v7 = vpop.xlane.xlu0 %9116 }
0x44b0   : > { %v9118_v9 = vsub.f32 %v9114_v4, %v9117_v7  ;;  %v11541_v4 = vpack.c.bf16 %v10364_v3, %v10363_v2 }
0x44b2   : > { %v9119_v10 = vmul.f32 1.442695, %v9118_v9 }
0x44b3   : > { %v9129_v12 = vpop.permute.xlu0 %9128 }
0x44b4   : > { %11831 = vpow2.f32 %v9119_v10  ;;  %11301 = vmatpush3.msk.msra.mxu1 %vm1648_vm5, %v9129_v12  ;;  %v10352_v12 = vld [vmem:[%s13341_s14 + $0x1] ss:$0 sm:$0xff] }
0x44b5   : > { %11310 = vmatprep.subr.mxu1 %v11892_v8 }
0x44b7   : > { %v9280_v62 = vpop.permute.xlu0 %9279 }
0x44be   : > { %v11832_v11 = vpop.eup %11831 }
0x44bf   : > { %v9121_v15 = vsel %vm1631_vm4, %v11832_v11, 0.0 }
0x44c0   : > { %9122 = vadd.xlane.f32.xlu1 %v9121_v15  ;;  %v10353_v15 = vld [vmem:[%s13342_s17 + $0x1] ss:$0 sm:$0xff] }
0x44d1   : > { %9281 = vrot.lane.b32.xlu1 %v13075_v13, %s13337_s11  ;;  %v10318_v13 = vld [vmem:[%s13335_s3 + $0x30] sm:$0xff] }
0x44d2   : > { %11306 = vmatpush3.msra.mxu0 %v10318_v13  ;;  %v10370_v13 = vld [vmem:[%s13343_s19 + $0x1] ss:$0 sm:$0xff] }
0x44d3   : > { %11315 = vmatprep.subr.mxu0 %v11892_v8 }
0x454d   : > { %v9123_v33 = vpop.xlane.xlu1 %9122 }
0x454e   : > { %11833 = vrcp.f32 %v9123_v33 }
0x4551   : > { %v9282_v16 = vpop.permute.xlu1 %9281 }
0x4558   : > { %v11834_v60 = vpop.eup %11833 }
0x4559   : > { %v9125_v0 = vmul.f32 %v11834_v60, %v11832_v11 }
0x455b   : > { %10341 = vst.msk [vmem:[%s12775_s6 + $0x30] sm:$0x1f] %vm1631_vm4, %v9125_v0  ;;  %11303 = vmatmul.mubr.msk.f32.vlgmr.msra.gmra.mrb[90].mxu1 %vm1644_vm6, %v9125_v0  ;;  %v10365_v0 = vld [vmem:[%s13340_s13 + $0x70] sm:$0xff] }
0x455c   : > { %11311 = vmatpush3.xpose.msk.msra.mxu1 %vm1551_vm2, %v9282_v16  ;;  %11312 = vmatprep.mubr.msk.f32.mxu1 %vm11891_vm0, %v11892_v8  ;;  %v10366_v16 = vld [vmem:[%s13340_s13 + $0x78] sm:$0xff] }
0x455d   : > { %11320 = vmatprep.subr.mxu1 %v11892_v8 }
0x455f   : > { %11313 = vmatmul.mubr.msk.f32.vlgmr.msra.gmra.mrb[92].mxu1 %vm1551_vm2, %v9280_v62  ;;  %v11544_v62 = vpack.c.bf16 %v10366_v16, %v10365_v0 }
0x4560   : > { %11322 = vmatprep.mubr.msk.f32.mxu1 %vm11891_vm0, %v11892_v8  ;;  %11321 = vmatpush3.msra.mxu1 %v10319_v29 }
0x4561   : > { %11534 = vmatprep.subr.bf16.mxu1 %v11890_v5 }
0x462e   : > { %v9201_v18 = vpop.f32.mrb[90].mxu1 }
0x462f   : > { %v11304_v19 = vpop.f32.mrb[91].mxu1  ;;  %11308 = vmatmul.mubr.msk.f32.vlgmr.msra.gmra.mrb[92].mxu0 %vm1551_vm2, %v9201_v18 }
0x4630   : > { %11317 = vmatprep.mubr.msk.f32.mxu0 %vm11891_vm0, %v11892_v8 }
0x4632   : > { %v9353_v20 = vpop.f32.mrb[92].mxu1 }
0x4633   : > { %v9357_v22 = vmul.f32 0.35355338, %v9353_v20  ;;  %v11314_v24 = vpop.f32.mrb[93].mxu1 }
0x4634   : > { %v10372_v24 = vld [vmem:[%s13344_s20 + $0x1] ss:$0 sm:$0xff] }
0x4635   : > { %v9358_v26 = vsel %vm5872_vm10, -1e+09, %v9357_v22 }
0x4636   : > { %v9359_v27 = vsel %vm1631_vm4, %v9358_v26, -inf }
0x4637   : > { %9360 = vmax.xlane.f32.xlu1 %v9359_v27 }
0x46c4   : > { %v9361_v28 = vpop.xlane.xlu1 %9360 }
0x46c5   : > { %v9362_v30 = vsub.f32 %v9358_v26, %v9361_v28 }
0x46c7   : > { %v9363_v31 = vmul.f32 1.442695, %v9362_v30 }
0x46c9   : > { %11835 = vpow2.f32 %v9363_v31 }
0x46d3   : > { %v11836_v32 = vpop.eup %11835 }
0x46d4   : > { %v9365_v34 = vsel %vm1631_vm4, %v11836_v32, 0.0 }
0x46d5   : > { %9366 = vadd.xlane.f32.xlu0 %v9365_v34 }
0x46eb   : > { %9372 = vrot.lane.b32.xlu0 %v13108_v36, %s13337_s11 }
0x4702   : > { %v9274_v57 = vpop.f32.mrb[92].mxu0 }
0x4703   : > { %v9278_v25 = vadd.f32 %v9274_v57, %v9032_v63  ;;  %v11309_v35 = vpop.f32.mrb[93].mxu0  ;;  %v11535_v63 = vpack.c.bf16 %v10360_v39, %v10359_v52 }
0x4704   : > { %v9768_v35 = vld [vmem:[%s13348_s5 + $0x8] sm:$0xff] }
0x4762   : > { %v9367_v41 = vpop.xlane.xlu0 %9366 }
0x4763   : > { %11837 = vrcp.f32 %v9367_v41 }
0x4766   : > { %v9373_v21 = vpop.permute.xlu0 %9372 }
0x4767   : > { %11316 = vmatpush3.msk.msra.mxu0 %vm1648_vm5, %v9373_v21  ;;  %v9769_v21 = vld [vmem:[%s13348_s5 + $0x10] sm:$0xff] }
0x4768   : > { %11528 = vmatprep.subr.bf16.mxu0 %v11890_v5 }
0x476d   : > { %v11838_v23 = vpop.eup %11837 }
0x476e   : > { %v9369_v37 = vmul.f32 %v11838_v23, %v11836_v32  ;;  %v9770_v23 = vld [vmem:[%s13348_s5 + $0x18] sm:$0xff] }
0x4770   : > { %10347 = vst.msk [vmem:[%s12775_s6 + $0x38] sm:$0x1f] %vm1631_vm4, %v9369_v37  ;;  %11318 = vmatmul.mubr.msk.f32.vlgmr.msra.gmra.mrb[94].mxu0 %vm1644_vm6, %v9369_v37  ;;  %v11550_v37 = vpack.c.bf16 %v9770_v23, %v9769_v21 }
0x4771   : > { %11333 = vmatprep.mubr.msk.f32.mxu0 %vm11891_vm0, %v11892_v8  ;;  %11530 = vmatpush3.bf16.msra.mxu0 %v11529_v47 }
0x4772   : > { %11531 = vmatprep.subr.bf16.mxu0 %v11890_v5 }
0x4843   : > { %v9445_v36 = vpop.f32.mrb[94].mxu0 }
0x4844   : > { %v11319_v40 = vpop.f32.mrb[95].mxu0  ;;  %11323 = vmatmul.mubr.msk.f32.vlgmr.msra.gmra.mrb[94].mxu1 %vm1551_vm2, %v9445_v36 }
0x4845   : > { %11352 = vmatprep.mubr.msk.f32.mxu1 %vm11891_vm0, %v11892_v8  ;;  %11536 = vmatpush3.bf16.msra.mxu1 %v11535_v63 }
0x4846   : > { %11537 = vmatprep.subr.bf16.mxu1 %v11890_v5 }
0x4849   : > { %11539 = vmatpush3.bf16.msra.mxu1 %v11538_v50 }
0x484a   : > { %11540 = vmatprep.subr.bf16.mxu1 %v11890_v5 }
0x484d   : > { %11542 = vmatpush3.bf16.msra.mxu1 %v11541_v4 }
0x484e   : > { %11543 = vmatprep.subr.bf16.mxu1 %v11890_v5 }
0x4851   : > { %11545 = vmatpush3.bf16.msra.mxu1 %v11544_v62 }
0x4917   : > { %v9518_v42 = vpop.f32.mrb[94].mxu1 }
0x4918   : > { %v9522_v14 = vadd.f32 %v9518_v42, %v9278_v25  ;;  %v11324_v43 = vpop.f32.mrb[95].mxu1  ;;  %v9767_v25 = vld [vmem:[%s13348_s5] sm:$0xff] }
0x4919   : > { %v11547_v41 = vpack.c.bf16 %v9768_v35, %v9767_v25 }
0x491a   : > { %v9529_v44 = vadd.f32 %v10351_v38, %v9522_v14  ;;  %v10374_v14 = vld [vmem:[%s13346_s24 + $0x1] ss:$0 sm:$0xff] }
0x491c   : > { %v9530_v45 = vadd.f32 %v9529_v44, %v13063_v17  ;;  %v10356_v17 = vld [vmem:[%s13339_s12 + $0x30] sm:$0xff]  ;;  %v10375_v44 = vld [vmem:[%s13347_s25 + $0x1] ss:$0 sm:$0xff] }
0x491d   : > { %v11532_v59 = vpack.c.bf16 %v10357_v58, %v10356_v17 }
0x491e   : > { %v9531_v46 = vsel %vm2534_vm7, %v9530_v45, 0.0 }
0x491f   : > { %9532 = vadd.xlane.f32.xlu1 %v9531_v46  ;;  %11533 = vmatpush3.bf16.msra.mxu0 %v11532_v59 }
0x4920   : > { %11546 = vmatprep.subr.bf16.mxu0 %v11890_v5 }
0x49ac   : > { %v9533_v48 = vpop.xlane.xlu1 %9532 }
0x49ad   : > { %v9534_v49 = vmul.f32 0.03125, %v9533_v48 }
0x49af   : > { %v9535_v51 = vsub.f32 %v9530_v45, %v9534_v49 }
0x49b1   : > { %v9536_v54 = vmul.f32 %v9535_v51, %v9535_v51 }
0x49b3   : > { %v9537_v55 = vsel %vm2534_vm7, %v9536_v54, 0.0 }
0x49b4   : > { %9538 = vadd.xlane.f32.xlu1 %v9537_v55 }
0x4a41   : > { %v9539_v6 = vpop.xlane.xlu1 %9538 }
0x4a42   : > { %v9540_v7 = vmul.f32 0.03125, %v9539_v6 }
0x4a44   : > { %v9541_v9 = vadd.f32 1e-05, %v9540_v7 }
0x4a46   : > { %11839 = vrsqrt.f32 %v9541_v9 }
0x4a50   : > { %v11840_v10 = vpop.eup %11839 }
0x4a51   : > { %v9543_v11 = vmul.f32 %v11840_v10, %v9535_v51 }
0x4a53   : > { %v9550_v33 = vmul.f32 %v10352_v12, %v9543_v11 }
0x4a55   : > { %v9557_v60 = vadd.f32 %v10353_v15, %v9550_v33 }
0x4a57   : > { %11334 = vmatmul.mubr.msk.f32.vlgmr.msra.gmra.mrb[96].mxu0 %vm1303_vm1, %v9557_v60 }
0x4a58   : > { %11363 = vmatprep.mubr.msk.f32.mxu0 %vm11891_vm0, %v11892_v8  ;;  %11548 = vmatpush3.bf16.msra.mxu0 %v11547_v41 }
0x4a59   : > { %11549 = vmatprep.subr.bf16.mxu0 %v11890_v5 }
0x4a5c   : > { %11551 = vmatpush3.bf16.msra.mxu0 %v11550_v37 }
0x4b2a   : > { %v9655_v18 = vpop.f32.mrb[96].mxu0 }
0x4b2b   : > { %v9656_v19 = vadd.f32 %v10370_v13, %v9655_v18  ;;  %v11335_v20 = vpop.f32.mrb[97].mxu0 }
0x4b2d   : > { %v9659_v22 = vmax.f32 %v9656_v19, 0.0 }
0x4b2f   : > { %11353 = vmatmul.mubr.msk.f32.vlgmr.msra.gmra.mrb[96].mxu1 %vm2665_vm8, %v9659_v22 }
0x4c02   : > { %v9735_v26 = vpop.f32.mrb[96].mxu1 }
0x4c03   : > { %v9736_v27 = vadd.f32 %v10372_v24, %v9735_v26  ;;  %v11354_v28 = vpop.f32.mrb[97].mxu1 }
0x4c05   : > { %v9739_v8 = vadd.f32 %v9736_v27, %v9557_v60 }
0x4c07   : > { %v9740_v30 = vsel %vm2534_vm7, %v9739_v8, 0.0 }
0x4c08   : > { %9741 = vadd.xlane.f32.xlu1 %v9740_v30 }
0x4c95   : > { %v9742_v31 = vpop.xlane.xlu1 %9741 }
0x4c96   : > { %v9743_v32 = vmul.f32 0.03125, %v9742_v31 }
0x4c98   : > { %v9744_v34 = vsub.f32 %v9739_v8, %v9743_v32 }
0x4c9a   : > { %v9745_v29 = vmul.f32 %v9744_v34, %v9744_v34 }
0x4c9c   : > { %v9746_v57 = vsel %vm2534_vm7, %v9745_v29, 0.0 }
0x4c9d   : > { %9747 = vadd.xlane.f32.xlu1 %v9746_v57 }
0x4d2a   : > { %v9748_v36 = vpop.xlane.xlu1 %9747 }
0x4d2b   : > { %v9749_v40 = vmul.f32 0.03125, %v9748_v36 }
0x4d2d   : > { %v9750_v38 = vadd.f32 1e-05, %v9749_v40 }
0x4d2f   : > { %11841 = vrsqrt.f32 %v9750_v38 }
0x4d39   : > { %v11842_v42 = vpop.eup %11841 }
0x4d3a   : > { %v9752_v43 = vmul.f32 %v11842_v42, %v9744_v34 }
0x4d3c   : > { %v9759_v45 = vmul.f32 %v10374_v14, %v9752_v43 }
0x4d3e   : > { %v9766_v46 = vadd.f32 %v10375_v44, %v9759_v45 }
0x4d40   : > { %11364 = vmatmul.mubr.msk.f32.vlgmr.msra.gmra.mrb[98].mxu0 %vm1303_vm1, %v9766_v46 }
0x4e13   : > { %v9840_v5 = vpop.f32.mrb[98].mxu0 }
0x4e14   : > { %9844 = vst [vmem:[%s1267_s21] sm:$0x1f] %v9840_v5  ;;  %v11365_v48 = vpop.f32.mrb[99].mxu0 }
0x4e15 PF: > { %s90_s22 = sadd.s32 1, %s11849_s22  }
0x4e16   : > { %p87_p4 = scmp.ge.s32.totalorder %s90_s22, 4  }
0x4e18   :  { %89 = sbr.rel (!%p87_p4) target bundleno = 84 (0x54), region = 332 }

</bundles_post_ra>
